<compile_context>
chip_gen: v6e
topology: v6e:2x2x1
jax: 0.10.0
libtpu: 0.0.40
codegen_flags: <defaults>
</compile_context>

<pallas_src>
import functools
import math

import jax
import jax.numpy as jnp
from jax import lax
from jax.experimental import pallas as pl
from jax.experimental.pallas import tpu as pltpu


def _round_up(x, m):
    return ((x + m - 1) // m) * m


def _largest_divisor_leq(n, cap):
    for d in range(min(cap, n), 0, -1):
        if n % d == 0:
            return d
    return 1


def _pick_seq_tile(S, cap=256):
    """Largest query tile: whole sequence if small, else a multiple of 8 dividing S."""
    if S <= cap:
        return S
    start = cap - (cap % 8)
    for t in range(start, 7, -8):
        if S % t == 0:
            return t
    return S


def _erf_gelu(x):
    # exact (erf-based) GELU == PyTorch F.gelu default / nn.GELU()
    return 0.5 * x * (1.0 + lax.erf(x * (1.0 / math.sqrt(2.0))))


def _layernorm(x, gamma, beta, eps=1e-5):
    mean = jnp.mean(x, axis=-1, keepdims=True)
    var = jnp.mean(jnp.square(x - mean), axis=-1, keepdims=True)
    return (x - mean) * lax.rsqrt(var + eps) * gamma + beta


def _mha_heads_out(q, k, v, wo_ref, acc, H, scale):
    """Per-head attention + fused output-projection accumulation.

    q:   (Sq, H*Dh) f32      (query projection)
    k,v: (Sk, H*Dh) bf16     (cached K/V)
    wo_ref: (H*Dh, D) bf16 weight ref
    acc: (Sq, D) f32 running sum (residual + out-proj bias already included)

    No kh.T (dot_general contracts the head dim directly) and no concatenate
    (each head's contribution goes straight through its slice of Wo).
    """
    D = q.shape[-1]
    Dh = D // H
    for h in range(H):                 # statically unrolled, heads stay in vregs
        sl = slice(h * Dh, (h + 1) * Dh)
        qh = q[:, sl].astype(jnp.bfloat16)
        kh = k[:, sl]
        vh = v[:, sl]
        s = lax.dot_general(qh, kh, (((1,), (1,)), ((), ())),
                            preferred_element_type=jnp.float32) * scale
        s = s - jnp.max(s, axis=-1, keepdims=True)
        p = jnp.exp(s)
        p = p * pl.reciprocal(jnp.sum(p, axis=-1, keepdims=True), approx=True)
        oh = jnp.dot(p.astype(jnp.bfloat16), vh,
                     preferred_element_type=jnp.float32)
        acc = acc + jnp.dot(oh.astype(jnp.bfloat16), wo_ref[sl, :],
                            preferred_element_type=jnp.float32)
    return acc


# ----------------------------------------------------------------------------
# Fused self-attention block:  x + Wo( MHA( LN(x) @ Wqkv ) )
# grid = (B, Sq//tq); K/V projected once per batch and cached in VMEM scratch.
# ----------------------------------------------------------------------------
def _self_attn_block_kernel(xq_ref, xf_ref, g_ref, b_ref, wqkv_ref, bqkv_ref,
                            wo_ref, bo_ref, o_ref, k_s, v_s, *, H, scale):
    D = xq_ref.shape[-1]
    qi = pl.program_id(1)

    @pl.when(qi == 0)
    def _():
        # LN + K/V projection of the full key sequence once per batch (bf16
        # cached in VMEM scratch for all query tiles).
        xf = xf_ref[0]                                           # (Sk, D) f32
        hf = _layernorm(xf, g_ref[...], b_ref[...]).astype(jnp.bfloat16)
        k_s[...] = (jnp.dot(hf, wqkv_ref[:, D:2 * D],
                            preferred_element_type=jnp.float32)
                    + bqkv_ref[:, D:2 * D]).astype(jnp.bfloat16)
        v_s[...] = (jnp.dot(hf, wqkv_ref[:, 2 * D:],
                            preferred_element_type=jnp.float32)
                    + bqkv_ref[:, 2 * D:]).astype(jnp.bfloat16)

    xq = xq_ref[0]                                               # (tq, D) f32
    hq = _layernorm(xq, g_ref[...], b_ref[...]).astype(jnp.bfloat16)
    q = (jnp.dot(hq, wqkv_ref[:, :D], preferred_element_type=jnp.float32)
         + bqkv_ref[:, :D])
    acc = xq + bo_ref[...]                     # residual + out-proj bias
    o_ref[0] = _mha_heads_out(q, k_s[...], v_s[...], wo_ref, acc, H, scale)


def self_attention_block(x, ln_g, ln_b, p, H, *, tq_max=256):
    B, S, D = x.shape
    scale = 1.0 / math.sqrt(D // H)
    tq = _pick_seq_tile(S, tq_max)
    nq = S // tq
    wqkv = p["wqkv"].astype(jnp.bfloat16)
    wo = p["wo"].astype(jnp.bfloat16)
    return pl.pallas_call(
        functools.partial(_self_attn_block_kernel, H=H, scale=scale),
        out_shape=jax.ShapeDtypeStruct((B, S, D), jnp.float32),
        grid=(B, nq),
        in_specs=[
            pl.BlockSpec((1, tq, D), lambda b, q: (b, q, 0)),   # query tile
            pl.BlockSpec((1, S, D), lambda b, q: (b, 0, 0)),    # full seq (K/V)
            pl.BlockSpec((1, D), lambda b, q: (0, 0)),
            pl.BlockSpec((1, D), lambda b, q: (0, 0)),
            pl.BlockSpec((D, 3 * D), lambda b, q: (0, 0)),
            pl.BlockSpec((1, 3 * D), lambda b, q: (0, 0)),
            pl.BlockSpec((D, D), lambda b, q: (0, 0)),
            pl.BlockSpec((1, D), lambda b, q: (0, 0)),
        ],
        out_specs=pl.BlockSpec((1, tq, D), lambda b, q: (b, q, 0)),
        scratch_shapes=[
            pltpu.VMEM((S, D), jnp.bfloat16),   # cached K
            pltpu.VMEM((S, D), jnp.bfloat16),   # cached V
        ],
        compiler_params=pltpu.CompilerParams(
            dimension_semantics=("parallel", "arbitrary"),
            vmem_limit_bytes=40 * 1024 * 1024),
    )(x, x, ln_g.reshape(1, D), ln_b.reshape(1, D),
      wqkv, p["bqkv"].reshape(1, 3 * D), wo, p["bo"].reshape(1, D))


# ----------------------------------------------------------------------------
# Fused cross-attention block:  x + Wo( MHA( LN(x) @ Wq , memory @ Wkv ) )
# ----------------------------------------------------------------------------
def _cross_attn_block_kernel(xq_ref, m_ref, g_ref, b_ref, wq_ref, bq_ref,
                             wkv_ref, bkv_ref, wo_ref, bo_ref, o_ref,
                             k_s, v_s, *, H, scale):
    D = xq_ref.shape[-1]
    qi = pl.program_id(1)

    @pl.when(qi == 0)
    def _():
        mem = m_ref[0].astype(jnp.bfloat16)                      # (Ss, D)
        k_s[...] = (jnp.dot(mem, wkv_ref[:, :D],
                            preferred_element_type=jnp.float32)
                    + bkv_ref[:, :D]).astype(jnp.bfloat16)
        v_s[...] = (jnp.dot(mem, wkv_ref[:, D:],
                            preferred_element_type=jnp.float32)
                    + bkv_ref[:, D:]).astype(jnp.bfloat16)

    xq = xq_ref[0]                                               # (tq, D) f32
    hq = _layernorm(xq, g_ref[...], b_ref[...]).astype(jnp.bfloat16)
    q = jnp.dot(hq, wq_ref[...], preferred_element_type=jnp.float32) + bq_ref[...]
    acc = xq + bo_ref[...]
    o_ref[0] = _mha_heads_out(q, k_s[...], v_s[...], wo_ref, acc, H, scale)


def cross_attention_block(x, memory, ln_g, ln_b, p, H, *, tq_max=256):
    B, St, D = x.shape
    _, Ss, _ = memory.shape
    scale = 1.0 / math.sqrt(D // H)
    tq = _pick_seq_tile(St, tq_max)
    nq = St // tq
    wq = p["wq"].astype(jnp.bfloat16)
    wkv = p["wkv"].astype(jnp.bfloat16)
    wo = p["wo"].astype(jnp.bfloat16)
    return pl.pallas_call(
        functools.partial(_cross_attn_block_kernel, H=H, scale=scale),
        out_shape=jax.ShapeDtypeStruct((B, St, D), jnp.float32),
        grid=(B, nq),
        in_specs=[
            pl.BlockSpec((1, tq, D), lambda b, q: (b, q, 0)),
            pl.BlockSpec((1, Ss, D), lambda b, q: (b, 0, 0)),
            pl.BlockSpec((1, D), lambda b, q: (0, 0)),
            pl.BlockSpec((1, D), lambda b, q: (0, 0)),
            pl.BlockSpec((D, D), lambda b, q: (0, 0)),
            pl.BlockSpec((1, D), lambda b, q: (0, 0)),
            pl.BlockSpec((D, 2 * D), lambda b, q: (0, 0)),
            pl.BlockSpec((1, 2 * D), lambda b, q: (0, 0)),
            pl.BlockSpec((D, D), lambda b, q: (0, 0)),
            pl.BlockSpec((1, D), lambda b, q: (0, 0)),
        ],
        out_specs=pl.BlockSpec((1, tq, D), lambda b, q: (b, q, 0)),
        scratch_shapes=[
            pltpu.VMEM((Ss, D), jnp.bfloat16),
            pltpu.VMEM((Ss, D), jnp.bfloat16),
        ],
        compiler_params=pltpu.CompilerParams(
            dimension_semantics=("parallel", "arbitrary"),
            vmem_limit_bytes=40 * 1024 * 1024),
    )(x, memory, ln_g.reshape(1, D), ln_b.reshape(1, D),
      wq, p["bq"].reshape(1, D), wkv, p["bkv"].reshape(1, 2 * D),
      wo, p["bo"].reshape(1, D))


# ----------------------------------------------------------------------------
# Fused SoftMoE block:  x + softmax(gate(LN(x))) * sum_e expert_e(LN(x))
# grid = (M tiles, E // Eb); Eb experts fetched per step (bf16 weights),
# looped with an unrolled fori_loop, accumulated in VMEM scratch.
# ----------------------------------------------------------------------------
def _softmoe_block_kernel(x_ref, g_ref, b_ref, gw_ref, gb_ref,
                          w1_ref, b1_ref, w2_ref, b2_ref, o_ref,
                          h_s, gate_s, acc_s, *, Eb):
    e = pl.program_id(1)

    @pl.when(e == 0)
    def _():
        # LayerNorm + gate softmax done once per M tile (hidden under the first
        # expert-weight prefetch), cached in VMEM scratch.
        x = x_ref[...]
        h = _layernorm(x, g_ref[...], b_ref[...])
        hb = h.astype(jnp.bfloat16)
        h_s[...] = hb
        g = jnp.dot(hb, gw_ref[...], preferred_element_type=jnp.float32) + gb_ref[...]
        g = jnp.exp(g - jnp.max(g, axis=-1, keepdims=True))
        gate_s[...] = g * pl.reciprocal(jnp.sum(g, axis=-1, keepdims=True),
                                        approx=True)
        acc_s[...] = jnp.zeros_like(acc_s)

    h = h_s[...]                                      # (tm, D) bf16

    def expert_step(i, acc):
        y = jnp.dot(h, w1_ref[i], preferred_element_type=jnp.float32) + b1_ref[i]
        y = _erf_gelu(y)                              # f32 vector math
        y = jnp.dot(y.astype(jnp.bfloat16), w2_ref[i],
                    preferred_element_type=jnp.float32) + b2_ref[i]
        return acc + y

    acc_s[...] = lax.fori_loop(0, Eb, expert_step, acc_s[...], unroll=True)

    @pl.when(e == pl.num_programs(1) - 1)
    def _():
        # einsum('bsd,bsde->bsd', gate, stack(expert_outs, dim=3))
        #   == gate * sum_e expert_out_e   (requires num_experts == d_model)
        o_ref[...] = x_ref[...] + gate_s[...] * acc_s[...]


def softmoe_block(x, ln_g, ln_b, p, *, tm_max=512, eb_max=8):
    B, S, D = x.shape
    M = B * S
    E, _, F = p["w1"].shape
    assert E == D, "the reference einsum 'bsd,bsde->bsd' requires num_experts == d_model"

    # Maximize the M tile: expert weights are streamed once per M tile.
    tm = min(tm_max, _round_up(M, 8))
    Mp = _round_up(M, tm)
    Eb = _largest_divisor_leq(E, eb_max)

    x2 = x.reshape(M, D)
    xp = jnp.pad(x2, ((0, Mp - M), (0, 0)))
    gw = p["gate_w"].astype(jnp.bfloat16)
    w1 = p["w1"].astype(jnp.bfloat16)
    w2 = p["w2"].astype(jnp.bfloat16)

    out = pl.pallas_call(
        functools.partial(_softmoe_block_kernel, Eb=Eb),
        out_shape=jax.ShapeDtypeStruct((Mp, D), jnp.float32),
        grid=(Mp // tm, E // Eb),
        in_specs=[
            pl.BlockSpec((tm, D), lambda m, e: (m, 0)),
            pl.BlockSpec((1, D), lambda m, e: (0, 0)),
            pl.BlockSpec((1, D), lambda m, e: (0, 0)),
            pl.BlockSpec((D, E), lambda m, e: (0, 0)),
            pl.BlockSpec((1, E), lambda m, e: (0, 0)),
            pl.BlockSpec((Eb, D, F), lambda m, e: (e, 0, 0)),
            pl.BlockSpec((Eb, 1, F), lambda m, e: (e, 0, 0)),
            pl.BlockSpec((Eb, F, D), lambda m, e: (e, 0, 0)),
            pl.BlockSpec((Eb, 1, D), lambda m, e: (e, 0, 0)),
        ],
        out_specs=pl.BlockSpec((tm, D), lambda m, e: (m, 0)),
        scratch_shapes=[
            pltpu.VMEM((tm, D), jnp.bfloat16),   # cached LN(x) (bf16 for MXU)
            pltpu.VMEM((tm, E), jnp.float32),    # cached gate softmax
            pltpu.VMEM((tm, D), jnp.float32),    # expert-sum accumulator
        ],
        compiler_params=pltpu.CompilerParams(
            dimension_semantics=("parallel", "arbitrary"),
            vmem_limit_bytes=40 * 1024 * 1024),
    )(xp, ln_g.reshape(1, D), ln_b.reshape(1, D),
      gw, p["gate_b"].reshape(1, E),
      w1, p["b1"].reshape(E, 1, F), w2, p["b2"].reshape(E, 1, D))

    return out[:M].reshape(B, S, D)


# ----------------------------------------------------------------------------
# Tiled linear (used for fc_out):  y = x @ w + b, lane-dense padded output
# ----------------------------------------------------------------------------
def _linear_kernel(x_ref, w_ref, b_ref, o_ref, acc_ref):
    k = pl.program_id(2)

    @pl.when(k == 0)
    def _():
        acc_ref[...] = jnp.zeros_like(acc_ref)

    acc_ref[...] += jnp.dot(x_ref[...], w_ref[...],
                            preferred_element_type=jnp.float32)

    @pl.when(k == pl.num_programs(2) - 1)
    def _():
        o_ref[...] = acc_ref[...] + b_ref[...]


def linear(x, w, b, *, tm_max=512, tn_max=512, tk_max=512):
    M, K = x.shape
    _, N = w.shape

    tm = min(tm_max, _round_up(M, 8))     # usually the whole (small) M in one tile
    tn = min(tn_max, _round_up(N, 128))
    tk = tk_max if K % tk_max == 0 else K  # full-K block when K is small/ragged

    Mp = _round_up(M, tm)
    Np = _round_up(N, tn)

    xp = jnp.pad(x, ((0, Mp - M), (0, 0))).astype(jnp.bfloat16)
    wp = jnp.pad(w, ((0, 0), (0, Np - N))).astype(jnp.bfloat16)
    bp = jnp.pad(b, (0, Np - N)).reshape(1, Np)

    out = pl.pallas_call(
        _linear_kernel,
        out_shape=jax.ShapeDtypeStruct((Mp, Np), jnp.float32),
        grid=(Mp // tm, Np // tn, K // tk),
        in_specs=[
            pl.BlockSpec((tm, tk), lambda i, j, k: (i, k)),
            pl.BlockSpec((tk, tn), lambda i, j, k: (k, j)),
            pl.BlockSpec((1, tn), lambda i, j, k: (0, j)),
        ],
        out_specs=pl.BlockSpec((tm, tn), lambda i, j, k: (i, j)),
        scratch_shapes=[pltpu.VMEM((tm, tn), jnp.float32)],
        compiler_params=pltpu.CompilerParams(
            dimension_semantics=("parallel", "parallel", "arbitrary")),
    )(xp, wp, bp)
    return out[:M, :N]


# ----------------------------------------------------------------------------
# Model glue (plain JAX): embedding lookup + layer stacking
# ----------------------------------------------------------------------------
def encoder_layer_fwd(x, p, H):
    x = self_attention_block(x, p["ln1_g"], p["ln1_b"], p["sa"], H)
    x = softmoe_block(x, p["ln2_g"], p["ln2_b"], p["moe"])
    return x


def decoder_layer_fwd(x, memory, p, H):
    x = self_attention_block(x, p["ln1_g"], p["ln1_b"], p["sa"], H)   # no tgt_mask in reference
    x = cross_attention_block(x, memory, p["ln2_g"], p["ln2_b"], p["ca"], H)
    x = softmoe_block(x, p["ln3_g"], p["ln3_b"], p["moe"])
    return x


def transformer_forward(params, src, tgt, H):
    emb = params["embedding"]
    memory = jnp.take(emb, src, axis=0)   # (B, Ss, D) — shared embedding table
    out = jnp.take(emb, tgt, axis=0)      # (B, St, D)
    for p in params["encoder_layers"]:
        memory = encoder_layer_fwd(memory, p, H)
    for p in params["decoder_layers"]:
        out = decoder_layer_fwd(out, memory, p, H)
    B, St, D = out.shape
    logits = linear(out.reshape(B * St, D), params["fc_out_w"], params["fc_out_b"])
    return logits.reshape(B, St, -1)


# ----------------------------------------------------------------------------
# Deterministic parameter construction
# ----------------------------------------------------------------------------
def _init_linear_params(key, d_in, d_out, scale=0.02):
    kw, kb = jax.random.split(key)
    w = scale * jax.random.normal(kw, (d_in, d_out), jnp.float32)
    b = scale * jax.random.normal(kb, (d_out,), jnp.float32)
    return w, b


def _init_self_attn_params(key, D):
    k1, k2 = jax.random.split(key)
    wqkv, bqkv = _init_linear_params(k1, D, 3 * D)   # fused Q|K|V projection
    wo, bo = _init_linear_params(k2, D, D)
    return dict(wqkv=wqkv, bqkv=bqkv, wo=wo, bo=bo)


def _init_cross_attn_params(key, D):
    k1, k2, k3 = jax.random.split(key, 3)
    wq, bq = _init_linear_params(k1, D, D)
    wkv, bkv = _init_linear_params(k2, D, 2 * D)     # fused K|V projection
    wo, bo = _init_linear_params(k3, D, D)
    return dict(wq=wq, bq=bq, wkv=wkv, bkv=bkv, wo=wo, bo=bo)


def _init_softmoe_params(key, D, E):
    F = 4 * D
    kg, k1, kb1, k2, kb2 = jax.random.split(key, 5)
    gate_w, gate_b = _init_linear_params(kg, D, E)
    w1 = 0.02 * jax.random.normal(k1, (E, D, F), jnp.float32)
    b1 = 0.02 * jax.random.normal(kb1, (E, F), jnp.float32)
    w2 = 0.02 * jax.random.normal(k2, (E, F, D), jnp.float32)
    b2 = 0.02 * jax.random.normal(kb2, (E, D), jnp.float32)
    return dict(gate_w=gate_w, gate_b=gate_b, w1=w1, b1=b1, w2=w2, b2=b2)


def _init_encoder_layer(key, D, E):
    k_sa, k_moe = jax.random.split(key, 2)
    return dict(
        sa=_init_self_attn_params(k_sa, D),
        moe=_init_softmoe_params(k_moe, D, E),
        ln1_g=jnp.ones((D,), jnp.float32), ln1_b=jnp.zeros((D,), jnp.float32),
        ln2_g=jnp.ones((D,), jnp.float32), ln2_b=jnp.zeros((D,), jnp.float32),
    )


def _init_decoder_layer(key, D, E):
    k_sa, k_ca, k_moe = jax.random.split(key, 3)
    return dict(
        sa=_init_self_attn_params(k_sa, D),
        ca=_init_cross_attn_params(k_ca, D),
        moe=_init_softmoe_params(k_moe, D, E),
        ln1_g=jnp.ones((D,), jnp.float32), ln1_b=jnp.zeros((D,), jnp.float32),
        ln2_g=jnp.ones((D,), jnp.float32), ln2_b=jnp.zeros((D,), jnp.float32),
        ln3_g=jnp.ones((D,), jnp.float32), ln3_b=jnp.zeros((D,), jnp.float32),
    )


def init_params(key, src_vocab, tgt_vocab, D, L, E):
    keys = jax.random.split(key, 2 * L + 2)
    embedding = 0.02 * jax.random.normal(keys[0], (src_vocab, D), jnp.float32)
    enc = [_init_encoder_layer(keys[1 + i], D, E) for i in range(L)]
    dec = [_init_decoder_layer(keys[1 + L + i], D, E) for i in range(L)]
    fc_w, fc_b = _init_linear_params(keys[1 + 2 * L], D, tgt_vocab)
    return dict(embedding=embedding, encoder_layers=enc, decoder_layers=dec,
                fc_out_w=fc_w, fc_out_b=fc_b)


# ----------------------------------------------------------------------------
if __name__ == "__main__":
    B = 2
    S_SRC, S_TGT = 16, 16
    D_MODEL = 128             # multiple of 128 -> lane-dense stores everywhere
    NUM_HEADS = 4             # Dh = 32
    NUM_LAYERS = 2
    NUM_EXPERTS = 128         # must equal d_model (see einsum note above)
    SRC_VOCAB, TGT_VOCAB = 64, 72

    root = jax.random.PRNGKey(0)
    kp, ks, kt = jax.random.split(root, 3)

    params = init_params(kp, SRC_VOCAB, TGT_VOCAB, D_MODEL, NUM_LAYERS, NUM_EXPERTS)
    src = jax.random.randint(ks, (B, S_SRC), 0, SRC_VOCAB, dtype=jnp.int32)
    # tgt is embedded with the (src-vocab-sized) shared table, as in the reference
    tgt = jax.random.randint(kt, (B, S_TGT), 0, SRC_VOCAB, dtype=jnp.int32)

    fwd = jax.jit(functools.partial(transformer_forward, H=NUM_HEADS))
    logits = fwd(params, src, tgt)
    jax.block_until_ready(logits)

    assert logits.shape == (B, S_TGT, TGT_VOCAB), logits.shape
    assert bool(jnp.all(jnp.isfinite(logits)))
    print("KERNEL_OK")
</pallas_src>

<mosaic_0001>
module attributes {stable_mosaic.version = 11 : i64} {
  func.func @_self_attn_block_kernel(%arg0: i32, %arg1: i32, %arg2: memref<1x16x128xf32, #tpu.memory_space<vmem>>, %arg3: memref<1x16x128xf32, #tpu.memory_space<vmem>>, %arg4: memref<1x128xf32, #tpu.memory_space<vmem>>, %arg5: memref<1x128xf32, #tpu.memory_space<vmem>>, %arg6: memref<128x384xbf16, #tpu.memory_space<vmem>>, %arg7: memref<1x384xf32, #tpu.memory_space<vmem>>, %arg8: memref<128x128xbf16, #tpu.memory_space<vmem>>, %arg9: memref<1x128xf32, #tpu.memory_space<vmem>>, %arg10: memref<1x16x128xf32, #tpu.memory_space<vmem>>, %arg11: memref<16x128xbf16, #tpu.memory_space<vmem>>, %arg12: memref<16x128xbf16, #tpu.memory_space<vmem>>) attributes {dimension_semantics = [#tpu.dimension_semantics<parallel>, #tpu.dimension_semantics<arbitrary>], iteration_bounds = array<i64: 2, 1>, scalar_prefetch = 0 : i64, scratch_operands = 2 : i64, tpu.core_type = #tpu.core_type<tc>, window_params = [{transform_indices = @transform_0, window_bounds = array<i64: 1, 16, 128>}, {transform_indices = @transform_1, window_bounds = array<i64: 1, 16, 128>}, {pipeline_mode = #tpu.pipeline_mode<synchronous>, transform_indices = @transform_2, window_bounds = array<i64: 1, 128>}, {pipeline_mode = #tpu.pipeline_mode<synchronous>, transform_indices = @transform_3, window_bounds = array<i64: 1, 128>}, {pipeline_mode = #tpu.pipeline_mode<synchronous>, transform_indices = @transform_4, window_bounds = array<i64: 128, 384>}, {pipeline_mode = #tpu.pipeline_mode<synchronous>, transform_indices = @transform_5, window_bounds = array<i64: 1, 384>}, {pipeline_mode = #tpu.pipeline_mode<synchronous>, transform_indices = @transform_6, window_bounds = array<i64: 128, 128>}, {pipeline_mode = #tpu.pipeline_mode<synchronous>, transform_indices = @transform_7, window_bounds = array<i64: 1, 128>}, {transform_indices = @transform_8, window_bounds = array<i64: 1, 16, 128>}]} {
    %c0_i32 = arith.constant 0 : i32
    %0 = arith.cmpi eq, %arg1, %c0_i32 : i32
    %1 = arith.extui %0 : i1 to i32
    %c0_i32_0 = arith.constant 0 : i32
    %2 = arith.cmpi ne, %1, %c0_i32_0 : i32
    scf.if %2 {
      %c0_54 = arith.constant 0 : index
      %c0_55 = arith.constant 0 : index
      %c0_56 = arith.constant 0 : index
      %135 = vector.load %arg3[%c0_54, %c0_55, %c0_56] : memref<1x16x128xf32, #tpu.memory_space<vmem>>, vector<1x16x128xf32>
      %136 = vector.shape_cast %135 : vector<1x16x128xf32> to vector<16x128xf32>
      %c0_57 = arith.constant 0 : index
      %c0_58 = arith.constant 0 : index
      %137 = vector.load %arg4[%c0_57, %c0_58] : memref<1x128xf32, #tpu.memory_space<vmem>>, vector<1x128xf32>
      %c0_59 = arith.constant 0 : index
      %c0_60 = arith.constant 0 : index
      %138 = vector.load %arg5[%c0_59, %c0_60] : memref<1x128xf32, #tpu.memory_space<vmem>>, vector<1x128xf32>
      %cst_61 = arith.constant dense<0.000000e+00> : vector<16xf32>
      %139 = vector.multi_reduction <add>, %136, %cst_61 [1] : vector<16x128xf32> to vector<16xf32>
      %140 = vector.shape_cast %139 : vector<16xf32> to vector<16x1xf32>
      %cst_62 = arith.constant 1.280000e+02 : f32
      %141 = vector.broadcast %cst_62 : f32 to vector<16x1xf32>
      %142 = arith.divf %140, %141 : vector<16x1xf32>
      %143 = vector.broadcast %142 : vector<16x1xf32> to vector<16x128xf32>
      %144 = arith.subf %136, %143 : vector<16x128xf32>
      %145 = arith.mulf %144, %144 : vector<16x128xf32>
      %cst_63 = arith.constant dense<0.000000e+00> : vector<16xf32>
      %146 = vector.multi_reduction <add>, %145, %cst_63 [1] : vector<16x128xf32> to vector<16xf32>
      %147 = vector.shape_cast %146 : vector<16xf32> to vector<16x1xf32>
      %cst_64 = arith.constant 1.280000e+02 : f32
      %148 = vector.broadcast %cst_64 : f32 to vector<16x1xf32>
      %149 = arith.divf %147, %148 : vector<16x1xf32>
      %150 = vector.broadcast %142 : vector<16x1xf32> to vector<16x128xf32>
      %151 = arith.subf %136, %150 : vector<16x128xf32>
      %cst_65 = arith.constant 9.99999974E-6 : f32
      %152 = vector.broadcast %cst_65 : f32 to vector<16x1xf32>
      %153 = arith.addf %149, %152 : vector<16x1xf32>
      %154 = math.rsqrt %153 : vector<16x1xf32>
      %155 = vector.broadcast %154 : vector<16x1xf32> to vector<16x128xf32>
      %156 = arith.mulf %151, %155 : vector<16x128xf32>
      %157 = vector.broadcast %137 : vector<1x128xf32> to vector<16x128xf32>
      %158 = arith.mulf %156, %157 : vector<16x128xf32>
      %159 = vector.broadcast %138 : vector<1x128xf32> to vector<16x128xf32>
      %160 = arith.addf %158, %159 : vector<16x128xf32>
      %161 = arith.truncf %160 : vector<16x128xf32> to vector<16x128xbf16>
      %c0_66 = arith.constant 0 : index
      %c128 = arith.constant 128 : index
      %162 = vector.load %arg6[%c0_66, %c128] : memref<128x384xbf16, #tpu.memory_space<vmem>>, vector<128x128xbf16>
      %cst_67 = arith.constant dense<0.000000e+00> : vector<16x128xf32>
      %163 = tpu.matmul %161, %162, %cst_67 {dimension_numbers = #tpu.dot_dimension_numbers<[1], [0], [0], [1], [0, 0, 1, 1], [], []>} : vector<16x128xbf16>, vector<128x128xbf16>, vector<16x128xf32> -> vector<16x128xf32>
      %c0_68 = arith.constant 0 : index
      %c128_69 = arith.constant 128 : index
      %164 = vector.load %arg7[%c0_68, %c128_69] : memref<1x384xf32, #tpu.memory_space<vmem>>, vector<1x128xf32>
      %165 = vector.broadcast %164 : vector<1x128xf32> to vector<16x128xf32>
      %166 = arith.addf %163, %165 : vector<16x128xf32>
      %167 = arith.truncf %166 : vector<16x128xf32> to vector<16x128xbf16>
      %c0_70 = arith.constant 0 : index
      %c0_71 = arith.constant 0 : index
      %168 = vector.load %arg11[%c0_70, %c0_71] : memref<16x128xbf16, #tpu.memory_space<vmem>>, vector<16x128xbf16>
      tpu.vector_store %arg11[%c0_70, %c0_71], %167 {strides = array<i32>} : memref<16x128xbf16, #tpu.memory_space<vmem>>, vector<16x128xbf16>,
      %c0_72 = arith.constant 0 : index
      %c256 = arith.constant 256 : index
      %169 = vector.load %arg6[%c0_72, %c256] : memref<128x384xbf16, #tpu.memory_space<vmem>>, vector<128x128xbf16>
      %cst_73 = arith.constant dense<0.000000e+00> : vector<16x128xf32>
      %170 = tpu.matmul %161, %169, %cst_73 {dimension_numbers = #tpu.dot_dimension_numbers<[1], [0], [0], [1], [0, 0, 1, 1], [], []>} : vector<16x128xbf16>, vector<128x128xbf16>, vector<16x128xf32> -> vector<16x128xf32>
      %c0_74 = arith.constant 0 : index
      %c256_75 = arith.constant 256 : index
      %171 = vector.load %arg7[%c0_74, %c256_75] : memref<1x384xf32, #tpu.memory_space<vmem>>, vector<1x128xf32>
      %172 = vector.broadcast %171 : vector<1x128xf32> to vector<16x128xf32>
      %173 = arith.addf %170, %172 : vector<16x128xf32>
      %174 = arith.truncf %173 : vector<16x128xf32> to vector<16x128xbf16>
      %c0_76 = arith.constant 0 : index
      %c0_77 = arith.constant 0 : index
      %175 = vector.load %arg12[%c0_76, %c0_77] : memref<16x128xbf16, #tpu.memory_space<vmem>>, vector<16x128xbf16>
      tpu.vector_store %arg12[%c0_76, %c0_77], %174 {strides = array<i32>} : memref<16x128xbf16, #tpu.memory_space<vmem>>, vector<16x128xbf16>,
    } else {
    }
    %c0 = arith.constant 0 : index
    %c0_1 = arith.constant 0 : index
    %c0_2 = arith.constant 0 : index
    %3 = vector.load %arg2[%c0, %c0_1, %c0_2] : memref<1x16x128xf32, #tpu.memory_space<vmem>>, vector<1x16x128xf32>
    %4 = vector.shape_cast %3 : vector<1x16x128xf32> to vector<16x128xf32>
    %c0_3 = arith.constant 0 : index
    %c0_4 = arith.constant 0 : index
    %5 = vector.load %arg4[%c0_3, %c0_4] : memref<1x128xf32, #tpu.memory_space<vmem>>, vector<1x128xf32>
    %c0_5 = arith.constant 0 : index
    %c0_6 = arith.constant 0 : index
    %6 = vector.load %arg5[%c0_5, %c0_6] : memref<1x128xf32, #tpu.memory_space<vmem>>, vector<1x128xf32>
    %cst = arith.constant dense<0.000000e+00> : vector<16xf32>
    %7 = vector.multi_reduction <add>, %4, %cst [1] : vector<16x128xf32> to vector<16xf32>
    %8 = vector.shape_cast %7 : vector<16xf32> to vector<16x1xf32>
    %cst_7 = arith.constant 1.280000e+02 : f32
    %9 = vector.broadcast %cst_7 : f32 to vector<16x1xf32>
    %10 = arith.divf %8, %9 : vector<16x1xf32>
    %11 = vector.broadcast %10 : vector<16x1xf32> to vector<16x128xf32>
    %12 = arith.subf %4, %11 : vector<16x128xf32>
    %13 = arith.mulf %12, %12 : vector<16x128xf32>
    %cst_8 = arith.constant dense<0.000000e+00> : vector<16xf32>
    %14 = vector.multi_reduction <add>, %13, %cst_8 [1] : vector<16x128xf32> to vector<16xf32>
    %15 = vector.shape_cast %14 : vector<16xf32> to vector<16x1xf32>
    %cst_9 = arith.constant 1.280000e+02 : f32
    %16 = vector.broadcast %cst_9 : f32 to vector<16x1xf32>
    %17 = arith.divf %15, %16 : vector<16x1xf32>
    %18 = vector.broadcast %10 : vector<16x1xf32> to vector<16x128xf32>
    %19 = arith.subf %4, %18 : vector<16x128xf32>
    %cst_10 = arith.constant 9.99999974E-6 : f32
    %20 = vector.broadcast %cst_10 : f32 to vector<16x1xf32>
    %21 = arith.addf %17, %20 : vector<16x1xf32>
    %22 = math.rsqrt %21 : vector<16x1xf32>
    %23 = vector.broadcast %22 : vector<16x1xf32> to vector<16x128xf32>
    %24 = arith.mulf %19, %23 : vector<16x128xf32>
    %25 = vector.broadcast %5 : vector<1x128xf32> to vector<16x128xf32>
    %26 = arith.mulf %24, %25 : vector<16x128xf32>
    %27 = vector.broadcast %6 : vector<1x128xf32> to vector<16x128xf32>
    %28 = arith.addf %26, %27 : vector<16x128xf32>
    %29 = arith.truncf %28 : vector<16x128xf32> to vector<16x128xbf16>
    %c0_11 = arith.constant 0 : index
    %c0_12 = arith.constant 0 : index
    %30 = vector.load %arg6[%c0_11, %c0_12] : memref<128x384xbf16, #tpu.memory_space<vmem>>, vector<128x128xbf16>
    %cst_13 = arith.constant dense<0.000000e+00> : vector<16x128xf32>
    %31 = tpu.matmul %29, %30, %cst_13 {dimension_numbers = #tpu.dot_dimension_numbers<[1], [0], [0], [1], [0, 0, 1, 1], [], []>} : vector<16x128xbf16>, vector<128x128xbf16>, vector<16x128xf32> -> vector<16x128xf32>
    %c0_14 = arith.constant 0 : index
    %c0_15 = arith.constant 0 : index
    %32 = vector.load %arg7[%c0_14, %c0_15] : memref<1x384xf32, #tpu.memory_space<vmem>>, vector<1x128xf32>
    %33 = vector.broadcast %32 : vector<1x128xf32> to vector<16x128xf32>
    %34 = arith.addf %31, %33 : vector<16x128xf32>
    %c0_16 = arith.constant 0 : index
    %c0_17 = arith.constant 0 : index
    %35 = vector.load %arg9[%c0_16, %c0_17] : memref<1x128xf32, #tpu.memory_space<vmem>>, vector<1x128xf32>
    %36 = vector.broadcast %35 : vector<1x128xf32> to vector<16x128xf32>
    %37 = arith.addf %4, %36 : vector<16x128xf32>
    %c0_18 = arith.constant 0 : index
    %c0_19 = arith.constant 0 : index
    %38 = vector.load %arg11[%c0_18, %c0_19] : memref<16x128xbf16, #tpu.memory_space<vmem>>, vector<16x128xbf16>
    %c0_20 = arith.constant 0 : index
    %c0_21 = arith.constant 0 : index
    %39 = vector.load %arg12[%c0_20, %c0_21] : memref<16x128xbf16, #tpu.memory_space<vmem>>, vector<16x128xbf16>
    %40 = vector.extract_strided_slice %34 {offsets = [0, 0], sizes = [16, 32], strides = [1, 1]} : vector<16x128xf32> to vector<16x32xf32>
    %41 = arith.truncf %40 : vector<16x32xf32> to vector<16x32xbf16>
    %42 = vector.extract_strided_slice %38 {offsets = [0, 0], sizes = [16, 32], strides = [1, 1]} : vector<16x128xbf16> to vector<16x32xbf16>
    %43 = vector.extract_strided_slice %39 {offsets = [0, 0], sizes = [16, 32], strides = [1, 1]} : vector<16x128xbf16> to vector<16x32xbf16>
    %cst_22 = arith.constant dense<0.000000e+00> : vector<16x16xf32>
    %44 = tpu.matmul %41, %42, %cst_22 {dimension_numbers = #tpu.dot_dimension_numbers<[1], [1], [0], [0], [0, 0, 1, 0], [], []>} : vector<16x32xbf16>, vector<16x32xbf16>, vector<16x16xf32> -> vector<16x16xf32>
    %cst_23 = arith.constant 0.176776692 : f32
    %45 = vector.broadcast %cst_23 : f32 to vector<16x16xf32>
    %46 = arith.mulf %44, %45 : vector<16x16xf32>
    %cst_24 = arith.constant dense<0xFF800000> : vector<16xf32>
    %47 = vector.multi_reduction <maximumf>, %46, %cst_24 [1] : vector<16x16xf32> to vector<16xf32>
    %48 = vector.shape_cast %47 : vector<16xf32> to vector<16x1xf32>
    %49 = vector.broadcast %48 : vector<16x1xf32> to vector<16x16xf32>
    %50 = arith.subf %46, %49 : vector<16x16xf32>
    %51 = math.exp %50 : vector<16x16xf32>
    %cst_25 = arith.constant dense<0.000000e+00> : vector<16xf32>
    %52 = vector.multi_reduction <add>, %51, %cst_25 [1] : vector<16x16xf32> to vector<16xf32>
    %53 = vector.shape_cast %52 : vector<16xf32> to vector<16x1xf32>
    %54 = tpu.reciprocal %53 {approx = true} : vector<16x1xf32> -> vector<16x1xf32>
    %55 = vector.broadcast %54 : vector<16x1xf32> to vector<16x16xf32>
    %56 = arith.mulf %51, %55 : vector<16x16xf32>
    %57 = arith.truncf %56 : vector<16x16xf32> to vector<16x16xbf16>
    %cst_26 = arith.constant dense<0.000000e+00> : vector<16x32xf32>
    %58 = tpu.matmul %57, %43, %cst_26 {dimension_numbers = #tpu.dot_dimension_numbers<[1], [0], [0], [1], [0, 0, 1, 1], [], []>} : vector<16x16xbf16>, vector<16x32xbf16>, vector<16x32xf32> -> vector<16x32xf32>
    %59 = arith.truncf %58 : vector<16x32xf32> to vector<16x32xbf16>
    %c0_27 = arith.constant 0 : index
    %c0_28 = arith.constant 0 : index
    %60 = vector.load %arg8[%c0_27, %c0_28] : memref<128x128xbf16, #tpu.memory_space<vmem>>, vector<32x128xbf16>
    %cst_29 = arith.constant dense<0.000000e+00> : vector<16x128xf32>
    %61 = tpu.matmul %59, %60, %cst_29 {dimension_numbers = #tpu.dot_dimension_numbers<[1], [0], [0], [1], [0, 0, 1, 1], [], []>} : vector<16x32xbf16>, vector<32x128xbf16>, vector<16x128xf32> -> vector<16x128xf32>
    %62 = arith.addf %37, %61 : vector<16x128xf32>
    %63 = vector.extract_strided_slice %34 {offsets = [0, 32], sizes = [16, 32], strides = [1, 1]} : vector<16x128xf32> to vector<16x32xf32>
    %64 = arith.truncf %63 : vector<16x32xf32> to vector<16x32xbf16>
    %65 = vector.extract_strided_slice %38 {offsets = [0, 32], sizes = [16, 32], strides = [1, 1]} : vector<16x128xbf16> to vector<16x32xbf16>
    %66 = vector.extract_strided_slice %39 {offsets = [0, 32], sizes = [16, 32], strides = [1, 1]} : vector<16x128xbf16> to vector<16x32xbf16>
    %cst_30 = arith.constant dense<0.000000e+00> : vector<16x16xf32>
    %67 = tpu.matmul %64, %65, %cst_30 {dimension_numbers = #tpu.dot_dimension_numbers<[1], [1], [0], [0], [0, 0, 1, 0], [], []>} : vector<16x32xbf16>, vector<16x32xbf16>, vector<16x16xf32> -> vector<16x16xf32>
    %cst_31 = arith.constant 0.176776692 : f32
    %68 = vector.broadcast %cst_31 : f32 to vector<16x16xf32>
    %69 = arith.mulf %67, %68 : vector<16x16xf32>
    %cst_32 = arith.constant dense<0xFF800000> : vector<16xf32>
    %70 = vector.multi_reduction <maximumf>, %69, %cst_32 [1] : vector<16x16xf32> to vector<16xf32>
    %71 = vector.shape_cast %70 : vector<16xf32> to vector<16x1xf32>
    %72 = vector.broadcast %71 : vector<16x1xf32> to vector<16x16xf32>
    %73 = arith.subf %69, %72 : vector<16x16xf32>
    %74 = math.exp %73 : vector<16x16xf32>
    %cst_33 = arith.constant dense<0.000000e+00> : vector<16xf32>
    %75 = vector.multi_reduction <add>, %74, %cst_33 [1] : vector<16x16xf32> to vector<16xf32>
    %76 = vector.shape_cast %75 : vector<16xf32> to vector<16x1xf32>
    %77 = tpu.reciprocal %76 {approx = true} : vector<16x1xf32> -> vector<16x1xf32>
    %78 = vector.broadcast %77 : vector<16x1xf32> to vector<16x16xf32>
    %79 = arith.mulf %74, %78 : vector<16x16xf32>
    %80 = arith.truncf %79 : vector<16x16xf32> to vector<16x16xbf16>
    %cst_34 = arith.constant dense<0.000000e+00> : vector<16x32xf32>
    %81 = tpu.matmul %80, %66, %cst_34 {dimension_numbers = #tpu.dot_dimension_numbers<[1], [0], [0], [1], [0, 0, 1, 1], [], []>} : vector<16x16xbf16>, vector<16x32xbf16>, vector<16x32xf32> -> vector<16x32xf32>
    %82 = arith.truncf %81 : vector<16x32xf32> to vector<16x32xbf16>
    %c32 = arith.constant 32 : index
    %c0_35 = arith.constant 0 : index
    %83 = vector.load %arg8[%c32, %c0_35] : memref<128x128xbf16, #tpu.memory_space<vmem>>, vector<32x128xbf16>
    %cst_36 = arith.constant dense<0.000000e+00> : vector<16x128xf32>
    %84 = tpu.matmul %82, %83, %cst_36 {dimension_numbers = #tpu.dot_dimension_numbers<[1], [0], [0], [1], [0, 0, 1, 1], [], []>} : vector<16x32xbf16>, vector<32x128xbf16>, vector<16x128xf32> -> vector<16x128xf32>
    %85 = arith.addf %62, %84 : vector<16x128xf32>
    %86 = vector.extract_strided_slice %34 {offsets = [0, 64], sizes = [16, 32], strides = [1, 1]} : vector<16x128xf32> to vector<16x32xf32>
    %87 = arith.truncf %86 : vector<16x32xf32> to vector<16x32xbf16>
    %88 = vector.extract_strided_slice %38 {offsets = [0, 64], sizes = [16, 32], strides = [1, 1]} : vector<16x128xbf16> to vector<16x32xbf16>
    %89 = vector.extract_strided_slice %39 {offsets = [0, 64], sizes = [16, 32], strides = [1, 1]} : vector<16x128xbf16> to vector<16x32xbf16>
    %cst_37 = arith.constant dense<0.000000e+00> : vector<16x16xf32>
    %90 = tpu.matmul %87, %88, %cst_37 {dimension_numbers = #tpu.dot_dimension_numbers<[1], [1], [0], [0], [0, 0, 1, 0], [], []>} : vector<16x32xbf16>, vector<16x32xbf16>, vector<16x16xf32> -> vector<16x16xf32>
    %cst_38 = arith.constant 0.176776692 : f32
    %91 = vector.broadcast %cst_38 : f32 to vector<16x16xf32>
    %92 = arith.mulf %90, %91 : vector<16x16xf32>
    %cst_39 = arith.constant dense<0xFF800000> : vector<16xf32>
    %93 = vector.multi_reduction <maximumf>, %92, %cst_39 [1] : vector<16x16xf32> to vector<16xf32>
    %94 = vector.shape_cast %93 : vector<16xf32> to vector<16x1xf32>
    %95 = vector.broadcast %94 : vector<16x1xf32> to vector<16x16xf32>
    %96 = arith.subf %92, %95 : vector<16x16xf32>
    %97 = math.exp %96 : vector<16x16xf32>
    %cst_40 = arith.constant dense<0.000000e+00> : vector<16xf32>
    %98 = vector.multi_reduction <add>, %97, %cst_40 [1] : vector<16x16xf32> to vector<16xf32>
    %99 = vector.shape_cast %98 : vector<16xf32> to vector<16x1xf32>
    %100 = tpu.reciprocal %99 {approx = true} : vector<16x1xf32> -> vector<16x1xf32>
    %101 = vector.broadcast %100 : vector<16x1xf32> to vector<16x16xf32>
    %102 = arith.mulf %97, %101 : vector<16x16xf32>
    %103 = arith.truncf %102 : vector<16x16xf32> to vector<16x16xbf16>
    %cst_41 = arith.constant dense<0.000000e+00> : vector<16x32xf32>
    %104 = tpu.matmul %103, %89, %cst_41 {dimension_numbers = #tpu.dot_dimension_numbers<[1], [0], [0], [1], [0, 0, 1, 1], [], []>} : vector<16x16xbf16>, vector<16x32xbf16>, vector<16x32xf32> -> vector<16x32xf32>
    %105 = arith.truncf %104 : vector<16x32xf32> to vector<16x32xbf16>
    %c64 = arith.constant 64 : index
    %c0_42 = arith.constant 0 : index
    %106 = vector.load %arg8[%c64, %c0_42] : memref<128x128xbf16, #tpu.memory_space<vmem>>, vector<32x128xbf16>
    %cst_43 = arith.constant dense<0.000000e+00> : vector<16x128xf32>
    %107 = tpu.matmul %105, %106, %cst_43 {dimension_numbers = #tpu.dot_dimension_numbers<[1], [0], [0], [1], [0, 0, 1, 1], [], []>} : vector<16x32xbf16>, vector<32x128xbf16>, vector<16x128xf32> -> vector<16x128xf32>
    %108 = arith.addf %85, %107 : vector<16x128xf32>
    %109 = vector.extract_strided_slice %34 {offsets = [0, 96], sizes = [16, 32], strides = [1, 1]} : vector<16x128xf32> to vector<16x32xf32>
    %110 = arith.truncf %109 : vector<16x32xf32> to vector<16x32xbf16>
    %111 = vector.extract_strided_slice %38 {offsets = [0, 96], sizes = [16, 32], strides = [1, 1]} : vector<16x128xbf16> to vector<16x32xbf16>
    %112 = vector.extract_strided_slice %39 {offsets = [0, 96], sizes = [16, 32], strides = [1, 1]} : vector<16x128xbf16> to vector<16x32xbf16>
    %cst_44 = arith.constant dense<0.000000e+00> : vector<16x16xf32>
    %113 = tpu.matmul %110, %111, %cst_44 {dimension_numbers = #tpu.dot_dimension_numbers<[1], [1], [0], [0], [0, 0, 1, 0], [], []>} : vector<16x32xbf16>, vector<16x32xbf16>, vector<16x16xf32> -> vector<16x16xf32>
    %cst_45 = arith.constant 0.176776692 : f32
    %114 = vector.broadcast %cst_45 : f32 to vector<16x16xf32>
    %115 = arith.mulf %113, %114 : vector<16x16xf32>
    %cst_46 = arith.constant dense<0xFF800000> : vector<16xf32>
    %116 = vector.multi_reduction <maximumf>, %115, %cst_46 [1] : vector<16x16xf32> to vector<16xf32>
    %117 = vector.shape_cast %116 : vector<16xf32> to vector<16x1xf32>
    %118 = vector.broadcast %117 : vector<16x1xf32> to vector<16x16xf32>
    %119 = arith.subf %115, %118 : vector<16x16xf32>
    %120 = math.exp %119 : vector<16x16xf32>
    %cst_47 = arith.constant dense<0.000000e+00> : vector<16xf32>
    %121 = vector.multi_reduction <add>, %120, %cst_47 [1] : vector<16x16xf32> to vector<16xf32>
    %122 = vector.shape_cast %121 : vector<16xf32> to vector<16x1xf32>
    %123 = tpu.reciprocal %122 {approx = true} : vector<16x1xf32> -> vector<16x1xf32>
    %124 = vector.broadcast %123 : vector<16x1xf32> to vector<16x16xf32>
    %125 = arith.mulf %120, %124 : vector<16x16xf32>
    %126 = arith.truncf %125 : vector<16x16xf32> to vector<16x16xbf16>
    %cst_48 = arith.constant dense<0.000000e+00> : vector<16x32xf32>
    %127 = tpu.matmul %126, %112, %cst_48 {dimension_numbers = #tpu.dot_dimension_numbers<[1], [0], [0], [1], [0, 0, 1, 1], [], []>} : vector<16x16xbf16>, vector<16x32xbf16>, vector<16x32xf32> -> vector<16x32xf32>
    %128 = arith.truncf %127 : vector<16x32xf32> to vector<16x32xbf16>
    %c96 = arith.constant 96 : index
    %c0_49 = arith.constant 0 : index
    %129 = vector.load %arg8[%c96, %c0_49] : memref<128x128xbf16, #tpu.memory_space<vmem>>, vector<32x128xbf16>
    %cst_50 = arith.constant dense<0.000000e+00> : vector<16x128xf32>
    %130 = tpu.matmul %128, %129, %cst_50 {dimension_numbers = #tpu.dot_dimension_numbers<[1], [0], [0], [1], [0, 0, 1, 1], [], []>} : vector<16x32xbf16>, vector<32x128xbf16>, vector<16x128xf32> -> vector<16x128xf32>
    %131 = arith.addf %108, %130 : vector<16x128xf32>
    %c0_51 = arith.constant 0 : index
    %c0_52 = arith.constant 0 : index
    %c0_53 = arith.constant 0 : index
    %132 = vector.load %arg10[%c0_51, %c0_52, %c0_53] : memref<1x16x128xf32, #tpu.memory_space<vmem>>, vector<1x16x128xf32>
    %133 = vector.shape_cast %132 : vector<1x16x128xf32> to vector<16x128xf32>
    %134 = vector.shape_cast %131 : vector<16x128xf32> to vector<1x16x128xf32>
    tpu.vector_store %arg10[%c0_51, %c0_52, %c0_53], %134 {strides = array<i32>} : memref<1x16x128xf32, #tpu.memory_space<vmem>>, vector<1x16x128xf32>,
    return
  }
  func.func @transform_0(%arg0: i32, %arg1: i32) -> (i32, i32, i32) {
    %c0_i32 = arith.constant 0 : i32
    %c0_i32_0 = arith.constant 0 : i32
    return %arg0, %arg1, %c0_i32 : i32, i32, i32
  }
  func.func @transform_1(%arg0: i32, %arg1: i32) -> (i32, i32, i32) {
    %c0_i32 = arith.constant 0 : i32
    %c0_i32_0 = arith.constant 0 : i32
    %c0_i32_1 = arith.constant 0 : i32
    return %arg0, %c0_i32, %c0_i32_0 : i32, i32, i32
  }
  func.func @transform_2(%arg0: i32, %arg1: i32) -> (i32, i32) {
    %c0_i32 = arith.constant 0 : i32
    %c0_i32_0 = arith.constant 0 : i32
    %c0_i32_1 = arith.constant 0 : i32
    return %c0_i32, %c0_i32_0 : i32, i32
  }
  func.func @transform_3(%arg0: i32, %arg1: i32) -> (i32, i32) {
    %c0_i32 = arith.constant 0 : i32
    %c0_i32_0 = arith.constant 0 : i32
    %c0_i32_1 = arith.constant 0 : i32
    return %c0_i32, %c0_i32_0 : i32, i32
  }
  func.func @transform_4(%arg0: i32, %arg1: i32) -> (i32, i32) {
    %c0_i32 = arith.constant 0 : i32
    %c0_i32_0 = arith.constant 0 : i32
    %c0_i32_1 = arith.constant 0 : i32
    return %c0_i32, %c0_i32_0 : i32, i32
  }
  func.func @transform_5(%arg0: i32, %arg1: i32) -> (i32, i32) {
    %c0_i32 = arith.constant 0 : i32
    %c0_i32_0 = arith.constant 0 : i32
    %c0_i32_1 = arith.constant 0 : i32
    return %c0_i32, %c0_i32_0 : i32, i32
  }
  func.func @transform_6(%arg0: i32, %arg1: i32) -> (i32, i32) {
    %c0_i32 = arith.constant 0 : i32
    %c0_i32_0 = arith.constant 0 : i32
    %c0_i32_1 = arith.constant 0 : i32
    return %c0_i32, %c0_i32_0 : i32, i32
  }
  func.func @transform_7(%arg0: i32, %arg1: i32) -> (i32, i32) {
    %c0_i32 = arith.constant 0 : i32
    %c0_i32_0 = arith.constant 0 : i32
    %c0_i32_1 = arith.constant 0 : i32
    return %c0_i32, %c0_i32_0 : i32, i32
  }
  func.func @transform_8(%arg0: i32, %arg1: i32) -> (i32, i32, i32) {
    %c0_i32 = arith.constant 0 : i32
    %c0_i32_0 = arith.constant 0 : i32
    return %arg0, %arg1, %c0_i32 : i32, i32, i32
  }
}

module attributes {stable_mosaic.version = 11 : i64} {
  func.func @_softmoe_block_kernel(%arg0: i32, %arg1: i32, %arg2: memref<32x128xf32, #tpu.memory_space<vmem>>, %arg3: memref<1x128xf32, #tpu.memory_space<vmem>>, %arg4: memref<1x128xf32, #tpu.memory_space<vmem>>, %arg5: memref<128x128xbf16, #tpu.memory_space<vmem>>, %arg6: memref<1x128xf32, #tpu.memory_space<vmem>>, %arg7: memref<8x128x512xbf16, #tpu.memory_space<vmem>>, %arg8: memref<8x1x512xf32, #tpu.memory_space<vmem>>, %arg9: memref<8x512x128xbf16, #tpu.memory_space<vmem>>, %arg10: memref<8x1x128xf32, #tpu.memory_space<vmem>>, %arg11: memref<32x128xf32, #tpu.memory_space<vmem>>, %arg12: memref<32x128xbf16, #tpu.memory_space<vmem>>, %arg13: memref<32x128xf32, #tpu.memory_space<vmem>>, %arg14: memref<32x128xf32, #tpu.memory_space<vmem>>) attributes {dimension_semantics = [#tpu.dimension_semantics<parallel>, #tpu.dimension_semantics<arbitrary>], iteration_bounds = array<i64: 1, 16>, scalar_prefetch = 0 : i64, scratch_operands = 3 : i64, tpu.core_type = #tpu.core_type<tc>, window_params = [{transform_indices = @transform_0, window_bounds = array<i64: 32, 128>}, {pipeline_mode = #tpu.pipeline_mode<synchronous>, transform_indices = @transform_1, window_bounds = array<i64: 1, 128>}, {pipeline_mode = #tpu.pipeline_mode<synchronous>, transform_indices = @transform_2, window_bounds = array<i64: 1, 128>}, {pipeline_mode = #tpu.pipeline_mode<synchronous>, transform_indices = @transform_3, window_bounds = array<i64: 128, 128>}, {pipeline_mode = #tpu.pipeline_mode<synchronous>, transform_indices = @transform_4, window_bounds = array<i64: 1, 128>}, {transform_indices = @transform_5, window_bounds = array<i64: 8, 128, 512>}, {transform_indices = @transform_6, window_bounds = array<i64: 8, 1, 512>}, {transform_indices = @transform_7, window_bounds = array<i64: 8, 512, 128>}, {transform_indices = @transform_8, window_bounds = array<i64: 8, 1, 128>}, {transform_indices = @transform_9, window_bounds = array<i64: 32, 128>}]} {
    %c0_i32 = arith.constant 0 : i32
    %0 = arith.cmpi eq, %arg1, %c0_i32 : i32
    %1 = arith.extui %0 : i1 to i32
    %c0_i32_0 = arith.constant 0 : i32
    %2 = arith.cmpi ne, %1, %c0_i32_0 : i32
    scf.if %2 {
      %c0_111 = arith.constant 0 : index
      %c0_112 = arith.constant 0 : index
      %233 = vector.load %arg2[%c0_111, %c0_112] : memref<32x128xf32, #tpu.memory_space<vmem>>, vector<32x128xf32>
      %c0_113 = arith.constant 0 : index
      %c0_114 = arith.constant 0 : index
      %234 = vector.load %arg3[%c0_113, %c0_114] : memref<1x128xf32, #tpu.memory_space<vmem>>, vector<1x128xf32>
      %c0_115 = arith.constant 0 : index
      %c0_116 = arith.constant 0 : index
      %235 = vector.load %arg4[%c0_115, %c0_116] : memref<1x128xf32, #tpu.memory_space<vmem>>, vector<1x128xf32>
      %cst_117 = arith.constant dense<0.000000e+00> : vector<32xf32>
      %236 = vector.multi_reduction <add>, %233, %cst_117 [1] : vector<32x128xf32> to vector<32xf32>
      %237 = vector.shape_cast %236 : vector<32xf32> to vector<32x1xf32>
      %cst_118 = arith.constant 1.280000e+02 : f32
      %238 = vector.broadcast %cst_118 : f32 to vector<32x1xf32>
      %239 = arith.divf %237, %238 : vector<32x1xf32>
      %240 = vector.broadcast %239 : vector<32x1xf32> to vector<32x128xf32>
      %241 = arith.subf %233, %240 : vector<32x128xf32>
      %242 = arith.mulf %241, %241 : vector<32x128xf32>
      %cst_119 = arith.constant dense<0.000000e+00> : vector<32xf32>
      %243 = vector.multi_reduction <add>, %242, %cst_119 [1] : vector<32x128xf32> to vector<32xf32>
      %244 = vector.shape_cast %243 : vector<32xf32> to vector<32x1xf32>
      %cst_120 = arith.constant 1.280000e+02 : f32
      %245 = vector.broadcast %cst_120 : f32 to vector<32x1xf32>
      %246 = arith.divf %244, %245 : vector<32x1xf32>
      %247 = vector.broadcast %239 : vector<32x1xf32> to vector<32x128xf32>
      %248 = arith.subf %233, %247 : vector<32x128xf32>
      %cst_121 = arith.constant 9.99999974E-6 : f32
      %249 = vector.broadcast %cst_121 : f32 to vector<32x1xf32>
      %250 = arith.addf %246, %249 : vector<32x1xf32>
      %251 = math.rsqrt %250 : vector<32x1xf32>
      %252 = vector.broadcast %251 : vector<32x1xf32> to vector<32x128xf32>
      %253 = arith.mulf %248, %252 : vector<32x128xf32>
      %254 = vector.broadcast %234 : vector<1x128xf32> to vector<32x128xf32>
      %255 = arith.mulf %253, %254 : vector<32x128xf32>
      %256 = vector.broadcast %235 : vector<1x128xf32> to vector<32x128xf32>
      %257 = arith.addf %255, %256 : vector<32x128xf32>
      %258 = arith.truncf %257 : vector<32x128xf32> to vector<32x128xbf16>
      %c0_122 = arith.constant 0 : index
      %c0_123 = arith.constant 0 : index
      %259 = vector.load %arg12[%c0_122, %c0_123] : memref<32x128xbf16, #tpu.memory_space<vmem>>, vector<32x128xbf16>
      tpu.vector_store %arg12[%c0_122, %c0_123], %258 {strides = array<i32>} : memref<32x128xbf16, #tpu.memory_space<vmem>>, vector<32x128xbf16>,
      %c0_124 = arith.constant 0 : index
      %c0_125 = arith.constant 0 : index
      %260 = vector.load %arg5[%c0_124, %c0_125] : memref<128x128xbf16, #tpu.memory_space<vmem>>, vector<128x128xbf16>
      %cst_126 = arith.constant dense<0.000000e+00> : vector<32x128xf32>
      %261 = tpu.matmul %258, %260, %cst_126 {dimension_numbers = #tpu.dot_dimension_numbers<[1], [0], [0], [1], [0, 0, 1, 1], [], []>} : vector<32x128xbf16>, vector<128x128xbf16>, vector<32x128xf32> -> vector<32x128xf32>
      %c0_127 = arith.constant 0 : index
      %c0_128 = arith.constant 0 : index
      %262 = vector.load %arg6[%c0_127, %c0_128] : memref<1x128xf32, #tpu.memory_space<vmem>>, vector<1x128xf32>
      %263 = vector.broadcast %262 : vector<1x128xf32> to vector<32x128xf32>
      %264 = arith.addf %261, %263 : vector<32x128xf32>
      %cst_129 = arith.constant dense<0xFF800000> : vector<32xf32>
      %265 = vector.multi_reduction <maximumf>, %264, %cst_129 [1] : vector<32x128xf32> to vector<32xf32>
      %266 = vector.shape_cast %265 : vector<32xf32> to vector<32x1xf32>
      %267 = vector.broadcast %266 : vector<32x1xf32> to vector<32x128xf32>
      %268 = arith.subf %264, %267 : vector<32x128xf32>
      %269 = math.exp %268 : vector<32x128xf32>
      %cst_130 = arith.constant dense<0.000000e+00> : vector<32xf32>
      %270 = vector.multi_reduction <add>, %269, %cst_130 [1] : vector<32x128xf32> to vector<32xf32>
      %271 = vector.shape_cast %270 : vector<32xf32> to vector<32x1xf32>
      %272 = tpu.reciprocal %271 {approx = true} : vector<32x1xf32> -> vector<32x1xf32>
      %273 = vector.broadcast %272 : vector<32x1xf32> to vector<32x128xf32>
      %274 = arith.mulf %269, %273 : vector<32x128xf32>
      %c0_131 = arith.constant 0 : index
      %c0_132 = arith.constant 0 : index
      %275 = vector.load %arg13[%c0_131, %c0_132] : memref<32x128xf32, #tpu.memory_space<vmem>>, vector<32x128xf32>
      tpu.vector_store %arg13[%c0_131, %c0_132], %274 {strides = array<i32>} : memref<32x128xf32, #tpu.memory_space<vmem>>, vector<32x128xf32>,
      %cst_133 = arith.constant 0.000000e+00 : f32
      %276 = vector.broadcast %cst_133 : f32 to vector<32x128xf32>
      %c0_134 = arith.constant 0 : index
      %c0_135 = arith.constant 0 : index
      %277 = vector.load %arg14[%c0_134, %c0_135] : memref<32x128xf32, #tpu.memory_space<vmem>>, vector<32x128xf32>
      tpu.vector_store %arg14[%c0_134, %c0_135], %276 {strides = array<i32>} : memref<32x128xf32, #tpu.memory_space<vmem>>, vector<32x128xf32>,
    } else {
    }
    %c0 = arith.constant 0 : index
    %c0_1 = arith.constant 0 : index
    %3 = vector.load %arg12[%c0, %c0_1] : memref<32x128xbf16, #tpu.memory_space<vmem>>, vector<32x128xbf16>
    %c0_2 = arith.constant 0 : index
    %c0_3 = arith.constant 0 : index
    %4 = vector.load %arg14[%c0_2, %c0_3] : memref<32x128xf32, #tpu.memory_space<vmem>>, vector<32x128xf32>
    %c0_i32_4 = arith.constant 0 : i32
    %5 = arith.index_cast %c0_i32_4 : i32 to index
    %c0_5 = arith.constant 0 : index
    %c0_6 = arith.constant 0 : index
    %6 = vector.load %arg7[%5, %c0_5, %c0_6] : memref<8x128x512xbf16, #tpu.memory_space<vmem>>, vector<1x128x512xbf16>
    %7 = vector.shape_cast %6 : vector<1x128x512xbf16> to vector<128x512xbf16>
    %cst = arith.constant dense<0.000000e+00> : vector<32x512xf32>
    %8 = tpu.matmul %3, %7, %cst {dimension_numbers = #tpu.dot_dimension_numbers<[1], [0], [0], [1], [0, 0, 1, 1], [], []>} : vector<32x128xbf16>, vector<128x512xbf16>, vector<32x512xf32> -> vector<32x512xf32>
    %9 = arith.index_cast %c0_i32_4 : i32 to index
    %c0_7 = arith.constant 0 : index
    %c0_8 = arith.constant 0 : index
    %10 = vector.load %arg8[%9, %c0_7, %c0_8] : memref<8x1x512xf32, #tpu.memory_space<vmem>>, vector<1x1x512xf32>
    %11 = vector.shape_cast %10 : vector<1x1x512xf32> to vector<1x512xf32>
    %12 = vector.broadcast %11 : vector<1x512xf32> to vector<32x512xf32>
    %13 = arith.addf %8, %12 : vector<32x512xf32>
    %cst_9 = arith.constant 5.000000e-01 : f32
    %14 = vector.broadcast %cst_9 : f32 to vector<32x512xf32>
    %15 = arith.mulf %14, %13 : vector<32x512xf32>
    %cst_10 = arith.constant 0.707106769 : f32
    %16 = vector.broadcast %cst_10 : f32 to vector<32x512xf32>
    %17 = arith.mulf %13, %16 : vector<32x512xf32>
    %18 = math.erf %17 : vector<32x512xf32>
    %cst_11 = arith.constant 1.000000e+00 : f32
    %19 = vector.broadcast %cst_11 : f32 to vector<32x512xf32>
    %20 = arith.addf %19, %18 : vector<32x512xf32>
    %21 = arith.mulf %15, %20 : vector<32x512xf32>
    %22 = arith.truncf %21 : vector<32x512xf32> to vector<32x512xbf16>
    %23 = arith.index_cast %c0_i32_4 : i32 to index
    %c0_12 = arith.constant 0 : index
    %c0_13 = arith.constant 0 : index
    %24 = vector.load %arg9[%23, %c0_12, %c0_13] : memref<8x512x128xbf16, #tpu.memory_space<vmem>>, vector<1x512x128xbf16>
    %25 = vector.shape_cast %24 : vector<1x512x128xbf16> to vector<512x128xbf16>
    %cst_14 = arith.constant dense<0.000000e+00> : vector<32x128xf32>
    %26 = tpu.matmul %22, %25, %cst_14 {dimension_numbers = #tpu.dot_dimension_numbers<[1], [0], [0], [1], [0, 0, 1, 1], [], []>} : vector<32x512xbf16>, vector<512x128xbf16>, vector<32x128xf32> -> vector<32x128xf32>
    %27 = arith.index_cast %c0_i32_4 : i32 to index
    %c0_15 = arith.constant 0 : index
    %c0_16 = arith.constant 0 : index
    %28 = vector.load %arg10[%27, %c0_15, %c0_16] : memref<8x1x128xf32, #tpu.memory_space<vmem>>, vector<1x1x128xf32>
    %29 = vector.shape_cast %28 : vector<1x1x128xf32> to vector<1x128xf32>
    %30 = vector.broadcast %29 : vector<1x128xf32> to vector<32x128xf32>
    %31 = arith.addf %26, %30 : vector<32x128xf32>
    %32 = arith.addf %4, %31 : vector<32x128xf32>
    %c1_i32 = arith.constant 1 : i32
    %33 = arith.index_cast %c1_i32 : i32 to index
    %c0_17 = arith.constant 0 : index
    %c0_18 = arith.constant 0 : index
    %34 = vector.load %arg7[%33, %c0_17, %c0_18] : memref<8x128x512xbf16, #tpu.memory_space<vmem>>, vector<1x128x512xbf16>
    %35 = vector.shape_cast %34 : vector<1x128x512xbf16> to vector<128x512xbf16>
    %cst_19 = arith.constant dense<0.000000e+00> : vector<32x512xf32>
    %36 = tpu.matmul %3, %35, %cst_19 {dimension_numbers = #tpu.dot_dimension_numbers<[1], [0], [0], [1], [0, 0, 1, 1], [], []>} : vector<32x128xbf16>, vector<128x512xbf16>, vector<32x512xf32> -> vector<32x512xf32>
    %37 = arith.index_cast %c1_i32 : i32 to index
    %c0_20 = arith.constant 0 : index
    %c0_21 = arith.constant 0 : index
    %38 = vector.load %arg8[%37, %c0_20, %c0_21] : memref<8x1x512xf32, #tpu.memory_space<vmem>>, vector<1x1x512xf32>
    %39 = vector.shape_cast %38 : vector<1x1x512xf32> to vector<1x512xf32>
    %40 = vector.broadcast %39 : vector<1x512xf32> to vector<32x512xf32>
    %41 = arith.addf %36, %40 : vector<32x512xf32>
    %cst_22 = arith.constant 5.000000e-01 : f32
    %42 = vector.broadcast %cst_22 : f32 to vector<32x512xf32>
    %43 = arith.mulf %42, %41 : vector<32x512xf32>
    %cst_23 = arith.constant 0.707106769 : f32
    %44 = vector.broadcast %cst_23 : f32 to vector<32x512xf32>
    %45 = arith.mulf %41, %44 : vector<32x512xf32>
    %46 = math.erf %45 : vector<32x512xf32>
    %cst_24 = arith.constant 1.000000e+00 : f32
    %47 = vector.broadcast %cst_24 : f32 to vector<32x512xf32>
    %48 = arith.addf %47, %46 : vector<32x512xf32>
    %49 = arith.mulf %43, %48 : vector<32x512xf32>
    %50 = arith.truncf %49 : vector<32x512xf32> to vector<32x512xbf16>
    %51 = arith.index_cast %c1_i32 : i32 to index
    %c0_25 = arith.constant 0 : index
    %c0_26 = arith.constant 0 : index
    %52 = vector.load %arg9[%51, %c0_25, %c0_26] : memref<8x512x128xbf16, #tpu.memory_space<vmem>>, vector<1x512x128xbf16>
    %53 = vector.shape_cast %52 : vector<1x512x128xbf16> to vector<512x128xbf16>
    %cst_27 = arith.constant dense<0.000000e+00> : vector<32x128xf32>
    %54 = tpu.matmul %50, %53, %cst_27 {dimension_numbers = #tpu.dot_dimension_numbers<[1], [0], [0], [1], [0, 0, 1, 1], [], []>} : vector<32x512xbf16>, vector<512x128xbf16>, vector<32x128xf32> -> vector<32x128xf32>
    %55 = arith.index_cast %c1_i32 : i32 to index
    %c0_28 = arith.constant 0 : index
    %c0_29 = arith.constant 0 : index
    %56 = vector.load %arg10[%55, %c0_28, %c0_29] : memref<8x1x128xf32, #tpu.memory_space<vmem>>, vector<1x1x128xf32>
    %57 = vector.shape_cast %56 : vector<1x1x128xf32> to vector<1x128xf32>
    %58 = vector.broadcast %57 : vector<1x128xf32> to vector<32x128xf32>
    %59 = arith.addf %54, %58 : vector<32x128xf32>
    %60 = arith.addf %32, %59 : vector<32x128xf32>
    %c2_i32 = arith.constant 2 : i32
    %61 = arith.index_cast %c2_i32 : i32 to index
    %c0_30 = arith.constant 0 : index
    %c0_31 = arith.constant 0 : index
    %62 = vector.load %arg7[%61, %c0_30, %c0_31] : memref<8x128x512xbf16, #tpu.memory_space<vmem>>, vector<1x128x512xbf16>
    %63 = vector.shape_cast %62 : vector<1x128x512xbf16> to vector<128x512xbf16>
    %cst_32 = arith.constant dense<0.000000e+00> : vector<32x512xf32>
    %64 = tpu.matmul %3, %63, %cst_32 {dimension_numbers = #tpu.dot_dimension_numbers<[1], [0], [0], [1], [0, 0, 1, 1], [], []>} : vector<32x128xbf16>, vector<128x512xbf16>, vector<32x512xf32> -> vector<32x512xf32>
    %65 = arith.index_cast %c2_i32 : i32 to index
    %c0_33 = arith.constant 0 : index
    %c0_34 = arith.constant 0 : index
    %66 = vector.load %arg8[%65, %c0_33, %c0_34] : memref<8x1x512xf32, #tpu.memory_space<vmem>>, vector<1x1x512xf32>
    %67 = vector.shape_cast %66 : vector<1x1x512xf32> to vector<1x512xf32>
    %68 = vector.broadcast %67 : vector<1x512xf32> to vector<32x512xf32>
    %69 = arith.addf %64, %68 : vector<32x512xf32>
    %cst_35 = arith.constant 5.000000e-01 : f32
    %70 = vector.broadcast %cst_35 : f32 to vector<32x512xf32>
    %71 = arith.mulf %70, %69 : vector<32x512xf32>
    %cst_36 = arith.constant 0.707106769 : f32
    %72 = vector.broadcast %cst_36 : f32 to vector<32x512xf32>
    %73 = arith.mulf %69, %72 : vector<32x512xf32>
    %74 = math.erf %73 : vector<32x512xf32>
    %cst_37 = arith.constant 1.000000e+00 : f32
    %75 = vector.broadcast %cst_37 : f32 to vector<32x512xf32>
    %76 = arith.addf %75, %74 : vector<32x512xf32>
    %77 = arith.mulf %71, %76 : vector<32x512xf32>
    %78 = arith.truncf %77 : vector<32x512xf32> to vector<32x512xbf16>
    %79 = arith.index_cast %c2_i32 : i32 to index
    %c0_38 = arith.constant 0 : index
    %c0_39 = arith.constant 0 : index
    %80 = vector.load %arg9[%79, %c0_38, %c0_39] : memref<8x512x128xbf16, #tpu.memory_space<vmem>>, vector<1x512x128xbf16>
    %81 = vector.shape_cast %80 : vector<1x512x128xbf16> to vector<512x128xbf16>
    %cst_40 = arith.constant dense<0.000000e+00> : vector<32x128xf32>
    %82 = tpu.matmul %78, %81, %cst_40 {dimension_numbers = #tpu.dot_dimension_numbers<[1], [0], [0], [1], [0, 0, 1, 1], [], []>} : vector<32x512xbf16>, vector<512x128xbf16>, vector<32x128xf32> -> vector<32x128xf32>
    %83 = arith.index_cast %c2_i32 : i32 to index
    %c0_41 = arith.constant 0 : index
    %c0_42 = arith.constant 0 : index
    %84 = vector.load %arg10[%83, %c0_41, %c0_42] : memref<8x1x128xf32, #tpu.memory_space<vmem>>, vector<1x1x128xf32>
    %85 = vector.shape_cast %84 : vector<1x1x128xf32> to vector<1x128xf32>
    %86 = vector.broadcast %85 : vector<1x128xf32> to vector<32x128xf32>
    %87 = arith.addf %82, %86 : vector<32x128xf32>
    %88 = arith.addf %60, %87 : vector<32x128xf32>
    %c3_i32 = arith.constant 3 : i32
    %89 = arith.index_cast %c3_i32 : i32 to index
    %c0_43 = arith.constant 0 : index
    %c0_44 = arith.constant 0 : index
    %90 = vector.load %arg7[%89, %c0_43, %c0_44] : memref<8x128x512xbf16, #tpu.memory_space<vmem>>, vector<1x128x512xbf16>
    %91 = vector.shape_cast %90 : vector<1x128x512xbf16> to vector<128x512xbf16>
    %cst_45 = arith.constant dense<0.000000e+00> : vector<32x512xf32>
    %92 = tpu.matmul %3, %91, %cst_45 {dimension_numbers = #tpu.dot_dimension_numbers<[1], [0], [0], [1], [0, 0, 1, 1], [], []>} : vector<32x128xbf16>, vector<128x512xbf16>, vector<32x512xf32> -> vector<32x512xf32>
    %93 = arith.index_cast %c3_i32 : i32 to index
    %c0_46 = arith.constant 0 : index
    %c0_47 = arith.constant 0 : index
    %94 = vector.load %arg8[%93, %c0_46, %c0_47] : memref<8x1x512xf32, #tpu.memory_space<vmem>>, vector<1x1x512xf32>
    %95 = vector.shape_cast %94 : vector<1x1x512xf32> to vector<1x512xf32>
    %96 = vector.broadcast %95 : vector<1x512xf32> to vector<32x512xf32>
    %97 = arith.addf %92, %96 : vector<32x512xf32>
    %cst_48 = arith.constant 5.000000e-01 : f32
    %98 = vector.broadcast %cst_48 : f32 to vector<32x512xf32>
    %99 = arith.mulf %98, %97 : vector<32x512xf32>
    %cst_49 = arith.constant 0.707106769 : f32
    %100 = vector.broadcast %cst_49 : f32 to vector<32x512xf32>
    %101 = arith.mulf %97, %100 : vector<32x512xf32>
    %102 = math.erf %101 : vector<32x512xf32>
    %cst_50 = arith.constant 1.000000e+00 : f32
    %103 = vector.broadcast %cst_50 : f32 to vector<32x512xf32>
    %104 = arith.addf %103, %102 : vector<32x512xf32>
    %105 = arith.mulf %99, %104 : vector<32x512xf32>
    %106 = arith.truncf %105 : vector<32x512xf32> to vector<32x512xbf16>
    %107 = arith.index_cast %c3_i32 : i32 to index
    %c0_51 = arith.constant 0 : index
    %c0_52 = arith.constant 0 : index
    %108 = vector.load %arg9[%107, %c0_51, %c0_52] : memref<8x512x128xbf16, #tpu.memory_space<vmem>>, vector<1x512x128xbf16>
    %109 = vector.shape_cast %108 : vector<1x512x128xbf16> to vector<512x128xbf16>
    %cst_53 = arith.constant dense<0.000000e+00> : vector<32x128xf32>
    %110 = tpu.matmul %106, %109, %cst_53 {dimension_numbers = #tpu.dot_dimension_numbers<[1], [0], [0], [1], [0, 0, 1, 1], [], []>} : vector<32x512xbf16>, vector<512x128xbf16>, vector<32x128xf32> -> vector<32x128xf32>
    %111 = arith.index_cast %c3_i32 : i32 to index
    %c0_54 = arith.constant 0 : index
    %c0_55 = arith.constant 0 : index
    %112 = vector.load %arg10[%111, %c0_54, %c0_55] : memref<8x1x128xf32, #tpu.memory_space<vmem>>, vector<1x1x128xf32>
    %113 = vector.shape_cast %112 : vector<1x1x128xf32> to vector<1x128xf32>
    %114 = vector.broadcast %113 : vector<1x128xf32> to vector<32x128xf32>
    %115 = arith.addf %110, %114 : vector<32x128xf32>
    %116 = arith.addf %88, %115 : vector<32x128xf32>
    %c4_i32 = arith.constant 4 : i32
    %117 = arith.index_cast %c4_i32 : i32 to index
    %c0_56 = arith.constant 0 : index
    %c0_57 = arith.constant 0 : index
    %118 = vector.load %arg7[%117, %c0_56, %c0_57] : memref<8x128x512xbf16, #tpu.memory_space<vmem>>, vector<1x128x512xbf16>
    %119 = vector.shape_cast %118 : vector<1x128x512xbf16> to vector<128x512xbf16>
    %cst_58 = arith.constant dense<0.000000e+00> : vector<32x512xf32>
    %120 = tpu.matmul %3, %119, %cst_58 {dimension_numbers = #tpu.dot_dimension_numbers<[1], [0], [0], [1], [0, 0, 1, 1], [], []>} : vector<32x128xbf16>, vector<128x512xbf16>, vector<32x512xf32> -> vector<32x512xf32>
    %121 = arith.index_cast %c4_i32 : i32 to index
    %c0_59 = arith.constant 0 : index
    %c0_60 = arith.constant 0 : index
    %122 = vector.load %arg8[%121, %c0_59, %c0_60] : memref<8x1x512xf32, #tpu.memory_space<vmem>>, vector<1x1x512xf32>
    %123 = vector.shape_cast %122 : vector<1x1x512xf32> to vector<1x512xf32>
    %124 = vector.broadcast %123 : vector<1x512xf32> to vector<32x512xf32>
    %125 = arith.addf %120, %124 : vector<32x512xf32>
    %cst_61 = arith.constant 5.000000e-01 : f32
    %126 = vector.broadcast %cst_61 : f32 to vector<32x512xf32>
    %127 = arith.mulf %126, %125 : vector<32x512xf32>
    %cst_62 = arith.constant 0.707106769 : f32
    %128 = vector.broadcast %cst_62 : f32 to vector<32x512xf32>
    %129 = arith.mulf %125, %128 : vector<32x512xf32>
    %130 = math.erf %129 : vector<32x512xf32>
    %cst_63 = arith.constant 1.000000e+00 : f32
    %131 = vector.broadcast %cst_63 : f32 to vector<32x512xf32>
    %132 = arith.addf %131, %130 : vector<32x512xf32>
    %133 = arith.mulf %127, %132 : vector<32x512xf32>
    %134 = arith.truncf %133 : vector<32x512xf32> to vector<32x512xbf16>
    %135 = arith.index_cast %c4_i32 : i32 to index
    %c0_64 = arith.constant 0 : index
    %c0_65 = arith.constant 0 : index
    %136 = vector.load %arg9[%135, %c0_64, %c0_65] : memref<8x512x128xbf16, #tpu.memory_space<vmem>>, vector<1x512x128xbf16>
    %137 = vector.shape_cast %136 : vector<1x512x128xbf16> to vector<512x128xbf16>
    %cst_66 = arith.constant dense<0.000000e+00> : vector<32x128xf32>
    %138 = tpu.matmul %134, %137, %cst_66 {dimension_numbers = #tpu.dot_dimension_numbers<[1], [0], [0], [1], [0, 0, 1, 1], [], []>} : vector<32x512xbf16>, vector<512x128xbf16>, vector<32x128xf32> -> vector<32x128xf32>
    %139 = arith.index_cast %c4_i32 : i32 to index
    %c0_67 = arith.constant 0 : index
    %c0_68 = arith.constant 0 : index
    %140 = vector.load %arg10[%139, %c0_67, %c0_68] : memref<8x1x128xf32, #tpu.memory_space<vmem>>, vector<1x1x128xf32>
    %141 = vector.shape_cast %140 : vector<1x1x128xf32> to vector<1x128xf32>
    %142 = vector.broadcast %141 : vector<1x128xf32> to vector<32x128xf32>
    %143 = arith.addf %138, %142 : vector<32x128xf32>
    %144 = arith.addf %116, %143 : vector<32x128xf32>
    %c5_i32 = arith.constant 5 : i32
    %145 = arith.index_cast %c5_i32 : i32 to index
    %c0_69 = arith.constant 0 : index
    %c0_70 = arith.constant 0 : index
    %146 = vector.load %arg7[%145, %c0_69, %c0_70] : memref<8x128x512xbf16, #tpu.memory_space<vmem>>, vector<1x128x512xbf16>
    %147 = vector.shape_cast %146 : vector<1x128x512xbf16> to vector<128x512xbf16>
    %cst_71 = arith.constant dense<0.000000e+00> : vector<32x512xf32>
    %148 = tpu.matmul %3, %147, %cst_71 {dimension_numbers = #tpu.dot_dimension_numbers<[1], [0], [0], [1], [0, 0, 1, 1], [], []>} : vector<32x128xbf16>, vector<128x512xbf16>, vector<32x512xf32> -> vector<32x512xf32>
    %149 = arith.index_cast %c5_i32 : i32 to index
    %c0_72 = arith.constant 0 : index
    %c0_73 = arith.constant 0 : index
    %150 = vector.load %arg8[%149, %c0_72, %c0_73] : memref<8x1x512xf32, #tpu.memory_space<vmem>>, vector<1x1x512xf32>
    %151 = vector.shape_cast %150 : vector<1x1x512xf32> to vector<1x512xf32>
    %152 = vector.broadcast %151 : vector<1x512xf32> to vector<32x512xf32>
    %153 = arith.addf %148, %152 : vector<32x512xf32>
    %cst_74 = arith.constant 5.000000e-01 : f32
    %154 = vector.broadcast %cst_74 : f32 to vector<32x512xf32>
    %155 = arith.mulf %154, %153 : vector<32x512xf32>
    %cst_75 = arith.constant 0.707106769 : f32
    %156 = vector.broadcast %cst_75 : f32 to vector<32x512xf32>
    %157 = arith.mulf %153, %156 : vector<32x512xf32>
    %158 = math.erf %157 : vector<32x512xf32>
    %cst_76 = arith.constant 1.000000e+00 : f32
    %159 = vector.broadcast %cst_76 : f32 to vector<32x512xf32>
    %160 = arith.addf %159, %158 : vector<32x512xf32>
    %161 = arith.mulf %155, %160 : vector<32x512xf32>
    %162 = arith.truncf %161 : vector<32x512xf32> to vector<32x512xbf16>
    %163 = arith.index_cast %c5_i32 : i32 to index
    %c0_77 = arith.constant 0 : index
    %c0_78 = arith.constant 0 : index
    %164 = vector.load %arg9[%163, %c0_77, %c0_78] : memref<8x512x128xbf16, #tpu.memory_space<vmem>>, vector<1x512x128xbf16>
    %165 = vector.shape_cast %164 : vector<1x512x128xbf16> to vector<512x128xbf16>
    %cst_79 = arith.constant dense<0.000000e+00> : vector<32x128xf32>
    %166 = tpu.matmul %162, %165, %cst_79 {dimension_numbers = #tpu.dot_dimension_numbers<[1], [0], [0], [1], [0, 0, 1, 1], [], []>} : vector<32x512xbf16>, vector<512x128xbf16>, vector<32x128xf32> -> vector<32x128xf32>
    %167 = arith.index_cast %c5_i32 : i32 to index
    %c0_80 = arith.constant 0 : index
    %c0_81 = arith.constant 0 : index
    %168 = vector.load %arg10[%167, %c0_80, %c0_81] : memref<8x1x128xf32, #tpu.memory_space<vmem>>, vector<1x1x128xf32>
    %169 = vector.shape_cast %168 : vector<1x1x128xf32> to vector<1x128xf32>
    %170 = vector.broadcast %169 : vector<1x128xf32> to vector<32x128xf32>
    %171 = arith.addf %166, %170 : vector<32x128xf32>
    %172 = arith.addf %144, %171 : vector<32x128xf32>
    %c6_i32 = arith.constant 6 : i32
    %173 = arith.index_cast %c6_i32 : i32 to index
    %c0_82 = arith.constant 0 : index
    %c0_83 = arith.constant 0 : index
    %174 = vector.load %arg7[%173, %c0_82, %c0_83] : memref<8x128x512xbf16, #tpu.memory_space<vmem>>, vector<1x128x512xbf16>
    %175 = vector.shape_cast %174 : vector<1x128x512xbf16> to vector<128x512xbf16>
    %cst_84 = arith.constant dense<0.000000e+00> : vector<32x512xf32>
    %176 = tpu.matmul %3, %175, %cst_84 {dimension_numbers = #tpu.dot_dimension_numbers<[1], [0], [0], [1], [0, 0, 1, 1], [], []>} : vector<32x128xbf16>, vector<128x512xbf16>, vector<32x512xf32> -> vector<32x512xf32>
    %177 = arith.index_cast %c6_i32 : i32 to index
    %c0_85 = arith.constant 0 : index
    %c0_86 = arith.constant 0 : index
    %178 = vector.load %arg8[%177, %c0_85, %c0_86] : memref<8x1x512xf32, #tpu.memory_space<vmem>>, vector<1x1x512xf32>
    %179 = vector.shape_cast %178 : vector<1x1x512xf32> to vector<1x512xf32>
    %180 = vector.broadcast %179 : vector<1x512xf32> to vector<32x512xf32>
    %181 = arith.addf %176, %180 : vector<32x512xf32>
    %cst_87 = arith.constant 5.000000e-01 : f32
    %182 = vector.broadcast %cst_87 : f32 to vector<32x512xf32>
    %183 = arith.mulf %182, %181 : vector<32x512xf32>
    %cst_88 = arith.constant 0.707106769 : f32
    %184 = vector.broadcast %cst_88 : f32 to vector<32x512xf32>
    %185 = arith.mulf %181, %184 : vector<32x512xf32>
    %186 = math.erf %185 : vector<32x512xf32>
    %cst_89 = arith.constant 1.000000e+00 : f32
    %187 = vector.broadcast %cst_89 : f32 to vector<32x512xf32>
    %188 = arith.addf %187, %186 : vector<32x512xf32>
    %189 = arith.mulf %183, %188 : vector<32x512xf32>
    %190 = arith.truncf %189 : vector<32x512xf32> to vector<32x512xbf16>
    %191 = arith.index_cast %c6_i32 : i32 to index
    %c0_90 = arith.constant 0 : index
    %c0_91 = arith.constant 0 : index
    %192 = vector.load %arg9[%191, %c0_90, %c0_91] : memref<8x512x128xbf16, #tpu.memory_space<vmem>>, vector<1x512x128xbf16>
    %193 = vector.shape_cast %192 : vector<1x512x128xbf16> to vector<512x128xbf16>
    %cst_92 = arith.constant dense<0.000000e+00> : vector<32x128xf32>
    %194 = tpu.matmul %190, %193, %cst_92 {dimension_numbers = #tpu.dot_dimension_numbers<[1], [0], [0], [1], [0, 0, 1, 1], [], []>} : vector<32x512xbf16>, vector<512x128xbf16>, vector<32x128xf32> -> vector<32x128xf32>
    %195 = arith.index_cast %c6_i32 : i32 to index
    %c0_93 = arith.constant 0 : index
    %c0_94 = arith.constant 0 : index
    %196 = vector.load %arg10[%195, %c0_93, %c0_94] : memref<8x1x128xf32, #tpu.memory_space<vmem>>, vector<1x1x128xf32>
    %197 = vector.shape_cast %196 : vector<1x1x128xf32> to vector<1x128xf32>
    %198 = vector.broadcast %197 : vector<1x128xf32> to vector<32x128xf32>
    %199 = arith.addf %194, %198 : vector<32x128xf32>
    %200 = arith.addf %172, %199 : vector<32x128xf32>
    %c7_i32 = arith.constant 7 : i32
    %201 = arith.index_cast %c7_i32 : i32 to index
    %c0_95 = arith.constant 0 : index
    %c0_96 = arith.constant 0 : index
    %202 = vector.load %arg7[%201, %c0_95, %c0_96] : memref<8x128x512xbf16, #tpu.memory_space<vmem>>, vector<1x128x512xbf16>
    %203 = vector.shape_cast %202 : vector<1x128x512xbf16> to vector<128x512xbf16>
    %cst_97 = arith.constant dense<0.000000e+00> : vector<32x512xf32>
    %204 = tpu.matmul %3, %203, %cst_97 {dimension_numbers = #tpu.dot_dimension_numbers<[1], [0], [0], [1], [0, 0, 1, 1], [], []>} : vector<32x128xbf16>, vector<128x512xbf16>, vector<32x512xf32> -> vector<32x512xf32>
    %205 = arith.index_cast %c7_i32 : i32 to index
    %c0_98 = arith.constant 0 : index
    %c0_99 = arith.constant 0 : index
    %206 = vector.load %arg8[%205, %c0_98, %c0_99] : memref<8x1x512xf32, #tpu.memory_space<vmem>>, vector<1x1x512xf32>
    %207 = vector.shape_cast %206 : vector<1x1x512xf32> to vector<1x512xf32>
    %208 = vector.broadcast %207 : vector<1x512xf32> to vector<32x512xf32>
    %209 = arith.addf %204, %208 : vector<32x512xf32>
    %cst_100 = arith.constant 5.000000e-01 : f32
    %210 = vector.broadcast %cst_100 : f32 to vector<32x512xf32>
    %211 = arith.mulf %210, %209 : vector<32x512xf32>
    %cst_101 = arith.constant 0.707106769 : f32
    %212 = vector.broadcast %cst_101 : f32 to vector<32x512xf32>
    %213 = arith.mulf %209, %212 : vector<32x512xf32>
    %214 = math.erf %213 : vector<32x512xf32>
    %cst_102 = arith.constant 1.000000e+00 : f32
    %215 = vector.broadcast %cst_102 : f32 to vector<32x512xf32>
    %216 = arith.addf %215, %214 : vector<32x512xf32>
    %217 = arith.mulf %211, %216 : vector<32x512xf32>
    %218 = arith.truncf %217 : vector<32x512xf32> to vector<32x512xbf16>
    %219 = arith.index_cast %c7_i32 : i32 to index
    %c0_103 = arith.constant 0 : index
    %c0_104 = arith.constant 0 : index
    %220 = vector.load %arg9[%219, %c0_103, %c0_104] : memref<8x512x128xbf16, #tpu.memory_space<vmem>>, vector<1x512x128xbf16>
    %221 = vector.shape_cast %220 : vector<1x512x128xbf16> to vector<512x128xbf16>
    %cst_105 = arith.constant dense<0.000000e+00> : vector<32x128xf32>
    %222 = tpu.matmul %218, %221, %cst_105 {dimension_numbers = #tpu.dot_dimension_numbers<[1], [0], [0], [1], [0, 0, 1, 1], [], []>} : vector<32x512xbf16>, vector<512x128xbf16>, vector<32x128xf32> -> vector<32x128xf32>
    %223 = arith.index_cast %c7_i32 : i32 to index
    %c0_106 = arith.constant 0 : index
    %c0_107 = arith.constant 0 : index
    %224 = vector.load %arg10[%223, %c0_106, %c0_107] : memref<8x1x128xf32, #tpu.memory_space<vmem>>, vector<1x1x128xf32>
    %225 = vector.shape_cast %224 : vector<1x1x128xf32> to vector<1x128xf32>
    %226 = vector.broadcast %225 : vector<1x128xf32> to vector<32x128xf32>
    %227 = arith.addf %222, %226 : vector<32x128xf32>
    %228 = arith.addf %200, %227 : vector<32x128xf32>
    %c8_i32 = arith.constant 8 : i32
    %c0_108 = arith.constant 0 : index
    %c0_109 = arith.constant 0 : index
    %229 = vector.load %arg14[%c0_108, %c0_109] : memref<32x128xf32, #tpu.memory_space<vmem>>, vector<32x128xf32>
    tpu.vector_store %arg14[%c0_108, %c0_109], %228 {strides = array<i32>} : memref<32x128xf32, #tpu.memory_space<vmem>>, vector<32x128xf32>,
    %c15_i32 = arith.constant 15 : i32
    %230 = arith.cmpi eq, %arg1, %c15_i32 : i32
    %231 = arith.extui %230 : i1 to i32
    %c0_i32_110 = arith.constant 0 : i32
    %232 = arith.cmpi ne, %231, %c0_i32_110 : i32
    scf.if %232 {
      %c0_111 = arith.constant 0 : index
      %c0_112 = arith.constant 0 : index
      %233 = vector.load %arg2[%c0_111, %c0_112] : memref<32x128xf32, #tpu.memory_space<vmem>>, vector<32x128xf32>
      %c0_113 = arith.constant 0 : index
      %c0_114 = arith.constant 0 : index
      %234 = vector.load %arg13[%c0_113, %c0_114] : memref<32x128xf32, #tpu.memory_space<vmem>>, vector<32x128xf32>
      %c0_115 = arith.constant 0 : index
      %c0_116 = arith.constant 0 : index
      %235 = vector.load %arg14[%c0_115, %c0_116] : memref<32x128xf32, #tpu.memory_space<vmem>>, vector<32x128xf32>
      %236 = arith.mulf %234, %235 : vector<32x128xf32>
      %237 = arith.addf %233, %236 : vector<32x128xf32>
      %c0_117 = arith.constant 0 : index
      %c0_118 = arith.constant 0 : index
      %238 = vector.load %arg11[%c0_117, %c0_118] : memref<32x128xf32, #tpu.memory_space<vmem>>, vector<32x128xf32>
      tpu.vector_store %arg11[%c0_117, %c0_118], %237 {strides = array<i32>} : memref<32x128xf32, #tpu.memory_space<vmem>>, vector<32x128xf32>,
    } else {
    }
    return
  }
  func.func @transform_0(%arg0: i32, %arg1: i32) -> (i32, i32) {
    %c0_i32 = arith.constant 0 : i32
    %c0_i32_0 = arith.constant 0 : i32
    return %arg0, %c0_i32 : i32, i32
  }
  func.func @transform_1(%arg0: i32, %arg1: i32) -> (i32, i32) {
    %c0_i32 = arith.constant 0 : i32
    %c0_i32_0 = arith.constant 0 : i32
    %c0_i32_1 = arith.constant 0 : i32
    return %c0_i32, %c0_i32_0 : i32, i32
  }
  func.func @transform_2(%arg0: i32, %arg1: i32) -> (i32, i32) {
    %c0_i32 = arith.constant 0 : i32
    %c0_i32_0 = arith.constant 0 : i32
    %c0_i32_1 = arith.constant 0 : i32
    return %c0_i32, %c0_i32_0 : i32, i32
  }
  func.func @transform_3(%arg0: i32, %arg1: i32) -> (i32, i32) {
    %c0_i32 = arith.constant 0 : i32
    %c0_i32_0 = arith.constant 0 : i32
    %c0_i32_1 = arith.constant 0 : i32
    return %c0_i32, %c0_i32_0 : i32, i32
  }
  func.func @transform_4(%arg0: i32, %arg1: i32) -> (i32, i32) {
    %c0_i32 = arith.constant 0 : i32
    %c0_i32_0 = arith.constant 0 : i32
    %c0_i32_1 = arith.constant 0 : i32
    return %c0_i32, %c0_i32_0 : i32, i32
  }
  func.func @transform_5(%arg0: i32, %arg1: i32) -> (i32, i32, i32) {
    %c0_i32 = arith.constant 0 : i32
    %c0_i32_0 = arith.constant 0 : i32
    %c0_i32_1 = arith.constant 0 : i32
    return %arg1, %c0_i32, %c0_i32_0 : i32, i32, i32
  }
  func.func @transform_6(%arg0: i32, %arg1: i32) -> (i32, i32, i32) {
    %c0_i32 = arith.constant 0 : i32
    %c0_i32_0 = arith.constant 0 : i32
    %c0_i32_1 = arith.constant 0 : i32
    return %arg1, %c0_i32, %c0_i32_0 : i32, i32, i32
  }
  func.func @transform_7(%arg0: i32, %arg1: i32) -> (i32, i32, i32) {
    %c0_i32 = arith.constant 0 : i32
    %c0_i32_0 = arith.constant 0 : i32
    %c0_i32_1 = arith.constant 0 : i32
    return %arg1, %c0_i32, %c0_i32_0 : i32, i32, i32
  }
  func.func @transform_8(%arg0: i32, %arg1: i32) -> (i32, i32, i32) {
    %c0_i32 = arith.constant 0 : i32
    %c0_i32_0 = arith.constant 0 : i32
    %c0_i32_1 = arith.constant 0 : i32
    return %arg1, %c0_i32, %c0_i32_0 : i32, i32, i32
  }
  func.func @transform_9(%arg0: i32, %arg1: i32) -> (i32, i32) {
    %c0_i32 = arith.constant 0 : i32
    %c0_i32_0 = arith.constant 0 : i32
    return %arg0, %c0_i32 : i32, i32
  }
}

module attributes {stable_mosaic.version = 11 : i64} {
  func.func @_self_attn_block_kernel(%arg0: i32, %arg1: i32, %arg2: memref<1x16x128xf32, #tpu.memory_space<vmem>>, %arg3: memref<1x16x128xf32, #tpu.memory_space<vmem>>, %arg4: memref<1x128xf32, #tpu.memory_space<vmem>>, %arg5: memref<1x128xf32, #tpu.memory_space<vmem>>, %arg6: memref<128x384xbf16, #tpu.memory_space<vmem>>, %arg7: memref<1x384xf32, #tpu.memory_space<vmem>>, %arg8: memref<128x128xbf16, #tpu.memory_space<vmem>>, %arg9: memref<1x128xf32, #tpu.memory_space<vmem>>, %arg10: memref<1x16x128xf32, #tpu.memory_space<vmem>>, %arg11: memref<16x128xbf16, #tpu.memory_space<vmem>>, %arg12: memref<16x128xbf16, #tpu.memory_space<vmem>>) attributes {dimension_semantics = [#tpu.dimension_semantics<parallel>, #tpu.dimension_semantics<arbitrary>], iteration_bounds = array<i64: 2, 1>, scalar_prefetch = 0 : i64, scratch_operands = 2 : i64, tpu.core_type = #tpu.core_type<tc>, window_params = [{transform_indices = @transform_0, window_bounds = array<i64: 1, 16, 128>}, {transform_indices = @transform_1, window_bounds = array<i64: 1, 16, 128>}, {pipeline_mode = #tpu.pipeline_mode<synchronous>, transform_indices = @transform_2, window_bounds = array<i64: 1, 128>}, {pipeline_mode = #tpu.pipeline_mode<synchronous>, transform_indices = @transform_3, window_bounds = array<i64: 1, 128>}, {pipeline_mode = #tpu.pipeline_mode<synchronous>, transform_indices = @transform_4, window_bounds = array<i64: 128, 384>}, {pipeline_mode = #tpu.pipeline_mode<synchronous>, transform_indices = @transform_5, window_bounds = array<i64: 1, 384>}, {pipeline_mode = #tpu.pipeline_mode<synchronous>, transform_indices = @transform_6, window_bounds = array<i64: 128, 128>}, {pipeline_mode = #tpu.pipeline_mode<synchronous>, transform_indices = @transform_7, window_bounds = array<i64: 1, 128>}, {transform_indices = @transform_8, window_bounds = array<i64: 1, 16, 128>}]} {
    %c0_i32 = arith.constant 0 : i32
    %0 = arith.cmpi eq, %arg1, %c0_i32 : i32
    %1 = arith.extui %0 : i1 to i32
    %c0_i32_0 = arith.constant 0 : i32
    %2 = arith.cmpi ne, %1, %c0_i32_0 : i32
    scf.if %2 {
      %c0_54 = arith.constant 0 : index
      %c0_55 = arith.constant 0 : index
      %c0_56 = arith.constant 0 : index
      %135 = vector.load %arg3[%c0_54, %c0_55, %c0_56] : memref<1x16x128xf32, #tpu.memory_space<vmem>>, vector<1x16x128xf32>
      %136 = vector.shape_cast %135 : vector<1x16x128xf32> to vector<16x128xf32>
      %c0_57 = arith.constant 0 : index
      %c0_58 = arith.constant 0 : index
      %137 = vector.load %arg4[%c0_57, %c0_58] : memref<1x128xf32, #tpu.memory_space<vmem>>, vector<1x128xf32>
      %c0_59 = arith.constant 0 : index
      %c0_60 = arith.constant 0 : index
      %138 = vector.load %arg5[%c0_59, %c0_60] : memref<1x128xf32, #tpu.memory_space<vmem>>, vector<1x128xf32>
      %cst_61 = arith.constant dense<0.000000e+00> : vector<16xf32>
      %139 = vector.multi_reduction <add>, %136, %cst_61 [1] : vector<16x128xf32> to vector<16xf32>
      %140 = vector.shape_cast %139 : vector<16xf32> to vector<16x1xf32>
      %cst_62 = arith.constant 1.280000e+02 : f32
      %141 = vector.broadcast %cst_62 : f32 to vector<16x1xf32>
      %142 = arith.divf %140, %141 : vector<16x1xf32>
      %143 = vector.broadcast %142 : vector<16x1xf32> to vector<16x128xf32>
      %144 = arith.subf %136, %143 : vector<16x128xf32>
      %145 = arith.mulf %144, %144 : vector<16x128xf32>
      %cst_63 = arith.constant dense<0.000000e+00> : vector<16xf32>
      %146 = vector.multi_reduction <add>, %145, %cst_63 [1] : vector<16x128xf32> to vector<16xf32>
      %147 = vector.shape_cast %146 : vector<16xf32> to vector<16x1xf32>
      %cst_64 = arith.constant 1.280000e+02 : f32
      %148 = vector.broadcast %cst_64 : f32 to vector<16x1xf32>
      %149 = arith.divf %147, %148 : vector<16x1xf32>
      %150 = vector.broadcast %142 : vector<16x1xf32> to vector<16x128xf32>
      %151 = arith.subf %136, %150 : vector<16x128xf32>
      %cst_65 = arith.constant 9.99999974E-6 : f32
      %152 = vector.broadcast %cst_65 : f32 to vector<16x1xf32>
      %153 = arith.addf %149, %152 : vector<16x1xf32>
      %154 = math.rsqrt %153 : vector<16x1xf32>
      %155 = vector.broadcast %154 : vector<16x1xf32> to vector<16x128xf32>
      %156 = arith.mulf %151, %155 : vector<16x128xf32>
      %157 = vector.broadcast %137 : vector<1x128xf32> to vector<16x128xf32>
      %158 = arith.mulf %156, %157 : vector<16x128xf32>
      %159 = vector.broadcast %138 : vector<1x128xf32> to vector<16x128xf32>
      %160 = arith.addf %158, %159 : vector<16x128xf32>
      %161 = arith.truncf %160 : vector<16x128xf32> to vector<16x128xbf16>
      %c0_66 = arith.constant 0 : index
      %c128 = arith.constant 128 : index
      %162 = vector.load %arg6[%c0_66, %c128] : memref<128x384xbf16, #tpu.memory_space<vmem>>, vector<128x128xbf16>
      %cst_67 = arith.constant dense<0.000000e+00> : vector<16x128xf32>
      %163 = tpu.matmul %161, %162, %cst_67 {dimension_numbers = #tpu.dot_dimension_numbers<[1], [0], [0], [1], [0, 0, 1, 1], [], []>} : vector<16x128xbf16>, vector<128x128xbf16>, vector<16x128xf32> -> vector<16x128xf32>
      %c0_68 = arith.constant 0 : index
      %c128_69 = arith.constant 128 : index
      %164 = vector.load %arg7[%c0_68, %c128_69] : memref<1x384xf32, #tpu.memory_space<vmem>>, vector<1x128xf32>
      %165 = vector.broadcast %164 : vector<1x128xf32> to vector<16x128xf32>
      %166 = arith.addf %163, %165 : vector<16x128xf32>
      %167 = arith.truncf %166 : vector<16x128xf32> to vector<16x128xbf16>
      %c0_70 = arith.constant 0 : index
      %c0_71 = arith.constant 0 : index
      %168 = vector.load %arg11[%c0_70, %c0_71] : memref<16x128xbf16, #tpu.memory_space<vmem>>, vector<16x128xbf16>
      tpu.vector_store %arg11[%c0_70, %c0_71], %167 {strides = array<i32>} : memref<16x128xbf16, #tpu.memory_space<vmem>>, vector<16x128xbf16>,
      %c0_72 = arith.constant 0 : index
      %c256 = arith.constant 256 : index
      %169 = vector.load %arg6[%c0_72, %c256] : memref<128x384xbf16, #tpu.memory_space<vmem>>, vector<128x128xbf16>
      %cst_73 = arith.constant dense<0.000000e+00> : vector<16x128xf32>
      %170 = tpu.matmul %161, %169, %cst_73 {dimension_numbers = #tpu.dot_dimension_numbers<[1], [0], [0], [1], [0, 0, 1, 1], [], []>} : vector<16x128xbf16>, vector<128x128xbf16>, vector<16x128xf32> -> vector<16x128xf32>
      %c0_74 = arith.constant 0 : index
      %c256_75 = arith.constant 256 : index
      %171 = vector.load %arg7[%c0_74, %c256_75] : memref<1x384xf32, #tpu.memory_space<vmem>>, vector<1x128xf32>
      %172 = vector.broadcast %171 : vector<1x128xf32> to vector<16x128xf32>
      %173 = arith.addf %170, %172 : vector<16x128xf32>
      %174 = arith.truncf %173 : vector<16x128xf32> to vector<16x128xbf16>
      %c0_76 = arith.constant 0 : index
      %c0_77 = arith.constant 0 : index
      %175 = vector.load %arg12[%c0_76, %c0_77] : memref<16x128xbf16, #tpu.memory_space<vmem>>, vector<16x128xbf16>
      tpu.vector_store %arg12[%c0_76, %c0_77], %174 {strides = array<i32>} : memref<16x128xbf16, #tpu.memory_space<vmem>>, vector<16x128xbf16>,
    } else {
    }
    %c0 = arith.constant 0 : index
    %c0_1 = arith.constant 0 : index
    %c0_2 = arith.constant 0 : index
    %3 = vector.load %arg2[%c0, %c0_1, %c0_2] : memref<1x16x128xf32, #tpu.memory_space<vmem>>, vector<1x16x128xf32>
    %4 = vector.shape_cast %3 : vector<1x16x128xf32> to vector<16x128xf32>
    %c0_3 = arith.constant 0 : index
    %c0_4 = arith.constant 0 : index
    %5 = vector.load %arg4[%c0_3, %c0_4] : memref<1x128xf32, #tpu.memory_space<vmem>>, vector<1x128xf32>
    %c0_5 = arith.constant 0 : index
    %c0_6 = arith.constant 0 : index
    %6 = vector.load %arg5[%c0_5, %c0_6] : memref<1x128xf32, #tpu.memory_space<vmem>>, vector<1x128xf32>
    %cst = arith.constant dense<0.000000e+00> : vector<16xf32>
    %7 = vector.multi_reduction <add>, %4, %cst [1] : vector<16x128xf32> to vector<16xf32>
    %8 = vector.shape_cast %7 : vector<16xf32> to vector<16x1xf32>
    %cst_7 = arith.constant 1.280000e+02 : f32
    %9 = vector.broadcast %cst_7 : f32 to vector<16x1xf32>
    %10 = arith.divf %8, %9 : vector<16x1xf32>
    %11 = vector.broadcast %10 : vector<16x1xf32> to vector<16x128xf32>
    %12 = arith.subf %4, %11 : vector<16x128xf32>
    %13 = arith.mulf %12, %12 : vector<16x128xf32>
    %cst_8 = arith.constant dense<0.000000e+00> : vector<16xf32>
    %14 = vector.multi_reduction <add>, %13, %cst_8 [1] : vector<16x128xf32> to vector<16xf32>
    %15 = vector.shape_cast %14 : vector<16xf32> to vector<16x1xf32>
    %cst_9 = arith.constant 1.280000e+02 : f32
    %16 = vector.broadcast %cst_9 : f32 to vector<16x1xf32>
    %17 = arith.divf %15, %16 : vector<16x1xf32>
    %18 = vector.broadcast %10 : vector<16x1xf32> to vector<16x128xf32>
    %19 = arith.subf %4, %18 : vector<16x128xf32>
    %cst_10 = arith.constant 9.99999974E-6 : f32
    %20 = vector.broadcast %cst_10 : f32 to vector<16x1xf32>
    %21 = arith.addf %17, %20 : vector<16x1xf32>
    %22 = math.rsqrt %21 : vector<16x1xf32>
    %23 = vector.broadcast %22 : vector<16x1xf32> to vector<16x128xf32>
    %24 = arith.mulf %19, %23 : vector<16x128xf32>
    %25 = vector.broadcast %5 : vector<1x128xf32> to vector<16x128xf32>
    %26 = arith.mulf %24, %25 : vector<16x128xf32>
    %27 = vector.broadcast %6 : vector<1x128xf32> to vector<16x128xf32>
    %28 = arith.addf %26, %27 : vector<16x128xf32>
    %29 = arith.truncf %28 : vector<16x128xf32> to vector<16x128xbf16>
    %c0_11 = arith.constant 0 : index
    %c0_12 = arith.constant 0 : index
    %30 = vector.load %arg6[%c0_11, %c0_12] : memref<128x384xbf16, #tpu.memory_space<vmem>>, vector<128x128xbf16>
    %cst_13 = arith.constant dense<0.000000e+00> : vector<16x128xf32>
    %31 = tpu.matmul %29, %30, %cst_13 {dimension_numbers = #tpu.dot_dimension_numbers<[1], [0], [0], [1], [0, 0, 1, 1], [], []>} : vector<16x128xbf16>, vector<128x128xbf16>, vector<16x128xf32> -> vector<16x128xf32>
    %c0_14 = arith.constant 0 : index
    %c0_15 = arith.constant 0 : index
    %32 = vector.load %arg7[%c0_14, %c0_15] : memref<1x384xf32, #tpu.memory_space<vmem>>, vector<1x128xf32>
    %33 = vector.broadcast %32 : vector<1x128xf32> to vector<16x128xf32>
    %34 = arith.addf %31, %33 : vector<16x128xf32>
    %c0_16 = arith.constant 0 : index
    %c0_17 = arith.constant 0 : index
    %35 = vector.load %arg9[%c0_16, %c0_17] : memref<1x128xf32, #tpu.memory_space<vmem>>, vector<1x128xf32>
    %36 = vector.broadcast %35 : vector<1x128xf32> to vector<16x128xf32>
    %37 = arith.addf %4, %36 : vector<16x128xf32>
    %c0_18 = arith.constant 0 : index
    %c0_19 = arith.constant 0 : index
    %38 = vector.load %arg11[%c0_18, %c0_19] : memref<16x128xbf16, #tpu.memory_space<vmem>>, vector<16x128xbf16>
    %c0_20 = arith.constant 0 : index
    %c0_21 = arith.constant 0 : index
    %39 = vector.load %arg12[%c0_20, %c0_21] : memref<16x128xbf16, #tpu.memory_space<vmem>>, vector<16x128xbf16>
    %40 = vector.extract_strided_slice %34 {offsets = [0, 0], sizes = [16, 32], strides = [1, 1]} : vector<16x128xf32> to vector<16x32xf32>
    %41 = arith.truncf %40 : vector<16x32xf32> to vector<16x32xbf16>
    %42 = vector.extract_strided_slice %38 {offsets = [0, 0], sizes = [16, 32], strides = [1, 1]} : vector<16x128xbf16> to vector<16x32xbf16>
    %43 = vector.extract_strided_slice %39 {offsets = [0, 0], sizes = [16, 32], strides = [1, 1]} : vector<16x128xbf16> to vector<16x32xbf16>
    %cst_22 = arith.constant dense<0.000000e+00> : vector<16x16xf32>
    %44 = tpu.matmul %41, %42, %cst_22 {dimension_numbers = #tpu.dot_dimension_numbers<[1], [1], [0], [0], [0, 0, 1, 0], [], []>} : vector<16x32xbf16>, vector<16x32xbf16>, vector<16x16xf32> -> vector<16x16xf32>
    %cst_23 = arith.constant 0.176776692 : f32
    %45 = vector.broadcast %cst_23 : f32 to vector<16x16xf32>
    %46 = arith.mulf %44, %45 : vector<16x16xf32>
    %cst_24 = arith.constant dense<0xFF800000> : vector<16xf32>
    %47 = vector.multi_reduction <maximumf>, %46, %cst_24 [1] : vector<16x16xf32> to vector<16xf32>
    %48 = vector.shape_cast %47 : vector<16xf32> to vector<16x1xf32>
    %49 = vector.broadcast %48 : vector<16x1xf32> to vector<16x16xf32>
    %50 = arith.subf %46, %49 : vector<16x16xf32>
    %51 = math.exp %50 : vector<16x16xf32>
    %cst_25 = arith.constant dense<0.000000e+00> : vector<16xf32>
    %52 = vector.multi_reduction <add>, %51, %cst_25 [1] : vector<16x16xf32> to vector<16xf32>
    %53 = vector.shape_cast %52 : vector<16xf32> to vector<16x1xf32>
    %54 = tpu.reciprocal %53 {approx = true} : vector<16x1xf32> -> vector<16x1xf32>
    %55 = vector.broadcast %54 : vector<16x1xf32> to vector<16x16xf32>
    %56 = arith.mulf %51, %55 : vector<16x16xf32>
    %57 = arith.truncf %56 : vector<16x16xf32> to vector<16x16xbf16>
    %cst_26 = arith.constant dense<0.000000e+00> : vector<16x32xf32>
    %58 = tpu.matmul %57, %43, %cst_26 {dimension_numbers = #tpu.dot_dimension_numbers<[1], [0], [0], [1], [0, 0, 1, 1], [], []>} : vector<16x16xbf16>, vector<16x32xbf16>, vector<16x32xf32> -> vector<16x32xf32>
    %59 = arith.truncf %58 : vector<16x32xf32> to vector<16x32xbf16>
    %c0_27 = arith.constant 0 : index
    %c0_28 = arith.constant 0 : index
    %60 = vector.load %arg8[%c0_27, %c0_28] : memref<128x128xbf16, #tpu.memory_space<vmem>>, vector<32x128xbf16>
    %cst_29 = arith.constant dense<0.000000e+00> : vector<16x128xf32>
    %61 = tpu.matmul %59, %60, %cst_29 {dimension_numbers = #tpu.dot_dimension_numbers<[1], [0], [0], [1], [0, 0, 1, 1], [], []>} : vector<16x32xbf16>, vector<32x128xbf16>, vector<16x128xf32> -> vector<16x128xf32>
    %62 = arith.addf %37, %61 : vector<16x128xf32>
    %63 = vector.extract_strided_slice %34 {offsets = [0, 32], sizes = [16, 32], strides = [1, 1]} : vector<16x128xf32> to vector<16x32xf32>
    %64 = arith.truncf %63 : vector<16x32xf32> to vector<16x32xbf16>
    %65 = vector.extract_strided_slice %38 {offsets = [0, 32], sizes = [16, 32], strides = [1, 1]} : vector<16x128xbf16> to vector<16x32xbf16>
    %66 = vector.extract_strided_slice %39 {offsets = [0, 32], sizes = [16, 32], strides = [1, 1]} : vector<16x128xbf16> to vector<16x32xbf16>
    %cst_30 = arith.constant dense<0.000000e+00> : vector<16x16xf32>
    %67 = tpu.matmul %64, %65, %cst_30 {dimension_numbers = #tpu.dot_dimension_numbers<[1], [1], [0], [0], [0, 0, 1, 0], [], []>} : vector<16x32xbf16>, vector<16x32xbf16>, vector<16x16xf32> -> vector<16x16xf32>
    %cst_31 = arith.constant 0.176776692 : f32
    %68 = vector.broadcast %cst_31 : f32 to vector<16x16xf32>
    %69 = arith.mulf %67, %68 : vector<16x16xf32>
    %cst_32 = arith.constant dense<0xFF800000> : vector<16xf32>
    %70 = vector.multi_reduction <maximumf>, %69, %cst_32 [1] : vector<16x16xf32> to vector<16xf32>
    %71 = vector.shape_cast %70 : vector<16xf32> to vector<16x1xf32>
    %72 = vector.broadcast %71 : vector<16x1xf32> to vector<16x16xf32>
    %73 = arith.subf %69, %72 : vector<16x16xf32>
    %74 = math.exp %73 : vector<16x16xf32>
    %cst_33 = arith.constant dense<0.000000e+00> : vector<16xf32>
    %75 = vector.multi_reduction <add>, %74, %cst_33 [1] : vector<16x16xf32> to vector<16xf32>
    %76 = vector.shape_cast %75 : vector<16xf32> to vector<16x1xf32>
    %77 = tpu.reciprocal %76 {approx = true} : vector<16x1xf32> -> vector<16x1xf32>
    %78 = vector.broadcast %77 : vector<16x1xf32> to vector<16x16xf32>
    %79 = arith.mulf %74, %78 : vector<16x16xf32>
    %80 = arith.truncf %79 : vector<16x16xf32> to vector<16x16xbf16>
    %cst_34 = arith.constant dense<0.000000e+00> : vector<16x32xf32>
    %81 = tpu.matmul %80, %66, %cst_34 {dimension_numbers = #tpu.dot_dimension_numbers<[1], [0], [0], [1], [0, 0, 1, 1], [], []>} : vector<16x16xbf16>, vector<16x32xbf16>, vector<16x32xf32> -> vector<16x32xf32>
    %82 = arith.truncf %81 : vector<16x32xf32> to vector<16x32xbf16>
    %c32 = arith.constant 32 : index
    %c0_35 = arith.constant 0 : index
    %83 = vector.load %arg8[%c32, %c0_35] : memref<128x128xbf16, #tpu.memory_space<vmem>>, vector<32x128xbf16>
    %cst_36 = arith.constant dense<0.000000e+00> : vector<16x128xf32>
    %84 = tpu.matmul %82, %83, %cst_36 {dimension_numbers = #tpu.dot_dimension_numbers<[1], [0], [0], [1], [0, 0, 1, 1], [], []>} : vector<16x32xbf16>, vector<32x128xbf16>, vector<16x128xf32> -> vector<16x128xf32>
    %85 = arith.addf %62, %84 : vector<16x128xf32>
    %86 = vector.extract_strided_slice %34 {offsets = [0, 64], sizes = [16, 32], strides = [1, 1]} : vector<16x128xf32> to vector<16x32xf32>
    %87 = arith.truncf %86 : vector<16x32xf32> to vector<16x32xbf16>
    %88 = vector.extract_strided_slice %38 {offsets = [0, 64], sizes = [16, 32], strides = [1, 1]} : vector<16x128xbf16> to vector<16x32xbf16>
    %89 = vector.extract_strided_slice %39 {offsets = [0, 64], sizes = [16, 32], strides = [1, 1]} : vector<16x128xbf16> to vector<16x32xbf16>
    %cst_37 = arith.constant dense<0.000000e+00> : vector<16x16xf32>
    %90 = tpu.matmul %87, %88, %cst_37 {dimension_numbers = #tpu.dot_dimension_numbers<[1], [1], [0], [0], [0, 0, 1, 0], [], []>} : vector<16x32xbf16>, vector<16x32xbf16>, vector<16x16xf32> -> vector<16x16xf32>
    %cst_38 = arith.constant 0.176776692 : f32
    %91 = vector.broadcast %cst_38 : f32 to vector<16x16xf32>
    %92 = arith.mulf %90, %91 : vector<16x16xf32>
    %cst_39 = arith.constant dense<0xFF800000> : vector<16xf32>
    %93 = vector.multi_reduction <maximumf>, %92, %cst_39 [1] : vector<16x16xf32> to vector<16xf32>
    %94 = vector.shape_cast %93 : vector<16xf32> to vector<16x1xf32>
    %95 = vector.broadcast %94 : vector<16x1xf32> to vector<16x16xf32>
    %96 = arith.subf %92, %95 : vector<16x16xf32>
    %97 = math.exp %96 : vector<16x16xf32>
    %cst_40 = arith.constant dense<0.000000e+00> : vector<16xf32>
    %98 = vector.multi_reduction <add>, %97, %cst_40 [1] : vector<16x16xf32> to vector<16xf32>
    %99 = vector.shape_cast %98 : vector<16xf32> to vector<16x1xf32>
    %100 = tpu.reciprocal %99 {approx = true} : vector<16x1xf32> -> vector<16x1xf32>
    %101 = vector.broadcast %100 : vector<16x1xf32> to vector<16x16xf32>
    %102 = arith.mulf %97, %101 : vector<16x16xf32>
    %103 = arith.truncf %102 : vector<16x16xf32> to vector<16x16xbf16>
    %cst_41 = arith.constant dense<0.000000e+00> : vector<16x32xf32>
    %104 = tpu.matmul %103, %89, %cst_41 {dimension_numbers = #tpu.dot_dimension_numbers<[1], [0], [0], [1], [0, 0, 1, 1], [], []>} : vector<16x16xbf16>, vector<16x32xbf16>, vector<16x32xf32> -> vector<16x32xf32>
    %105 = arith.truncf %104 : vector<16x32xf32> to vector<16x32xbf16>
    %c64 = arith.constant 64 : index
    %c0_42 = arith.constant 0 : index
    %106 = vector.load %arg8[%c64, %c0_42] : memref<128x128xbf16, #tpu.memory_space<vmem>>, vector<32x128xbf16>
    %cst_43 = arith.constant dense<0.000000e+00> : vector<16x128xf32>
    %107 = tpu.matmul %105, %106, %cst_43 {dimension_numbers = #tpu.dot_dimension_numbers<[1], [0], [0], [1], [0, 0, 1, 1], [], []>} : vector<16x32xbf16>, vector<32x128xbf16>, vector<16x128xf32> -> vector<16x128xf32>
    %108 = arith.addf %85, %107 : vector<16x128xf32>
    %109 = vector.extract_strided_slice %34 {offsets = [0, 96], sizes = [16, 32], strides = [1, 1]} : vector<16x128xf32> to vector<16x32xf32>
    %110 = arith.truncf %109 : vector<16x32xf32> to vector<16x32xbf16>
    %111 = vector.extract_strided_slice %38 {offsets = [0, 96], sizes = [16, 32], strides = [1, 1]} : vector<16x128xbf16> to vector<16x32xbf16>
    %112 = vector.extract_strided_slice %39 {offsets = [0, 96], sizes = [16, 32], strides = [1, 1]} : vector<16x128xbf16> to vector<16x32xbf16>
    %cst_44 = arith.constant dense<0.000000e+00> : vector<16x16xf32>
    %113 = tpu.matmul %110, %111, %cst_44 {dimension_numbers = #tpu.dot_dimension_numbers<[1], [1], [0], [0], [0, 0, 1, 0], [], []>} : vector<16x32xbf16>, vector<16x32xbf16>, vector<16x16xf32> -> vector<16x16xf32>
    %cst_45 = arith.constant 0.176776692 : f32
    %114 = vector.broadcast %cst_45 : f32 to vector<16x16xf32>
    %115 = arith.mulf %113, %114 : vector<16x16xf32>
    %cst_46 = arith.constant dense<0xFF800000> : vector<16xf32>
    %116 = vector.multi_reduction <maximumf>, %115, %cst_46 [1] : vector<16x16xf32> to vector<16xf32>
    %117 = vector.shape_cast %116 : vector<16xf32> to vector<16x1xf32>
    %118 = vector.broadcast %117 : vector<16x1xf32> to vector<16x16xf32>
    %119 = arith.subf %115, %118 : vector<16x16xf32>
    %120 = math.exp %119 : vector<16x16xf32>
    %cst_47 = arith.constant dense<0.000000e+00> : vector<16xf32>
    %121 = vector.multi_reduction <add>, %120, %cst_47 [1] : vector<16x16xf32> to vector<16xf32>
    %122 = vector.shape_cast %121 : vector<16xf32> to vector<16x1xf32>
    %123 = tpu.reciprocal %122 {approx = true} : vector<16x1xf32> -> vector<16x1xf32>
    %124 = vector.broadcast %123 : vector<16x1xf32> to vector<16x16xf32>
    %125 = arith.mulf %120, %124 : vector<16x16xf32>
    %126 = arith.truncf %125 : vector<16x16xf32> to vector<16x16xbf16>
    %cst_48 = arith.constant dense<0.000000e+00> : vector<16x32xf32>
    %127 = tpu.matmul %126, %112, %cst_48 {dimension_numbers = #tpu.dot_dimension_numbers<[1], [0], [0], [1], [0, 0, 1, 1], [], []>} : vector<16x16xbf16>, vector<16x32xbf16>, vector<16x32xf32> -> vector<16x32xf32>
    %128 = arith.truncf %127 : vector<16x32xf32> to vector<16x32xbf16>
    %c96 = arith.constant 96 : index
    %c0_49 = arith.constant 0 : index
    %129 = vector.load %arg8[%c96, %c0_49] : memref<128x128xbf16, #tpu.memory_space<vmem>>, vector<32x128xbf16>
    %cst_50 = arith.constant dense<0.000000e+00> : vector<16x128xf32>
    %130 = tpu.matmul %128, %129, %cst_50 {dimension_numbers = #tpu.dot_dimension_numbers<[1], [0], [0], [1], [0, 0, 1, 1], [], []>} : vector<16x32xbf16>, vector<32x128xbf16>, vector<16x128xf32> -> vector<16x128xf32>
    %131 = arith.addf %108, %130 : vector<16x128xf32>
    %c0_51 = arith.constant 0 : index
    %c0_52 = arith.constant 0 : index
    %c0_53 = arith.constant 0 : index
    %132 = vector.load %arg10[%c0_51, %c0_52, %c0_53] : memref<1x16x128xf32, #tpu.memory_space<vmem>>, vector<1x16x128xf32>
    %133 = vector.shape_cast %132 : vector<1x16x128xf32> to vector<16x128xf32>
    %134 = vector.shape_cast %131 : vector<16x128xf32> to vector<1x16x128xf32>
    tpu.vector_store %arg10[%c0_51, %c0_52, %c0_53], %134 {strides = array<i32>} : memref<1x16x128xf32, #tpu.memory_space<vmem>>, vector<1x16x128xf32>,
    return
  }
  func.func @transform_0(%arg0: i32, %arg1: i32) -> (i32, i32, i32) {
    %c0_i32 = arith.constant 0 : i32
    %c0_i32_0 = arith.constant 0 : i32
    return %arg0, %arg1, %c0_i32 : i32, i32, i32
  }
  func.func @transform_1(%arg0: i32, %arg1: i32) -> (i32, i32, i32) {
    %c0_i32 = arith.constant 0 : i32
    %c0_i32_0 = arith.constant 0 : i32
    %c0_i32_1 = arith.constant 0 : i32
    return %arg0, %c0_i32, %c0_i32_0 : i32, i32, i32
  }
  func.func @transform_2(%arg0: i32, %arg1: i32) -> (i32, i32) {
    %c0_i32 = arith.constant 0 : i32
    %c0_i32_0 = arith.constant 0 : i32
    %c0_i32_1 = arith.constant 0 : i32
    return %c0_i32, %c0_i32_0 : i32, i32
  }
  func.func @transform_3(%arg0: i32, %arg1: i32) -> (i32, i32) {
    %c0_i32 = arith.constant 0 : i32
    %c0_i32_0 = arith.constant 0 : i32
    %c0_i32_1 = arith.constant 0 : i32
    return %c0_i32, %c0_i32_0 : i32, i32
  }
  func.func @transform_4(%arg0: i32, %arg1: i32) -> (i32, i32) {
    %c0_i32 = arith.constant 0 : i32
    %c0_i32_0 = arith.constant 0 : i32
    %c0_i32_1 = arith.constant 0 : i32
    return %c0_i32, %c0_i32_0 : i32, i32
  }
  func.func @transform_5(%arg0: i32, %arg1: i32) -> (i32, i32) {
    %c0_i32 = arith.constant 0 : i32
    %c0_i32_0 = arith.constant 0 : i32
    %c0_i32_1 = arith.constant 0 : i32
    return %c0_i32, %c0_i32_0 : i32, i32
  }
  func.func @transform_6(%arg0: i32, %arg1: i32) -> (i32, i32) {
    %c0_i32 = arith.constant 0 : i32
    %c0_i32_0 = arith.constant 0 : i32
    %c0_i32_1 = arith.constant 0 : i32
    return %c0_i32, %c0_i32_0 : i32, i32
  }
  func.func @transform_7(%arg0: i32, %arg1: i32) -> (i32, i32) {
    %c0_i32 = arith.constant 0 : i32
    %c0_i32_0 = arith.constant 0 : i32
    %c0_i32_1 = arith.constant 0 : i32
    return %c0_i32, %c0_i32_0 : i32, i32
  }
  func.func @transform_8(%arg0: i32, %arg1: i32) -> (i32, i32, i32) {
    %c0_i32 = arith.constant 0 : i32
    %c0_i32_0 = arith.constant 0 : i32
    return %arg0, %arg1, %c0_i32 : i32, i32, i32
  }
}

module attributes {stable_mosaic.version = 11 : i64} {
  func.func @_cross_attn_block_kernel(%arg0: i32, %arg1: i32, %arg2: memref<1x16x128xf32, #tpu.memory_space<vmem>>, %arg3: memref<1x16x128xf32, #tpu.memory_space<vmem>>, %arg4: memref<1x128xf32, #tpu.memory_space<vmem>>, %arg5: memref<1x128xf32, #tpu.memory_space<vmem>>, %arg6: memref<128x128xbf16, #tpu.memory_space<vmem>>, %arg7: memref<1x128xf32, #tpu.memory_space<vmem>>, %arg8: memref<128x256xbf16, #tpu.memory_space<vmem>>, %arg9: memref<1x256xf32, #tpu.memory_space<vmem>>, %arg10: memref<128x128xbf16, #tpu.memory_space<vmem>>, %arg11: memref<1x128xf32, #tpu.memory_space<vmem>>, %arg12: memref<1x16x128xf32, #tpu.memory_space<vmem>>, %arg13: memref<16x128xbf16, #tpu.memory_space<vmem>>, %arg14: memref<16x128xbf16, #tpu.memory_space<vmem>>) attributes {dimension_semantics = [#tpu.dimension_semantics<parallel>, #tpu.dimension_semantics<arbitrary>], iteration_bounds = array<i64: 2, 1>, scalar_prefetch = 0 : i64, scratch_operands = 2 : i64, tpu.core_type = #tpu.core_type<tc>, window_params = [{transform_indices = @transform_0, window_bounds = array<i64: 1, 16, 128>}, {transform_indices = @transform_1, window_bounds = array<i64: 1, 16, 128>}, {pipeline_mode = #tpu.pipeline_mode<synchronous>, transform_indices = @transform_2, window_bounds = array<i64: 1, 128>}, {pipeline_mode = #tpu.pipeline_mode<synchronous>, transform_indices = @transform_3, window_bounds = array<i64: 1, 128>}, {pipeline_mode = #tpu.pipeline_mode<synchronous>, transform_indices = @transform_4, window_bounds = array<i64: 128, 128>}, {pipeline_mode = #tpu.pipeline_mode<synchronous>, transform_indices = @transform_5, window_bounds = array<i64: 1, 128>}, {pipeline_mode = #tpu.pipeline_mode<synchronous>, transform_indices = @transform_6, window_bounds = array<i64: 128, 256>}, {pipeline_mode = #tpu.pipeline_mode<synchronous>, transform_indices = @transform_7, window_bounds = array<i64: 1, 256>}, {pipeline_mode = #tpu.pipeline_mode<synchronous>, transform_indices = @transform_8, window_bounds = array<i64: 128, 128>}, {pipeline_mode = #tpu.pipeline_mode<synchronous>, transform_indices = @transform_9, window_bounds = array<i64: 1, 128>}, {transform_indices = @transform_10, window_bounds = array<i64: 1, 16, 128>}]} {
    %c0_i32 = arith.constant 0 : i32
    %0 = arith.cmpi eq, %arg1, %c0_i32 : i32
    %1 = arith.extui %0 : i1 to i32
    %c0_i32_0 = arith.constant 0 : i32
    %2 = arith.cmpi ne, %1, %c0_i32_0 : i32
    scf.if %2 {
      %c0_54 = arith.constant 0 : index
      %c0_55 = arith.constant 0 : index
      %c0_56 = arith.constant 0 : index
      %135 = vector.load %arg3[%c0_54, %c0_55, %c0_56] : memref<1x16x128xf32, #tpu.memory_space<vmem>>, vector<1x16x128xf32>
      %136 = vector.shape_cast %135 : vector<1x16x128xf32> to vector<16x128xf32>
      %137 = arith.truncf %136 : vector<16x128xf32> to vector<16x128xbf16>
      %c0_57 = arith.constant 0 : index
      %c0_58 = arith.constant 0 : index
      %138 = vector.load %arg8[%c0_57, %c0_58] : memref<128x256xbf16, #tpu.memory_space<vmem>>, vector<128x128xbf16>
      %cst_59 = arith.constant dense<0.000000e+00> : vector<16x128xf32>
      %139 = tpu.matmul %137, %138, %cst_59 {dimension_numbers = #tpu.dot_dimension_numbers<[1], [0], [0], [1], [0, 0, 1, 1], [], []>} : vector<16x128xbf16>, vector<128x128xbf16>, vector<16x128xf32> -> vector<16x128xf32>
      %c0_60 = arith.constant 0 : index
      %c0_61 = arith.constant 0 : index
      %140 = vector.load %arg9[%c0_60, %c0_61] : memref<1x256xf32, #tpu.memory_space<vmem>>, vector<1x128xf32>
      %141 = vector.broadcast %140 : vector<1x128xf32> to vector<16x128xf32>
      %142 = arith.addf %139, %141 : vector<16x128xf32>
      %143 = arith.truncf %142 : vector<16x128xf32> to vector<16x128xbf16>
      %c0_62 = arith.constant 0 : index
      %c0_63 = arith.constant 0 : index
      %144 = vector.load %arg13[%c0_62, %c0_63] : memref<16x128xbf16, #tpu.memory_space<vmem>>, vector<16x128xbf16>
      tpu.vector_store %arg13[%c0_62, %c0_63], %143 {strides = array<i32>} : memref<16x128xbf16, #tpu.memory_space<vmem>>, vector<16x128xbf16>,
      %c0_64 = arith.constant 0 : index
      %c128 = arith.constant 128 : index
      %145 = vector.load %arg8[%c0_64, %c128] : memref<128x256xbf16, #tpu.memory_space<vmem>>, vector<128x128xbf16>
      %cst_65 = arith.constant dense<0.000000e+00> : vector<16x128xf32>
      %146 = tpu.matmul %137, %145, %cst_65 {dimension_numbers = #tpu.dot_dimension_numbers<[1], [0], [0], [1], [0, 0, 1, 1], [], []>} : vector<16x128xbf16>, vector<128x128xbf16>, vector<16x128xf32> -> vector<16x128xf32>
      %c0_66 = arith.constant 0 : index
      %c128_67 = arith.constant 128 : index
      %147 = vector.load %arg9[%c0_66, %c128_67] : memref<1x256xf32, #tpu.memory_space<vmem>>, vector<1x128xf32>
      %148 = vector.broadcast %147 : vector<1x128xf32> to vector<16x128xf32>
      %149 = arith.addf %146, %148 : vector<16x128xf32>
      %150 = arith.truncf %149 : vector<16x128xf32> to vector<16x128xbf16>
      %c0_68 = arith.constant 0 : index
      %c0_69 = arith.constant 0 : index
      %151 = vector.load %arg14[%c0_68, %c0_69] : memref<16x128xbf16, #tpu.memory_space<vmem>>, vector<16x128xbf16>
      tpu.vector_store %arg14[%c0_68, %c0_69], %150 {strides = array<i32>} : memref<16x128xbf16, #tpu.memory_space<vmem>>, vector<16x128xbf16>,
    } else {
    }
    %c0 = arith.constant 0 : index
    %c0_1 = arith.constant 0 : index
    %c0_2 = arith.constant 0 : index
    %3 = vector.load %arg2[%c0, %c0_1, %c0_2] : memref<1x16x128xf32, #tpu.memory_space<vmem>>, vector<1x16x128xf32>
    %4 = vector.shape_cast %3 : vector<1x16x128xf32> to vector<16x128xf32>
    %c0_3 = arith.constant 0 : index
    %c0_4 = arith.constant 0 : index
    %5 = vector.load %arg4[%c0_3, %c0_4] : memref<1x128xf32, #tpu.memory_space<vmem>>, vector<1x128xf32>
    %c0_5 = arith.constant 0 : index
    %c0_6 = arith.constant 0 : index
    %6 = vector.load %arg5[%c0_5, %c0_6] : memref<1x128xf32, #tpu.memory_space<vmem>>, vector<1x128xf32>
    %cst = arith.constant dense<0.000000e+00> : vector<16xf32>
    %7 = vector.multi_reduction <add>, %4, %cst [1] : vector<16x128xf32> to vector<16xf32>
    %8 = vector.shape_cast %7 : vector<16xf32> to vector<16x1xf32>
    %cst_7 = arith.constant 1.280000e+02 : f32
    %9 = vector.broadcast %cst_7 : f32 to vector<16x1xf32>
    %10 = arith.divf %8, %9 : vector<16x1xf32>
    %11 = vector.broadcast %10 : vector<16x1xf32> to vector<16x128xf32>
    %12 = arith.subf %4, %11 : vector<16x128xf32>
    %13 = arith.mulf %12, %12 : vector<16x128xf32>
    %cst_8 = arith.constant dense<0.000000e+00> : vector<16xf32>
    %14 = vector.multi_reduction <add>, %13, %cst_8 [1] : vector<16x128xf32> to vector<16xf32>
    %15 = vector.shape_cast %14 : vector<16xf32> to vector<16x1xf32>
    %cst_9 = arith.constant 1.280000e+02 : f32
    %16 = vector.broadcast %cst_9 : f32 to vector<16x1xf32>
    %17 = arith.divf %15, %16 : vector<16x1xf32>
    %18 = vector.broadcast %10 : vector<16x1xf32> to vector<16x128xf32>
    %19 = arith.subf %4, %18 : vector<16x128xf32>
    %cst_10 = arith.constant 9.99999974E-6 : f32
    %20 = vector.broadcast %cst_10 : f32 to vector<16x1xf32>
    %21 = arith.addf %17, %20 : vector<16x1xf32>
    %22 = math.rsqrt %21 : vector<16x1xf32>
    %23 = vector.broadcast %22 : vector<16x1xf32> to vector<16x128xf32>
    %24 = arith.mulf %19, %23 : vector<16x128xf32>
    %25 = vector.broadcast %5 : vector<1x128xf32> to vector<16x128xf32>
    %26 = arith.mulf %24, %25 : vector<16x128xf32>
    %27 = vector.broadcast %6 : vector<1x128xf32> to vector<16x128xf32>
    %28 = arith.addf %26, %27 : vector<16x128xf32>
    %29 = arith.truncf %28 : vector<16x128xf32> to vector<16x128xbf16>
    %c0_11 = arith.constant 0 : index
    %c0_12 = arith.constant 0 : index
    %30 = vector.load %arg6[%c0_11, %c0_12] : memref<128x128xbf16, #tpu.memory_space<vmem>>, vector<128x128xbf16>
    %cst_13 = arith.constant dense<0.000000e+00> : vector<16x128xf32>
    %31 = tpu.matmul %29, %30, %cst_13 {dimension_numbers = #tpu.dot_dimension_numbers<[1], [0], [0], [1], [0, 0, 1, 1], [], []>} : vector<16x128xbf16>, vector<128x128xbf16>, vector<16x128xf32> -> vector<16x128xf32>
    %c0_14 = arith.constant 0 : index
    %c0_15 = arith.constant 0 : index
    %32 = vector.load %arg7[%c0_14, %c0_15] : memref<1x128xf32, #tpu.memory_space<vmem>>, vector<1x128xf32>
    %33 = vector.broadcast %32 : vector<1x128xf32> to vector<16x128xf32>
    %34 = arith.addf %31, %33 : vector<16x128xf32>
    %c0_16 = arith.constant 0 : index
    %c0_17 = arith.constant 0 : index
    %35 = vector.load %arg11[%c0_16, %c0_17] : memref<1x128xf32, #tpu.memory_space<vmem>>, vector<1x128xf32>
    %36 = vector.broadcast %35 : vector<1x128xf32> to vector<16x128xf32>
    %37 = arith.addf %4, %36 : vector<16x128xf32>
    %c0_18 = arith.constant 0 : index
    %c0_19 = arith.constant 0 : index
    %38 = vector.load %arg13[%c0_18, %c0_19] : memref<16x128xbf16, #tpu.memory_space<vmem>>, vector<16x128xbf16>
    %c0_20 = arith.constant 0 : index
    %c0_21 = arith.constant 0 : index
    %39 = vector.load %arg14[%c0_20, %c0_21] : memref<16x128xbf16, #tpu.memory_space<vmem>>, vector<16x128xbf16>
    %40 = vector.extract_strided_slice %34 {offsets = [0, 0], sizes = [16, 32], strides = [1, 1]} : vector<16x128xf32> to vector<16x32xf32>
    %41 = arith.truncf %40 : vector<16x32xf32> to vector<16x32xbf16>
    %42 = vector.extract_strided_slice %38 {offsets = [0, 0], sizes = [16, 32], strides = [1, 1]} : vector<16x128xbf16> to vector<16x32xbf16>
    %43 = vector.extract_strided_slice %39 {offsets = [0, 0], sizes = [16, 32], strides = [1, 1]} : vector<16x128xbf16> to vector<16x32xbf16>
    %cst_22 = arith.constant dense<0.000000e+00> : vector<16x16xf32>
    %44 = tpu.matmul %41, %42, %cst_22 {dimension_numbers = #tpu.dot_dimension_numbers<[1], [1], [0], [0], [0, 0, 1, 0], [], []>} : vector<16x32xbf16>, vector<16x32xbf16>, vector<16x16xf32> -> vector<16x16xf32>
    %cst_23 = arith.constant 0.176776692 : f32
    %45 = vector.broadcast %cst_23 : f32 to vector<16x16xf32>
    %46 = arith.mulf %44, %45 : vector<16x16xf32>
    %cst_24 = arith.constant dense<0xFF800000> : vector<16xf32>
    %47 = vector.multi_reduction <maximumf>, %46, %cst_24 [1] : vector<16x16xf32> to vector<16xf32>
    %48 = vector.shape_cast %47 : vector<16xf32> to vector<16x1xf32>
    %49 = vector.broadcast %48 : vector<16x1xf32> to vector<16x16xf32>
    %50 = arith.subf %46, %49 : vector<16x16xf32>
    %51 = math.exp %50 : vector<16x16xf32>
    %cst_25 = arith.constant dense<0.000000e+00> : vector<16xf32>
    %52 = vector.multi_reduction <add>, %51, %cst_25 [1] : vector<16x16xf32> to vector<16xf32>
    %53 = vector.shape_cast %52 : vector<16xf32> to vector<16x1xf32>
    %54 = tpu.reciprocal %53 {approx = true} : vector<16x1xf32> -> vector<16x1xf32>
    %55 = vector.broadcast %54 : vector<16x1xf32> to vector<16x16xf32>
    %56 = arith.mulf %51, %55 : vector<16x16xf32>
    %57 = arith.truncf %56 : vector<16x16xf32> to vector<16x16xbf16>
    %cst_26 = arith.constant dense<0.000000e+00> : vector<16x32xf32>
    %58 = tpu.matmul %57, %43, %cst_26 {dimension_numbers = #tpu.dot_dimension_numbers<[1], [0], [0], [1], [0, 0, 1, 1], [], []>} : vector<16x16xbf16>, vector<16x32xbf16>, vector<16x32xf32> -> vector<16x32xf32>
    %59 = arith.truncf %58 : vector<16x32xf32> to vector<16x32xbf16>
    %c0_27 = arith.constant 0 : index
    %c0_28 = arith.constant 0 : index
    %60 = vector.load %arg10[%c0_27, %c0_28] : memref<128x128xbf16, #tpu.memory_space<vmem>>, vector<32x128xbf16>
    %cst_29 = arith.constant dense<0.000000e+00> : vector<16x128xf32>
    %61 = tpu.matmul %59, %60, %cst_29 {dimension_numbers = #tpu.dot_dimension_numbers<[1], [0], [0], [1], [0, 0, 1, 1], [], []>} : vector<16x32xbf16>, vector<32x128xbf16>, vector<16x128xf32> -> vector<16x128xf32>
    %62 = arith.addf %37, %61 : vector<16x128xf32>
    %63 = vector.extract_strided_slice %34 {offsets = [0, 32], sizes = [16, 32], strides = [1, 1]} : vector<16x128xf32> to vector<16x32xf32>
    %64 = arith.truncf %63 : vector<16x32xf32> to vector<16x32xbf16>
    %65 = vector.extract_strided_slice %38 {offsets = [0, 32], sizes = [16, 32], strides = [1, 1]} : vector<16x128xbf16> to vector<16x32xbf16>
    %66 = vector.extract_strided_slice %39 {offsets = [0, 32], sizes = [16, 32], strides = [1, 1]} : vector<16x128xbf16> to vector<16x32xbf16>
    %cst_30 = arith.constant dense<0.000000e+00> : vector<16x16xf32>
    %67 = tpu.matmul %64, %65, %cst_30 {dimension_numbers = #tpu.dot_dimension_numbers<[1], [1], [0], [0], [0, 0, 1, 0], [], []>} : vector<16x32xbf16>, vector<16x32xbf16>, vector<16x16xf32> -> vector<16x16xf32>
    %cst_31 = arith.constant 0.176776692 : f32
    %68 = vector.broadcast %cst_31 : f32 to vector<16x16xf32>
    %69 = arith.mulf %67, %68 : vector<16x16xf32>
    %cst_32 = arith.constant dense<0xFF800000> : vector<16xf32>
    %70 = vector.multi_reduction <maximumf>, %69, %cst_32 [1] : vector<16x16xf32> to vector<16xf32>
    %71 = vector.shape_cast %70 : vector<16xf32> to vector<16x1xf32>
    %72 = vector.broadcast %71 : vector<16x1xf32> to vector<16x16xf32>
    %73 = arith.subf %69, %72 : vector<16x16xf32>
    %74 = math.exp %73 : vector<16x16xf32>
    %cst_33 = arith.constant dense<0.000000e+00> : vector<16xf32>
    %75 = vector.multi_reduction <add>, %74, %cst_33 [1] : vector<16x16xf32> to vector<16xf32>
    %76 = vector.shape_cast %75 : vector<16xf32> to vector<16x1xf32>
    %77 = tpu.reciprocal %76 {approx = true} : vector<16x1xf32> -> vector<16x1xf32>
    %78 = vector.broadcast %77 : vector<16x1xf32> to vector<16x16xf32>
    %79 = arith.mulf %74, %78 : vector<16x16xf32>
    %80 = arith.truncf %79 : vector<16x16xf32> to vector<16x16xbf16>
    %cst_34 = arith.constant dense<0.000000e+00> : vector<16x32xf32>
    %81 = tpu.matmul %80, %66, %cst_34 {dimension_numbers = #tpu.dot_dimension_numbers<[1], [0], [0], [1], [0, 0, 1, 1], [], []>} : vector<16x16xbf16>, vector<16x32xbf16>, vector<16x32xf32> -> vector<16x32xf32>
    %82 = arith.truncf %81 : vector<16x32xf32> to vector<16x32xbf16>
    %c32 = arith.constant 32 : index
    %c0_35 = arith.constant 0 : index
    %83 = vector.load %arg10[%c32, %c0_35] : memref<128x128xbf16, #tpu.memory_space<vmem>>, vector<32x128xbf16>
    %cst_36 = arith.constant dense<0.000000e+00> : vector<16x128xf32>
    %84 = tpu.matmul %82, %83, %cst_36 {dimension_numbers = #tpu.dot_dimension_numbers<[1], [0], [0], [1], [0, 0, 1, 1], [], []>} : vector<16x32xbf16>, vector<32x128xbf16>, vector<16x128xf32> -> vector<16x128xf32>
    %85 = arith.addf %62, %84 : vector<16x128xf32>
    %86 = vector.extract_strided_slice %34 {offsets = [0, 64], sizes = [16, 32], strides = [1, 1]} : vector<16x128xf32> to vector<16x32xf32>
    %87 = arith.truncf %86 : vector<16x32xf32> to vector<16x32xbf16>
    %88 = vector.extract_strided_slice %38 {offsets = [0, 64], sizes = [16, 32], strides = [1, 1]} : vector<16x128xbf16> to vector<16x32xbf16>
    %89 = vector.extract_strided_slice %39 {offsets = [0, 64], sizes = [16, 32], strides = [1, 1]} : vector<16x128xbf16> to vector<16x32xbf16>
    %cst_37 = arith.constant dense<0.000000e+00> : vector<16x16xf32>
    %90 = tpu.matmul %87, %88, %cst_37 {dimension_numbers = #tpu.dot_dimension_numbers<[1], [1], [0], [0], [0, 0, 1, 0], [], []>} : vector<16x32xbf16>, vector<16x32xbf16>, vector<16x16xf32> -> vector<16x16xf32>
    %cst_38 = arith.constant 0.176776692 : f32
    %91 = vector.broadcast %cst_38 : f32 to vector<16x16xf32>
    %92 = arith.mulf %90, %91 : vector<16x16xf32>
    %cst_39 = arith.constant dense<0xFF800000> : vector<16xf32>
    %93 = vector.multi_reduction <maximumf>, %92, %cst_39 [1] : vector<16x16xf32> to vector<16xf32>
    %94 = vector.shape_cast %93 : vector<16xf32> to vector<16x1xf32>
    %95 = vector.broadcast %94 : vector<16x1xf32> to vector<16x16xf32>
    %96 = arith.subf %92, %95 : vector<16x16xf32>
    %97 = math.exp %96 : vector<16x16xf32>
    %cst_40 = arith.constant dense<0.000000e+00> : vector<16xf32>
    %98 = vector.multi_reduction <add>, %97, %cst_40 [1] : vector<16x16xf32> to vector<16xf32>
    %99 = vector.shape_cast %98 : vector<16xf32> to vector<16x1xf32>
    %100 = tpu.reciprocal %99 {approx = true} : vector<16x1xf32> -> vector<16x1xf32>
    %101 = vector.broadcast %100 : vector<16x1xf32> to vector<16x16xf32>
    %102 = arith.mulf %97, %101 : vector<16x16xf32>
    %103 = arith.truncf %102 : vector<16x16xf32> to vector<16x16xbf16>
    %cst_41 = arith.constant dense<0.000000e+00> : vector<16x32xf32>
    %104 = tpu.matmul %103, %89, %cst_41 {dimension_numbers = #tpu.dot_dimension_numbers<[1], [0], [0], [1], [0, 0, 1, 1], [], []>} : vector<16x16xbf16>, vector<16x32xbf16>, vector<16x32xf32> -> vector<16x32xf32>
    %105 = arith.truncf %104 : vector<16x32xf32> to vector<16x32xbf16>
    %c64 = arith.constant 64 : index
    %c0_42 = arith.constant 0 : index
    %106 = vector.load %arg10[%c64, %c0_42] : memref<128x128xbf16, #tpu.memory_space<vmem>>, vector<32x128xbf16>
    %cst_43 = arith.constant dense<0.000000e+00> : vector<16x128xf32>
    %107 = tpu.matmul %105, %106, %cst_43 {dimension_numbers = #tpu.dot_dimension_numbers<[1], [0], [0], [1], [0, 0, 1, 1], [], []>} : vector<16x32xbf16>, vector<32x128xbf16>, vector<16x128xf32> -> vector<16x128xf32>
    %108 = arith.addf %85, %107 : vector<16x128xf32>
    %109 = vector.extract_strided_slice %34 {offsets = [0, 96], sizes = [16, 32], strides = [1, 1]} : vector<16x128xf32> to vector<16x32xf32>
    %110 = arith.truncf %109 : vector<16x32xf32> to vector<16x32xbf16>
    %111 = vector.extract_strided_slice %38 {offsets = [0, 96], sizes = [16, 32], strides = [1, 1]} : vector<16x128xbf16> to vector<16x32xbf16>
    %112 = vector.extract_strided_slice %39 {offsets = [0, 96], sizes = [16, 32], strides = [1, 1]} : vector<16x128xbf16> to vector<16x32xbf16>
    %cst_44 = arith.constant dense<0.000000e+00> : vector<16x16xf32>
    %113 = tpu.matmul %110, %111, %cst_44 {dimension_numbers = #tpu.dot_dimension_numbers<[1], [1], [0], [0], [0, 0, 1, 0], [], []>} : vector<16x32xbf16>, vector<16x32xbf16>, vector<16x16xf32> -> vector<16x16xf32>
    %cst_45 = arith.constant 0.176776692 : f32
    %114 = vector.broadcast %cst_45 : f32 to vector<16x16xf32>
    %115 = arith.mulf %113, %114 : vector<16x16xf32>
    %cst_46 = arith.constant dense<0xFF800000> : vector<16xf32>
    %116 = vector.multi_reduction <maximumf>, %115, %cst_46 [1] : vector<16x16xf32> to vector<16xf32>
    %117 = vector.shape_cast %116 : vector<16xf32> to vector<16x1xf32>
    %118 = vector.broadcast %117 : vector<16x1xf32> to vector<16x16xf32>
    %119 = arith.subf %115, %118 : vector<16x16xf32>
    %120 = math.exp %119 : vector<16x16xf32>
    %cst_47 = arith.constant dense<0.000000e+00> : vector<16xf32>
    %121 = vector.multi_reduction <add>, %120, %cst_47 [1] : vector<16x16xf32> to vector<16xf32>
    %122 = vector.shape_cast %121 : vector<16xf32> to vector<16x1xf32>
    %123 = tpu.reciprocal %122 {approx = true} : vector<16x1xf32> -> vector<16x1xf32>
    %124 = vector.broadcast %123 : vector<16x1xf32> to vector<16x16xf32>
    %125 = arith.mulf %120, %124 : vector<16x16xf32>
    %126 = arith.truncf %125 : vector<16x16xf32> to vector<16x16xbf16>
    %cst_48 = arith.constant dense<0.000000e+00> : vector<16x32xf32>
    %127 = tpu.matmul %126, %112, %cst_48 {dimension_numbers = #tpu.dot_dimension_numbers<[1], [0], [0], [1], [0, 0, 1, 1], [], []>} : vector<16x16xbf16>, vector<16x32xbf16>, vector<16x32xf32> -> vector<16x32xf32>
    %128 = arith.truncf %127 : vector<16x32xf32> to vector<16x32xbf16>
    %c96 = arith.constant 96 : index
    %c0_49 = arith.constant 0 : index
    %129 = vector.load %arg10[%c96, %c0_49] : memref<128x128xbf16, #tpu.memory_space<vmem>>, vector<32x128xbf16>
    %cst_50 = arith.constant dense<0.000000e+00> : vector<16x128xf32>
    %130 = tpu.matmul %128, %129, %cst_50 {dimension_numbers = #tpu.dot_dimension_numbers<[1], [0], [0], [1], [0, 0, 1, 1], [], []>} : vector<16x32xbf16>, vector<32x128xbf16>, vector<16x128xf32> -> vector<16x128xf32>
    %131 = arith.addf %108, %130 : vector<16x128xf32>
    %c0_51 = arith.constant 0 : index
    %c0_52 = arith.constant 0 : index
    %c0_53 = arith.constant 0 : index
    %132 = vector.load %arg12[%c0_51, %c0_52, %c0_53] : memref<1x16x128xf32, #tpu.memory_space<vmem>>, vector<1x16x128xf32>
    %133 = vector.shape_cast %132 : vector<1x16x128xf32> to vector<16x128xf32>
    %134 = vector.shape_cast %131 : vector<16x128xf32> to vector<1x16x128xf32>
    tpu.vector_store %arg12[%c0_51, %c0_52, %c0_53], %134 {strides = array<i32>} : memref<1x16x128xf32, #tpu.memory_space<vmem>>, vector<1x16x128xf32>,
    return
  }
  func.func @transform_0(%arg0: i32, %arg1: i32) -> (i32, i32, i32) {
    %c0_i32 = arith.constant 0 : i32
    %c0_i32_0 = arith.constant 0 : i32
    return %arg0, %arg1, %c0_i32 : i32, i32, i32
  }
  func.func @transform_1(%arg0: i32, %arg1: i32) -> (i32, i32, i32) {
    %c0_i32 = arith.constant 0 : i32
    %c0_i32_0 = arith.constant 0 : i32
    %c0_i32_1 = arith.constant 0 : i32
    return %arg0, %c0_i32, %c0_i32_0 : i32, i32, i32
  }
  func.func @transform_2(%arg0: i32, %arg1: i32) -> (i32, i32) {
    %c0_i32 = arith.constant 0 : i32
    %c0_i32_0 = arith.constant 0 : i32
    %c0_i32_1 = arith.constant 0 : i32
    return %c0_i32, %c0_i32_0 : i32, i32
  }
  func.func @transform_3(%arg0: i32, %arg1: i32) -> (i32, i32) {
    %c0_i32 = arith.constant 0 : i32
    %c0_i32_0 = arith.constant 0 : i32
    %c0_i32_1 = arith.constant 0 : i32
    return %c0_i32, %c0_i32_0 : i32, i32
  }
  func.func @transform_4(%arg0: i32, %arg1: i32) -> (i32, i32) {
    %c0_i32 = arith.constant 0 : i32
    %c0_i32_0 = arith.constant 0 : i32
    %c0_i32_1 = arith.constant 0 : i32
    return %c0_i32, %c0_i32_0 : i32, i32
  }
  func.func @transform_5(%arg0: i32, %arg1: i32) -> (i32, i32) {
    %c0_i32 = arith.constant 0 : i32
    %c0_i32_0 = arith.constant 0 : i32
    %c0_i32_1 = arith.constant 0 : i32
    return %c0_i32, %c0_i32_0 : i32, i32
  }
  func.func @transform_6(%arg0: i32, %arg1: i32) -> (i32, i32) {
    %c0_i32 = arith.constant 0 : i32
    %c0_i32_0 = arith.constant 0 : i32
    %c0_i32_1 = arith.constant 0 : i32
    return %c0_i32, %c0_i32_0 : i32, i32
  }
  func.func @transform_7(%arg0: i32, %arg1: i32) -> (i32, i32) {
    %c0_i32 = arith.constant 0 : i32
    %c0_i32_0 = arith.constant 0 : i32
    %c0_i32_1 = arith.constant 0 : i32
    return %c0_i32, %c0_i32_0 : i32, i32
  }
  func.func @transform_8(%arg0: i32, %arg1: i32) -> (i32, i32) {
    %c0_i32 = arith.constant 0 : i32
    %c0_i32_0 = arith.constant 0 : i32
    %c0_i32_1 = arith.constant 0 : i32
    return %c0_i32, %c0_i32_0 : i32, i32
  }
  func.func @transform_9(%arg0: i32, %arg1: i32) -> (i32, i32) {
    %c0_i32 = arith.constant 0 : i32
    %c0_i32_0 = arith.constant 0 : i32
    %c0_i32_1 = arith.constant 0 : i32
    return %c0_i32, %c0_i32_0 : i32, i32
  }
  func.func @transform_10(%arg0: i32, %arg1: i32) -> (i32, i32, i32) {
    %c0_i32 = arith.constant 0 : i32
    %c0_i32_0 = arith.constant 0 : i32
    return %arg0, %arg1, %c0_i32 : i32, i32, i32
  }
}

module attributes {stable_mosaic.version = 11 : i64} {
  func.func @_linear_kernel(%arg0: i32, %arg1: i32, %arg2: i32, %arg3: memref<32x128xbf16, #tpu.memory_space<vmem>>, %arg4: memref<128x128xbf16, #tpu.memory_space<vmem>>, %arg5: memref<1x128xf32, #tpu.memory_space<vmem>>, %arg6: memref<32x128xf32, #tpu.memory_space<vmem>>, %arg7: memref<32x128xf32, #tpu.memory_space<vmem>>) attributes {dimension_semantics = [#tpu.dimension_semantics<parallel>, #tpu.dimension_semantics<parallel>, #tpu.dimension_semantics<arbitrary>], iteration_bounds = array<i64: 1, 1, 1>, scalar_prefetch = 0 : i64, scratch_operands = 1 : i64, tpu.core_type = #tpu.core_type<tc>, window_params = [{transform_indices = @transform_0, window_bounds = array<i64: 32, 128>}, {transform_indices = @transform_1, window_bounds = array<i64: 128, 128>}, {transform_indices = @transform_2, window_bounds = array<i64: 1, 128>}, {transform_indices = @transform_3, window_bounds = array<i64: 32, 128>}]} {
    %c0_i32 = arith.constant 0 : i32
    %0 = arith.cmpi eq, %arg2, %c0_i32 : i32
    %1 = arith.extui %0 : i1 to i32
    %c0_i32_0 = arith.constant 0 : i32
    %2 = arith.cmpi ne, %1, %c0_i32_0 : i32
    scf.if %2 {
      %cst_10 = arith.constant 0.000000e+00 : f32
      %12 = vector.broadcast %cst_10 : f32 to vector<32x128xf32>
      %c0_11 = arith.constant 0 : index
      %c0_12 = arith.constant 0 : index
      %13 = vector.load %arg7[%c0_11, %c0_12] : memref<32x128xf32, #tpu.memory_space<vmem>>, vector<32x128xf32>
      tpu.vector_store %arg7[%c0_11, %c0_12], %12 {strides = array<i32>} : memref<32x128xf32, #tpu.memory_space<vmem>>, vector<32x128xf32>,
    } else {
    }
    %c0 = arith.constant 0 : index
    %c0_1 = arith.constant 0 : index
    %3 = vector.load %arg7[%c0, %c0_1] : memref<32x128xf32, #tpu.memory_space<vmem>>, vector<32x128xf32>
    %c0_2 = arith.constant 0 : index
    %c0_3 = arith.constant 0 : index
    %4 = vector.load %arg3[%c0_2, %c0_3] : memref<32x128xbf16, #tpu.memory_space<vmem>>, vector<32x128xbf16>
    %c0_4 = arith.constant 0 : index
    %c0_5 = arith.constant 0 : index
    %5 = vector.load %arg4[%c0_4, %c0_5] : memref<128x128xbf16, #tpu.memory_space<vmem>>, vector<128x128xbf16>
    %cst = arith.constant dense<0.000000e+00> : vector<32x128xf32>
    %6 = tpu.matmul %4, %5, %cst {dimension_numbers = #tpu.dot_dimension_numbers<[1], [0], [0], [1], [0, 0, 1, 1], [], []>} : vector<32x128xbf16>, vector<128x128xbf16>, vector<32x128xf32> -> vector<32x128xf32>
    %7 = arith.addf %3, %6 : vector<32x128xf32>
    %c0_6 = arith.constant 0 : index
    %c0_7 = arith.constant 0 : index
    %8 = vector.load %arg7[%c0_6, %c0_7] : memref<32x128xf32, #tpu.memory_space<vmem>>, vector<32x128xf32>
    tpu.vector_store %arg7[%c0_6, %c0_7], %7 {strides = array<i32>} : memref<32x128xf32, #tpu.memory_space<vmem>>, vector<32x128xf32>,
    %c0_i32_8 = arith.constant 0 : i32
    %9 = arith.cmpi eq, %arg2, %c0_i32_8 : i32
    %10 = arith.extui %9 : i1 to i32
    %c0_i32_9 = arith.constant 0 : i32
    %11 = arith.cmpi ne, %10, %c0_i32_9 : i32
    scf.if %11 {
      %c0_10 = arith.constant 0 : index
      %c0_11 = arith.constant 0 : index
      %12 = vector.load %arg7[%c0_10, %c0_11] : memref<32x128xf32, #tpu.memory_space<vmem>>, vector<32x128xf32>
      %c0_12 = arith.constant 0 : index
      %c0_13 = arith.constant 0 : index
      %13 = vector.load %arg5[%c0_12, %c0_13] : memref<1x128xf32, #tpu.memory_space<vmem>>, vector<1x128xf32>
      %14 = vector.broadcast %13 : vector<1x128xf32> to vector<32x128xf32>
      %15 = arith.addf %12, %14 : vector<32x128xf32>
      %c0_14 = arith.constant 0 : index
      %c0_15 = arith.constant 0 : index
      %16 = vector.load %arg6[%c0_14, %c0_15] : memref<32x128xf32, #tpu.memory_space<vmem>>, vector<32x128xf32>
      tpu.vector_store %arg6[%c0_14, %c0_15], %15 {strides = array<i32>} : memref<32x128xf32, #tpu.memory_space<vmem>>, vector<32x128xf32>,
    } else {
    }
    return
  }
  func.func @transform_0(%arg0: i32, %arg1: i32, %arg2: i32) -> (i32, i32) {
    %c0_i32 = arith.constant 0 : i32
    return %arg0, %arg2 : i32, i32
  }
  func.func @transform_1(%arg0: i32, %arg1: i32, %arg2: i32) -> (i32, i32) {
    %c0_i32 = arith.constant 0 : i32
    return %arg2, %arg1 : i32, i32
  }
  func.func @transform_2(%arg0: i32, %arg1: i32, %arg2: i32) -> (i32, i32) {
    %c0_i32 = arith.constant 0 : i32
    %c0_i32_0 = arith.constant 0 : i32
    return %c0_i32, %arg1 : i32, i32
  }
  func.func @transform_3(%arg0: i32, %arg1: i32, %arg2: i32) -> (i32, i32) {
    %c0_i32 = arith.constant 0 : i32
    return %arg0, %arg1 : i32, i32
  }
}

</mosaic_0001>

<bundles_post_ra>
// kernel: transformer_forward.15
= control target key start
LH: loop header
LB: loop body
LE: loop exit
PB: predicated region body
PF: predicated region fallthrough
CT: control target
= control target key end

     0   :  { %13 = vsyncpa [#allocation5], 0  ;;  %s2715_s0 = inlined_call_operand.vmem [shape: f32[2,16,128], index: 0, kind: input, shape index: {}, may-alias: {0,1}]   ;;  %s2716_s1 = inlined_call_operand.vmem [shape: f32[2,16,128], index: 1, kind: input, shape index: {}, may-alias: {0,1}]   ;;  %s2717_s2 = inlined_call_operand.hbm [shape: f32[1,128], index: 2, kind: input, shape index: {}]   ;;  %s2718_s3 = inlined_call_operand.hbm [shape: f32[1,128], index: 3, kind: input, shape index: {}]   ;;  %s2719_s4 = inlined_call_operand.vmem [shape: bf16[128,384], index: 4, kind: input, shape index: {}]   ;;  %s2720_s5 = inlined_call_operand.vmem [shape: f32[1,384], index: 5, kind: input, shape index: {}]   ;;  %s2721_s6 = inlined_call_operand.vmem [shape: bf16[128,128], index: 6, kind: input, shape index: {}]   ;;  %s2722_s7 = inlined_call_operand.hbm [shape: f32[1,128], index: 7, kind: input, shape index: {}]   ;;  %s2723_s8 = inlined_call_operand.vmem [shape: f32[2,16,128], index: 8, kind: output, shape index: {}]  }
   0x1   :  { %14 = vsyncpa [#allocation7], 0  ;;  %s2335_s27 = smov 0   ;;  %s2337_s28 = smov 0  }
   0x2   :  { %s2339_s29 = smov 0  }
   0x3 LB: > { %s2282_s30 = smov [#allocation6]   ;;  %s1749_s10 = sadd.s32 4294967295, %s2280_s29   ;;  %s2280_s29 = sphi %s2339_s29, %s20_s29   ;;  %s2276_s28 = sphi %s2337_s28, %s2729_s28   ;;  %s2272_s27 = sphi %s2335_s27, %s2728_s27  }
   0x4   : > { %s269_s9 = sshll.u32 %s2282_s30, 4  ;;  %p1751_p0 = scmp.ge.s32.totalorder %s2280_s29, 1  ;;  %s270_s9 = int_to_ptr.vmem [resolvable:$true] %s269_s9 }
   0x5   : > { %p245_p1 = scmp.lt.s32.totalorder %s2280_s29, 3  ;;  %p2353_p2 = scmp.eq.s32.totalorder %s1749_s10, 0 }
   0x6   : > { %s32_s13 = sadd.s32 1, %s2276_s28  ;;  %s2283_s16 = smov [#allocation4]  }
   0x7   : > { %p2357_p3 = pnand %p1751_p0, %p245_p1  ;;  %p2370_p6 = scmp.ge.s32.totalorder %s32_s13, 2 }
   0x8   : > { %s258_s17 = sshll.u32 %s2283_s16, 4  ;;  %s2183_s18 = scalar_lea.vmem %s270_s9, 16  ;;  %s259_s17 = int_to_ptr.vmem [resolvable:$true] %s258_s17 }
   0x9   : > { %p2050_p4 = pneg %p2357_p3  ;;  %p2184_p8 = scmp.ne.s32.totalorder %s270_s9, %s2183_s18 }
   0xa   : > { %s2190_s19 = scalar_lea.vmem %s270_s9, 32  ;;  %p2191_p11 = scmp.lt.s32.totalorder %s270_s9, %s270_s9 }
   0xb   : > { %p2366_p5 = pnand %p2353_p2, %p2050_p4  ;;  %p2192_p12 = scmp.lt.s32.totalorder %s2190_s19, %s2183_s18 }
   0xd   : > { %p2174_p7 = pneg %p2366_p5  ;;  %p2193_p13 = por %p2192_p12, %p2191_p11 }
   0xf   : > { %p2186_p9 = pnand %p2184_p8, %p2174_p7 }
  0x11   : > { %p2187_p10 = pneg %p2186_p9 }
  0x13   : > { %p2194_p0 = pnand %p2193_p13, %p2187_p10 }
  0x15   : > { %2197 = shalt.err (!%p2194_p0)
}
  0x16   : > { %2056 = dma.hbm_to_vmem [thread:$0]  (!%p2366_p5), %s2718_s3, 16, %s270_s9, [#allocation7]  }
  0x17   : > { %s2731_s13 = smov (%p2370_p6, %s32_s13), 0  ;;  %s2209_s22 = scalar_lea.vmem %s259_s17, 16 }
  0x18   : > { %p2210_p1 = scmp.ne.s32.totalorder %s259_s17, %s2209_s22  ;;  %s2216_s23 = scalar_lea.vmem %s259_s17, 32 }
  0x19   : > { %p2217_p9 = scmp.lt.s32.totalorder %s259_s17, %s259_s17  ;;  %p2218_p10 = scmp.lt.s32.totalorder %s2216_s23, %s2209_s22 }
  0x1a   : > { %p2212_p4 = pnand %p2210_p1, %p2174_p7 }
  0x1b   : > { %p2219_p11 = por %p2218_p10, %p2217_p9 }
  0x1c   : > { %p2213_p8 = pneg %p2212_p4 }
  0x1e   : > { %p2220_p12 = pnand %p2219_p11, %p2213_p8 }
  0x20   : > { %2223 = shalt.err (!%p2220_p12)
}
  0x21   : > { %2053 = dma.hbm_to_vmem [thread:$0]  (!%p2366_p5), %s2717_s2, 16, %s259_s17, [#allocation5]  }
  0x22   : > { %s2284_s26 = smov [#allocation8]  }
  0x23   : > { %s289_s30 = sshll.u32 %s2284_s26, 4  ;;  %s290_s30 = int_to_ptr.vmem [resolvable:$true] %s289_s30 }
  0x24   : > { %s2235_s9 = scalar_lea.vmem %s290_s30, 16  ;;  %s2242_s10 = scalar_lea.vmem %s290_s30, 32 }
  0x25   : > { %p2236_p6 = scmp.ne.s32.totalorder %s290_s30, %s2235_s9  ;;  %p2243_p1 = scmp.lt.s32.totalorder %s290_s30, %s290_s30 }
  0x26   : > { %p2244_p4 = scmp.lt.s32.totalorder %s2242_s10, %s2235_s9 }
  0x27   : > { %p2238_p13 = pnand %p2236_p6, %p2174_p7 }
  0x28   : > { %p2245_p8 = por %p2244_p4, %p2243_p1 }
  0x29   : > { %p2239_p0 = pneg %p2238_p13 }
  0x2b   : > { %p2246_p9 = pnand %p2245_p8, %p2239_p0 }
  0x2d   : > { %2249 = shalt.err (!%p2246_p9)
}
  0x2e   : > { %2059 = dma.hbm_to_vmem [thread:$0]  (!%p2366_p5), %s2722_s7, 16, %s290_s30, [#allocation7]  }
  0x2f   : > { %323 = sbr.rel (%p2357_p3) target bundleno = 3280 (0xcd0), region = 52 }
  0x34   : > { %2263 = dma.done.wait (%p2353_p2), [#allocation5], 16  }
  0x35   : > { %2265 = vsyncadd (%p2353_p2), [#allocation5], 4294967280 }
  0x36   : > { %2267 = dma.done.wait (%p2353_p2), [#allocation7], 32  }
  0x37   : > { %2269 = vsyncadd (%p2353_p2), [#allocation7], 4294967264  ;;  %p379_p7 = scmp.lt.s32.totalorder %s2272_s27, 1  ;;  %v2098_v4 = vld [vmem:[%s2719_s4 + $0xac] ss:$12 sps:$4 sm:$0xff]   ;;  %v2285_v6 = vmov 0.0  }
  0x38   : > { %v2099_v5 = vld [vmem:[%s2719_s4 + $0xb0] ss:$12 sps:$4 sm:$0xff]   ;;  %1898 = vmatprep.subr.bf16.mxu0 %v2285_v6  ;;  %1918 = vmatprep.subr.bf16.mxu1 %v2285_v6  ;;  %v2100_v23 = vld [vmem:[%s2719_s4 + $0x94] ss:$12 sps:$4 sm:$0xff]   ;;  %v2101_v24 = vld [vmem:[%s2719_s4 + $0x98] ss:$12 sps:$4 sm:$0xff]  }
  0x39   : > { %s2733_s27 = smov (!%p379_p7, %s2272_s27), 1  ;;  %1899 = vmatpush3.bf16.msra.mxu0 %v2098_v4  ;;  %1919 = vmatpush3.bf16.msra.mxu1 %v2099_v5  ;;  %v2102_v25 = vld [vmem:[%s2719_s4 + $0x7c] ss:$12 sps:$4 sm:$0xff]   ;;  %v2103_v26 = vld [vmem:[%s2719_s4 + $0x80] ss:$12 sps:$4 sm:$0xff]   ;;  %vm2286_vm0 = vmmov 0  }
  0x3a   : > { %s2416_s14 = sshll.u32 %s2733_s27, 4  ;;  %1900 = vmatprep.subr.bf16.mxu0 %v2285_v6  ;;  %1920 = vmatprep.subr.bf16.mxu1 %v2285_v6  ;;  %v2104_v27 = vld [vmem:[%s2719_s4 + $0x64] ss:$12 sps:$4 sm:$0xff]   ;;  %v2105_v28 = vld [vmem:[%s2719_s4 + $0x68] ss:$12 sps:$4 sm:$0xff]   ;;  %vm871_vm1 = vcmask 261120  }
  0x3b   : > { %s392_s18 = scalar_lea.vmem %s2716_s1, %s2416_s14  ;;  %s386_s21 = scalar_lea.vmem %s2715_s0, %s2416_s14  ;;  %v2106_v29 = vld [vmem:[%s2719_s4 + $0x4c] ss:$12 sps:$4 sm:$0xff]   ;;  %v2107_v30 = vld [vmem:[%s2719_s4 + $0x50] ss:$12 sps:$4 sm:$0xff]   ;;  %v2108_v31 = vld [vmem:[%s2719_s4 + $0x34] ss:$12 sps:$4 sm:$0xff]   ;;  %1914 = vmatprep.mubr.msk.bf16.mxu0 %vm2286_vm0, %v2285_v6  ;;  %1934 = vmatprep.mubr.msk.bf16.mxu1 %vm2286_vm0, %v2285_v6 }
  0x3c   : > { %v408_v0 = vld [vmem:[%s392_s18] sm:$0xff]  ;;  %v409_v2 = vld [vmem:[%s392_s18 + $0x8] sm:$0xff]  ;;  %v1766_v45 = vld [vmem:[#allocation4] ss:$0 sm:$0xff]  ;;  %vm921_vm2 = vcmask 130048   ;;  %s2287_s27 = smov 96   ;;  %s401_s23 = scalar_lea.vmem %s2723_s8, %s2416_s14 }
  0x3d   : > { %v2426_v1 = vld [vmem:[%s386_s21] sm:$0xff]  ;;  %412 = vadd.xlane.f32.xlu0 %v408_v0  ;;  %v2429_v3 = vld [vmem:[%s386_s21 + $0x8] sm:$0xff]  ;;  %1901 = vmatpush3.bf16.msra.mxu0 %v2100_v23  ;;  %v1767_v51 = vld [vmem:[#allocation6] ss:$0 sm:$0xff]  ;;  %s2288_s25 = smov 64   ;;  %s2289_s15 = smov 32  }
  0x3e   : > { %700 = vadd.xlane.f32.xlu1 %v2426_v1  ;;  %1921 = vmatpush3.bf16.msra.mxu1 %v2101_v24  ;;  %v2109_v32 = vld [vmem:[%s2719_s4 + $0x38] ss:$12 sps:$4 sm:$0xff]   ;;  %v2110_v33 = vld [vmem:[%s2719_s4 + $0x1c] ss:$12 sps:$4 sm:$0xff]   ;;  %v2111_v34 = vld [vmem:[%s2719_s4 + $0x20] ss:$12 sps:$4 sm:$0xff]  }
  0x3f   : > { %1902 = vmatprep.subr.bf16.mxu0 %v2285_v6  ;;  %1922 = vmatprep.subr.bf16.mxu1 %v2285_v6  ;;  %v2112_v35 = vld [vmem:[%s2719_s4 + $0x4] ss:$12 sps:$4 sm:$0xff]   ;;  %v2113_v36 = vld [vmem:[%s2719_s4 + $0x8] ss:$12 sps:$4 sm:$0xff]   ;;  %v2117_v63 = vld [vmem:[%s2719_s4 + $0x60] ss:$12 sps:$4 sm:$0xff]  }
  0x40   : > { %v2114_v57 = vld [vmem:[%s2719_s4 + $0xa8] ss:$12 sps:$4 sm:$0xff]   ;;  %v2115_v61 = vld [vmem:[%s2719_s4 + $0x90] ss:$12 sps:$4 sm:$0xff]   ;;  %v2116_v62 = vld [vmem:[%s2719_s4 + $0x78] ss:$12 sps:$4 sm:$0xff]  }
  0x41   : > { %414 = vadd.xlane.f32.xlu0 %v409_v2  ;;  %1903 = vmatpush3.bf16.msra.mxu0 %v2102_v25  ;;  %v2119_v5 = vld [vmem:[%s2719_s4 + $0x30] ss:$12 sps:$4 sm:$0xff]  }
  0x42   : > { %702 = vadd.xlane.f32.xlu1 %v2429_v3  ;;  %1923 = vmatpush3.bf16.msra.mxu1 %v2103_v26 }
  0x43   : > { %1904 = vmatprep.subr.bf16.mxu0 %v2285_v6  ;;  %1924 = vmatprep.subr.bf16.mxu1 %v2285_v6 }
  0x45   : > { %1905 = vmatpush3.bf16.msra.mxu0 %v2104_v27 }
  0x46   : > { %1925 = vmatpush3.bf16.msra.mxu1 %v2105_v28  ;;  %1906 = vmatprep.subr.bf16.mxu0 %v2285_v6 }
  0x47   : > { %1926 = vmatprep.subr.bf16.mxu1 %v2285_v6 }
  0x49   : > { %1907 = vmatpush3.bf16.msra.mxu0 %v2106_v29 }
  0x4a   : > { %1927 = vmatpush3.bf16.msra.mxu1 %v2107_v30  ;;  %1908 = vmatprep.subr.bf16.mxu0 %v2285_v6 }
  0x4b   : > { %1928 = vmatprep.subr.bf16.mxu1 %v2285_v6 }
  0x4d   : > { %1909 = vmatpush3.bf16.msra.mxu0 %v2108_v31 }
  0x4e   : > { %1929 = vmatpush3.bf16.msra.mxu1 %v2109_v32  ;;  %1910 = vmatprep.subr.bf16.mxu0 %v2285_v6 }
  0x4f   : > { %1930 = vmatprep.subr.bf16.mxu1 %v2285_v6 }
  0x51   : > { %1911 = vmatpush3.bf16.msra.mxu0 %v2110_v33 }
  0x52   : > { %1931 = vmatpush3.bf16.msra.mxu1 %v2111_v34  ;;  %1912 = vmatprep.subr.bf16.mxu0 %v2285_v6 }
  0x53   : > { %1932 = vmatprep.subr.bf16.mxu1 %v2285_v6 }
  0x55   : > { %1913 = vmatpush3.bf16.msra.mxu0 %v2112_v35  ;;  %v1792_v35 = vld [vmem:[%s2720_s5] ss:$0 sm:$0xff] }
  0x56   : > { %1933 = vmatpush3.bf16.msra.mxu1 %v2113_v36  ;;  %1938 = vmatprep.subr.bf16.mxu0 %v2285_v6 }
  0x57   : > { %1958 = vmatprep.subr.bf16.mxu1 %v2285_v6 }
  0xc6   : > { %v413_v7 = vpop.xlane.xlu0 %412 }
  0xc7   : > { %v701_v8 = vpop.xlane.xlu1 %700  ;;  %v417_v9 = vmul.f32 0.0078125, %v413_v7 }
  0xc8   : > { %v705_v10 = vmul.f32 0.0078125, %v701_v8 }
  0xc9   : > { %v2442_v11 = vsub.f32 %v408_v0, %v417_v9  ;;  %v2118_v0 = vld [vmem:[%s2719_s4 + $0x48] ss:$12 sps:$4 sm:$0xff]   ;;  %v2120_v9 = vld [vmem:[%s2719_s4 + $0x18] ss:$12 sps:$4 sm:$0xff]  }
  0xca   : > { %v2445_v12 = vsub.f32 %v2426_v1, %v705_v10  ;;  %v415_v13 = vpop.xlane.xlu0 %414 }
  0xcb   : > { %v703_v14 = vpop.xlane.xlu1 %702  ;;  %v418_v15 = vmul.f32 0.0078125, %v415_v13  ;;  %v421_v16 = vmul.f32 %v2442_v11, %v2442_v11  ;;  %v2121_v13 = vld [vmem:[%s2719_s4] ss:$12 sps:$4 sm:$0xff]  }
  0xcc   : > { %v706_v17 = vmul.f32 0.0078125, %v703_v14  ;;  %v709_v20 = vmul.f32 %v2445_v12, %v2445_v12 }
  0xcd   : > { %v2449_v18 = vsub.f32 %v409_v2, %v418_v15  ;;  %423 = vadd.xlane.f32.xlu0 %v421_v16 }
  0xce   : > { %v2452_v19 = vsub.f32 %v2429_v3, %v706_v17 }
  0xcf   : > { %v422_v21 = vmul.f32 %v2449_v18, %v2449_v18 }
  0xd0   : > { %v710_v22 = vmul.f32 %v2452_v19, %v2452_v19 }
  0xd1   : > { %711 = vadd.xlane.f32.xlu0 %v709_v20  ;;  %425 = vadd.xlane.f32.xlu1 %v422_v21 }
  0xd5   : > { %713 = vadd.xlane.f32.xlu1 %v710_v22 }
 0x156   : > { %v424_v37 = vpop.xlane.xlu0 %423 }
 0x157   : > { %v427_v38 = vmul.f32 0.0078125, %v424_v37 }
 0x159   : > { %v429_v39 = vadd.f32 1e-05, %v427_v38 }
 0x15a   : > { %v426_v40 = vpop.xlane.xlu1 %425  ;;  %v712_v50 = vpop.xlane.xlu0 %711 }
 0x15b   : > { %2132 = vrsqrt.f32 %v429_v39  ;;  %v428_v41 = vmul.f32 0.0078125, %v426_v40  ;;  %v715_v54 = vmul.f32 0.0078125, %v712_v50 }
 0x15d   : > { %v430_v42 = vadd.f32 1e-05, %v428_v41  ;;  %v717_v60 = vadd.f32 1e-05, %v715_v54 }
 0x15e   : > { %v714_v47 = vpop.xlane.xlu1 %713 }
 0x15f   : > { %2134 = vrsqrt.f32 %v430_v42  ;;  %v716_v52 = vmul.f32 0.0078125, %v714_v47 }
 0x161   : > { %v718_v58 = vadd.f32 1e-05, %v716_v52 }
 0x163   : > { %2136 = vrsqrt.f32 %v718_v58 }
 0x164   : > { %2138 = vrsqrt.f32 %v717_v60 }
 0x168   : > { %v2133_v43 = vpop.eup %2132 }
 0x169   : > { %v433_v44 = vmul.f32 %v2133_v43, %v2442_v11 }
 0x16b   : > { %v441_v49 = vmul.f32 %v1766_v45, %v433_v44 }
 0x16c   : > { %v2135_v46 = vpop.eup %2134 }
 0x16d   : > { %v434_v48 = vmul.f32 %v2135_v46, %v2449_v18  ;;  %v449_v55 = vadd.f32 %v1767_v51, %v441_v49  ;;  %v1768_v18 = vld [vmem:[%s2720_s5 + $0x1] ss:$0 sm:$0xff] }
 0x16f   : > { %v442_v53 = vmul.f32 %v1766_v45, %v434_v48 }
 0x170   : > { %v2137_v2 = vpop.eup %2136 }
 0x171   : > { %v450_v56 = vadd.f32 %v1767_v51, %v442_v53  ;;  %v2139_v4 = vpop.eup %2138  ;;  %v722_v7 = vmul.f32 %v2137_v2, %v2452_v19  ;;  %v1779_v19 = vld [vmem:[%s2720_s5 + $0x2] ss:$0 sm:$0xff] }
 0x172   : > { %v721_v8 = vmul.f32 %v2139_v4, %v2445_v12 }
 0x173   : > { %v451_v59 = vpack.c.bf16 %v450_v56, %v449_v55  ;;  %v730_v10 = vmul.f32 %v1766_v45, %v722_v7 }
 0x174   : > { %v729_v11 = vmul.f32 %v1766_v45, %v721_v8  ;;  %v2125_v8 = vld [vmem:[%s2721_s6] sm:$0xff]  }
 0x175   : > { %1915 = vmatmul.mubr.bf16.vlgmr.msra.gmra.mxu0 %v451_v59  ;;  %1935 = vmatmul.mubr.bf16.vlgmr.msra.gmra.mxu1 %v451_v59  ;;  %v738_v14 = vadd.f32 %v1767_v51, %v730_v10 }
 0x176   : > { %1939 = vmatpush3.bf16.msra.mxu0 %v2114_v57  ;;  %1954 = vmatprep.mubr.msk.bf16.mxu0 %vm2286_vm0, %v2285_v6  ;;  %v737_v15 = vadd.f32 %v1767_v51, %v729_v11 }
 0x177   : > { %1940 = vmatprep.subr.bf16.mxu0 %v2285_v6  ;;  %1960 = vmatprep.mubr.msk.bf16.mxu1 %vm2286_vm0, %v2285_v6 }
 0x178   : > { %v739_v12 = vpack.c.bf16 %v738_v14, %v737_v15 }
 0x17a   : > { %1941 = vmatpush3.bf16.msra.mxu0 %v2115_v61 }
 0x17b   : > { %1942 = vmatprep.subr.bf16.mxu0 %v2285_v6 }
 0x17e   : > { %1943 = vmatpush3.bf16.msra.mxu0 %v2116_v62 }
 0x17f   : > { %1944 = vmatprep.subr.bf16.mxu0 %v2285_v6 }
 0x182   : > { %1945 = vmatpush3.bf16.msra.mxu0 %v2117_v63 }
 0x183   : > { %1946 = vmatprep.subr.bf16.mxu0 %v2285_v6 }
 0x186   : > { %1947 = vmatpush3.bf16.msra.mxu0 %v2118_v0 }
 0x187   : > { %1948 = vmatprep.subr.bf16.mxu0 %v2285_v6 }
 0x18a   : > { %1949 = vmatpush3.bf16.msra.mxu0 %v2119_v5  ;;  %v2124_v5 = vld [vmem:[%s2721_s6 + $0x8] sm:$0xff]  }
 0x18b   : > { %1950 = vmatprep.subr.bf16.mxu0 %v2285_v6 }
 0x18e   : > { %1951 = vmatpush3.bf16.msra.mxu0 %v2120_v9 }
 0x18f   : > { %1952 = vmatprep.subr.bf16.mxu0 %v2285_v6 }
 0x192   : > { %1953 = vmatpush3.bf16.msra.mxu0 %v2121_v13 }
 0x193   : > { %1984 = vmatprep.subr.bf16.mxu0 %v2285_v6 }
 0x195   : > { %1955 = vmatmul.mubr.bf16.vlgmr.msra.gmra.mxu0 %v739_v12 }
 0x196   : > { %1986 = vmatprep.mubr.msk.bf16.mxu0 %vm2286_vm0, %v2285_v6 }
 0x235   : > { %v557_v16 = vpop.f32.mrf.mxu0  ;;  %v679_v17 = vpop.f32.mrf.mxu1 }
 0x236   : > { %v558_v24 = vadd.f32 %v1768_v18, %v557_v16  ;;  %v680_v25 = vadd.f32 %v1779_v19, %v679_v17 }
 0x237   : > { %v1916_v20 = vpop.f32.mrf.mxu0  ;;  %v1936_v21 = vpop.f32.mrf.mxu1 }
 0x239   : > { %v560_v22 = vpop.f32.mrf.mxu0  ;;  %v682_v23 = vpop.f32.mrf.mxu1 }
 0x23a   : > { %v561_v26 = vadd.f32 %v1768_v18, %v560_v22  ;;  %v683_v27 = vadd.f32 %v1779_v19, %v682_v23 }
 0x23b   : > { %v1917_v28 = vpop.f32.mrf.mxu0  ;;  %v1937_v29 = vpop.f32.mrf.mxu1 }
 0x23c   : > { %v1836_v30 = vpack.c.bf16 %v561_v26, %v558_v24  ;;  %v1841_v31 = vpack.c.bf16 %v683_v27, %v680_v25 }
 0x23e   : > { %1837 = vst [vmem:[#allocation2] sm:$0xff] %v1836_v30   ;;  %1842 = vst [vmem:[#allocation3] sm:$0xff] %v1841_v31  }
 0x245   : > { %v2568_v32 = vld [vmem:[#allocation2] sm:$0xff]   ;;  %v2578_v42 = vld [vmem:[#allocation3] sm:$0xff]  }
 0x246   : > { %v876_v33 = vsel %vm871_vm1, %v2568_v32, 0 }
 0x247   : > { %1959 = vmatpush3.bf16.xpose.msra.mxu1 %v876_v33 }
 0x248   : > { %1964 = vmatprep.subr.bf16.mxu1 %v2285_v6 }
 0x255   : > { %v845_v34 = vpop.f32.mrf.mxu0 }
 0x256   : > { %v846_v38 = vadd.f32 %v1792_v35, %v845_v34 }
 0x257   : > { %v1956_v36 = vpop.f32.mrf.mxu0 }
 0x259   : > { %v848_v37 = vpop.f32.mrf.mxu0 }
 0x25a   : > { %v849_v39 = vadd.f32 %v1792_v35, %v848_v37 }
 0x25b   : > { %v1957_v40 = vpop.f32.mrf.mxu0 }
 0x25c   : > { %v2576_v41 = vpack.c.bf16 %v849_v39, %v846_v38 }
 0x25e   : > { %1961 = vmatmul.mubr.msk.bf16.vlgmr.msra.gmra.mxu1 %vm871_vm1, %v2576_v41 }
 0x25f   : > { %1965 = vmatpush3.bf16.msra.mxu1 %v2578_v42  ;;  %1966 = vmatprep.mubr.msk.bf16.mxu1 %vm2286_vm0, %v2285_v6 }
 0x260   : > { %1970 = vmatprep.subr.bf16.mxu1 %v2285_v6 }
 0x31e   : > { %v912_v43 = vpop.f32.mrf.mxu1 }
 0x31f   : > { %v919_v44 = vmul.f32 0.17677669, %v912_v43 }
 0x320   : > { %v1962_v45 = vpop.f32.mrf.mxu1 }
 0x321   : > { %v922_v46 = vsel %vm921_vm2, %v919_v44, -inf }
 0x322   : > { %923 = vmax.xlane.f32.xlu0 %v922_v46  ;;  %v915_v47 = vpop.f32.mrf.mxu1 }
 0x323   : > { %v920_v48 = vmul.f32 0.17677669, %v915_v47 }
 0x324   : > { %v1963_v49 = vpop.f32.mrf.mxu1 }
 0x325   : > { %v925_v50 = vsel %vm921_vm2, %v920_v48, -inf }
 0x326   : > { %926 = vmax.xlane.f32.xlu1 %v925_v50 }
 0x3ab   : > { %v924_v51 = vpop.xlane.xlu0 %923 }
 0x3ac   : > { %v928_v52 = vsub.f32 %v919_v44, %v924_v51 }
 0x3ae   : > { %v930_v53 = vmul.f32 1.442695, %v928_v52 }
 0x3af   : > { %v927_v54 = vpop.xlane.xlu1 %926 }
 0x3b0   : > { %2140 = vpow2.f32 %v930_v53  ;;  %v929_v55 = vsub.f32 %v920_v48, %v927_v54  ;;  %v2126_v53 = vld [vmem:[%s2721_s6 + $0x18] sm:$0xff]   ;;  %v2127_v54 = vld [vmem:[%s2721_s6 + $0x10] sm:$0xff]  }
 0x3b2   : > { %v932_v56 = vmul.f32 1.442695, %v929_v55 }
 0x3b4   : > { %2142 = vpow2.f32 %v932_v56 }
 0x3bd   : > { %v2141_v57 = vpop.eup %2140 }
 0x3be   : > { %v934_v58 = vsel %vm921_vm2, %v2141_v57, 0.0 }
 0x3bf   : > { %935 = vadd.xlane.f32.xlu0 %v934_v58 }
 0x3c1   : > { %v2143_v59 = vpop.eup %2142 }
 0x3c2   : > { %v937_v60 = vsel %vm921_vm2, %v2143_v59, 0.0 }
 0x3c3   : > { %938 = vadd.xlane.f32.xlu1 %v937_v60 }
 0x3d4   : > { %1059 = vrot.lane.b32.xlu1 %v2576_v41, %s2287_s27 }
 0x3d5   : > { %1061 = vrot.lane.b32.xlu0 %v2568_v32, %s2287_s27 }
 0x448   : > { %v936_v61 = vpop.xlane.xlu0 %935 }
 0x449   : > { %2144 = vrcp.f32 %v936_v61 }
 0x44c   : > { %v939_v62 = vpop.xlane.xlu1 %938  ;;  %v1062_v11 = vpop.permute.xlu0 %1061 }
 0x44d   : > { %2146 = vrcp.f32 %v939_v62  ;;  %v1067_v12 = vsel %vm871_vm1, %v1062_v11, 0 }
 0x450   : > { %v1060_v16 = vpop.permute.xlu1 %1059 }
 0x456   : > { %v2145_v63 = vpop.eup %2144 }
 0x457   : > { %v942_v2 = vmul.f32 %v2145_v63, %v2141_v57 }
 0x45a   : > { %v2147_v0 = vpop.eup %2146 }
 0x45b   : > { %v943_v4 = vmul.f32 %v2147_v0, %v2143_v59 }
 0x45d   : > { %v944_v7 = vpack.c.bf16 %v943_v4, %v942_v2 }
 0x45f   : > { %1967 = vmatmul.mubr.msk.bf16.vlgmr.msra.gmra.mxu1 %vm921_vm2, %v944_v7 }
 0x460   : > { %1971 = vmatpush3.bf16.msra.mxu1 %v2124_v5  ;;  %1974 = vmatprep.mubr.msk.bf16.mxu1 %vm2286_vm0, %v2285_v6 }
 0x461   : > { %1972 = vmatprep.subr.bf16.mxu1 %v2285_v6 }
 0x464   : > { %1973 = vmatpush3.bf16.msra.mxu1 %v2125_v8 }
 0x465   : > { %1978 = vmatprep.subr.bf16.mxu1 %v2285_v6 }
 0x51f   : > { %v988_v9 = vpop.f32.mrf.mxu1 }
 0x521   : > { %v1968_v10 = vpop.f32.mrf.mxu1 }
 0x523   : > { %v991_v13 = vpop.f32.mrf.mxu1 }
 0x524   : > { %v995_v14 = vpack.c.bf16 %v991_v13, %v988_v9 }
 0x525   : > { %v1969_v15 = vpop.f32.mrf.mxu1 }
 0x526   : > { %1975 = vmatmul.mubr.msk.bf16.vlgmr.msra.gmra.mxu1 %vm871_vm1, %v995_v14 }
 0x527   : > { %1979 = vmatpush3.bf16.xpose.msra.mxu1 %v1067_v12  ;;  %1980 = vmatprep.mubr.msk.bf16.mxu1 %vm2286_vm0, %v2285_v6 }
 0x528   : > { %1990 = vmatprep.subr.bf16.mxu1 %v2285_v6 }
 0x52e   : > { %1981 = vmatmul.mubr.msk.bf16.vlgmr.msra.gmra.mxu1 %vm871_vm1, %v1060_v16 }
 0x52f   : > { %1994 = vmatprep.mubr.msk.bf16.mxu1 %vm2286_vm0, %v2285_v6  ;;  %1991 = vmatpush3.bf16.msra.mxu1 %v2126_v53 }
 0x530   : > { %1992 = vmatprep.subr.bf16.mxu1 %v2285_v6 }
 0x533   : > { %1993 = vmatpush3.bf16.msra.mxu1 %v2127_v54 }
 0x534   : > { %2004 = vmatprep.subr.bf16.mxu1 %v2285_v6 }
 0x5e6   : > { %v2613_v17 = vpop.f32.mrf.mxu1 }
 0x5e8   : > { %v1976_v18 = vpop.f32.mrf.mxu1 }
 0x5ea   : > { %v2615_v19 = vpop.f32.mrf.mxu1 }
 0x5ec   : > { %v1977_v20 = vpop.f32.mrf.mxu1 }
 0x5ee   : > { %v1103_v21 = vpop.f32.mrf.mxu1 }
 0x5ef   : > { %v1110_v22 = vmul.f32 0.17677669, %v1103_v21 }
 0x5f0   : > { %v1982_v23 = vpop.f32.mrf.mxu1 }
 0x5f1   : > { %v1112_v24 = vsel %vm921_vm2, %v1110_v22, -inf }
 0x5f2   : > { %1113 = vmax.xlane.f32.xlu1 %v1112_v24  ;;  %v1106_v25 = vpop.f32.mrf.mxu1 }
 0x5f3   : > { %v1111_v26 = vmul.f32 0.17677669, %v1106_v25 }
 0x5f4   : > { %v1983_v27 = vpop.f32.mrf.mxu1 }
 0x5f5   : > { %v1115_v28 = vsel %vm921_vm2, %v1111_v26, -inf }
 0x5f6   : > { %1116 = vmax.xlane.f32.xlu0 %v1115_v28 }
 0x67b   : > { %v1114_v29 = vpop.xlane.xlu1 %1113 }
 0x67c   : > { %v1118_v30 = vsub.f32 %v1110_v22, %v1114_v29 }
 0x67e   : > { %v1120_v31 = vmul.f32 1.442695, %v1118_v30 }
 0x67f   : > { %v1117_v33 = vpop.xlane.xlu0 %1116 }
 0x680   : > { %2148 = vpow2.f32 %v1120_v31  ;;  %v1119_v34 = vsub.f32 %v1111_v26, %v1117_v33 }
 0x682   : > { %v1122_v35 = vmul.f32 1.442695, %v1119_v34 }
 0x684   : > { %2150 = vpow2.f32 %v1122_v35 }
 0x68d   : > { %v2149_v36 = vpop.eup %2148 }
 0x68e   : > { %v1124_v37 = vsel %vm921_vm2, %v2149_v36, 0.0 }
 0x68f   : > { %1125 = vadd.xlane.f32.xlu0 %v1124_v37  ;;  %v2129_v37 = vld [vmem:[%s2721_s6 + $0x20] sm:$0xff]  }
 0x691   : > { %v2151_v38 = vpop.eup %2150 }
 0x692   : > { %v1127_v39 = vsel %vm921_vm2, %v2151_v38, 0.0 }
 0x693   : > { %1128 = vadd.xlane.f32.xlu1 %v1127_v39 }
 0x6a4   : > { %1247 = vrot.lane.b32.xlu1 %v2568_v32, %s2288_s25 }
 0x6a5   : > { %1135 = vrot.lane.b32.xlu0 %v2578_v42, %s2287_s27 }
 0x6a8   : > { %1245 = vrot.lane.b32.xlu1 %v2576_v41, %s2288_s25 }
 0x718   : > { %v1126_v40 = vpop.xlane.xlu0 %1125 }
 0x719   : > { %2152 = vrcp.f32 %v1126_v40 }
 0x71c   : > { %v1129_v43 = vpop.xlane.xlu1 %1128  ;;  %v1136_v44 = vpop.permute.xlu0 %1135 }
 0x71d   : > { %2154 = vrcp.f32 %v1129_v43  ;;  %1985 = vmatpush3.bf16.msra.mxu0 %v1136_v44 }
 0x71e   : > { %1998 = vmatprep.subr.bf16.mxu0 %v2285_v6 }
 0x720   : > { %v1248_v49 = vpop.permute.xlu1 %1247 }
 0x721   : > { %v1253_v51 = vsel %vm871_vm1, %v1248_v49, 0 }
 0x724   : > { %v1246_v52 = vpop.permute.xlu1 %1245 }
 0x726   : > { %v2153_v45 = vpop.eup %2152 }
 0x727   : > { %v1132_v47 = vmul.f32 %v2153_v45, %v2149_v36  ;;  %v2128_v36 = vld [vmem:[%s2721_s6 + $0x28] sm:$0xff]  }
 0x72a   : > { %v2155_v46 = vpop.eup %2154 }
 0x72b   : > { %v1133_v48 = vmul.f32 %v2155_v46, %v2151_v38 }
 0x72d   : > { %v1134_v50 = vpack.c.bf16 %v1133_v48, %v1132_v47 }
 0x72f   : > { %1987 = vmatmul.mubr.msk.bf16.vlgmr.msra.gmra.mxu0 %vm921_vm2, %v1134_v50 }
 0x730   : > { %1999 = vmatpush3.bf16.xpose.msra.mxu0 %v1253_v51  ;;  %2000 = vmatprep.mubr.msk.bf16.mxu0 %vm2286_vm0, %v2285_v6 }
 0x731   : > { %2010 = vmatprep.subr.bf16.mxu0 %v2285_v6 }
 0x737   : > { %2001 = vmatmul.mubr.msk.bf16.vlgmr.msra.gmra.mxu0 %vm871_vm1, %v1246_v52 }
 0x738   : > { %2014 = vmatprep.mubr.msk.bf16.mxu0 %vm2286_vm0, %v2285_v6  ;;  %2011 = vmatpush3.bf16.msra.mxu0 %v2128_v36 }
 0x739   : > { %2012 = vmatprep.subr.bf16.mxu0 %v2285_v6 }
 0x73c   : > { %2013 = vmatpush3.bf16.msra.mxu0 %v2129_v37 }
 0x73d   : > { %2024 = vmatprep.subr.bf16.mxu0 %v2285_v6 }
 0x7ef   : > { %v1175_v55 = vpop.f32.mrf.mxu0 }
 0x7f1   : > { %v1988_v56 = vpop.f32.mrf.mxu0 }
 0x7f3   : > { %v1178_v57 = vpop.f32.mrf.mxu0 }
 0x7f4   : > { %v1182_v58 = vpack.c.bf16 %v1178_v57, %v1175_v55 }
 0x7f5   : > { %v1989_v59 = vpop.f32.mrf.mxu0 }
 0x7f6   : > { %1995 = vmatmul.mubr.msk.bf16.vlgmr.msra.gmra.mxu1 %vm871_vm1, %v1182_v58 }
 0x7f7   : > { %v1289_v60 = vpop.f32.mrf.mxu0  ;;  %2006 = vmatprep.mubr.msk.bf16.mxu1 %vm2286_vm0, %v2285_v6 }
 0x7f8   : > { %v1296_v61 = vmul.f32 0.17677669, %v1289_v60 }
 0x7f9   : > { %v2002_v62 = vpop.f32.mrf.mxu0 }
 0x7fa   : > { %v1298_v63 = vsel %vm921_vm2, %v1296_v61, -inf }
 0x7fb   : > { %1299 = vmax.xlane.f32.xlu1 %v1298_v63  ;;  %v1292_v0 = vpop.f32.mrf.mxu0 }
 0x7fc   : > { %v1297_v2 = vmul.f32 0.17677669, %v1292_v0 }
 0x7fd   : > { %v2003_v4 = vpop.f32.mrf.mxu0 }
 0x7fe   : > { %v1301_v5 = vsel %vm921_vm2, %v1297_v2, -inf  ;;  %v2130_v4 = vld [vmem:[%s2721_s6 + $0x38] sm:$0xff]  }
 0x7ff   : > { %1302 = vmax.xlane.f32.xlu0 %v1301_v5 }
 0x80c   : > { %1321 = vrot.lane.b32.xlu1 %v2578_v42, %s2288_s25 }
 0x810   : > { %1431 = vrot.lane.b32.xlu1 %v2576_v41, %s2289_s15  ;;  %v1801_v41 = vld [vmem:[#allocation8] ss:$0 sm:$0xff] }
 0x811   : > { %v859_v20 = vadd.f32 %v1801_v41, %v2426_v1  ;;  %v860_v22 = vadd.f32 %v1801_v41, %v2429_v3 }
 0x813   : > { %v1056_v21 = vadd.f32 %v2613_v17, %v859_v20  ;;  %v1057_v26 = vadd.f32 %v2615_v19, %v860_v22 }
 0x884   : > { %v1300_v7 = vpop.xlane.xlu1 %1299 }
 0x885   : > { %v1304_v8 = vsub.f32 %v1296_v61, %v1300_v7 }
 0x887   : > { %v1306_v9 = vmul.f32 1.442695, %v1304_v8 }
 0x888   : > { %v1322_v10 = vpop.permute.xlu1 %1321  ;;  %v1303_v11 = vpop.xlane.xlu0 %1302 }
 0x889   : > { %2156 = vpow2.f32 %v1306_v9  ;;  %v1305_v13 = vsub.f32 %v1297_v2, %v1303_v11  ;;  %2005 = vmatpush3.bf16.msra.mxu1 %v1322_v10 }
 0x88a   : > { %2018 = vmatprep.subr.bf16.mxu1 %v2285_v6 }
 0x88b   : > { %v1308_v14 = vmul.f32 1.442695, %v1305_v13 }
 0x88c   : > { %v1432_v19 = vpop.permute.xlu1 %1431 }
 0x88d   : > { %2158 = vpow2.f32 %v1308_v14 }
 0x896   : > { %v2157_v15 = vpop.eup %2156 }
 0x897   : > { %v1310_v12 = vsel %vm921_vm2, %v2157_v15, 0.0 }
 0x898   : > { %1311 = vadd.xlane.f32.xlu0 %v1310_v12 }
 0x89a   : > { %v2159_v16 = vpop.eup %2158 }
 0x89b   : > { %v1313_v18 = vsel %vm921_vm2, %v2159_v16, 0.0 }
 0x89c   : > { %1314 = vadd.xlane.f32.xlu0 %v1313_v18 }
 0x8b2   : > { %1433 = vrot.lane.b32.xlu0 %v2568_v32, %s2289_s15 }
 0x8b6   : > { %v1236_v23 = vpop.f32.mrf.mxu1 }
 0x8b7   : > { %v2661_v24 = vadd.f32 %v1236_v23, %v1056_v21 }
 0x8b8   : > { %v1996_v25 = vpop.f32.mrf.mxu1 }
 0x8ba   : > { %v1239_v27 = vpop.f32.mrf.mxu1 }
 0x8bb   : > { %v2664_v28 = vadd.f32 %v1239_v27, %v1057_v26 }
 0x8bc   : > { %v1997_v29 = vpop.f32.mrf.mxu1 }
 0x921   : > { %v1312_v30 = vpop.xlane.xlu0 %1311 }
 0x922   : > { %2160 = vrcp.f32 %v1312_v30 }
 0x925   : > { %v1315_v1 = vpop.xlane.xlu0 %1314 }
 0x926   : > { %2162 = vrcp.f32 %v1315_v1 }
 0x929   : > { %v1434_v34 = vpop.permute.xlu0 %1433 }
 0x92a   : > { %v1439_v35 = vsel %vm871_vm1, %v1434_v34, 0 }
 0x92f   : > { %v2161_v31 = vpop.eup %2160 }
 0x930   : > { %v1318_v33 = vmul.f32 %v2161_v31, %v2157_v15 }
 0x933   : > { %v2163_v32 = vpop.eup %2162 }
 0x934   : > { %v1319_v17 = vmul.f32 %v2163_v32, %v2159_v16  ;;  %v2131_v16 = vld [vmem:[%s2721_s6 + $0x30] sm:$0xff]  }
 0x936   : > { %v1320_v3 = vpack.c.bf16 %v1319_v17, %v1318_v33 }
 0x938   : > { %2007 = vmatmul.mubr.msk.bf16.vlgmr.msra.gmra.mxu1 %vm921_vm2, %v1320_v3 }
 0x939   : > { %2019 = vmatpush3.bf16.xpose.msra.mxu1 %v1439_v35  ;;  %2020 = vmatprep.mubr.msk.bf16.mxu1 %vm2286_vm0, %v2285_v6 }
 0x93a   : > { %2030 = vmatprep.subr.bf16.mxu1 %v2285_v6 }
 0x940   : > { %2021 = vmatmul.mubr.msk.bf16.vlgmr.msra.gmra.mxu1 %vm871_vm1, %v1432_v19 }
 0x941   : > { %2034 = vmatprep.mubr.msk.bf16.mxu1 %vm2286_vm0, %v2285_v6  ;;  %2031 = vmatpush3.bf16.msra.mxu1 %v2130_v4 }
 0x942   : > { %2032 = vmatprep.subr.bf16.mxu1 %v2285_v6 }
 0x945   : > { %2033 = vmatpush3.bf16.msra.mxu1 %v2131_v16 }
 0x9f8   : > { %v1361_v38 = vpop.f32.mrf.mxu1 }
 0x9fa   : > { %v2008_v39 = vpop.f32.mrf.mxu1 }
 0x9fc   : > { %v1364_v40 = vpop.f32.mrf.mxu1 }
 0x9fd   : > { %v1368_v43 = vpack.c.bf16 %v1364_v40, %v1361_v38 }
 0x9fe   : > { %v2009_v44 = vpop.f32.mrf.mxu1 }
 0x9ff   : > { %2015 = vmatmul.mubr.msk.bf16.vlgmr.msra.gmra.mxu0 %vm871_vm1, %v1368_v43 }
 0xa00   : > { %v1475_v45 = vpop.f32.mrf.mxu1  ;;  %2026 = vmatprep.mubr.msk.bf16.mxu0 %vm2286_vm0, %v2285_v6 }
 0xa01   : > { %v1482_v46 = vmul.f32 0.17677669, %v1475_v45 }
 0xa02   : > { %v2022_v47 = vpop.f32.mrf.mxu1 }
 0xa03   : > { %v1484_v48 = vsel %vm921_vm2, %v1482_v46, -inf }
 0xa04   : > { %1485 = vmax.xlane.f32.xlu1 %v1484_v48  ;;  %v1478_v49 = vpop.f32.mrf.mxu1 }
 0xa05   : > { %v1483_v50 = vmul.f32 0.17677669, %v1478_v49 }
 0xa06   : > { %v2023_v51 = vpop.f32.mrf.mxu1 }
 0xa07   : > { %v1487_v52 = vsel %vm921_vm2, %v1483_v50, -inf }
 0xa08   : > { %1488 = vmax.xlane.f32.xlu0 %v1487_v52 }
 0xa8d   : > { %v1486_v53 = vpop.xlane.xlu1 %1485 }
 0xa8e   : > { %v1490_v54 = vsub.f32 %v1482_v46, %v1486_v53 }
 0xa90   : > { %v1492_v55 = vmul.f32 1.442695, %v1490_v54 }
 0xa91   : > { %v1489_v56 = vpop.xlane.xlu0 %1488 }
 0xa92   : > { %2164 = vpow2.f32 %v1492_v55  ;;  %v1491_v57 = vsub.f32 %v1483_v50, %v1489_v56 }
 0xa94   : > { %v1494_v58 = vmul.f32 1.442695, %v1491_v57 }
 0xa96   : > { %2166 = vpow2.f32 %v1494_v58 }
 0xa9f   : > { %v2165_v59 = vpop.eup %2164 }
 0xaa0   : > { %v1496_v60 = vsel %vm921_vm2, %v2165_v59, 0.0 }
 0xaa1   : > { %1497 = vadd.xlane.f32.xlu0 %v1496_v60 }
 0xaa3   : > { %v2167_v61 = vpop.eup %2166 }
 0xaa4   : > { %v1499_v62 = vsel %vm921_vm2, %v2167_v61, 0.0 }
 0xaa5   : > { %1500 = vadd.xlane.f32.xlu1 %v1499_v62 }
 0xab7   : > { %1507 = vrot.lane.b32.xlu0 %v2578_v42, %s2289_s15 }
 0xabf   : > { %v1422_v63 = vpop.f32.mrf.mxu0 }
 0xac0   : > { %v1429_v0 = vadd.f32 %v1422_v63, %v2661_v24 }
 0xac1   : > { %v2016_v2 = vpop.f32.mrf.mxu0 }
 0xac3   : > { %v1425_v5 = vpop.f32.mrf.mxu0 }
 0xac4   : > { %v1430_v7 = vadd.f32 %v1425_v5, %v2664_v28 }
 0xac5   : > { %v2017_v8 = vpop.f32.mrf.mxu0 }
 0xb2a   : > { %v1498_v9 = vpop.xlane.xlu0 %1497 }
 0xb2b   : > { %2168 = vrcp.f32 %v1498_v9 }
 0xb2e   : > { %v1501_v10 = vpop.xlane.xlu1 %1500  ;;  %v1508_v11 = vpop.permute.xlu0 %1507 }
 0xb2f   : > { %2170 = vrcp.f32 %v1501_v10  ;;  %2025 = vmatpush3.bf16.msra.mxu0 %v1508_v11 }
 0xb38   : > { %v2169_v42 = vpop.eup %2168 }
 0xb39   : > { %v1504_v15 = vmul.f32 %v2169_v42, %v2165_v59 }
 0xb3c   : > { %v2171_v13 = vpop.eup %2170 }
 0xb3d   : > { %v1505_v14 = vmul.f32 %v2171_v13, %v2167_v61 }
 0xb3f   : > { %v1506_v12 = vpack.c.bf16 %v1505_v14, %v1504_v15 }
 0xb41   : > { %2027 = vmatmul.mubr.msk.bf16.vlgmr.msra.gmra.mxu0 %vm921_vm2, %v1506_v12 }
 0xc01   : > { %v1547_v6 = vpop.f32.mrf.mxu0 }
 0xc03   : > { %v2028_v18 = vpop.f32.mrf.mxu0 }
 0xc05   : > { %v1550_v41 = vpop.f32.mrf.mxu0 }
 0xc06   : > { %v1554_v20 = vpack.c.bf16 %v1550_v41, %v1547_v6 }
 0xc07   : > { %v2029_v21 = vpop.f32.mrf.mxu0 }
 0xc08   : > { %2035 = vmatmul.mubr.msk.bf16.vlgmr.msra.gmra.mxu1 %vm871_vm1, %v1554_v20 }
 0xcc8   : > { %v1608_v22 = vpop.f32.mrf.mxu1 }
 0xcc9   : > { %v1615_v23 = vadd.f32 %v1608_v22, %v1429_v0 }
 0xcca   : > { %v2036_v24 = vpop.f32.mrf.mxu1 }
 0xccb   : > { %1617 = vst [vmem:[%s401_s23] sm:$0xff] %v1615_v23 }
 0xccc   : > { %v1611_v25 = vpop.f32.mrf.mxu1 }
 0xccd   : > { %v1616_v26 = vadd.f32 %v1611_v25, %v1430_v7 }
 0xcce   : > { %v2037_v27 = vpop.f32.mrf.mxu1 }
 0xccf   : > { %1618 = vst [vmem:[%s401_s23 + $0x8] sm:$0xff] %v1616_v26 }
 0xcd0 PF: > { %s20_s29 = sadd.s32 1, %s2280_s29   ;;  %s2728_s27 = smov %s2276_s28 }
 0xcd1   : > { %p17_p2 = scmp.ge.s32.totalorder %s20_s29, 4   ;;  %s2729_s28 = smov %s2731_s13 }
 0xcd3   :  { %19 = sbr.rel (!%p17_p2) target bundleno = 3 (0x3), region = 102 }
 0xcd8   :  { %1649 = vsyncpa [#allocation5], 1 }
 0xcd9   :  { %1651 = vsyncpa [#allocation5 + $0x1], 1 }
 0xcda   :  { %1652 = vsyncpa [#allocation7], 1 }

// kernel: transformer_forward.13
= control target key start
LH: loop header
LB: loop body
LE: loop exit
PB: predicated region body
PF: predicated region fallthrough
CT: control target
= control target key end

     0   :  { %s2140_s27 = smov 0   ;;  %s2142_s28 = smov 0   ;;  %s2466_s0 = inlined_call_operand.vmem [shape: f32[2,16,128], index: 0, kind: input, shape index: {}, may-alias: {0,1}]   ;;  %s2467_s1 = inlined_call_operand.vmem [shape: f32[2,16,128], index: 1, kind: input, shape index: {}, may-alias: {0,1}]   ;;  %s2468_s2 = inlined_call_operand.vmem [shape: f32[1,128], index: 2, kind: input, shape index: {}]   ;;  %s2469_s3 = inlined_call_operand.vmem [shape: f32[1,128], index: 3, kind: input, shape index: {}]   ;;  %s2470_s4 = inlined_call_operand.vmem [shape: bf16[128,384], index: 4, kind: input, shape index: {}]   ;;  %s2471_s5 = inlined_call_operand.vmem [shape: f32[1,384], index: 5, kind: input, shape index: {}]   ;;  %s2472_s6 = inlined_call_operand.vmem [shape: bf16[128,128], index: 6, kind: input, shape index: {}]   ;;  %s2473_s7 = inlined_call_operand.vmem [shape: f32[1,128], index: 7, kind: input, shape index: {}]   ;;  %s2474_s8 = inlined_call_operand.vmem [shape: f32[2,16,128], index: 8, kind: output, shape index: {}]  }
   0x1   :  { %s2144_s29 = smov 0  }
   0x2 LB: > { %s30_s30 = sadd.s32 1, %s2084_s28  ;;  %p1684_p0 = scmp.ge.s32.totalorder %s2088_s29, 1  ;;  %s2088_s29 = sphi %s2144_s29, %s18_s29   ;;  %s2084_s28 = sphi %s2142_s28, %s2476_s28   ;;  %s2080_s27 = sphi %s2140_s27, %s2475_s27  }
   0x3   : > { %p32_p1 = scmp.ge.s32.totalorder %s30_s30, 2  ;;  %p293_p2 = scmp.lt.s32.totalorder %s2088_s29, 3 }
   0x5   : > { %s2478_s30 = smov (%p32_p1, %s30_s30), 0  ;;  %p294_p3 = pnand %p1684_p0, %p293_p2 }
   0x6   : > { %p341_p4 = scmp.lt.s32.totalorder (!%p294_p3), %s2080_s27, 1  ;;  %s2092_s20 = smov (!%p294_p3), 96  }
   0x7   : > { %297 = sbr.rel (%p294_p3) target bundleno = 3235 (0xca3), region = 52  ;;  %s2093_s25 = smov (!%p294_p3), 64  }
   0xc   : > { %s2480_s27 = smov (!%p341_p4, %s2080_s27), 1  ;;  %v1992_v4 = vld [vmem:[%s2470_s4 + $0xac] ss:$12 sps:$4 sm:$0xff]   ;;  %v1993_v5 = vld [vmem:[%s2470_s4 + $0xb0] ss:$12 sps:$4 sm:$0xff]   ;;  %v2090_v6 = vmov 0.0  }
   0xd   : > { %s2158_s9 = sshll.u32 %s2480_s27, 4  ;;  %1823 = vmatprep.subr.bf16.mxu0 %v2090_v6  ;;  %1843 = vmatprep.subr.bf16.mxu1 %v2090_v6  ;;  %v1994_v23 = vld [vmem:[%s2470_s4 + $0x94] ss:$12 sps:$4 sm:$0xff]   ;;  %v1995_v24 = vld [vmem:[%s2470_s4 + $0x98] ss:$12 sps:$4 sm:$0xff]   ;;  %vm2091_vm0 = vmmov 0  }
   0xe   : > { %s354_s12 = scalar_lea.vmem %s2467_s1, %s2158_s9  ;;  %s348_s15 = scalar_lea.vmem %s2466_s0, %s2158_s9  ;;  %1824 = vmatpush3.bf16.msra.mxu0 %v1992_v4  ;;  %1844 = vmatpush3.bf16.msra.mxu1 %v1993_v5  ;;  %v1996_v25 = vld [vmem:[%s2470_s4 + $0x7c] ss:$12 sps:$4 sm:$0xff]   ;;  %v1997_v26 = vld [vmem:[%s2470_s4 + $0x80] ss:$12 sps:$4 sm:$0xff]   ;;  %v1998_v27 = vld [vmem:[%s2470_s4 + $0x64] ss:$12 sps:$4 sm:$0xff]  }
   0xf   : > { %v370_v0 = vld [vmem:[%s354_s12] sm:$0xff]  ;;  %v371_v1 = vld [vmem:[%s354_s12 + $0x8] sm:$0xff]  ;;  %1825 = vmatprep.subr.bf16.mxu0 %v2090_v6  ;;  %1845 = vmatprep.subr.bf16.mxu1 %v2090_v6  ;;  %v2001_v30 = vld [vmem:[%s2470_s4 + $0x50] ss:$12 sps:$4 sm:$0xff]   ;;  %vm833_vm1 = vcmask 261120   ;;  %vm883_vm2 = vcmask 130048  }
  0x10   : > { %v2168_v2 = vld [vmem:[%s348_s15] sm:$0xff]  ;;  %374 = vadd.xlane.f32.xlu0 %v370_v0  ;;  %v2171_v3 = vld [vmem:[%s348_s15 + $0x8] sm:$0xff]  ;;  %1839 = vmatprep.mubr.msk.bf16.mxu0 %vm2091_vm0, %v2090_v6  ;;  %v2009_v61 = vld [vmem:[%s2470_s4 + $0x90] ss:$12 sps:$4 sm:$0xff]   ;;  %s2094_s12 = smov 32  }
  0x11   : > { %662 = vadd.xlane.f32.xlu1 %v2168_v2  ;;  %v1999_v28 = vld [vmem:[%s2470_s4 + $0x68] ss:$12 sps:$4 sm:$0xff]   ;;  %v2000_v29 = vld [vmem:[%s2470_s4 + $0x4c] ss:$12 sps:$4 sm:$0xff]   ;;  %1859 = vmatprep.mubr.msk.bf16.mxu1 %vm2091_vm0, %v2090_v6  ;;  %v2006_v35 = vld [vmem:[%s2470_s4 + $0x4] ss:$12 sps:$4 sm:$0xff]  }
  0x12   : > { %1826 = vmatpush3.bf16.msra.mxu0 %v1994_v23  ;;  %1846 = vmatpush3.bf16.msra.mxu1 %v1995_v24  ;;  %v2002_v31 = vld [vmem:[%s2470_s4 + $0x34] ss:$12 sps:$4 sm:$0xff]   ;;  %v2003_v32 = vld [vmem:[%s2470_s4 + $0x38] ss:$12 sps:$4 sm:$0xff]   ;;  %v2004_v33 = vld [vmem:[%s2470_s4 + $0x1c] ss:$12 sps:$4 sm:$0xff]  }
  0x13   : > { %1827 = vmatprep.subr.bf16.mxu0 %v2090_v6  ;;  %1847 = vmatprep.subr.bf16.mxu1 %v2090_v6  ;;  %v2005_v34 = vld [vmem:[%s2470_s4 + $0x20] ss:$12 sps:$4 sm:$0xff]   ;;  %v2007_v36 = vld [vmem:[%s2470_s4 + $0x8] ss:$12 sps:$4 sm:$0xff]   ;;  %v2010_v62 = vld [vmem:[%s2470_s4 + $0x78] ss:$12 sps:$4 sm:$0xff]  }
  0x14   : > { %376 = vadd.xlane.f32.xlu0 %v371_v1  ;;  %v1691_v45 = vld [vmem:[%s2468_s2] ss:$0 sm:$0xff]  ;;  %v2008_v57 = vld [vmem:[%s2470_s4 + $0xa8] ss:$12 sps:$4 sm:$0xff]   ;;  %v2013_v5 = vld [vmem:[%s2470_s4 + $0x30] ss:$12 sps:$4 sm:$0xff]  }
  0x15   : > { %664 = vadd.xlane.f32.xlu1 %v2171_v3  ;;  %v1692_v51 = vld [vmem:[%s2469_s3] ss:$0 sm:$0xff] }
  0x16   : > { %1828 = vmatpush3.bf16.msra.mxu0 %v1996_v25  ;;  %1848 = vmatpush3.bf16.msra.mxu1 %v1997_v26  ;;  %v2011_v63 = vld [vmem:[%s2470_s4 + $0x60] ss:$12 sps:$4 sm:$0xff]  }
  0x17   : > { %1829 = vmatprep.subr.bf16.mxu0 %v2090_v6  ;;  %1849 = vmatprep.subr.bf16.mxu1 %v2090_v6 }
  0x1a   : > { %1830 = vmatpush3.bf16.msra.mxu0 %v1998_v27  ;;  %1850 = vmatpush3.bf16.msra.mxu1 %v1999_v28 }
  0x1b   : > { %1831 = vmatprep.subr.bf16.mxu0 %v2090_v6  ;;  %1851 = vmatprep.subr.bf16.mxu1 %v2090_v6 }
  0x1e   : > { %1832 = vmatpush3.bf16.msra.mxu0 %v2000_v29  ;;  %1852 = vmatpush3.bf16.msra.mxu1 %v2001_v30 }
  0x1f   : > { %1833 = vmatprep.subr.bf16.mxu0 %v2090_v6  ;;  %1853 = vmatprep.subr.bf16.mxu1 %v2090_v6 }
  0x22   : > { %1834 = vmatpush3.bf16.msra.mxu0 %v2002_v31  ;;  %1854 = vmatpush3.bf16.msra.mxu1 %v2003_v32 }
  0x23   : > { %1835 = vmatprep.subr.bf16.mxu0 %v2090_v6  ;;  %1855 = vmatprep.subr.bf16.mxu1 %v2090_v6 }
  0x26   : > { %1836 = vmatpush3.bf16.msra.mxu0 %v2004_v33  ;;  %1856 = vmatpush3.bf16.msra.mxu1 %v2005_v34 }
  0x27   : > { %1837 = vmatprep.subr.bf16.mxu0 %v2090_v6  ;;  %1857 = vmatprep.subr.bf16.mxu1 %v2090_v6 }
  0x2a   : > { %1838 = vmatpush3.bf16.msra.mxu0 %v2006_v35  ;;  %1858 = vmatpush3.bf16.msra.mxu1 %v2007_v36  ;;  %v1717_v35 = vld [vmem:[%s2471_s5] ss:$0 sm:$0xff] }
  0x2b   : > { %1863 = vmatprep.subr.bf16.mxu0 %v2090_v6  ;;  %1883 = vmatprep.subr.bf16.mxu1 %v2090_v6 }
  0x99   : > { %v375_v7 = vpop.xlane.xlu0 %374 }
  0x9a   : > { %v663_v8 = vpop.xlane.xlu1 %662  ;;  %v379_v9 = vmul.f32 0.0078125, %v375_v7 }
  0x9b   : > { %v667_v10 = vmul.f32 0.0078125, %v663_v8 }
  0x9c   : > { %v2184_v11 = vsub.f32 %v370_v0, %v379_v9  ;;  %v2012_v0 = vld [vmem:[%s2470_s4 + $0x48] ss:$12 sps:$4 sm:$0xff]   ;;  %v2014_v9 = vld [vmem:[%s2470_s4 + $0x18] ss:$12 sps:$4 sm:$0xff]  }
  0x9d   : > { %v2187_v12 = vsub.f32 %v2168_v2, %v667_v10  ;;  %v377_v13 = vpop.xlane.xlu0 %376 }
  0x9e   : > { %v665_v14 = vpop.xlane.xlu1 %664  ;;  %v380_v15 = vmul.f32 0.0078125, %v377_v13  ;;  %v383_v16 = vmul.f32 %v2184_v11, %v2184_v11  ;;  %v2015_v13 = vld [vmem:[%s2470_s4] ss:$12 sps:$4 sm:$0xff]  }
  0x9f   : > { %v668_v17 = vmul.f32 0.0078125, %v665_v14  ;;  %v671_v20 = vmul.f32 %v2187_v12, %v2187_v12 }
  0xa0   : > { %v2191_v18 = vsub.f32 %v371_v1, %v380_v15  ;;  %385 = vadd.xlane.f32.xlu0 %v383_v16 }
  0xa1   : > { %v2194_v19 = vsub.f32 %v2171_v3, %v668_v17 }
  0xa2   : > { %v384_v21 = vmul.f32 %v2191_v18, %v2191_v18 }
  0xa3   : > { %v672_v22 = vmul.f32 %v2194_v19, %v2194_v19 }
  0xa4   : > { %387 = vadd.xlane.f32.xlu1 %v384_v21  ;;  %673 = vadd.xlane.f32.xlu0 %v671_v20 }
  0xa8   : > { %675 = vadd.xlane.f32.xlu1 %v672_v22 }
 0x129   : > { %v386_v37 = vpop.xlane.xlu0 %385 }
 0x12a   : > { %v389_v38 = vmul.f32 0.0078125, %v386_v37 }
 0x12c   : > { %v391_v39 = vadd.f32 1e-05, %v389_v38 }
 0x12d   : > { %v388_v40 = vpop.xlane.xlu1 %387  ;;  %v674_v50 = vpop.xlane.xlu0 %673 }
 0x12e   : > { %2026 = vrsqrt.f32 %v391_v39  ;;  %v390_v41 = vmul.f32 0.0078125, %v388_v40  ;;  %v677_v54 = vmul.f32 0.0078125, %v674_v50 }
 0x130   : > { %v392_v42 = vadd.f32 1e-05, %v390_v41  ;;  %v679_v60 = vadd.f32 1e-05, %v677_v54 }
 0x131   : > { %v676_v47 = vpop.xlane.xlu1 %675 }
 0x132   : > { %2028 = vrsqrt.f32 %v392_v42  ;;  %v678_v52 = vmul.f32 0.0078125, %v676_v47 }
 0x134   : > { %v680_v58 = vadd.f32 1e-05, %v678_v52 }
 0x136   : > { %2030 = vrsqrt.f32 %v680_v58 }
 0x137   : > { %2032 = vrsqrt.f32 %v679_v60 }
 0x13b   : > { %v2027_v43 = vpop.eup %2026 }
 0x13c   : > { %v395_v44 = vmul.f32 %v2027_v43, %v2184_v11 }
 0x13e   : > { %v403_v49 = vmul.f32 %v1691_v45, %v395_v44 }
 0x13f   : > { %v2029_v46 = vpop.eup %2028 }
 0x140   : > { %v396_v48 = vmul.f32 %v2029_v46, %v2191_v18  ;;  %v411_v55 = vadd.f32 %v1692_v51, %v403_v49  ;;  %v1693_v18 = vld [vmem:[%s2471_s5 + $0x1] ss:$0 sm:$0xff] }
 0x142   : > { %v404_v53 = vmul.f32 %v1691_v45, %v396_v48 }
 0x143   : > { %v2031_v1 = vpop.eup %2030 }
 0x144   : > { %v412_v56 = vadd.f32 %v1692_v51, %v404_v53  ;;  %v2033_v4 = vpop.eup %2032  ;;  %v684_v7 = vmul.f32 %v2031_v1, %v2194_v19  ;;  %v1704_v19 = vld [vmem:[%s2471_s5 + $0x2] ss:$0 sm:$0xff] }
 0x145   : > { %v683_v8 = vmul.f32 %v2033_v4, %v2187_v12 }
 0x146   : > { %v413_v59 = vpack.c.bf16 %v412_v56, %v411_v55  ;;  %v692_v10 = vmul.f32 %v1691_v45, %v684_v7 }
 0x147   : > { %v691_v11 = vmul.f32 %v1691_v45, %v683_v8  ;;  %v2019_v8 = vld [vmem:[%s2472_s6] sm:$0xff]  }
 0x148   : > { %1840 = vmatmul.mubr.bf16.vlgmr.msra.gmra.mxu0 %v413_v59  ;;  %1860 = vmatmul.mubr.bf16.vlgmr.msra.gmra.mxu1 %v413_v59  ;;  %v700_v14 = vadd.f32 %v1692_v51, %v692_v10 }
 0x149   : > { %1864 = vmatpush3.bf16.msra.mxu0 %v2008_v57  ;;  %1879 = vmatprep.mubr.msk.bf16.mxu0 %vm2091_vm0, %v2090_v6  ;;  %v699_v15 = vadd.f32 %v1692_v51, %v691_v11 }
 0x14a   : > { %1865 = vmatprep.subr.bf16.mxu0 %v2090_v6  ;;  %1885 = vmatprep.mubr.msk.bf16.mxu1 %vm2091_vm0, %v2090_v6 }
 0x14b   : > { %v701_v12 = vpack.c.bf16 %v700_v14, %v699_v15 }
 0x14d   : > { %1866 = vmatpush3.bf16.msra.mxu0 %v2009_v61 }
 0x14e   : > { %1867 = vmatprep.subr.bf16.mxu0 %v2090_v6 }
 0x151   : > { %1868 = vmatpush3.bf16.msra.mxu0 %v2010_v62 }
 0x152   : > { %1869 = vmatprep.subr.bf16.mxu0 %v2090_v6 }
 0x155   : > { %1870 = vmatpush3.bf16.msra.mxu0 %v2011_v63 }
 0x156   : > { %1871 = vmatprep.subr.bf16.mxu0 %v2090_v6 }
 0x159   : > { %1872 = vmatpush3.bf16.msra.mxu0 %v2012_v0 }
 0x15a   : > { %1873 = vmatprep.subr.bf16.mxu0 %v2090_v6 }
 0x15d   : > { %1874 = vmatpush3.bf16.msra.mxu0 %v2013_v5  ;;  %v2018_v5 = vld [vmem:[%s2472_s6 + $0x8] sm:$0xff]  }
 0x15e   : > { %1875 = vmatprep.subr.bf16.mxu0 %v2090_v6 }
 0x161   : > { %1876 = vmatpush3.bf16.msra.mxu0 %v2014_v9 }
 0x162   : > { %1877 = vmatprep.subr.bf16.mxu0 %v2090_v6 }
 0x165   : > { %1878 = vmatpush3.bf16.msra.mxu0 %v2015_v13 }
 0x166   : > { %1909 = vmatprep.subr.bf16.mxu0 %v2090_v6 }
 0x168   : > { %1880 = vmatmul.mubr.bf16.vlgmr.msra.gmra.mxu0 %v701_v12 }
 0x169   : > { %1911 = vmatprep.mubr.msk.bf16.mxu0 %vm2091_vm0, %v2090_v6 }
 0x208   : > { %v519_v16 = vpop.f32.mrf.mxu0  ;;  %v641_v17 = vpop.f32.mrf.mxu1 }
 0x209   : > { %v520_v24 = vadd.f32 %v1693_v18, %v519_v16  ;;  %v642_v25 = vadd.f32 %v1704_v19, %v641_v17 }
 0x20a   : > { %v1841_v20 = vpop.f32.mrf.mxu0  ;;  %v1861_v21 = vpop.f32.mrf.mxu1 }
 0x20c   : > { %v522_v22 = vpop.f32.mrf.mxu0  ;;  %v644_v23 = vpop.f32.mrf.mxu1 }
 0x20d   : > { %v523_v26 = vadd.f32 %v1693_v18, %v522_v22  ;;  %v645_v27 = vadd.f32 %v1704_v19, %v644_v23 }
 0x20e   : > { %v1842_v28 = vpop.f32.mrf.mxu0  ;;  %v1862_v29 = vpop.f32.mrf.mxu1 }
 0x20f   : > { %v1761_v30 = vpack.c.bf16 %v523_v26, %v520_v24  ;;  %v1766_v31 = vpack.c.bf16 %v645_v27, %v642_v25 }
 0x211   : > { %1762 = vst [vmem:[#allocation2] sm:$0xff] %v1761_v30   ;;  %1767 = vst [vmem:[#allocation3] sm:$0xff] %v1766_v31  }
 0x218   : > { %v2316_v32 = vld [vmem:[#allocation2] sm:$0xff]   ;;  %v2326_v42 = vld [vmem:[#allocation3] sm:$0xff]  }
 0x219   : > { %v838_v33 = vsel %vm833_vm1, %v2316_v32, 0 }
 0x21a   : > { %1884 = vmatpush3.bf16.xpose.msra.mxu1 %v838_v33 }
 0x21b   : > { %1889 = vmatprep.subr.bf16.mxu1 %v2090_v6 }
 0x228   : > { %v807_v34 = vpop.f32.mrf.mxu0 }
 0x229   : > { %v808_v38 = vadd.f32 %v1717_v35, %v807_v34 }
 0x22a   : > { %v1881_v36 = vpop.f32.mrf.mxu0 }
 0x22c   : > { %v810_v37 = vpop.f32.mrf.mxu0 }
 0x22d   : > { %v811_v39 = vadd.f32 %v1717_v35, %v810_v37 }
 0x22e   : > { %v1882_v40 = vpop.f32.mrf.mxu0 }
 0x22f   : > { %v2324_v41 = vpack.c.bf16 %v811_v39, %v808_v38 }
 0x231   : > { %1886 = vmatmul.mubr.msk.bf16.vlgmr.msra.gmra.mxu1 %vm833_vm1, %v2324_v41 }
 0x232   : > { %1890 = vmatpush3.bf16.msra.mxu1 %v2326_v42  ;;  %1891 = vmatprep.mubr.msk.bf16.mxu1 %vm2091_vm0, %v2090_v6 }
 0x233   : > { %1895 = vmatprep.subr.bf16.mxu1 %v2090_v6 }
 0x2f1   : > { %v874_v43 = vpop.f32.mrf.mxu1 }
 0x2f2   : > { %v881_v44 = vmul.f32 0.17677669, %v874_v43 }
 0x2f3   : > { %v1887_v45 = vpop.f32.mrf.mxu1 }
 0x2f4   : > { %v884_v46 = vsel %vm883_vm2, %v881_v44, -inf }
 0x2f5   : > { %885 = vmax.xlane.f32.xlu0 %v884_v46  ;;  %v877_v47 = vpop.f32.mrf.mxu1 }
 0x2f6   : > { %v882_v48 = vmul.f32 0.17677669, %v877_v47 }
 0x2f7   : > { %v1888_v49 = vpop.f32.mrf.mxu1 }
 0x2f8   : > { %v887_v50 = vsel %vm883_vm2, %v882_v48, -inf }
 0x2f9   : > { %888 = vmax.xlane.f32.xlu1 %v887_v50 }
 0x37e   : > { %v886_v51 = vpop.xlane.xlu0 %885 }
 0x37f   : > { %v890_v52 = vsub.f32 %v881_v44, %v886_v51 }
 0x381   : > { %v892_v53 = vmul.f32 1.442695, %v890_v52 }
 0x382   : > { %v889_v54 = vpop.xlane.xlu1 %888 }
 0x383   : > { %2034 = vpow2.f32 %v892_v53  ;;  %v891_v55 = vsub.f32 %v882_v48, %v889_v54  ;;  %v2020_v53 = vld [vmem:[%s2472_s6 + $0x18] sm:$0xff]   ;;  %v2021_v54 = vld [vmem:[%s2472_s6 + $0x10] sm:$0xff]  }
 0x385   : > { %v894_v56 = vmul.f32 1.442695, %v891_v55 }
 0x387   : > { %2036 = vpow2.f32 %v894_v56 }
 0x390   : > { %v2035_v57 = vpop.eup %2034 }
 0x391   : > { %v896_v58 = vsel %vm883_vm2, %v2035_v57, 0.0 }
 0x392   : > { %897 = vadd.xlane.f32.xlu0 %v896_v58 }
 0x394   : > { %v2037_v59 = vpop.eup %2036 }
 0x395   : > { %v899_v60 = vsel %vm883_vm2, %v2037_v59, 0.0 }
 0x396   : > { %900 = vadd.xlane.f32.xlu1 %v899_v60 }
 0x3a7   : > { %1021 = vrot.lane.b32.xlu1 %v2324_v41, %s2092_s20 }
 0x3a8   : > { %1023 = vrot.lane.b32.xlu0 %v2316_v32, %s2092_s20 }
 0x41b   : > { %v898_v61 = vpop.xlane.xlu0 %897 }
 0x41c   : > { %2038 = vrcp.f32 %v898_v61 }
 0x41f   : > { %v901_v62 = vpop.xlane.xlu1 %900  ;;  %v1024_v11 = vpop.permute.xlu0 %1023 }
 0x420   : > { %2040 = vrcp.f32 %v901_v62  ;;  %v1029_v12 = vsel %vm833_vm1, %v1024_v11, 0 }
 0x423   : > { %v1022_v16 = vpop.permute.xlu1 %1021 }
 0x429   : > { %v2039_v63 = vpop.eup %2038 }
 0x42a   : > { %v904_v1 = vmul.f32 %v2039_v63, %v2035_v57 }
 0x42d   : > { %v2041_v0 = vpop.eup %2040 }
 0x42e   : > { %v905_v4 = vmul.f32 %v2041_v0, %v2037_v59 }
 0x430   : > { %v906_v7 = vpack.c.bf16 %v905_v4, %v904_v1 }
 0x432   : > { %1892 = vmatmul.mubr.msk.bf16.vlgmr.msra.gmra.mxu1 %vm883_vm2, %v906_v7 }
 0x433   : > { %1896 = vmatpush3.bf16.msra.mxu1 %v2018_v5  ;;  %1899 = vmatprep.mubr.msk.bf16.mxu1 %vm2091_vm0, %v2090_v6 }
 0x434   : > { %1897 = vmatprep.subr.bf16.mxu1 %v2090_v6 }
 0x437   : > { %1898 = vmatpush3.bf16.msra.mxu1 %v2019_v8 }
 0x438   : > { %1903 = vmatprep.subr.bf16.mxu1 %v2090_v6 }
 0x4f2   : > { %v950_v9 = vpop.f32.mrf.mxu1 }
 0x4f4   : > { %v1893_v10 = vpop.f32.mrf.mxu1 }
 0x4f6   : > { %v953_v13 = vpop.f32.mrf.mxu1 }
 0x4f7   : > { %v957_v14 = vpack.c.bf16 %v953_v13, %v950_v9 }
 0x4f8   : > { %v1894_v15 = vpop.f32.mrf.mxu1 }
 0x4f9   : > { %1900 = vmatmul.mubr.msk.bf16.vlgmr.msra.gmra.mxu1 %vm833_vm1, %v957_v14 }
 0x4fa   : > { %1904 = vmatpush3.bf16.xpose.msra.mxu1 %v1029_v12  ;;  %1905 = vmatprep.mubr.msk.bf16.mxu1 %vm2091_vm0, %v2090_v6 }
 0x4fb   : > { %1915 = vmatprep.subr.bf16.mxu1 %v2090_v6 }
 0x501   : > { %1906 = vmatmul.mubr.msk.bf16.vlgmr.msra.gmra.mxu1 %vm833_vm1, %v1022_v16 }
 0x502   : > { %1919 = vmatprep.mubr.msk.bf16.mxu1 %vm2091_vm0, %v2090_v6  ;;  %1916 = vmatpush3.bf16.msra.mxu1 %v2020_v53 }
 0x503   : > { %1917 = vmatprep.subr.bf16.mxu1 %v2090_v6 }
 0x506   : > { %1918 = vmatpush3.bf16.msra.mxu1 %v2021_v54 }
 0x507   : > { %1929 = vmatprep.subr.bf16.mxu1 %v2090_v6 }
 0x5b9   : > { %v2361_v17 = vpop.f32.mrf.mxu1 }
 0x5bb   : > { %v1901_v18 = vpop.f32.mrf.mxu1 }
 0x5bd   : > { %v2363_v19 = vpop.f32.mrf.mxu1 }
 0x5bf   : > { %v1902_v20 = vpop.f32.mrf.mxu1 }
 0x5c1   : > { %v1065_v21 = vpop.f32.mrf.mxu1 }
 0x5c2   : > { %v1072_v22 = vmul.f32 0.17677669, %v1065_v21 }
 0x5c3   : > { %v1907_v23 = vpop.f32.mrf.mxu1 }
 0x5c4   : > { %v1074_v24 = vsel %vm883_vm2, %v1072_v22, -inf }
 0x5c5   : > { %1075 = vmax.xlane.f32.xlu1 %v1074_v24  ;;  %v1068_v25 = vpop.f32.mrf.mxu1 }
 0x5c6   : > { %v1073_v26 = vmul.f32 0.17677669, %v1068_v25 }
 0x5c7   : > { %v1908_v27 = vpop.f32.mrf.mxu1 }
 0x5c8   : > { %v1077_v28 = vsel %vm883_vm2, %v1073_v26, -inf }
 0x5c9   : > { %1078 = vmax.xlane.f32.xlu0 %v1077_v28 }
 0x64e   : > { %v1076_v29 = vpop.xlane.xlu1 %1075 }
 0x64f   : > { %v1080_v30 = vsub.f32 %v1072_v22, %v1076_v29 }
 0x651   : > { %v1082_v31 = vmul.f32 1.442695, %v1080_v30 }
 0x652   : > { %v1079_v33 = vpop.xlane.xlu0 %1078 }
 0x653   : > { %2042 = vpow2.f32 %v1082_v31  ;;  %v1081_v34 = vsub.f32 %v1073_v26, %v1079_v33 }
 0x655   : > { %v1084_v35 = vmul.f32 1.442695, %v1081_v34 }
 0x657   : > { %2044 = vpow2.f32 %v1084_v35 }
 0x660   : > { %v2043_v36 = vpop.eup %2042 }
 0x661   : > { %v1086_v37 = vsel %vm883_vm2, %v2043_v36, 0.0 }
 0x662   : > { %1087 = vadd.xlane.f32.xlu0 %v1086_v37  ;;  %v2023_v37 = vld [vmem:[%s2472_s6 + $0x20] sm:$0xff]  }
 0x664   : > { %v2045_v38 = vpop.eup %2044 }
 0x665   : > { %v1089_v39 = vsel %vm883_vm2, %v2045_v38, 0.0 }
 0x666   : > { %1090 = vadd.xlane.f32.xlu1 %v1089_v39 }
 0x677   : > { %1209 = vrot.lane.b32.xlu1 %v2316_v32, %s2093_s25 }
 0x678   : > { %1097 = vrot.lane.b32.xlu0 %v2326_v42, %s2092_s20 }
 0x67b   : > { %1207 = vrot.lane.b32.xlu1 %v2324_v41, %s2093_s25 }
 0x6eb   : > { %v1088_v40 = vpop.xlane.xlu0 %1087 }
 0x6ec   : > { %2046 = vrcp.f32 %v1088_v40 }
 0x6ef   : > { %v1091_v43 = vpop.xlane.xlu1 %1090  ;;  %v1098_v44 = vpop.permute.xlu0 %1097 }
 0x6f0   : > { %2048 = vrcp.f32 %v1091_v43  ;;  %1910 = vmatpush3.bf16.msra.mxu0 %v1098_v44 }
 0x6f1   : > { %1923 = vmatprep.subr.bf16.mxu0 %v2090_v6 }
 0x6f3   : > { %v1210_v49 = vpop.permute.xlu1 %1209 }
 0x6f4   : > { %v1215_v51 = vsel %vm833_vm1, %v1210_v49, 0 }
 0x6f7   : > { %v1208_v52 = vpop.permute.xlu1 %1207 }
 0x6f9   : > { %v2047_v45 = vpop.eup %2046 }
 0x6fa   : > { %v1094_v47 = vmul.f32 %v2047_v45, %v2043_v36  ;;  %v2022_v36 = vld [vmem:[%s2472_s6 + $0x28] sm:$0xff]  }
 0x6fd   : > { %v2049_v46 = vpop.eup %2048 }
 0x6fe   : > { %v1095_v48 = vmul.f32 %v2049_v46, %v2045_v38 }
 0x700   : > { %v1096_v50 = vpack.c.bf16 %v1095_v48, %v1094_v47 }
 0x702   : > { %1912 = vmatmul.mubr.msk.bf16.vlgmr.msra.gmra.mxu0 %vm883_vm2, %v1096_v50 }
 0x703   : > { %1924 = vmatpush3.bf16.xpose.msra.mxu0 %v1215_v51  ;;  %1925 = vmatprep.mubr.msk.bf16.mxu0 %vm2091_vm0, %v2090_v6 }
 0x704   : > { %1935 = vmatprep.subr.bf16.mxu0 %v2090_v6 }
 0x70a   : > { %1926 = vmatmul.mubr.msk.bf16.vlgmr.msra.gmra.mxu0 %vm833_vm1, %v1208_v52 }
 0x70b   : > { %1939 = vmatprep.mubr.msk.bf16.mxu0 %vm2091_vm0, %v2090_v6  ;;  %1936 = vmatpush3.bf16.msra.mxu0 %v2022_v36 }
 0x70c   : > { %1937 = vmatprep.subr.bf16.mxu0 %v2090_v6 }
 0x70f   : > { %1938 = vmatpush3.bf16.msra.mxu0 %v2023_v37 }
 0x710   : > { %1949 = vmatprep.subr.bf16.mxu0 %v2090_v6 }
 0x7c2   : > { %v1137_v55 = vpop.f32.mrf.mxu0 }
 0x7c4   : > { %v1913_v56 = vpop.f32.mrf.mxu0 }
 0x7c6   : > { %v1140_v57 = vpop.f32.mrf.mxu0 }
 0x7c7   : > { %v1144_v58 = vpack.c.bf16 %v1140_v57, %v1137_v55 }
 0x7c8   : > { %v1914_v59 = vpop.f32.mrf.mxu0 }
 0x7c9   : > { %1920 = vmatmul.mubr.msk.bf16.vlgmr.msra.gmra.mxu1 %vm833_vm1, %v1144_v58 }
 0x7ca   : > { %v1251_v60 = vpop.f32.mrf.mxu0  ;;  %1931 = vmatprep.mubr.msk.bf16.mxu1 %vm2091_vm0, %v2090_v6 }
 0x7cb   : > { %v1258_v61 = vmul.f32 0.17677669, %v1251_v60 }
 0x7cc   : > { %v1927_v62 = vpop.f32.mrf.mxu0 }
 0x7cd   : > { %v1260_v63 = vsel %vm883_vm2, %v1258_v61, -inf }
 0x7ce   : > { %1261 = vmax.xlane.f32.xlu1 %v1260_v63  ;;  %v1254_v0 = vpop.f32.mrf.mxu0 }
 0x7cf   : > { %v1259_v1 = vmul.f32 0.17677669, %v1254_v0 }
 0x7d0   : > { %v1928_v4 = vpop.f32.mrf.mxu0 }
 0x7d1   : > { %v1263_v5 = vsel %vm883_vm2, %v1259_v1, -inf  ;;  %v2024_v4 = vld [vmem:[%s2472_s6 + $0x38] sm:$0xff]  }
 0x7d2   : > { %1264 = vmax.xlane.f32.xlu0 %v1263_v5 }
 0x7df   : > { %1283 = vrot.lane.b32.xlu1 %v2326_v42, %s2093_s25  ;;  %s363_s25 = scalar_lea.vmem %s2474_s8, %s2158_s9 }
 0x7e3   : > { %1393 = vrot.lane.b32.xlu1 %v2324_v41, %s2094_s12  ;;  %v1726_v41 = vld [vmem:[%s2473_s7] ss:$0 sm:$0xff] }
 0x7e4   : > { %v821_v20 = vadd.f32 %v1726_v41, %v2168_v2  ;;  %v822_v22 = vadd.f32 %v1726_v41, %v2171_v3 }
 0x7e6   : > { %v1018_v21 = vadd.f32 %v2361_v17, %v821_v20  ;;  %v1019_v26 = vadd.f32 %v2363_v19, %v822_v22 }
 0x857   : > { %v1262_v7 = vpop.xlane.xlu1 %1261 }
 0x858   : > { %v1266_v8 = vsub.f32 %v1258_v61, %v1262_v7 }
 0x85a   : > { %v1268_v9 = vmul.f32 1.442695, %v1266_v8 }
 0x85b   : > { %v1284_v10 = vpop.permute.xlu1 %1283  ;;  %v1265_v11 = vpop.xlane.xlu0 %1264 }
 0x85c   : > { %2050 = vpow2.f32 %v1268_v9  ;;  %v1267_v13 = vsub.f32 %v1259_v1, %v1265_v11  ;;  %1930 = vmatpush3.bf16.msra.mxu1 %v1284_v10 }
 0x85d   : > { %1943 = vmatprep.subr.bf16.mxu1 %v2090_v6 }
 0x85e   : > { %v1270_v14 = vmul.f32 1.442695, %v1267_v13 }
 0x85f   : > { %v1394_v19 = vpop.permute.xlu1 %1393 }
 0x860   : > { %2052 = vpow2.f32 %v1270_v14 }
 0x869   : > { %v2051_v15 = vpop.eup %2050 }
 0x86a   : > { %v1272_v12 = vsel %vm883_vm2, %v2051_v15, 0.0 }
 0x86b   : > { %1273 = vadd.xlane.f32.xlu0 %v1272_v12 }
 0x86d   : > { %v2053_v16 = vpop.eup %2052 }
 0x86e   : > { %v1275_v18 = vsel %vm883_vm2, %v2053_v16, 0.0 }
 0x86f   : > { %1276 = vadd.xlane.f32.xlu0 %v1275_v18 }
 0x885   : > { %1395 = vrot.lane.b32.xlu0 %v2316_v32, %s2094_s12 }
 0x889   : > { %v1198_v23 = vpop.f32.mrf.mxu1 }
 0x88a   : > { %v2412_v24 = vadd.f32 %v1198_v23, %v1018_v21 }
 0x88b   : > { %v1921_v25 = vpop.f32.mrf.mxu1 }
 0x88d   : > { %v1201_v27 = vpop.f32.mrf.mxu1 }
 0x88e   : > { %v2415_v28 = vadd.f32 %v1201_v27, %v1019_v26 }
 0x88f   : > { %v1922_v29 = vpop.f32.mrf.mxu1 }
 0x8f4   : > { %v1274_v30 = vpop.xlane.xlu0 %1273 }
 0x8f5   : > { %2054 = vrcp.f32 %v1274_v30 }
 0x8f8   : > { %v1277_v2 = vpop.xlane.xlu0 %1276 }
 0x8f9   : > { %2056 = vrcp.f32 %v1277_v2 }
 0x8fc   : > { %v1396_v34 = vpop.permute.xlu0 %1395 }
 0x8fd   : > { %v1401_v35 = vsel %vm833_vm1, %v1396_v34, 0 }
 0x902   : > { %v2055_v31 = vpop.eup %2054 }
 0x903   : > { %v1280_v33 = vmul.f32 %v2055_v31, %v2051_v15 }
 0x906   : > { %v2057_v32 = vpop.eup %2056 }
 0x907   : > { %v1281_v17 = vmul.f32 %v2057_v32, %v2053_v16  ;;  %v2025_v16 = vld [vmem:[%s2472_s6 + $0x30] sm:$0xff]  }
 0x909   : > { %v1282_v3 = vpack.c.bf16 %v1281_v17, %v1280_v33 }
 0x90b   : > { %1932 = vmatmul.mubr.msk.bf16.vlgmr.msra.gmra.mxu1 %vm883_vm2, %v1282_v3 }
 0x90c   : > { %1944 = vmatpush3.bf16.xpose.msra.mxu1 %v1401_v35  ;;  %1945 = vmatprep.mubr.msk.bf16.mxu1 %vm2091_vm0, %v2090_v6 }
 0x90d   : > { %1955 = vmatprep.subr.bf16.mxu1 %v2090_v6 }
 0x913   : > { %1946 = vmatmul.mubr.msk.bf16.vlgmr.msra.gmra.mxu1 %vm833_vm1, %v1394_v19 }
 0x914   : > { %1959 = vmatprep.mubr.msk.bf16.mxu1 %vm2091_vm0, %v2090_v6  ;;  %1956 = vmatpush3.bf16.msra.mxu1 %v2024_v4 }
 0x915   : > { %1957 = vmatprep.subr.bf16.mxu1 %v2090_v6 }
 0x918   : > { %1958 = vmatpush3.bf16.msra.mxu1 %v2025_v16 }
 0x9cb   : > { %v1323_v38 = vpop.f32.mrf.mxu1 }
 0x9cd   : > { %v1933_v39 = vpop.f32.mrf.mxu1 }
 0x9cf   : > { %v1326_v40 = vpop.f32.mrf.mxu1 }
 0x9d0   : > { %v1330_v43 = vpack.c.bf16 %v1326_v40, %v1323_v38 }
 0x9d1   : > { %v1934_v44 = vpop.f32.mrf.mxu1 }
 0x9d2   : > { %1940 = vmatmul.mubr.msk.bf16.vlgmr.msra.gmra.mxu0 %vm833_vm1, %v1330_v43 }
 0x9d3   : > { %v1437_v45 = vpop.f32.mrf.mxu1  ;;  %1951 = vmatprep.mubr.msk.bf16.mxu0 %vm2091_vm0, %v2090_v6 }
 0x9d4   : > { %v1444_v46 = vmul.f32 0.17677669, %v1437_v45 }
 0x9d5   : > { %v1947_v47 = vpop.f32.mrf.mxu1 }
 0x9d6   : > { %v1446_v48 = vsel %vm883_vm2, %v1444_v46, -inf }
 0x9d7   : > { %1447 = vmax.xlane.f32.xlu1 %v1446_v48  ;;  %v1440_v49 = vpop.f32.mrf.mxu1 }
 0x9d8   : > { %v1445_v50 = vmul.f32 0.17677669, %v1440_v49 }
 0x9d9   : > { %v1948_v51 = vpop.f32.mrf.mxu1 }
 0x9da   : > { %v1449_v52 = vsel %vm883_vm2, %v1445_v50, -inf }
 0x9db   : > { %1450 = vmax.xlane.f32.xlu0 %v1449_v52 }
 0xa60   : > { %v1448_v53 = vpop.xlane.xlu1 %1447 }
 0xa61   : > { %v1452_v54 = vsub.f32 %v1444_v46, %v1448_v53 }
 0xa63   : > { %v1454_v55 = vmul.f32 1.442695, %v1452_v54 }
 0xa64   : > { %v1451_v56 = vpop.xlane.xlu0 %1450 }
 0xa65   : > { %2058 = vpow2.f32 %v1454_v55  ;;  %v1453_v57 = vsub.f32 %v1445_v50, %v1451_v56 }
 0xa67   : > { %v1456_v58 = vmul.f32 1.442695, %v1453_v57 }
 0xa69   : > { %2060 = vpow2.f32 %v1456_v58 }
 0xa72   : > { %v2059_v59 = vpop.eup %2058 }
 0xa73   : > { %v1458_v60 = vsel %vm883_vm2, %v2059_v59, 0.0 }
 0xa74   : > { %1459 = vadd.xlane.f32.xlu0 %v1458_v60 }
 0xa76   : > { %v2061_v61 = vpop.eup %2060 }
 0xa77   : > { %v1461_v62 = vsel %vm883_vm2, %v2061_v61, 0.0 }
 0xa78   : > { %1462 = vadd.xlane.f32.xlu1 %v1461_v62 }
 0xa8a   : > { %1469 = vrot.lane.b32.xlu0 %v2326_v42, %s2094_s12 }
 0xa92   : > { %v1384_v63 = vpop.f32.mrf.mxu0 }
 0xa93   : > { %v1391_v0 = vadd.f32 %v1384_v63, %v2412_v24 }
 0xa94   : > { %v1941_v1 = vpop.f32.mrf.mxu0 }
 0xa96   : > { %v1387_v5 = vpop.f32.mrf.mxu0 }
 0xa97   : > { %v1392_v7 = vadd.f32 %v1387_v5, %v2415_v28 }
 0xa98   : > { %v1942_v8 = vpop.f32.mrf.mxu0 }
 0xafd   : > { %v1460_v9 = vpop.xlane.xlu0 %1459 }
 0xafe   : > { %2062 = vrcp.f32 %v1460_v9 }
 0xb01   : > { %v1463_v10 = vpop.xlane.xlu1 %1462  ;;  %v1470_v11 = vpop.permute.xlu0 %1469 }
 0xb02   : > { %2064 = vrcp.f32 %v1463_v10  ;;  %1950 = vmatpush3.bf16.msra.mxu0 %v1470_v11 }
 0xb0b   : > { %v2063_v42 = vpop.eup %2062 }
 0xb0c   : > { %v1466_v15 = vmul.f32 %v2063_v42, %v2059_v59 }
 0xb0f   : > { %v2065_v13 = vpop.eup %2064 }
 0xb10   : > { %v1467_v14 = vmul.f32 %v2065_v13, %v2061_v61 }
 0xb12   : > { %v1468_v12 = vpack.c.bf16 %v1467_v14, %v1466_v15 }
 0xb14   : > { %1952 = vmatmul.mubr.msk.bf16.vlgmr.msra.gmra.mxu0 %vm883_vm2, %v1468_v12 }
 0xbd4   : > { %v1509_v6 = vpop.f32.mrf.mxu0 }
 0xbd6   : > { %v1953_v18 = vpop.f32.mrf.mxu0 }
 0xbd8   : > { %v1512_v41 = vpop.f32.mrf.mxu0 }
 0xbd9   : > { %v1516_v20 = vpack.c.bf16 %v1512_v41, %v1509_v6 }
 0xbda   : > { %v1954_v21 = vpop.f32.mrf.mxu0 }
 0xbdb   : > { %1960 = vmatmul.mubr.msk.bf16.vlgmr.msra.gmra.mxu1 %vm833_vm1, %v1516_v20 }
 0xc9b   : > { %v1570_v22 = vpop.f32.mrf.mxu1 }
 0xc9c   : > { %v1577_v23 = vadd.f32 %v1570_v22, %v1391_v0 }
 0xc9d   : > { %v1961_v24 = vpop.f32.mrf.mxu1 }
 0xc9e   : > { %1579 = vst [vmem:[%s363_s25] sm:$0xff] %v1577_v23 }
 0xc9f   : > { %v1573_v25 = vpop.f32.mrf.mxu1 }
 0xca0   : > { %v1578_v26 = vadd.f32 %v1573_v25, %v1392_v7 }
 0xca1   : > { %v1962_v27 = vpop.f32.mrf.mxu1 }
 0xca2   : > { %1580 = vst [vmem:[%s363_s25 + $0x8] sm:$0xff] %v1578_v26 }
 0xca3 PF: > { %s18_s29 = sadd.s32 1, %s2088_s29   ;;  %s2475_s27 = smov %s2084_s28 }
 0xca4   : > { %p15_p5 = scmp.ge.s32.totalorder %s18_s29, 4   ;;  %s2476_s28 = smov %s2478_s30 }
 0xca6   :  { %17 = sbr.rel (!%p15_p5) target bundleno = 2 (0x2), region = 89 }

// kernel: transformer_forward.21
= control target key start
LH: loop header
LB: loop body
LE: loop exit
PB: predicated region body
PF: predicated region fallthrough
CT: control target
= control target key end

     0   :  { %s338_s0 = inlined_call_operand.vmem [shape: bf16[32,128], index: 0, kind: input, shape index: {}]   ;;  %s339_s1 = inlined_call_operand.vmem [shape: bf16[128,128], index: 1, kind: input, shape index: {}]   ;;  %s340_s2 = inlined_call_operand.vmem [shape: f32[1,128], index: 2, kind: input, shape index: {}]   ;;  %s341_s3 = inlined_call_operand.hbm [shape: f32[32,128], index: 3, kind: output, shape index: {}]  }
   0x1   :  { %v247_v0 = vld [vmem:[%s339_s1 + $0x38] sm:$0xff]   ;;  %v248_v1 = vld [vmem:[%s339_s1 + $0x30] sm:$0xff]   ;;  %v249_v2 = vld [vmem:[%s339_s1 + $0x28] sm:$0xff]  }
   0x2   :  { %224 = vmatprep.subr.bf16.mxu0 %v247_v0  ;;  %v250_v3 = vld [vmem:[%s339_s1 + $0x20] sm:$0xff]  }
   0x3   :  { %225 = vmatpush3.bf16.msra.mxu0 %v247_v0  ;;  %v255_v4 = vld [vmem:[%s338_s0] sm:$0xff]  }
   0x4   :  { %226 = vmatprep.subr.bf16.mxu0 %v248_v1  ;;  %240 = vmatprep.mubr.bf16.mxu0 %v255_v4 }
   0x7   :  { %227 = vmatpush3.bf16.msra.mxu0 %v248_v1 }
   0x8   :  { %228 = vmatprep.subr.bf16.mxu0 %v249_v2 }
   0x9   :  { %8 = vsyncpa [#allocation4], 0  ;;  %v251_v5 = vld [vmem:[%s339_s1 + $0x18] sm:$0xff]   ;;  %v252_v6 = vld [vmem:[%s339_s1 + $0x10] sm:$0xff]   ;;  %s279_s7 = smov [#allocation3]  }
   0xa   :  { %v253_v7 = vld [vmem:[%s339_s1 + $0x8] sm:$0xff]   ;;  %v254_v8 = vld [vmem:[%s339_s1] sm:$0xff]   ;;  %s192_s8 = sshll.u32 %s279_s7, 4  ;;  %s193_s8 = int_to_ptr.vmem [resolvable:$true] %s192_s8 }
   0xb   :  { %229 = vmatpush3.bf16.msra.mxu0 %v249_v2  ;;  %v256_v9 = vld [vmem:[%s338_s0 + $0x8] sm:$0xff]   ;;  %v213_v10 = vld [vmem:[%s340_s2] ss:$0 sm:$0xff]  ;;  %s257_s0 = scalar_lea.vmem %s193_s8, 512  ;;  %p262_p1 = scmp.lt.s32.totalorder %s193_s8, %s193_s8 }
   0xc   :  { %230 = vmatprep.subr.bf16.mxu0 %v250_v3  ;;  %p258_p0 = scmp.ne.s32.totalorder %s193_s8, %s257_s0  ;;  %p263_p2 = scmp.lt.s32.totalorder %s257_s0, %s257_s0 }
   0xe   :  { %p264_p3 = por %p263_p2, %p262_p1 }
   0xf   :  { %231 = vmatpush3.bf16.msra.mxu0 %v250_v3 }
  0x10   :  { %232 = vmatprep.subr.bf16.mxu0 %v251_v5  ;;  %p265_p4 = pnand %p264_p3, %p258_p0 }
  0x13   :  { %233 = vmatpush3.bf16.msra.mxu0 %v251_v5 }
  0x14   :  { %234 = vmatprep.subr.bf16.mxu0 %v252_v6 }
  0x17   :  { %235 = vmatpush3.bf16.msra.mxu0 %v252_v6 }
  0x18   :  { %236 = vmatprep.subr.bf16.mxu0 %v253_v7 }
  0x1b   :  { %237 = vmatpush3.bf16.msra.mxu0 %v253_v7 }
  0x1c   :  { %238 = vmatprep.subr.bf16.mxu0 %v254_v8 }
  0x1f   :  { %239 = vmatpush3.bf16.msra.mxu0 %v254_v8 }
  0x22   :  { %241 = vmatmul.mubr.bf16.vlgmr.msra.gmra.mxu0 %v256_v9 }
  0xe2   :  { %v242_v11 = vpop.f32.mrf.mxu0 }
  0xe3   :  { %v181_v12 = vadd.f32 %v242_v11, %v213_v10 }
  0xe4   :  { %v142_v13 = vpop.f32.mrf.mxu0 }
  0xe5   :  { %185 = vst [vmem:[#allocation3 + $0x10] sm:$0xff] %v181_v12  ;;  %v179_v14 = vadd.f32 %v213_v10, %v142_v13 }
  0xe6   :  { %v243_v15 = vpop.f32.mrf.mxu0 }
  0xe7   :  { %183 = vst [vmem:[#allocation3] sm:$0xff] %v179_v14  ;;  %v182_v16 = vadd.f32 %v243_v15, %v213_v10 }
  0xe8   :  { %v145_v17 = vpop.f32.mrf.mxu0 }
  0xe9   :  { %186 = vst [vmem:[#allocation3 + $0x18] sm:$0xff] %v182_v16  ;;  %v180_v18 = vadd.f32 %v213_v10, %v145_v17 }
  0xeb   :  { %184 = vst [vmem:[#allocation3 + $0x8] sm:$0xff] %v180_v18 }
  0xec   :  { %268 = shalt.err (!%p265_p4)
}
  0xed   :  { %s280_s1 = smov 128   ;;  %s281_s2 = smov 8  }
  0xee   :  { %198 = dma.vmem_to_hbm [thread:$0]  %s193_s8, 512, %s341_s3, [#allocation4], %s280_s1, %s280_s1, %s281_s2  }
  0xef   :  { %277 = dma.done.wait [#allocation4], 512  }
  0xf0   :  { %278 = vsyncadd [#allocation4], 4294966784 }
  0xf1   :  { %202 = vsyncpa [#allocation4], 1 }

// kernel: transformer_forward.16
= control target key start
LH: loop header
LB: loop body
LE: loop exit
PB: predicated region body
PF: predicated region fallthrough
CT: control target
= control target key end

     0   :  { %s2157_s13 = smov 0   ;;  %s2159_s14 = smov 0   ;;  %s2473_s0 = inlined_call_operand.vmem [shape: f32[2,16,128], index: 0, kind: input, shape index: {}]   ;;  %s2474_s1 = inlined_call_operand.vmem [shape: f32[2,16,128], index: 1, kind: input, shape index: {}]   ;;  %s2475_s2 = inlined_call_operand.vmem [shape: f32[1,128], index: 2, kind: input, shape index: {}]   ;;  %s2476_s3 = inlined_call_operand.vmem [shape: f32[1,128], index: 3, kind: input, shape index: {}]   ;;  %s2477_s4 = inlined_call_operand.vmem [shape: bf16[128,128], index: 4, kind: input, shape index: {}]   ;;  %s2478_s5 = inlined_call_operand.vmem [shape: f32[1,128], index: 5, kind: input, shape index: {}]   ;;  %s2479_s6 = inlined_call_operand.vmem [shape: bf16[128,256], index: 6, kind: input, shape index: {}]   ;;  %s2480_s7 = inlined_call_operand.vmem [shape: f32[1,256], index: 7, kind: input, shape index: {}]   ;;  %s2481_s8 = inlined_call_operand.vmem [shape: bf16[128,128], index: 8, kind: input, shape index: {}]   ;;  %s2482_s9 = inlined_call_operand.vmem [shape: f32[1,128], index: 9, kind: input, shape index: {}]   ;;  %s2483_s10 = inlined_call_operand.vmem [shape: f32[2,16,128], index: 10, kind: output, shape index: {}]  }
   0x1   :  { %s2161_s15 = smov 0  }
   0x2 LB: > { %s32_s16 = sadd.s32 1, %s2091_s14  ;;  %p1697_p0 = scmp.ge.s32.totalorder %s2095_s15, 1  ;;  %s2095_s15 = sphi %s2161_s15, %s20_s15   ;;  %s2091_s14 = sphi %s2159_s14, %s2485_s14   ;;  %s2087_s13 = sphi %s2157_s13, %s2484_s13  }
   0x3   : > { %p34_p1 = scmp.ge.s32.totalorder %s32_s16, 2  ;;  %p343_p2 = scmp.lt.s32.totalorder %s2095_s15, 3 }
   0x5   : > { %s2487_s16 = smov (%p34_p1, %s32_s16), 0  ;;  %p344_p3 = pnand %p1697_p0, %p343_p2 }
   0x6   : > { %p395_p4 = scmp.lt.s32.totalorder (!%p344_p3), %s2087_s13, 1  ;;  %s2099_s18 = smov (!%p344_p3), 96  }
   0x7   : > { %347 = sbr.rel (%p344_p3) target bundleno = 3203 (0xc83), region = 60  ;;  %s2100_s23 = smov (!%p344_p3), 64  }
   0x8   : > { %s2101_s28 = smov (!%p344_p3), 32  }
   0xc   : > { %s2489_s13 = smov (!%p395_p4, %s2087_s13), 1  ;;  %v2003_v2 = vld [vmem:[%s2479_s6 + $0x70] ss:$8 sps:$4 sm:$0xff]   ;;  %v2097_v3 = vmov 0.0   ;;  %vm2098_vm0 = vmmov 0   ;;  %v2013_v24 = vld [vmem:[%s2477_s4 + $0x28] sm:$0xff]  }
   0xd   : > { %s2175_s17 = sshll.u32 %s2489_s13, 4  ;;  %1834 = vmatprep.subr.bf16.mxu0 %v2097_v3  ;;  %1850 = vmatprep.mubr.msk.bf16.mxu0 %vm2098_vm0, %v2097_v3  ;;  %v2004_v4 = vld [vmem:[%s2479_s6 + $0x60] ss:$8 sps:$4 sm:$0xff]   ;;  %v2005_v5 = vld [vmem:[%s2479_s6 + $0x50] ss:$8 sps:$4 sm:$0xff]   ;;  %vm846_vm1 = vcmask 261120  }
   0xe   : > { %s402_s20 = scalar_lea.vmem %s2473_s0, %s2175_s17  ;;  %1835 = vmatpush3.bf16.msra.mxu0 %v2003_v2  ;;  %1854 = vmatprep.subr.bf16.mxu1 %v2097_v3  ;;  %v2006_v6 = vld [vmem:[%s2479_s6 + $0x40] ss:$8 sps:$4 sm:$0xff]   ;;  %v2007_v7 = vld [vmem:[%s2479_s6 + $0x30] ss:$8 sps:$4 sm:$0xff]   ;;  %s408_s21 = scalar_lea.vmem %s2474_s1, %s2175_s17  ;;  %v2019_v30 = vld [vmem:[%s2479_s6 + $0x74] ss:$8 sps:$4 sm:$0xff]  }
   0xf   : > { %v2181_v0 = vld [vmem:[%s402_s20] sm:$0xff]  ;;  %v2183_v1 = vld [vmem:[%s402_s20 + $0x8] sm:$0xff]  ;;  %1836 = vmatprep.subr.bf16.mxu0 %v2097_v3  ;;  %1870 = vmatprep.mubr.msk.bf16.mxu1 %vm2098_vm0, %v2097_v3  ;;  %v2009_v9 = vld [vmem:[%s2479_s6 + $0x10] ss:$8 sps:$4 sm:$0xff]   ;;  %vm896_vm2 = vcmask 130048   ;;  %s417_s25 = scalar_lea.vmem %s2483_s10, %s2175_s17 }
  0x10   : > { %675 = vadd.xlane.f32.xlu0 %v2181_v0  ;;  %v2008_v8 = vld [vmem:[%s2479_s6 + $0x20] ss:$8 sps:$4 sm:$0xff]   ;;  %v2011_v14 = vld [vmem:[%s2477_s4 + $0x38] sm:$0xff]   ;;  %v2012_v23 = vld [vmem:[%s2477_s4 + $0x30] sm:$0xff]   ;;  %1855 = vmatpush3.bf16.msra.mxu1 %v2019_v30 }
  0x11   : > { %v2010_v10 = vld [vmem:[%s2479_s6] ss:$8 sps:$4 sm:$0xff]   ;;  %v2015_v26 = vld [vmem:[%s2477_s4 + $0x18] sm:$0xff]   ;;  %v2016_v27 = vld [vmem:[%s2477_s4 + $0x10] sm:$0xff]   ;;  %1856 = vmatprep.subr.bf16.mxu1 %v2097_v3 }
  0x12   : > { %1837 = vmatpush3.bf16.msra.mxu0 %v2004_v4  ;;  %v424_v11 = vld [vmem:[%s408_s21] sm:$0xff]  ;;  %v425_v12 = vld [vmem:[%s408_s21 + $0x8] sm:$0xff]  ;;  %v2021_v32 = vld [vmem:[%s2479_s6 + $0x54] ss:$8 sps:$4 sm:$0xff]  }
  0x13   : > { %1838 = vmatprep.subr.bf16.mxu0 %v2097_v3  ;;  %v426_v13 = vpack.c.bf16 %v425_v12, %v424_v11  ;;  %v2014_v25 = vld [vmem:[%s2477_s4 + $0x20] sm:$0xff]   ;;  %v2017_v28 = vld [vmem:[%s2477_s4 + $0x8] sm:$0xff]   ;;  %v2023_v34 = vld [vmem:[%s2479_s6 + $0x34] ss:$8 sps:$4 sm:$0xff]  }
  0x14   : > { %677 = vadd.xlane.f32.xlu0 %v2183_v1  ;;  %v2018_v29 = vld [vmem:[%s2477_s4] sm:$0xff]   ;;  %v2025_v36 = vld [vmem:[%s2479_s6 + $0x14] ss:$8 sps:$4 sm:$0xff]  }
  0x15   : > { %v2020_v31 = vld [vmem:[%s2479_s6 + $0x64] ss:$8 sps:$4 sm:$0xff]   ;;  %v1704_v38 = vld [vmem:[%s2480_s7] ss:$0 sm:$0xff]  ;;  %v1715_v4 = vld [vmem:[%s2480_s7 + $0x1] ss:$0 sm:$0xff] }
  0x16   : > { %1839 = vmatpush3.bf16.msra.mxu0 %v2005_v5  ;;  %1857 = vmatpush3.bf16.msra.mxu1 %v2020_v31  ;;  %v2022_v33 = vld [vmem:[%s2479_s6 + $0x44] ss:$8 sps:$4 sm:$0xff]   ;;  %v1726_v56 = vld [vmem:[%s2475_s2] ss:$0 sm:$0xff] }
  0x17   : > { %1840 = vmatprep.subr.bf16.mxu0 %v2097_v3  ;;  %1858 = vmatprep.subr.bf16.mxu1 %v2097_v3  ;;  %v2024_v35 = vld [vmem:[%s2479_s6 + $0x24] ss:$8 sps:$4 sm:$0xff]   ;;  %v1727_v60 = vld [vmem:[%s2476_s3] ss:$0 sm:$0xff] }
  0x18   : > { %v2026_v37 = vld [vmem:[%s2479_s6 + $0x4] ss:$8 sps:$4 sm:$0xff]  }
  0x1a   : > { %1841 = vmatpush3.bf16.msra.mxu0 %v2006_v6  ;;  %1859 = vmatpush3.bf16.msra.mxu1 %v2021_v32 }
  0x1b   : > { %1842 = vmatprep.subr.bf16.mxu0 %v2097_v3  ;;  %1860 = vmatprep.subr.bf16.mxu1 %v2097_v3 }
  0x1e   : > { %1843 = vmatpush3.bf16.msra.mxu0 %v2007_v7  ;;  %1861 = vmatpush3.bf16.msra.mxu1 %v2022_v33 }
  0x1f   : > { %1844 = vmatprep.subr.bf16.mxu0 %v2097_v3  ;;  %1862 = vmatprep.subr.bf16.mxu1 %v2097_v3 }
  0x22   : > { %1845 = vmatpush3.bf16.msra.mxu0 %v2008_v8  ;;  %1863 = vmatpush3.bf16.msra.mxu1 %v2023_v34 }
  0x23   : > { %1846 = vmatprep.subr.bf16.mxu0 %v2097_v3  ;;  %1864 = vmatprep.subr.bf16.mxu1 %v2097_v3 }
  0x26   : > { %1847 = vmatpush3.bf16.msra.mxu0 %v2009_v9  ;;  %1865 = vmatpush3.bf16.msra.mxu1 %v2024_v35 }
  0x27   : > { %1848 = vmatprep.subr.bf16.mxu0 %v2097_v3  ;;  %1866 = vmatprep.subr.bf16.mxu1 %v2097_v3 }
  0x2a   : > { %1849 = vmatpush3.bf16.msra.mxu0 %v2010_v10  ;;  %1867 = vmatpush3.bf16.msra.mxu1 %v2025_v36 }
  0x2b   : > { %1874 = vmatprep.subr.bf16.mxu0 %v2097_v3  ;;  %1868 = vmatprep.subr.bf16.mxu1 %v2097_v3 }
  0x2d   : > { %1851 = vmatmul.mubr.bf16.vlgmr.msra.gmra.mxu0 %v426_v13 }
  0x2e   : > { %1875 = vmatpush3.bf16.msra.mxu0 %v2011_v14  ;;  %1890 = vmatprep.mubr.msk.bf16.mxu0 %vm2098_vm0, %v2097_v3 }
  0x2f   : > { %1876 = vmatprep.subr.bf16.mxu0 %v2097_v3  ;;  %1869 = vmatpush3.bf16.msra.mxu1 %v2026_v37 }
  0x30   : > { %1894 = vmatprep.subr.bf16.mxu1 %v2097_v3 }
  0x32   : > { %1877 = vmatpush3.bf16.msra.mxu0 %v2012_v23  ;;  %1871 = vmatmul.mubr.bf16.vlgmr.msra.gmra.mxu1 %v426_v13  ;;  %v1728_v13 = vld [vmem:[%s2478_s5] ss:$0 sm:$0xff] }
  0x33   : > { %1878 = vmatprep.subr.bf16.mxu0 %v2097_v3  ;;  %1896 = vmatprep.mubr.msk.bf16.mxu1 %vm2098_vm0, %v2097_v3 }
  0x36   : > { %1879 = vmatpush3.bf16.msra.mxu0 %v2013_v24 }
  0x37   : > { %1880 = vmatprep.subr.bf16.mxu0 %v2097_v3 }
  0x3a   : > { %1881 = vmatpush3.bf16.msra.mxu0 %v2014_v25 }
  0x3b   : > { %1882 = vmatprep.subr.bf16.mxu0 %v2097_v3 }
  0x3e   : > { %1883 = vmatpush3.bf16.msra.mxu0 %v2015_v26 }
  0x3f   : > { %1884 = vmatprep.subr.bf16.mxu0 %v2097_v3 }
  0x42   : > { %1885 = vmatpush3.bf16.msra.mxu0 %v2016_v27 }
  0x43   : > { %1886 = vmatprep.subr.bf16.mxu0 %v2097_v3 }
  0x46   : > { %1887 = vmatpush3.bf16.msra.mxu0 %v2017_v28 }
  0x47   : > { %1888 = vmatprep.subr.bf16.mxu0 %v2097_v3 }
  0x4a   : > { %1889 = vmatpush3.bf16.msra.mxu0 %v2018_v29 }
  0x4b   : > { %1920 = vmatprep.subr.bf16.mxu0 %v2097_v3 }
  0x99   : > { %v676_v15 = vpop.xlane.xlu0 %675 }
  0x9a   : > { %v680_v16 = vmul.f32 0.0078125, %v676_v15 }
  0x9c   : > { %v2236_v17 = vsub.f32 %v2181_v0, %v680_v16 }
  0x9d   : > { %v678_v18 = vpop.xlane.xlu0 %677 }
  0x9e   : > { %v681_v19 = vmul.f32 0.0078125, %v678_v18  ;;  %v684_v20 = vmul.f32 %v2236_v17, %v2236_v17 }
  0xa0   : > { %v2241_v21 = vsub.f32 %v2183_v1, %v681_v19  ;;  %686 = vadd.xlane.f32.xlu1 %v684_v20 }
  0xa2   : > { %v685_v22 = vmul.f32 %v2241_v21, %v2241_v21 }
  0xa4   : > { %688 = vadd.xlane.f32.xlu1 %v685_v22 }
  0xed   : > { %v532_v39 = vpop.f32.mrf.mxu0 }
  0xee   : > { %v533_v41 = vadd.f32 %v1704_v38, %v532_v39 }
  0xef   : > { %v1852_v40 = vpop.f32.mrf.mxu0 }
  0xf1   : > { %v535_v42 = vpop.f32.mrf.mxu0 }
  0xf2   : > { %v536_v43 = vadd.f32 %v1704_v38, %v535_v42  ;;  %v654_v5 = vpop.f32.mrf.mxu1 }
  0xf3   : > { %v1853_v44 = vpop.f32.mrf.mxu0  ;;  %v655_v7 = vadd.f32 %v1715_v4, %v654_v5 }
  0xf4   : > { %v1772_v45 = vpack.c.bf16 %v536_v43, %v533_v41  ;;  %v1872_v6 = vpop.f32.mrf.mxu1 }
  0xf6   : > { %1773 = vst [vmem:[#allocation2] sm:$0xff] %v1772_v45   ;;  %v657_v8 = vpop.f32.mrf.mxu1  ;;  %v2029_v45 = vld [vmem:[%s2481_s8 + $0x8] sm:$0xff]  }
  0xf7   : > { %v658_v9 = vadd.f32 %v1715_v4, %v657_v8 }
  0xf8   : > { %v1873_v10 = vpop.f32.mrf.mxu1 }
  0xf9   : > { %v1777_v11 = vpack.c.bf16 %v658_v9, %v655_v7 }
  0xfb   : > { %1778 = vst [vmem:[#allocation3] sm:$0xff] %v1777_v11  }
  0xfd   : > { %v2310_v46 = vld [vmem:[#allocation2] sm:$0xff]  }
  0xfe   : > { %v851_v47 = vsel %vm846_vm1, %v2310_v46, 0 }
  0xff   : > { %1895 = vmatpush3.bf16.xpose.msra.mxu1 %v851_v47 }
 0x100   : > { %1900 = vmatprep.subr.bf16.mxu1 %v2097_v3 }
 0x102   : > { %v2337_v20 = vld [vmem:[#allocation3] sm:$0xff]  }
 0x129   : > { %v687_v48 = vpop.xlane.xlu1 %686 }
 0x12a   : > { %v690_v49 = vmul.f32 0.0078125, %v687_v48  ;;  %v2030_v48 = vld [vmem:[%s2481_s8] sm:$0xff]  }
 0x12c   : > { %v692_v50 = vadd.f32 1e-05, %v690_v49 }
 0x12d   : > { %v689_v51 = vpop.xlane.xlu1 %688 }
 0x12e   : > { %2037 = vrsqrt.f32 %v692_v50  ;;  %v691_v52 = vmul.f32 0.0078125, %v689_v51 }
 0x130   : > { %v693_v53 = vadd.f32 1e-05, %v691_v52 }
 0x132   : > { %2039 = vrsqrt.f32 %v693_v53 }
 0x13b   : > { %v2038_v54 = vpop.eup %2037 }
 0x13c   : > { %v696_v55 = vmul.f32 %v2038_v54, %v2236_v17 }
 0x13e   : > { %v704_v59 = vmul.f32 %v1726_v56, %v696_v55 }
 0x13f   : > { %v2040_v57 = vpop.eup %2039 }
 0x140   : > { %v697_v58 = vmul.f32 %v2040_v57, %v2241_v21  ;;  %v712_v62 = vadd.f32 %v1727_v60, %v704_v59 }
 0x142   : > { %v705_v61 = vmul.f32 %v1726_v56, %v697_v58 }
 0x144   : > { %v713_v63 = vadd.f32 %v1727_v60, %v705_v61 }
 0x146   : > { %v714_v2 = vpack.c.bf16 %v713_v63, %v712_v62 }
 0x148   : > { %1891 = vmatmul.mubr.bf16.vlgmr.msra.gmra.mxu0 %v714_v2 }
 0x149   : > { %1922 = vmatprep.mubr.msk.bf16.mxu0 %vm2098_vm0, %v2097_v3 }
 0x208   : > { %v820_v12 = vpop.f32.mrf.mxu0 }
 0x209   : > { %v821_v16 = vadd.f32 %v1728_v13, %v820_v12 }
 0x20a   : > { %v1892_v14 = vpop.f32.mrf.mxu0 }
 0x20c   : > { %v823_v15 = vpop.f32.mrf.mxu0 }
 0x20d   : > { %v824_v17 = vadd.f32 %v1728_v13, %v823_v15 }
 0x20e   : > { %v1893_v18 = vpop.f32.mrf.mxu0 }
 0x20f   : > { %v2331_v19 = vpack.c.bf16 %v824_v17, %v821_v16 }
 0x211   : > { %1897 = vmatmul.mubr.msk.bf16.vlgmr.msra.gmra.mxu1 %vm846_vm1, %v2331_v19 }
 0x212   : > { %1902 = vmatprep.mubr.msk.bf16.mxu1 %vm2098_vm0, %v2097_v3  ;;  %1901 = vmatpush3.bf16.msra.mxu1 %v2337_v20 }
 0x213   : > { %1906 = vmatprep.subr.bf16.mxu1 %v2097_v3 }
 0x2d1   : > { %v887_v21 = vpop.f32.mrf.mxu1 }
 0x2d2   : > { %v894_v22 = vmul.f32 0.17677669, %v887_v21 }
 0x2d3   : > { %v1898_v23 = vpop.f32.mrf.mxu1 }
 0x2d4   : > { %v897_v24 = vsel %vm896_vm2, %v894_v22, -inf }
 0x2d5   : > { %898 = vmax.xlane.f32.xlu0 %v897_v24  ;;  %v890_v25 = vpop.f32.mrf.mxu1 }
 0x2d6   : > { %v895_v26 = vmul.f32 0.17677669, %v890_v25 }
 0x2d7   : > { %v1899_v27 = vpop.f32.mrf.mxu1 }
 0x2d8   : > { %v900_v28 = vsel %vm896_vm2, %v895_v26, -inf }
 0x2d9   : > { %901 = vmax.xlane.f32.xlu1 %v900_v28 }
 0x35e   : > { %v899_v29 = vpop.xlane.xlu0 %898 }
 0x35f   : > { %v903_v30 = vsub.f32 %v894_v22, %v899_v29 }
 0x361   : > { %v905_v31 = vmul.f32 1.442695, %v903_v30 }
 0x362   : > { %v902_v32 = vpop.xlane.xlu1 %901 }
 0x363   : > { %2041 = vpow2.f32 %v905_v31  ;;  %v904_v33 = vsub.f32 %v895_v26, %v902_v32  ;;  %v2031_v31 = vld [vmem:[%s2481_s8 + $0x18] sm:$0xff]   ;;  %v2032_v32 = vld [vmem:[%s2481_s8 + $0x10] sm:$0xff]  }
 0x365   : > { %v907_v34 = vmul.f32 1.442695, %v904_v33 }
 0x367   : > { %2043 = vpow2.f32 %v907_v34 }
 0x370   : > { %v2042_v35 = vpop.eup %2041 }
 0x371   : > { %v909_v36 = vsel %vm896_vm2, %v2042_v35, 0.0 }
 0x372   : > { %910 = vadd.xlane.f32.xlu0 %v909_v36 }
 0x374   : > { %v2044_v37 = vpop.eup %2043 }
 0x375   : > { %v912_v38 = vsel %vm896_vm2, %v2044_v37, 0.0 }
 0x376   : > { %913 = vadd.xlane.f32.xlu1 %v912_v38 }
 0x387   : > { %1034 = vrot.lane.b32.xlu1 %v2331_v19, %s2099_s18 }
 0x388   : > { %1036 = vrot.lane.b32.xlu0 %v2310_v46, %s2099_s18 }
 0x3fb   : > { %v911_v39 = vpop.xlane.xlu0 %910 }
 0x3fc   : > { %2045 = vrcp.f32 %v911_v39 }
 0x3ff   : > { %v914_v40 = vpop.xlane.xlu1 %913  ;;  %v1037_v51 = vpop.permute.xlu0 %1036 }
 0x400   : > { %2047 = vrcp.f32 %v914_v40  ;;  %v1042_v55 = vsel %vm846_vm1, %v1037_v51, 0 }
 0x403   : > { %v1035_v56 = vpop.permute.xlu1 %1034 }
 0x409   : > { %v2046_v41 = vpop.eup %2045 }
 0x40a   : > { %v917_v43 = vmul.f32 %v2046_v41, %v2042_v35 }
 0x40d   : > { %v2048_v42 = vpop.eup %2047 }
 0x40e   : > { %v918_v44 = vmul.f32 %v2048_v42, %v2044_v37 }
 0x410   : > { %v919_v47 = vpack.c.bf16 %v918_v44, %v917_v43 }
 0x412   : > { %1903 = vmatmul.mubr.msk.bf16.vlgmr.msra.gmra.mxu1 %vm896_vm2, %v919_v47 }
 0x413   : > { %1907 = vmatpush3.bf16.msra.mxu1 %v2029_v45  ;;  %1910 = vmatprep.mubr.msk.bf16.mxu1 %vm2098_vm0, %v2097_v3 }
 0x414   : > { %1908 = vmatprep.subr.bf16.mxu1 %v2097_v3 }
 0x417   : > { %1909 = vmatpush3.bf16.msra.mxu1 %v2030_v48 }
 0x418   : > { %1914 = vmatprep.subr.bf16.mxu1 %v2097_v3 }
 0x4d2   : > { %v963_v49 = vpop.f32.mrf.mxu1 }
 0x4d4   : > { %v1904_v50 = vpop.f32.mrf.mxu1 }
 0x4d6   : > { %v966_v52 = vpop.f32.mrf.mxu1 }
 0x4d7   : > { %v970_v53 = vpack.c.bf16 %v966_v52, %v963_v49 }
 0x4d8   : > { %v1905_v54 = vpop.f32.mrf.mxu1 }
 0x4d9   : > { %1911 = vmatmul.mubr.msk.bf16.vlgmr.msra.gmra.mxu1 %vm846_vm1, %v970_v53 }
 0x4da   : > { %1915 = vmatpush3.bf16.xpose.msra.mxu1 %v1042_v55  ;;  %1916 = vmatprep.mubr.msk.bf16.mxu1 %vm2098_vm0, %v2097_v3 }
 0x4db   : > { %1926 = vmatprep.subr.bf16.mxu1 %v2097_v3 }
 0x4e1   : > { %1917 = vmatmul.mubr.msk.bf16.vlgmr.msra.gmra.mxu1 %vm846_vm1, %v1035_v56 }
 0x4e2   : > { %1930 = vmatprep.mubr.msk.bf16.mxu1 %vm2098_vm0, %v2097_v3  ;;  %1927 = vmatpush3.bf16.msra.mxu1 %v2031_v31 }
 0x4e3   : > { %1928 = vmatprep.subr.bf16.mxu1 %v2097_v3 }
 0x4e6   : > { %1929 = vmatpush3.bf16.msra.mxu1 %v2032_v32 }
 0x4e7   : > { %1940 = vmatprep.subr.bf16.mxu1 %v2097_v3 }
 0x599   : > { %v2368_v57 = vpop.f32.mrf.mxu1 }
 0x59b   : > { %v1912_v58 = vpop.f32.mrf.mxu1 }
 0x59d   : > { %v2370_v59 = vpop.f32.mrf.mxu1 }
 0x59f   : > { %v1913_v60 = vpop.f32.mrf.mxu1 }
 0x5a1   : > { %v1078_v61 = vpop.f32.mrf.mxu1 }
 0x5a2   : > { %v1085_v62 = vmul.f32 0.17677669, %v1078_v61 }
 0x5a3   : > { %v1918_v63 = vpop.f32.mrf.mxu1 }
 0x5a4   : > { %v1087_v2 = vsel %vm896_vm2, %v1085_v62, -inf }
 0x5a5   : > { %1088 = vmax.xlane.f32.xlu1 %v1087_v2  ;;  %v1081_v4 = vpop.f32.mrf.mxu1 }
 0x5a6   : > { %v1086_v5 = vmul.f32 0.17677669, %v1081_v4 }
 0x5a7   : > { %v1919_v6 = vpop.f32.mrf.mxu1 }
 0x5a8   : > { %v1090_v7 = vsel %vm896_vm2, %v1086_v5, -inf }
 0x5a9   : > { %1091 = vmax.xlane.f32.xlu0 %v1090_v7 }
 0x62e   : > { %v1089_v8 = vpop.xlane.xlu1 %1088 }
 0x62f   : > { %v1093_v9 = vsub.f32 %v1085_v62, %v1089_v8 }
 0x631   : > { %v1095_v10 = vmul.f32 1.442695, %v1093_v9 }
 0x632   : > { %v1092_v11 = vpop.xlane.xlu0 %1091 }
 0x633   : > { %2049 = vpow2.f32 %v1095_v10  ;;  %v1094_v12 = vsub.f32 %v1086_v5, %v1092_v11 }
 0x635   : > { %v1097_v13 = vmul.f32 1.442695, %v1094_v12 }
 0x637   : > { %2051 = vpow2.f32 %v1097_v13 }
 0x640   : > { %v2050_v14 = vpop.eup %2049 }
 0x641   : > { %v1099_v15 = vsel %vm896_vm2, %v2050_v14, 0.0 }
 0x642   : > { %1100 = vadd.xlane.f32.xlu0 %v1099_v15  ;;  %v2034_v15 = vld [vmem:[%s2481_s8 + $0x20] sm:$0xff]  }
 0x644   : > { %v2052_v16 = vpop.eup %2051 }
 0x645   : > { %v1102_v17 = vsel %vm896_vm2, %v2052_v16, 0.0 }
 0x646   : > { %1103 = vadd.xlane.f32.xlu1 %v1102_v17 }
 0x657   : > { %1222 = vrot.lane.b32.xlu1 %v2310_v46, %s2100_s23 }
 0x658   : > { %1110 = vrot.lane.b32.xlu0 %v2337_v20, %s2099_s18 }
 0x65b   : > { %1220 = vrot.lane.b32.xlu1 %v2331_v19, %s2100_s23 }
 0x6cb   : > { %v1101_v18 = vpop.xlane.xlu0 %1100 }
 0x6cc   : > { %2053 = vrcp.f32 %v1101_v18 }
 0x6cf   : > { %v1104_v21 = vpop.xlane.xlu1 %1103  ;;  %v1111_v22 = vpop.permute.xlu0 %1110 }
 0x6d0   : > { %2055 = vrcp.f32 %v1104_v21  ;;  %1921 = vmatpush3.bf16.msra.mxu0 %v1111_v22 }
 0x6d1   : > { %1934 = vmatprep.subr.bf16.mxu0 %v2097_v3 }
 0x6d3   : > { %v1223_v27 = vpop.permute.xlu1 %1222 }
 0x6d4   : > { %v1228_v29 = vsel %vm846_vm1, %v1223_v27, 0 }
 0x6d7   : > { %v1221_v30 = vpop.permute.xlu1 %1220 }
 0x6d9   : > { %v2054_v23 = vpop.eup %2053 }
 0x6da   : > { %v1107_v25 = vmul.f32 %v2054_v23, %v2050_v14  ;;  %v2033_v14 = vld [vmem:[%s2481_s8 + $0x28] sm:$0xff]  }
 0x6dd   : > { %v2056_v24 = vpop.eup %2055 }
 0x6de   : > { %v1108_v26 = vmul.f32 %v2056_v24, %v2052_v16 }
 0x6e0   : > { %v1109_v28 = vpack.c.bf16 %v1108_v26, %v1107_v25 }
 0x6e2   : > { %1923 = vmatmul.mubr.msk.bf16.vlgmr.msra.gmra.mxu0 %vm896_vm2, %v1109_v28 }
 0x6e3   : > { %1935 = vmatpush3.bf16.xpose.msra.mxu0 %v1228_v29  ;;  %1936 = vmatprep.mubr.msk.bf16.mxu0 %vm2098_vm0, %v2097_v3 }
 0x6e4   : > { %1946 = vmatprep.subr.bf16.mxu0 %v2097_v3 }
 0x6ea   : > { %1937 = vmatmul.mubr.msk.bf16.vlgmr.msra.gmra.mxu0 %vm846_vm1, %v1221_v30 }
 0x6eb   : > { %1950 = vmatprep.mubr.msk.bf16.mxu0 %vm2098_vm0, %v2097_v3  ;;  %1947 = vmatpush3.bf16.msra.mxu0 %v2033_v14 }
 0x6ec   : > { %1948 = vmatprep.subr.bf16.mxu0 %v2097_v3 }
 0x6ef   : > { %1949 = vmatpush3.bf16.msra.mxu0 %v2034_v15 }
 0x6f0   : > { %1960 = vmatprep.subr.bf16.mxu0 %v2097_v3 }
 0x7a2   : > { %v1150_v33 = vpop.f32.mrf.mxu0 }
 0x7a4   : > { %v1924_v34 = vpop.f32.mrf.mxu0 }
 0x7a6   : > { %v1153_v35 = vpop.f32.mrf.mxu0 }
 0x7a7   : > { %v1157_v36 = vpack.c.bf16 %v1153_v35, %v1150_v33 }
 0x7a8   : > { %v1925_v37 = vpop.f32.mrf.mxu0 }
 0x7a9   : > { %1931 = vmatmul.mubr.msk.bf16.vlgmr.msra.gmra.mxu1 %vm846_vm1, %v1157_v36 }
 0x7aa   : > { %v1264_v38 = vpop.f32.mrf.mxu0  ;;  %1942 = vmatprep.mubr.msk.bf16.mxu1 %vm2098_vm0, %v2097_v3 }
 0x7ab   : > { %v1271_v39 = vmul.f32 0.17677669, %v1264_v38 }
 0x7ac   : > { %v1938_v40 = vpop.f32.mrf.mxu0 }
 0x7ad   : > { %v1273_v41 = vsel %vm896_vm2, %v1271_v39, -inf }
 0x7ae   : > { %1274 = vmax.xlane.f32.xlu1 %v1273_v41  ;;  %v1267_v42 = vpop.f32.mrf.mxu0 }
 0x7af   : > { %v1272_v43 = vmul.f32 0.17677669, %v1267_v42 }
 0x7b0   : > { %v1939_v44 = vpop.f32.mrf.mxu0 }
 0x7b1   : > { %v1276_v45 = vsel %vm896_vm2, %v1272_v43, -inf  ;;  %v2035_v44 = vld [vmem:[%s2481_s8 + $0x38] sm:$0xff]  }
 0x7b2   : > { %1277 = vmax.xlane.f32.xlu0 %v1276_v45 }
 0x7bf   : > { %1296 = vrot.lane.b32.xlu1 %v2337_v20, %s2100_s23 }
 0x7c3   : > { %1406 = vrot.lane.b32.xlu1 %v2331_v19, %s2101_s28  ;;  %v1737_v19 = vld [vmem:[%s2482_s9] ss:$0 sm:$0xff] }
 0x7c4   : > { %v834_v60 = vadd.f32 %v1737_v19, %v2181_v0  ;;  %v835_v62 = vadd.f32 %v1737_v19, %v2183_v1 }
 0x7c6   : > { %v1031_v61 = vadd.f32 %v2368_v57, %v834_v60  ;;  %v1032_v5 = vadd.f32 %v2370_v59, %v835_v62 }
 0x837   : > { %v1275_v47 = vpop.xlane.xlu1 %1274 }
 0x838   : > { %v1279_v48 = vsub.f32 %v1271_v39, %v1275_v47 }
 0x83a   : > { %v1281_v49 = vmul.f32 1.442695, %v1279_v48 }
 0x83b   : > { %v1297_v50 = vpop.permute.xlu1 %1296  ;;  %v1278_v51 = vpop.xlane.xlu0 %1277 }
 0x83c   : > { %2057 = vpow2.f32 %v1281_v49  ;;  %v1280_v52 = vsub.f32 %v1272_v43, %v1278_v51  ;;  %1941 = vmatpush3.bf16.msra.mxu1 %v1297_v50 }
 0x83d   : > { %1954 = vmatprep.subr.bf16.mxu1 %v2097_v3 }
 0x83e   : > { %v1283_v53 = vmul.f32 1.442695, %v1280_v52 }
 0x83f   : > { %v1407_v59 = vpop.permute.xlu1 %1406 }
 0x840   : > { %2059 = vpow2.f32 %v1283_v53 }
 0x849   : > { %v2058_v54 = vpop.eup %2057 }
 0x84a   : > { %v1285_v55 = vsel %vm896_vm2, %v2058_v54, 0.0 }
 0x84b   : > { %1286 = vadd.xlane.f32.xlu0 %v1285_v55 }
 0x84d   : > { %v2060_v56 = vpop.eup %2059 }
 0x84e   : > { %v1288_v58 = vsel %vm896_vm2, %v2060_v56, 0.0 }
 0x84f   : > { %1289 = vadd.xlane.f32.xlu0 %v1288_v58 }
 0x865   : > { %1408 = vrot.lane.b32.xlu0 %v2310_v46, %s2101_s28 }
 0x869   : > { %v1211_v63 = vpop.f32.mrf.mxu1 }
 0x86a   : > { %v2419_v2 = vadd.f32 %v1211_v63, %v1031_v61 }
 0x86b   : > { %v1932_v4 = vpop.f32.mrf.mxu1 }
 0x86d   : > { %v1214_v6 = vpop.f32.mrf.mxu1 }
 0x86e   : > { %v2422_v7 = vadd.f32 %v1214_v6, %v1032_v5 }
 0x86f   : > { %v1933_v8 = vpop.f32.mrf.mxu1 }
 0x8d4   : > { %v1287_v9 = vpop.xlane.xlu0 %1286 }
 0x8d5   : > { %2061 = vrcp.f32 %v1287_v9 }
 0x8d8   : > { %v1290_v0 = vpop.xlane.xlu0 %1289 }
 0x8d9   : > { %2063 = vrcp.f32 %v1290_v0 }
 0x8dc   : > { %v1409_v12 = vpop.permute.xlu0 %1408 }
 0x8dd   : > { %v1414_v13 = vsel %vm846_vm1, %v1409_v12, 0 }
 0x8e2   : > { %v2062_v10 = vpop.eup %2061 }
 0x8e3   : > { %v1293_v11 = vmul.f32 %v2062_v10, %v2058_v54 }
 0x8e6   : > { %v2064_v46 = vpop.eup %2063 }
 0x8e7   : > { %v1294_v57 = vmul.f32 %v2064_v46, %v2060_v56  ;;  %v2036_v56 = vld [vmem:[%s2481_s8 + $0x30] sm:$0xff]  }
 0x8e9   : > { %v1295_v1 = vpack.c.bf16 %v1294_v57, %v1293_v11 }
 0x8eb   : > { %1943 = vmatmul.mubr.msk.bf16.vlgmr.msra.gmra.mxu1 %vm896_vm2, %v1295_v1 }
 0x8ec   : > { %1955 = vmatpush3.bf16.xpose.msra.mxu1 %v1414_v13  ;;  %1956 = vmatprep.mubr.msk.bf16.mxu1 %vm2098_vm0, %v2097_v3 }
 0x8ed   : > { %1966 = vmatprep.subr.bf16.mxu1 %v2097_v3 }
 0x8f3   : > { %1957 = vmatmul.mubr.msk.bf16.vlgmr.msra.gmra.mxu1 %vm846_vm1, %v1407_v59 }
 0x8f4   : > { %1970 = vmatprep.mubr.msk.bf16.mxu1 %vm2098_vm0, %v2097_v3  ;;  %1967 = vmatpush3.bf16.msra.mxu1 %v2035_v44 }
 0x8f5   : > { %1968 = vmatprep.subr.bf16.mxu1 %v2097_v3 }
 0x8f8   : > { %1969 = vmatpush3.bf16.msra.mxu1 %v2036_v56 }
 0x9ab   : > { %v1336_v16 = vpop.f32.mrf.mxu1 }
 0x9ad   : > { %v1944_v17 = vpop.f32.mrf.mxu1 }
 0x9af   : > { %v1339_v18 = vpop.f32.mrf.mxu1 }
 0x9b0   : > { %v1343_v21 = vpack.c.bf16 %v1339_v18, %v1336_v16 }
 0x9b1   : > { %v1945_v22 = vpop.f32.mrf.mxu1 }
 0x9b2   : > { %1951 = vmatmul.mubr.msk.bf16.vlgmr.msra.gmra.mxu0 %vm846_vm1, %v1343_v21 }
 0x9b3   : > { %v1450_v23 = vpop.f32.mrf.mxu1  ;;  %1962 = vmatprep.mubr.msk.bf16.mxu0 %vm2098_vm0, %v2097_v3 }
 0x9b4   : > { %v1457_v24 = vmul.f32 0.17677669, %v1450_v23 }
 0x9b5   : > { %v1958_v25 = vpop.f32.mrf.mxu1 }
 0x9b6   : > { %v1459_v26 = vsel %vm896_vm2, %v1457_v24, -inf }
 0x9b7   : > { %1460 = vmax.xlane.f32.xlu1 %v1459_v26  ;;  %v1453_v27 = vpop.f32.mrf.mxu1 }
 0x9b8   : > { %v1458_v28 = vmul.f32 0.17677669, %v1453_v27 }
 0x9b9   : > { %v1959_v29 = vpop.f32.mrf.mxu1 }
 0x9ba   : > { %v1462_v30 = vsel %vm896_vm2, %v1458_v28, -inf }
 0x9bb   : > { %1463 = vmax.xlane.f32.xlu0 %v1462_v30 }
 0xa40   : > { %v1461_v31 = vpop.xlane.xlu1 %1460 }
 0xa41   : > { %v1465_v32 = vsub.f32 %v1457_v24, %v1461_v31 }
 0xa43   : > { %v1467_v33 = vmul.f32 1.442695, %v1465_v32 }
 0xa44   : > { %v1464_v34 = vpop.xlane.xlu0 %1463 }
 0xa45   : > { %2065 = vpow2.f32 %v1467_v33  ;;  %v1466_v35 = vsub.f32 %v1458_v28, %v1464_v34 }
 0xa47   : > { %v1469_v36 = vmul.f32 1.442695, %v1466_v35 }
 0xa49   : > { %2067 = vpow2.f32 %v1469_v36 }
 0xa52   : > { %v2066_v37 = vpop.eup %2065 }
 0xa53   : > { %v1471_v38 = vsel %vm896_vm2, %v2066_v37, 0.0 }
 0xa54   : > { %1472 = vadd.xlane.f32.xlu0 %v1471_v38 }
 0xa56   : > { %v2068_v39 = vpop.eup %2067 }
 0xa57   : > { %v1474_v40 = vsel %vm896_vm2, %v2068_v39, 0.0 }
 0xa58   : > { %1475 = vadd.xlane.f32.xlu1 %v1474_v40 }
 0xa6a   : > { %1482 = vrot.lane.b32.xlu0 %v2337_v20, %s2101_s28 }
 0xa72   : > { %v1397_v41 = vpop.f32.mrf.mxu0 }
 0xa73   : > { %v1404_v42 = vadd.f32 %v1397_v41, %v2419_v2 }
 0xa74   : > { %v1952_v43 = vpop.f32.mrf.mxu0 }
 0xa76   : > { %v1400_v45 = vpop.f32.mrf.mxu0 }
 0xa77   : > { %v1405_v47 = vadd.f32 %v1400_v45, %v2422_v7 }
 0xa78   : > { %v1953_v48 = vpop.f32.mrf.mxu0 }
 0xadd   : > { %v1473_v49 = vpop.xlane.xlu0 %1472 }
 0xade   : > { %2069 = vrcp.f32 %v1473_v49 }
 0xae1   : > { %v1476_v50 = vpop.xlane.xlu1 %1475  ;;  %v1483_v51 = vpop.permute.xlu0 %1482 }
 0xae2   : > { %2071 = vrcp.f32 %v1476_v50  ;;  %1961 = vmatpush3.bf16.msra.mxu0 %v1483_v51 }
 0xaeb   : > { %v2070_v20 = vpop.eup %2069 }
 0xaec   : > { %v1479_v54 = vmul.f32 %v2070_v20, %v2066_v37 }
 0xaef   : > { %v2072_v52 = vpop.eup %2071 }
 0xaf0   : > { %v1480_v53 = vmul.f32 %v2072_v52, %v2068_v39 }
 0xaf2   : > { %v1481_v55 = vpack.c.bf16 %v1480_v53, %v1479_v54 }
 0xaf4   : > { %1963 = vmatmul.mubr.msk.bf16.vlgmr.msra.gmra.mxu0 %vm896_vm2, %v1481_v55 }
 0xbb4   : > { %v1522_v3 = vpop.f32.mrf.mxu0 }
 0xbb6   : > { %v1964_v58 = vpop.f32.mrf.mxu0 }
 0xbb8   : > { %v1525_v19 = vpop.f32.mrf.mxu0 }
 0xbb9   : > { %v1529_v60 = vpack.c.bf16 %v1525_v19, %v1522_v3 }
 0xbba   : > { %v1965_v61 = vpop.f32.mrf.mxu0 }
 0xbbb   : > { %1971 = vmatmul.mubr.msk.bf16.vlgmr.msra.gmra.mxu1 %vm846_vm1, %v1529_v60 }
 0xc7b   : > { %v1583_v62 = vpop.f32.mrf.mxu1 }
 0xc7c   : > { %v1590_v63 = vadd.f32 %v1583_v62, %v1404_v42 }
 0xc7d   : > { %v1972_v2 = vpop.f32.mrf.mxu1 }
 0xc7e   : > { %1592 = vst [vmem:[%s417_s25] sm:$0xff] %v1590_v63 }
 0xc7f   : > { %v1586_v4 = vpop.f32.mrf.mxu1 }
 0xc80   : > { %v1591_v5 = vadd.f32 %v1586_v4, %v1405_v47 }
 0xc81   : > { %v1973_v6 = vpop.f32.mrf.mxu1 }
 0xc82   : > { %1593 = vst [vmem:[%s417_s25 + $0x8] sm:$0xff] %v1591_v5 }
 0xc83 PF: > { %s20_s15 = sadd.s32 1, %s2095_s15   ;;  %s2484_s13 = smov %s2091_s14 }
 0xc84   : > { %p17_p5 = scmp.ge.s32.totalorder %s20_s15, 4   ;;  %s2485_s14 = smov %s2487_s16 }
 0xc86   :  { %19 = sbr.rel (!%p17_p5) target bundleno = 2 (0x2), region = 97 }

// kernel: transformer_forward.12
= control target key start
LH: loop header
LB: loop body
LE: loop exit
PB: predicated region body
PF: predicated region fallthrough
CT: control target
= control target key end

     0   :  { %s9851_s30 = smov 0   ;;  %s9853_s10 = smov 0   ;;  %s11149_s0 = inlined_call_operand.vmem [shape: f32[32,128], index: 0, kind: input, shape index: {}]   ;;  %s11150_s1 = inlined_call_operand.vmem [shape: f32[1,128], index: 1, kind: input, shape index: {}]   ;;  %s11151_s2 = inlined_call_operand.vmem [shape: f32[1,128], index: 2, kind: input, shape index: {}]   ;;  %s11152_s3 = inlined_call_operand.vmem [shape: bf16[128,128], index: 3, kind: input, shape index: {}]   ;;  %s11153_s4 = inlined_call_operand.vmem [shape: f32[1,128], index: 4, kind: input, shape index: {}]   ;;  %s11154_s5 = inlined_call_operand.vmem [shape: bf16[128,128,512], index: 5, kind: input, shape index: {}]   ;;  %s11155_s6 = inlined_call_operand.vmem [shape: f32[128,1,512], index: 6, kind: input, shape index: {}]   ;;  %s11156_s7 = inlined_call_operand.vmem [shape: bf16[128,512,128], index: 7, kind: input, shape index: {}]   ;;  %s11157_s8 = inlined_call_operand.vmem [shape: f32[128,1,128], index: 8, kind: input, shape index: {}]   ;;  %s11158_s9 = inlined_call_operand.vmem [shape: f32[32,128], index: 9, kind: output, shape index: {}]  }
   0x1   :  { %s9855_s11 = smov 0  }
   0x2 LB: > { %s28_s12 = sadd.s32 1, %s9793_s10  ;;  %p7077_p0 = scmp.ge.s32.totalorder %s9797_s11, 1  ;;  %s9797_s11 = sphi %s9855_s11, %s19_s11   ;;  %s9793_s10 = sphi %s9853_s10, %s11160_s10   ;;  %s9789_s30 = sphi %s9851_s30, %s11159_s30  }
   0x3   : > { %p29_p1 = scmp.ge.s32.totalorder %s28_s12, 16  ;;  %p345_p2 = scmp.lt.s32.totalorder %s9797_s11, 17 }
   0x5   : > { %s11162_s12 = smov (%p29_p1, %s28_s12), 0  ;;  %p346_p3 = pnand %p7077_p0, %p345_p2 }
   0x6   : > { %s7078_s13 = sshll.u32 (!%p346_p3), %s9789_s30, 3  ;;  %p7087_p5 = scmp.ne.s32.totalorder (!%p346_p3), %s9789_s30, 0 }
   0x7   : > { %349 = sbr.rel (%p346_p3) target bundleno = 3129 (0xc39), region = 56  ;;  %p409_p4 = scmp.lt.s32.totalorder (!%p346_p3), %s7078_s13, 127 }
   0xc   : > { %s11164_s13 = smov (!%p409_p4, %s7078_s13), 127  ;;  %443 = sbr.rel (%p7087_p5) target bundleno = 850 (0x352), region = 60 }
   0xd   : > { %s8316_s14 = sshll.u32 %s11164_s13, 8  ;;  %s7082_s15 = sshll.u32 %s11164_s13, 2 }
   0xe   : > { %s9875_s18 = scalar_lea.vmem %s11154_s5, %s8316_s14  ;;  %s9880_s21 = scalar_lea.vmem %s11155_s6, %s7082_s15 }
   0xf   : > { %s9885_s24 = scalar_lea.vmem %s11156_s7, %s8316_s14  ;;  %s9890_s27 = scalar_lea.vmem %s11157_s8, %s11164_s13 }
  0x11   : > { %v444_v0 = vld [vmem:[%s11149_s0] sm:$0xff]  ;;  %v446_v1 = vld [vmem:[%s11149_s0 + $0x10] sm:$0xff]  ;;  %v445_v2 = vld [vmem:[%s11149_s0 + $0x8] sm:$0xff] }
  0x12   : > { %450 = vadd.xlane.f32.xlu0 %v444_v0  ;;  %454 = vadd.xlane.f32.xlu1 %v446_v1  ;;  %v447_v3 = vld [vmem:[%s11149_s0 + $0x18] sm:$0xff]  ;;  %v8838_v21 = vld [vmem:[%s11152_s3 + $0x30] sm:$0xff]   ;;  %v8839_v22 = vld [vmem:[%s11152_s3 + $0x28] sm:$0xff]  }
  0x13   : > { %v8837_v20 = vld [vmem:[%s11152_s3 + $0x38] sm:$0xff]   ;;  %v8840_v23 = vld [vmem:[%s11152_s3 + $0x20] sm:$0xff]   ;;  %v8842_v25 = vld [vmem:[%s11152_s3 + $0x10] sm:$0xff]  }
  0x14   : > { %8791 = vmatprep.subr.bf16.mxu0 %v8837_v20  ;;  %v8841_v24 = vld [vmem:[%s11152_s3 + $0x18] sm:$0xff]   ;;  %v8843_v26 = vld [vmem:[%s11152_s3 + $0x8] sm:$0xff]   ;;  %v8844_v27 = vld [vmem:[%s11152_s3] sm:$0xff]  }
  0x15   : > { %8792 = vmatpush3.bf16.msra.mxu0 %v8837_v20  ;;  %v7088_v42 = vld [vmem:[%s11150_s1] ss:$0 sm:$0xff] }
  0x16   : > { %452 = vadd.xlane.f32.xlu0 %v445_v2  ;;  %456 = vadd.xlane.f32.xlu1 %v447_v3  ;;  %v7089_v47 = vld [vmem:[%s11151_s2] ss:$0 sm:$0xff] }
  0x17   : > { %8793 = vmatprep.subr.bf16.mxu0 %v8838_v21  ;;  %v7094_v61 = vld [vmem:[%s11153_s4] ss:$0 sm:$0xff] }
  0x19   : > { %8794 = vmatpush3.bf16.msra.mxu0 %v8838_v21  ;;  %v9799_v21 = vmov 0.0  }
  0x1a   : > { %8795 = vmatprep.subr.bf16.mxu0 %v8839_v22  ;;  %695 = vst [vmem:[#allocation4] sm:$0xff] %v9799_v21  ;;  %696 = vst [vmem:[#allocation4 + $0x18] sm:$0xff] %v9799_v21 }
  0x1b   : > { %697 = vst [vmem:[#allocation4 + $0x8] sm:$0xff] %v9799_v21  ;;  %698 = vst [vmem:[#allocation4 + $0x10] sm:$0xff] %v9799_v21 }
  0x1d   : > { %8796 = vmatpush3.bf16.msra.mxu0 %v8839_v22 }
  0x1e   : > { %8797 = vmatprep.subr.bf16.mxu0 %v8840_v23 }
  0x21   : > { %8798 = vmatpush3.bf16.msra.mxu0 %v8840_v23 }
  0x22   : > { %8799 = vmatprep.subr.bf16.mxu0 %v8841_v24 }
  0x25   : > { %8800 = vmatpush3.bf16.msra.mxu0 %v8841_v24 }
  0x26   : > { %8801 = vmatprep.subr.bf16.mxu0 %v8842_v25 }
  0x29   : > { %8802 = vmatpush3.bf16.msra.mxu0 %v8842_v25 }
  0x2a   : > { %8803 = vmatprep.subr.bf16.mxu0 %v8843_v26 }
  0x2d   : > { %8804 = vmatpush3.bf16.msra.mxu0 %v8843_v26 }
  0x2e   : > { %8805 = vmatprep.subr.bf16.mxu0 %v8844_v27 }
  0x31   : > { %8806 = vmatpush3.bf16.msra.mxu0 %v8844_v27 }
  0x9b   : > { %v451_v4 = vpop.xlane.xlu0 %450  ;;  %v455_v5 = vpop.xlane.xlu1 %454 }
  0x9c   : > { %v459_v6 = vmul.f32 0.0078125, %v451_v4  ;;  %v461_v7 = vmul.f32 0.0078125, %v455_v5 }
  0x9e   : > { %v463_v8 = vsub.f32 %v444_v0, %v459_v6  ;;  %v9905_v9 = vsub.f32 %v446_v1, %v461_v7 }
  0x9f   : > { %v453_v10 = vpop.xlane.xlu0 %452  ;;  %v457_v11 = vpop.xlane.xlu1 %456 }
  0xa0   : > { %v460_v12 = vmul.f32 0.0078125, %v453_v10  ;;  %v467_v13 = vmul.f32 %v463_v8, %v463_v8  ;;  %v462_v14 = vmul.f32 0.0078125, %v457_v11  ;;  %v469_v17 = vmul.f32 %v9905_v9, %v9905_v9 }
  0xa2   : > { %v464_v15 = vsub.f32 %v445_v2, %v460_v12  ;;  %471 = vadd.xlane.f32.xlu0 %v467_v13  ;;  %v466_v16 = vsub.f32 %v447_v3, %v462_v14 }
  0xa4   : > { %v468_v18 = vmul.f32 %v464_v15, %v464_v15  ;;  %v470_v19 = vmul.f32 %v466_v16, %v466_v16 }
  0xa6   : > { %475 = vadd.xlane.f32.xlu0 %v469_v17  ;;  %473 = vadd.xlane.f32.xlu1 %v468_v18 }
  0xaa   : > { %477 = vadd.xlane.f32.xlu1 %v470_v19 }
 0x12b   : > { %v472_v28 = vpop.xlane.xlu0 %471 }
 0x12c   : > { %v479_v29 = vmul.f32 0.0078125, %v472_v28 }
 0x12e   : > { %v483_v30 = vadd.f32 1e-05, %v479_v29 }
 0x12f   : > { %v474_v31 = vpop.xlane.xlu1 %473  ;;  %v476_v32 = vpop.xlane.xlu0 %475 }
 0x130   : > { %8845 = vrsqrt.f32 %v483_v30  ;;  %v480_v33 = vmul.f32 0.0078125, %v474_v31  ;;  %v481_v34 = vmul.f32 0.0078125, %v476_v32 }
 0x132   : > { %v484_v35 = vadd.f32 1e-05, %v480_v33  ;;  %v485_v36 = vadd.f32 1e-05, %v481_v34 }
 0x133   : > { %v478_v37 = vpop.xlane.xlu1 %477 }
 0x134   : > { %8847 = vrsqrt.f32 %v484_v35  ;;  %v482_v38 = vmul.f32 0.0078125, %v478_v37 }
 0x135   : > { %8849 = vrsqrt.f32 %v485_v36 }
 0x136   : > { %v486_v39 = vadd.f32 1e-05, %v482_v38 }
 0x138   : > { %8851 = vrsqrt.f32 %v486_v39 }
 0x13d   : > { %v8846_v40 = vpop.eup %8845 }
 0x13e   : > { %v491_v41 = vmul.f32 %v8846_v40, %v463_v8 }
 0x140   : > { %v501_v46 = vmul.f32 %v7088_v42, %v491_v41 }
 0x141   : > { %v8848_v43 = vpop.eup %8847 }
 0x142   : > { %v8850_v44 = vpop.eup %8849  ;;  %v492_v45 = vmul.f32 %v8848_v43, %v464_v15  ;;  %v511_v51 = vadd.f32 %v7089_v47, %v501_v46 }
 0x143   : > { %v493_v48 = vmul.f32 %v8850_v44, %v9905_v9 }
 0x144   : > { %v502_v49 = vmul.f32 %v7088_v42, %v492_v45 }
 0x145   : > { %v8852_v50 = vpop.eup %8851  ;;  %v503_v54 = vmul.f32 %v7088_v42, %v493_v48 }
 0x146   : > { %v512_v52 = vadd.f32 %v7089_v47, %v502_v49  ;;  %v494_v53 = vmul.f32 %v8852_v50, %v466_v16 }
 0x147   : > { %v513_v57 = vadd.f32 %v7089_v47, %v503_v54 }
 0x148   : > { %v515_v55 = vpack.c.bf16 %v512_v52, %v511_v51  ;;  %v504_v56 = vmul.f32 %v7088_v42, %v494_v53 }
 0x14a   : > { %8326 = vst [vmem:[#allocation2] sm:$0xff] %v515_v55   ;;  %8807 = vmatprep.mubr.bf16.mxu0 %v515_v55  ;;  %v514_v58 = vadd.f32 %v7089_v47, %v504_v56 }
 0x14c   : > { %v516_v59 = vpack.c.bf16 %v514_v58, %v513_v57 }
 0x14e   : > { %8332 = vst [vmem:[#allocation2 + $0x8] sm:$0xff] %v516_v59   ;;  %8808 = vmatmul.mubr.bf16.vlgmr.msra.gmra.mxu0 %v516_v59 }
 0x20e   : > { %v8809_v60 = vpop.f32.mrf.mxu0 }
 0x20f   : > { %v649_v2 = vadd.f32 %v8809_v60, %v7094_v61 }
 0x210   : > { %v640_v62 = vpop.f32.mrf.mxu0 }
 0x211   : > { %v641_v63 = vadd.f32 %v7094_v61, %v640_v62 }
 0x212   : > { %v8810_v0 = vpop.f32.mrf.mxu0 }
 0x213   : > { %655 = vmax.xlane.f32.xlu0 %v641_v63  ;;  %v652_v4 = vadd.f32 %v8810_v0, %v7094_v61 }
 0x214   : > { %v643_v1 = vpop.f32.mrf.mxu0 }
 0x215   : > { %v644_v3 = vadd.f32 %v7094_v61, %v643_v1 }
 0x217   : > { %657 = vmax.xlane.f32.xlu1 %v644_v3  ;;  %659 = vmax.xlane.f32.xlu0 %v649_v2 }
 0x21b   : > { %661 = vmax.xlane.f32.xlu1 %v652_v4 }
 0x29c   : > { %v656_v5 = vpop.xlane.xlu0 %655 }
 0x29d   : > { %v663_v6 = vsub.f32 %v641_v63, %v656_v5 }
 0x29f   : > { %v667_v7 = vmul.f32 1.442695, %v663_v6 }
 0x2a0   : > { %v658_v8 = vpop.xlane.xlu1 %657  ;;  %v660_v9 = vpop.xlane.xlu0 %659 }
 0x2a1   : > { %8853 = vpow2.f32 %v667_v7  ;;  %v664_v10 = vsub.f32 %v644_v3, %v658_v8  ;;  %v665_v11 = vsub.f32 %v649_v2, %v660_v9 }
 0x2a3   : > { %v669_v12 = vmul.f32 1.442695, %v664_v10  ;;  %v671_v13 = vmul.f32 1.442695, %v665_v11 }
 0x2a4   : > { %v662_v14 = vpop.xlane.xlu1 %661 }
 0x2a5   : > { %8855 = vpow2.f32 %v669_v12  ;;  %v666_v15 = vsub.f32 %v652_v4, %v662_v14 }
 0x2a6   : > { %8857 = vpow2.f32 %v671_v13 }
 0x2a7   : > { %v673_v16 = vmul.f32 1.442695, %v666_v15 }
 0x2a9   : > { %8859 = vpow2.f32 %v673_v16 }
 0x2ae   : > { %v8854_v17 = vpop.eup %8853 }
 0x2af   : > { %675 = vadd.xlane.f32.xlu0 %v8854_v17 }
 0x2b2   : > { %v8856_v18 = vpop.eup %8855 }
 0x2b3   : > { %v8858_v19 = vpop.eup %8857  ;;  %677 = vadd.xlane.f32.xlu1 %v8856_v18 }
 0x2b4   : > { %679 = vadd.xlane.f32.xlu0 %v8858_v19 }
 0x2b6   : > { %v8860_v20 = vpop.eup %8859 }
 0x2b7   : > { %681 = vadd.xlane.f32.xlu1 %v8860_v20 }
 0x338   : > { %v676_v22 = vpop.xlane.xlu0 %675 }
 0x339   : > { %8861 = vrcp.f32 %v676_v22 }
 0x33c   : > { %v678_v23 = vpop.xlane.xlu1 %677 }
 0x33d   : > { %8863 = vrcp.f32 %v678_v23  ;;  %v680_v24 = vpop.xlane.xlu0 %679 }
 0x33e   : > { %8865 = vrcp.f32 %v680_v24 }
 0x340   : > { %v682_v25 = vpop.xlane.xlu1 %681 }
 0x341   : > { %8867 = vrcp.f32 %v682_v25 }
 0x346   : > { %v8862_v26 = vpop.eup %8861 }
 0x347   : > { %v687_v27 = vmul.f32 %v8862_v26, %v8854_v17 }
 0x349   : > { %691 = vst [vmem:[#allocation3 + $0x10] sm:$0xff] %v687_v27 }
 0x34a   : > { %v8864_v28 = vpop.eup %8863 }
 0x34b   : > { %v8866_v29 = vpop.eup %8865  ;;  %v688_v30 = vmul.f32 %v8864_v28, %v8856_v18 }
 0x34c   : > { %v689_v31 = vmul.f32 %v8866_v29, %v8858_v19 }
 0x34d   : > { %692 = vst [vmem:[#allocation3] sm:$0xff] %v688_v30 }
 0x34e   : > { %v8868_v32 = vpop.eup %8867  ;;  %693 = vst [vmem:[#allocation3 + $0x18] sm:$0xff] %v689_v31 }
 0x34f   : > { %v690_v33 = vmul.f32 %v8868_v32, %v8860_v20 }
 0x351   : > { %694 = vst [vmem:[#allocation3 + $0x8] sm:$0xff] %v690_v33 }
 0x352 PF: > { %v8869_v34 = vld [vmem:[%s9875_s18 + $0xe4] ss:$16 sps:$4 sm:$0xff]   ;;  %v8871_v35 = vld [vmem:[%s9875_s18 + $0xec] ss:$16 sps:$4 sm:$0xff]   ;;  %v9800_v36 = vmov 0   ;;  %p8311_p6 = scmp.ne.s32.totalorder %s9789_s30, 15 }
 0x353   : > { %965 = vmatprep.mubr.bf16.mxu0 %v9800_v36  ;;  %1018 = vmatprep.mubr.bf16.mxu1 %v9800_v36  ;;  %v8873_v37 = vld [vmem:[%s9875_s18 + $0xe0] ss:$16 sps:$4 sm:$0xff]   ;;  %v8874_v38 = vld [vmem:[%s9875_s18 + $0xe8] ss:$16 sps:$4 sm:$0xff]   ;;  %v8875_v39 = vld [vmem:[%s9875_s18 + $0xc4] ss:$16 sps:$4 sm:$0xff]  }
 0x354   : > { %933 = vmatprep.subr.bf16.mxu0 %v8869_v34  ;;  %986 = vmatprep.subr.bf16.mxu1 %v8871_v35  ;;  %v8877_v40 = vld [vmem:[%s9875_s18 + $0xcc] ss:$16 sps:$4 sm:$0xff]   ;;  %v8879_v41 = vld [vmem:[%s9875_s18 + $0xc0] ss:$16 sps:$4 sm:$0xff]   ;;  %v8880_v42 = vld [vmem:[%s9875_s18 + $0xc8] ss:$16 sps:$4 sm:$0xff]  }
 0x355   : > { %934 = vmatpush1.bf16.msra.mxu0 %v8873_v37  ;;  %987 = vmatpush1.bf16.msra.mxu1 %v8874_v38  ;;  %v8881_v43 = vld [vmem:[%s9875_s18 + $0xa4] ss:$16 sps:$4 sm:$0xff]   ;;  %v8883_v44 = vld [vmem:[%s9875_s18 + $0xac] ss:$16 sps:$4 sm:$0xff]   ;;  %v8885_v45 = vld [vmem:[%s9875_s18 + $0xa0] ss:$16 sps:$4 sm:$0xff]  }
 0x356   : > { %935 = vmatprep.subr.bf16.mxu0 %v8875_v39  ;;  %988 = vmatprep.subr.bf16.mxu1 %v8877_v40  ;;  %v8886_v46 = vld [vmem:[%s9875_s18 + $0xa8] ss:$16 sps:$4 sm:$0xff]   ;;  %v8887_v47 = vld [vmem:[%s9875_s18 + $0x84] ss:$16 sps:$4 sm:$0xff]   ;;  %v8889_v48 = vld [vmem:[%s9875_s18 + $0x8c] ss:$16 sps:$4 sm:$0xff]   ;;  %v741_v40 = vlaneseq }
 0x357   : > { %v8891_v49 = vld [vmem:[%s9875_s18 + $0x80] ss:$16 sps:$4 sm:$0xff]   ;;  %v8892_v50 = vld [vmem:[%s9875_s18 + $0x88] ss:$16 sps:$4 sm:$0xff]   ;;  %v8893_v51 = vld [vmem:[%s9875_s18 + $0x64] ss:$16 sps:$4 sm:$0xff]  }
 0x358   : > { %v8895_v52 = vld [vmem:[%s9875_s18 + $0x6c] ss:$16 sps:$4 sm:$0xff]   ;;  %v8897_v53 = vld [vmem:[%s9875_s18 + $0x60] ss:$16 sps:$4 sm:$0xff]   ;;  %v8898_v54 = vld [vmem:[%s9875_s18 + $0x68] ss:$16 sps:$4 sm:$0xff]  }
 0x359   : > { %936 = vmatpush1.bf16.msra.mxu0 %v8879_v41  ;;  %989 = vmatpush1.bf16.msra.mxu1 %v8880_v42  ;;  %v8899_v55 = vld [vmem:[%s9875_s18 + $0x44] ss:$16 sps:$4 sm:$0xff]   ;;  %v8901_v56 = vld [vmem:[%s9875_s18 + $0x4c] ss:$16 sps:$4 sm:$0xff]   ;;  %v8903_v57 = vld [vmem:[%s9875_s18 + $0x40] ss:$16 sps:$4 sm:$0xff]  }
 0x35a   : > { %937 = vmatprep.subr.bf16.mxu0 %v8881_v43  ;;  %990 = vmatprep.subr.bf16.mxu1 %v8883_v44  ;;  %v8904_v58 = vld [vmem:[%s9875_s18 + $0x48] ss:$16 sps:$4 sm:$0xff]   ;;  %v8905_v59 = vld [vmem:[%s9875_s18 + $0x24] ss:$16 sps:$4 sm:$0xff]   ;;  %v8907_v60 = vld [vmem:[%s9875_s18 + $0x2c] ss:$16 sps:$4 sm:$0xff]  }
 0x35b   : > { %v8909_v61 = vld [vmem:[%s9875_s18 + $0x20] ss:$16 sps:$4 sm:$0xff]   ;;  %v8910_v62 = vld [vmem:[%s9875_s18 + $0x28] ss:$16 sps:$4 sm:$0xff]   ;;  %v8911_v63 = vld [vmem:[%s9875_s18 + $0x4] ss:$16 sps:$4 sm:$0xff]  }
 0x35c   : > { %v8913_v0 = vld [vmem:[%s9875_s18 + $0xc] ss:$16 sps:$4 sm:$0xff]   ;;  %v8915_v1 = vld [vmem:[%s9875_s18] ss:$16 sps:$4 sm:$0xff]   ;;  %v8916_v2 = vld [vmem:[%s9875_s18 + $0x8] ss:$16 sps:$4 sm:$0xff]  }
 0x35d   : > { %938 = vmatpush1.bf16.msra.mxu0 %v8885_v45  ;;  %991 = vmatpush1.bf16.msra.mxu1 %v8886_v46  ;;  %v8919_v3 = vld [vmem:[%s9885_s24 + $0x78] sm:$0xff]   ;;  %v8917_v5 = vld [vmem:[#allocation2] sm:$0xff]   ;;  %v8918_v6 = vld [vmem:[#allocation2 + $0x8] sm:$0xff]   ;;  %v742_v41 = vshrl.u32 %v741_v40, 7 }
 0x35e   : > { %939 = vmatprep.subr.bf16.mxu0 %v8887_v47  ;;  %992 = vmatprep.subr.bf16.mxu1 %v8889_v48  ;;  %v8920_v4 = vld [vmem:[%s9885_s24 + $0xf8] sm:$0xff]   ;;  %v8923_v9 = vld [vmem:[%s9885_s24 + $0x70] sm:$0xff]   ;;  %v8927_v13 = vld [vmem:[%s9885_s24 + $0x68] sm:$0xff]  }
 0x35f   : > { %v8921_v7 = vld [vmem:[%s9885_s24 + $0x38] sm:$0xff]   ;;  %v8924_v10 = vld [vmem:[%s9885_s24 + $0xf0] sm:$0xff]   ;;  %v8928_v14 = vld [vmem:[%s9885_s24 + $0xe8] sm:$0xff]   ;;  %v10013_v42 = vsub.s32 0, %v742_v41  ;;  %v10015_v43 = vsub.s32 2, %v742_v41  ;;  %v10017_v44 = vsub.s32 1, %v742_v41 }
 0x360   : > { %v8922_v8 = vld [vmem:[%s9885_s24 + $0xb8] sm:$0xff]   ;;  %v8925_v11 = vld [vmem:[%s9885_s24 + $0x30] sm:$0xff]   ;;  %v8929_v15 = vld [vmem:[%s9885_s24 + $0x28] sm:$0xff]   ;;  %v10019_v45 = vsub.s32 3, %v742_v41 }
 0x361   : > { %940 = vmatpush1.bf16.msra.mxu0 %v8891_v49  ;;  %993 = vmatpush1.bf16.msra.mxu1 %v8892_v50  ;;  %v8926_v12 = vld [vmem:[%s9885_s24 + $0xb0] sm:$0xff]   ;;  %v8930_v16 = vld [vmem:[%s9885_s24 + $0xa8] sm:$0xff]   ;;  %v8931_v17 = vld [vmem:[%s9885_s24 + $0x60] sm:$0xff]  }
 0x362   : > { %941 = vmatprep.subr.bf16.mxu0 %v8893_v51  ;;  %994 = vmatprep.subr.bf16.mxu1 %v8895_v52  ;;  %v8932_v18 = vld [vmem:[%s9885_s24 + $0xe0] sm:$0xff]   ;;  %v8935_v21 = vld [vmem:[%s9885_s24 + $0x58] sm:$0xff]   ;;  %v8939_v25 = vld [vmem:[%s9885_s24 + $0x50] sm:$0xff]  }
 0x363   : > { %v8933_v19 = vld [vmem:[%s9885_s24 + $0x20] sm:$0xff]   ;;  %v8936_v22 = vld [vmem:[%s9885_s24 + $0xd8] sm:$0xff]   ;;  %v8940_v26 = vld [vmem:[%s9885_s24 + $0xd0] sm:$0xff]  }
 0x364   : > { %v8934_v20 = vld [vmem:[%s9885_s24 + $0xa0] sm:$0xff]   ;;  %v8937_v23 = vld [vmem:[%s9885_s24 + $0x18] sm:$0xff]   ;;  %v8941_v27 = vld [vmem:[%s9885_s24 + $0x10] sm:$0xff]  }
 0x365   : > { %942 = vmatpush1.bf16.msra.mxu0 %v8897_v53  ;;  %995 = vmatpush1.bf16.msra.mxu1 %v8898_v54  ;;  %v8938_v24 = vld [vmem:[%s9885_s24 + $0x98] sm:$0xff]   ;;  %v8942_v28 = vld [vmem:[%s9885_s24 + $0x90] sm:$0xff]   ;;  %v8943_v29 = vld [vmem:[%s9885_s24 + $0x48] sm:$0xff]  }
 0x366   : > { %943 = vmatprep.subr.bf16.mxu0 %v8899_v55  ;;  %996 = vmatprep.subr.bf16.mxu1 %v8901_v56  ;;  %v8944_v30 = vld [vmem:[%s9885_s24 + $0xc8] sm:$0xff]   ;;  %v8947_v33 = vld [vmem:[%s9885_s24 + $0x40] sm:$0xff]  }
 0x367   : > { %v8945_v31 = vld [vmem:[%s9885_s24 + $0x8] sm:$0xff]   ;;  %v8948_v34 = vld [vmem:[%s9885_s24 + $0xc0] sm:$0xff]  }
 0x368   : > { %v8946_v32 = vld [vmem:[%s9885_s24 + $0x88] sm:$0xff]   ;;  %v8949_v35 = vld [vmem:[%s9885_s24] sm:$0xff]  }
 0x369   : > { %944 = vmatpush1.bf16.msra.mxu0 %v8903_v57  ;;  %997 = vmatpush1.bf16.msra.mxu1 %v8904_v58  ;;  %v8950_v37 = vld [vmem:[%s9885_s24 + $0x80] sm:$0xff]   ;;  %v8956_v39 = vld [vmem:[%s9875_s18 + $0x1ec] ss:$16 sps:$4 sm:$0xff]  }
 0x36a   : > { %945 = vmatprep.subr.bf16.mxu0 %v8905_v59  ;;  %998 = vmatprep.subr.bf16.mxu1 %v8907_v60  ;;  %v8953_v38 = vld [vmem:[%s9875_s18 + $0x1e4] ss:$16 sps:$4 sm:$0xff]   ;;  %v739_v46 = vld [vmem:[%s9880_s21] sm:$0xf] }
 0x36b   : > { %v744_v47 = vrot.slane %v739_v46, %v10013_v42  ;;  %v752_v48 = vrot.slane %v739_v46, %v10015_v43  ;;  %v10025_v51 = vrot.slane %v739_v46, %v10017_v44  ;;  %v10028_v52 = vrot.slane %v739_v46, %v10019_v45 }
 0x36d   : > { %946 = vmatpush1.bf16.msra.mxu0 %v8909_v61  ;;  %999 = vmatpush1.bf16.msra.mxu1 %v8910_v62 }
 0x36e   : > { %947 = vmatprep.subr.bf16.mxu0 %v8911_v63  ;;  %1000 = vmatprep.subr.bf16.mxu1 %v8913_v0 }
 0x371   : > { %948 = vmatpush1.bf16.msra.mxu0 %v8915_v1  ;;  %1001 = vmatpush1.bf16.msra.mxu1 %v8916_v2 }
 0x372   : > { %8343 = vmatprep.subr.bf16.mxu0 %v8919_v3  ;;  %8371 = vmatprep.subr.bf16.mxu1 %v8920_v4 }
 0x374   : > { %966 = vmatmul.mubr.bf16.vlgmr.msra.gmra.mxu0 %v8917_v5  ;;  %1019 = vmatmul.mubr.bf16.vlgmr.msra.gmra.mxu1 %v8917_v5 }
 0x375   : > { %975 = vmatprep.mubr.bf16.mxu0 %v9800_v36  ;;  %1028 = vmatprep.mubr.bf16.mxu1 %v9800_v36 }
 0x376   : > { %8344 = vmatpush3.bf16.msra.mxu0 %v8921_v7  ;;  %8372 = vmatpush3.bf16.msra.mxu1 %v8922_v8 }
 0x377   : > { %8345 = vmatprep.subr.bf16.mxu0 %v8923_v9  ;;  %8373 = vmatprep.subr.bf16.mxu1 %v8924_v10 }
 0x37a   : > { %8346 = vmatpush3.bf16.msra.mxu0 %v8925_v11  ;;  %8374 = vmatpush3.bf16.msra.mxu1 %v8926_v12 }
 0x37b   : > { %8347 = vmatprep.subr.bf16.mxu0 %v8927_v13  ;;  %8375 = vmatprep.subr.bf16.mxu1 %v8928_v14 }
 0x37c   : > { %976 = vmatmul.mubr.bf16.gmra.mxu0 %v8918_v6  ;;  %1029 = vmatmul.mubr.bf16.gmra.mxu1 %v8918_v6 }
 0x37e   : > { %8348 = vmatpush3.bf16.msra.mxu0 %v8929_v15  ;;  %8376 = vmatpush3.bf16.msra.mxu1 %v8930_v16 }
 0x37f   : > { %8349 = vmatprep.subr.bf16.mxu0 %v8931_v17  ;;  %8377 = vmatprep.subr.bf16.mxu1 %v8932_v18 }
 0x382   : > { %8350 = vmatpush3.bf16.msra.mxu0 %v8933_v19  ;;  %8378 = vmatpush3.bf16.msra.mxu1 %v8934_v20 }
 0x383   : > { %8351 = vmatprep.subr.bf16.mxu0 %v8935_v21  ;;  %8379 = vmatprep.subr.bf16.mxu1 %v8936_v22 }
 0x386   : > { %8352 = vmatpush3.bf16.msra.mxu0 %v8937_v23  ;;  %8380 = vmatpush3.bf16.msra.mxu1 %v8938_v24 }
 0x387   : > { %8353 = vmatprep.subr.bf16.mxu0 %v8939_v25  ;;  %8381 = vmatprep.subr.bf16.mxu1 %v8940_v26 }
 0x38a   : > { %8354 = vmatpush3.bf16.msra.mxu0 %v8941_v27  ;;  %8382 = vmatpush3.bf16.msra.mxu1 %v8942_v28 }
 0x38b   : > { %8355 = vmatprep.subr.bf16.mxu0 %v8943_v29  ;;  %8383 = vmatprep.subr.bf16.mxu1 %v8944_v30 }
 0x38e   : > { %8356 = vmatpush3.bf16.msra.mxu0 %v8945_v31  ;;  %8384 = vmatpush3.bf16.msra.mxu1 %v8946_v32 }
 0x38f   : > { %8357 = vmatprep.subr.bf16.mxu0 %v8947_v33  ;;  %8385 = vmatprep.subr.bf16.mxu1 %v8948_v34 }
 0x392   : > { %8358 = vmatpush3.bf16.msra.mxu0 %v8949_v35  ;;  %8386 = vmatpush3.bf16.msra.mxu1 %v8950_v37 }
 0x393   : > { %1708 = vmatprep.subr.bf16.mxu0 %v8953_v38  ;;  %1761 = vmatprep.subr.bf16.mxu1 %v8956_v39 }
 0x434   : > { %v967_v49 = vpop.f32.mrf.mxu0  ;;  %v1020_v50 = vpop.f32.mrf.mxu1 }
 0x435   : > { %v968_v53 = vadd.f32 %v967_v49, %v744_v47  ;;  %v1021_v54 = vadd.f32 %v1020_v50, %v752_v48 }
 0x436   : > { %v969_v55 = vpop.f32.mrf.mxu0  ;;  %v1022_v56 = vpop.f32.mrf.mxu1 }
 0x437   : > { %v1055_v57 = vmul.f32 0.70710677, %v968_v53  ;;  %v1057_v58 = vmul.f32 0.70710677, %v1021_v54  ;;  %v970_v59 = vadd.f32 %v969_v55, %v10025_v51  ;;  %v1023_v60 = vadd.f32 %v1022_v56, %v10028_v52 }
 0x438   : > { %v971_v61 = vpop.f32.mrf.mxu0  ;;  %v1024_v62 = vpop.f32.mrf.mxu1  ;;  %v10032_v63 = vmul.f32 0.5, %v968_v53  ;;  %v10034_v2 = vmul.f32 0.5, %v1021_v54 }
 0x439   : > { %9511 = verf.f32 %v1055_v57  ;;  %v972_v0 = vadd.f32 %v971_v61, %v744_v47  ;;  %v1025_v1 = vadd.f32 %v1024_v62, %v752_v48  ;;  %v10036_v3 = vmul.f32 0.5, %v970_v59 }
 0x43a   : > { %9513 = verf.f32 %v1057_v58  ;;  %v1056_v4 = vmul.f32 0.70710677, %v970_v59  ;;  %v973_v5 = vpop.f32.mrf.mxu0  ;;  %v1026_v6 = vpop.f32.mrf.mxu1  ;;  %v10038_v7 = vmul.f32 0.5, %v1023_v60  ;;  %v1058_v8 = vmul.f32 0.70710677, %v1023_v60 }
 0x43b   : > { %v10040_v9 = vmul.f32 0.5, %v972_v0  ;;  %v1059_v10 = vmul.f32 0.70710677, %v972_v0  ;;  %v1061_v11 = vmul.f32 0.70710677, %v1025_v1  ;;  %v974_v12 = vadd.f32 %v973_v5, %v10025_v51 }
 0x43c   : > { %9515 = verf.f32 %v1056_v4  ;;  %v1027_v13 = vadd.f32 %v1026_v6, %v10028_v52  ;;  %v977_v14 = vpop.f32.mrf.mxu0  ;;  %v1030_v15 = vpop.f32.mrf.mxu1  ;;  %v10044_v16 = vmul.f32 0.5, %v1025_v1 }
 0x43d   : > { %9517 = verf.f32 %v1058_v8  ;;  %v978_v17 = vadd.f32 %v977_v14, %v744_v47  ;;  %v1031_v18 = vadd.f32 %v1030_v15, %v752_v48  ;;  %v10046_v19 = vmul.f32 0.5, %v974_v12 }
 0x43e   : > { %9519 = verf.f32 %v1059_v10  ;;  %v1060_v20 = vmul.f32 0.70710677, %v974_v12  ;;  %v10048_v21 = vmul.f32 0.5, %v1027_v13  ;;  %v979_v22 = vpop.f32.mrf.mxu0  ;;  %v1032_v23 = vpop.f32.mrf.mxu1  ;;  %v1062_v24 = vmul.f32 0.70710677, %v1027_v13 }
 0x43f   : > { %9521 = verf.f32 %v1061_v11  ;;  %v10050_v25 = vmul.f32 0.5, %v978_v17  ;;  %v1063_v26 = vmul.f32 0.70710677, %v978_v17  ;;  %v10052_v27 = vmul.f32 0.5, %v1031_v18 }
 0x440   : > { %9523 = verf.f32 %v1060_v20  ;;  %v1065_v28 = vmul.f32 0.70710677, %v1031_v18  ;;  %v980_v29 = vadd.f32 %v979_v22, %v10025_v51  ;;  %v981_v30 = vpop.f32.mrf.mxu0  ;;  %v1034_v31 = vpop.f32.mrf.mxu1  ;;  %v1033_v32 = vadd.f32 %v1032_v23, %v10028_v52  ;;  %v8951_v23 = vld [vmem:[%s9875_s18 + $0x1e0] ss:$16 sps:$4 sm:$0xff]  }
 0x441   : > { %9525 = verf.f32 %v1062_v24  ;;  %v982_v33 = vadd.f32 %v981_v30, %v744_v47  ;;  %v1035_v34 = vadd.f32 %v1034_v31, %v752_v48  ;;  %v8959_v31 = vld [vmem:[%s9875_s18 + $0x1c4] ss:$16 sps:$4 sm:$0xff]  }
 0x442   : > { %9527 = verf.f32 %v1063_v26  ;;  %v10056_v35 = vmul.f32 0.5, %v980_v29  ;;  %v1064_v37 = vmul.f32 0.70710677, %v980_v29  ;;  %v983_v38 = vpop.f32.mrf.mxu0  ;;  %v1036_v39 = vpop.f32.mrf.mxu1  ;;  %v10058_v40 = vmul.f32 0.5, %v1033_v32 }
 0x443   : > { %9529 = verf.f32 %v1065_v28  ;;  %v1066_v41 = vmul.f32 0.70710677, %v1033_v32  ;;  %v10060_v46 = vmul.f32 0.5, %v982_v33  ;;  %v1067_v49 = vmul.f32 0.70710677, %v982_v33 }
 0x444   : > { %9531 = verf.f32 %v1064_v37  ;;  %v10062_v50 = vmul.f32 0.5, %v1035_v34  ;;  %v1069_v53 = vmul.f32 0.70710677, %v1035_v34  ;;  %v984_v47 = vadd.f32 %v983_v38, %v10025_v51  ;;  %v8962_v33 = vld [vmem:[%s9875_s18 + $0x1cc] ss:$16 sps:$4 sm:$0xff]  }
 0x445   : > { %9533 = verf.f32 %v1066_v41  ;;  %v1037_v48 = vadd.f32 %v1036_v39, %v10028_v52  ;;  %v8957_v41 = vld [vmem:[%s9875_s18 + $0x1c0] ss:$16 sps:$4 sm:$0xff]  }
 0x446   : > { %v9512_v54 = vpop.eup %9511  ;;  %9535 = verf.f32 %v1067_v49  ;;  %v10066_v57 = vmul.f32 0.5, %v984_v47  ;;  %v1068_v58 = vmul.f32 0.70710677, %v984_v47 }
 0x447   : > { %v9514_v55 = vpop.eup %9513  ;;  %v1087_v56 = vadd.f32 1.0, %v9512_v54  ;;  %9537 = verf.f32 %v1069_v53  ;;  %v10068_v60 = vmul.f32 0.5, %v1037_v48  ;;  %v1070_v61 = vmul.f32 0.70710677, %v1037_v48  ;;  %v8960_v53 = vld [vmem:[%s9875_s18 + $0x1c8] ss:$16 sps:$4 sm:$0xff]  }
 0x448   : > { %v1089_v59 = vadd.f32 1.0, %v9514_v55  ;;  %9539 = verf.f32 %v1068_v58  ;;  %v8968_v48 = vld [vmem:[%s9875_s18 + $0x1ac] ss:$16 sps:$4 sm:$0xff]  }
 0x449   : > { %v9516_v62 = vpop.eup %9515  ;;  %9541 = verf.f32 %v1070_v61  ;;  %v1103_v26 = vmul.f32 %v1087_v56, %v10032_v63 }
 0x44a   : > { %v9518_v0 = vpop.eup %9517  ;;  %v1088_v1 = vadd.f32 1.0, %v9516_v62 }
 0x44b   : > { %v9520_v51 = vpop.eup %9519  ;;  %v1090_v52 = vadd.f32 1.0, %v9518_v0  ;;  %v8963_v0 = vld [vmem:[%s9875_s18 + $0x1a0] ss:$16 sps:$4 sm:$0xff]  }
 0x44c   : > { %v9522_v4 = vpop.eup %9521  ;;  %v1091_v5 = vadd.f32 1.0, %v9520_v51  ;;  %v1104_v17 = vmul.f32 %v1088_v1, %v10036_v3  ;;  %v1105_v3 = vmul.f32 %v1089_v59, %v10034_v2  ;;  %v8965_v2 = vld [vmem:[%s9875_s18 + $0x1a4] ss:$16 sps:$4 sm:$0xff]  }
 0x44d   : > { %v9524_v6 = vpop.eup %9523  ;;  %v1093_v8 = vadd.f32 1.0, %v9522_v4  ;;  %v1106_v28 = vmul.f32 %v1090_v52, %v10038_v7  ;;  %v8971_v4 = vld [vmem:[%s9875_s18 + $0x184] ss:$16 sps:$4 sm:$0xff]  }
 0x44e   : > { %v9526_v10 = vpop.eup %9525  ;;  %v1092_v11 = vadd.f32 1.0, %v9524_v6  ;;  %v1107_v13 = vmul.f32 %v1091_v5, %v10040_v9  ;;  %v8954_v9 = vld [vmem:[%s9875_s18 + $0x1e8] ss:$16 sps:$4 sm:$0xff]  }
 0x44f   : > { %v9528_v12 = vpop.eup %9527  ;;  %v1094_v14 = vadd.f32 1.0, %v9526_v10  ;;  %v1109_v18 = vmul.f32 %v1093_v8, %v10044_v16  ;;  %v8972_v6 = vld [vmem:[%s9875_s18 + $0x188] ss:$16 sps:$4 sm:$0xff]   ;;  %v8977_v8 = vld [vmem:[%s9875_s18 + $0x164] ss:$16 sps:$4 sm:$0xff]  }
 0x450   : > { %v9530_v15 = vpop.eup %9529  ;;  %v1108_v20 = vmul.f32 %v1092_v11, %v10046_v19  ;;  %v1095_v22 = vadd.f32 1.0, %v9528_v12  ;;  %v1119_v37 = vpack.c.bf16 %v1107_v13, %v1103_v26  ;;  %v8975_v10 = vld [vmem:[%s9875_s18 + $0x160] ss:$16 sps:$4 sm:$0xff]   ;;  %v8978_v11 = vld [vmem:[%s9875_s18 + $0x168] ss:$16 sps:$4 sm:$0xff]  }
 0x451   : > { %v9532_v24 = vpop.eup %9531  ;;  %v1110_v29 = vmul.f32 %v1094_v14, %v10048_v21  ;;  %v1097_v30 = vadd.f32 1.0, %v9530_v15  ;;  %v1121_v39 = vpack.c.bf16 %v1109_v18, %v1105_v3  ;;  %v8983_v12 = vld [vmem:[%s9875_s18 + $0x144] ss:$16 sps:$4 sm:$0xff]   ;;  %v8986_v13 = vld [vmem:[%s9875_s18 + $0x14c] ss:$16 sps:$4 sm:$0xff]  }
 0x452   : > { %v9534_v32 = vpop.eup %9533  ;;  %v1096_v16 = vadd.f32 1.0, %v9532_v24  ;;  %v1120_v19 = vpack.c.bf16 %v1108_v20, %v1104_v17  ;;  %v1111_v1 = vmul.f32 %v1095_v22, %v10050_v25  ;;  %v8981_v14 = vld [vmem:[%s9875_s18 + $0x140] ss:$16 sps:$4 sm:$0xff]   ;;  %v8984_v15 = vld [vmem:[%s9875_s18 + $0x148] ss:$16 sps:$4 sm:$0xff]  }
 0x453   : > { %v9536_v34 = vpop.eup %9535  ;;  %v1098_v63 = vadd.f32 1.0, %v9534_v32  ;;  %v1122_v38 = vpack.c.bf16 %v1110_v29, %v1106_v28  ;;  %v1113_v5 = vmul.f32 %v1097_v30, %v10052_v27  ;;  %v8980_v27 = vld [vmem:[%s9875_s18 + $0x16c] ss:$16 sps:$4 sm:$0xff]   ;;  %v8989_v17 = vld [vmem:[%s9875_s18 + $0x124] ss:$16 sps:$4 sm:$0xff]  }
 0x454   : > { %v9538_v7 = vpop.eup %9537  ;;  %v1099_v21 = vadd.f32 1.0, %v9536_v34  ;;  %1422 = vmatprep.mubr.bf16.mxu0 %v1120_v19  ;;  %v1112_v59 = vmul.f32 %v1096_v16, %v10056_v35  ;;  %v8992_v18 = vld [vmem:[%s9875_s18 + $0x12c] ss:$16 sps:$4 sm:$0xff]   ;;  %v8987_v20 = vld [vmem:[%s9875_s18 + $0x120] ss:$16 sps:$4 sm:$0xff]  }
 0x455   : > { %v1101_v49 = vadd.f32 1.0, %v9538_v7  ;;  %1471 = vmatprep.mubr.bf16.mxu1 %v1122_v38  ;;  %1423 = vmatmul.mubr.bf16.vlgmr.msra.gmra.mxu0 %v1119_v37  ;;  %v9540_v47 = vpop.eup %9539  ;;  %v1114_v51 = vmul.f32 %v1098_v63, %v10058_v40  ;;  %v8990_v22 = vld [vmem:[%s9875_s18 + $0x128] ss:$16 sps:$4 sm:$0xff]   ;;  %v8998_v24 = vld [vmem:[%s9875_s18 + $0x10c] ss:$16 sps:$4 sm:$0xff]   ;;  %v10118_v29 = vld [vmem:[#allocation2] sm:$0xff]  }
 0x456   : > { %1472 = vmatmul.mubr.bf16.vlgmr.msra.gmra.mxu1 %v1121_v39  ;;  %1709 = vmatpush1.bf16.msra.mxu0 %v8951_v23  ;;  %v9542_v54 = vpop.eup %9541  ;;  %v1100_v55 = vadd.f32 1.0, %v9540_v47  ;;  %v1115_v56 = vmul.f32 %v1099_v21, %v10060_v46  ;;  %v8966_v46 = vld [vmem:[%s9875_s18 + $0x1a8] ss:$16 sps:$4 sm:$0xff]   ;;  %v8995_v23 = vld [vmem:[%s9875_s18 + $0x104] ss:$16 sps:$4 sm:$0xff]  }
 0x457   : > { %1762 = vmatpush1.bf16.msra.mxu1 %v8954_v9  ;;  %1710 = vmatprep.subr.bf16.mxu0 %v8959_v31  ;;  %v1102_v58 = vadd.f32 1.0, %v9542_v54  ;;  %v1117_v61 = vmul.f32 %v1101_v49, %v10062_v50  ;;  %v8974_v50 = vld [vmem:[%s9875_s18 + $0x18c] ss:$16 sps:$4 sm:$0xff]   ;;  %v8993_v26 = vld [vmem:[%s9875_s18 + $0x100] ss:$16 sps:$4 sm:$0xff]  }
 0x458   : > { %1763 = vmatprep.subr.bf16.mxu1 %v8962_v33  ;;  %v1116_v62 = vmul.f32 %v1100_v55, %v10066_v57  ;;  %v1123_v25 = vpack.c.bf16 %v1115_v56, %v1111_v1  ;;  %v8996_v28 = vld [vmem:[%s9875_s18 + $0x108] ss:$16 sps:$4 sm:$0xff]   ;;  %v9003_v16 = vld [vmem:[%s9885_s24 + $0x170] sm:$0xff]   ;;  %v9011_v39 = vld [vmem:[%s9885_s24 + $0x160] sm:$0xff]  }
 0x459   : > { %v1118_v52 = vmul.f32 %v1102_v58, %v10068_v60  ;;  %v1125_v40 = vpack.c.bf16 %v1117_v61, %v1113_v5  ;;  %v8969_v60 = vld [vmem:[%s9875_s18 + $0x180] ss:$16 sps:$4 sm:$0xff]   ;;  %v10124_v30 = vld [vmem:[#allocation2 + $0x8] sm:$0xff]   ;;  %v8999_v9 = vld [vmem:[%s9885_s24 + $0x178] sm:$0xff]  }
 0x45a   : > { %1711 = vmatpush1.bf16.msra.mxu0 %v8957_v41  ;;  %v1124_v35 = vpack.c.bf16 %v1116_v62, %v1112_v59  ;;  %v9000_v31 = vld [vmem:[%s9885_s24 + $0x1f8] sm:$0xff]   ;;  %v9004_v19 = vld [vmem:[%s9885_s24 + $0x1f0] sm:$0xff]   ;;  %v9007_v37 = vld [vmem:[%s9885_s24 + $0x168] sm:$0xff]  }
 0x45b   : > { %1764 = vmatpush1.bf16.msra.mxu1 %v8960_v53  ;;  %1712 = vmatprep.subr.bf16.mxu0 %v8965_v2  ;;  %v1126_v57 = vpack.c.bf16 %v1118_v52, %v1114_v51  ;;  %v9001_v32 = vld [vmem:[%s9885_s24 + $0x138] sm:$0xff]   ;;  %v9005_v33 = vld [vmem:[%s9885_s24 + $0x130] sm:$0xff]   ;;  %v9008_v63 = vld [vmem:[%s9885_s24 + $0x1e8] sm:$0xff]  }
 0x45c   : > { %1765 = vmatprep.subr.bf16.mxu1 %v8968_v48  ;;  %1430 = vmatprep.mubr.bf16.mxu0 %v1124_v35  ;;  %v9002_v3 = vld [vmem:[%s9885_s24 + $0x1b8] sm:$0xff]   ;;  %v9006_v34 = vld [vmem:[%s9885_s24 + $0x1b0] sm:$0xff]   ;;  %v9009_v38 = vld [vmem:[%s9885_s24 + $0x128] sm:$0xff]  }
 0x45d   : > { %1479 = vmatprep.mubr.bf16.mxu1 %v1126_v57  ;;  %1431 = vmatmul.mubr.bf16.gmra.mxu0 %v1123_v25  ;;  %v9010_v7 = vld [vmem:[%s9885_s24 + $0x1a8] sm:$0xff]   ;;  %v9012_v21 = vld [vmem:[%s9885_s24 + $0x1e0] sm:$0xff]   ;;  %v9015_v53 = vld [vmem:[%s9885_s24 + $0x158] sm:$0xff]  }
 0x45e   : > { %1480 = vmatmul.mubr.bf16.gmra.mxu1 %v1125_v40  ;;  %1713 = vmatpush1.bf16.msra.mxu0 %v8963_v0  ;;  %v9013_v41 = vld [vmem:[%s9885_s24 + $0x120] sm:$0xff]   ;;  %v9016_v2 = vld [vmem:[%s9885_s24 + $0x1d8] sm:$0xff]   ;;  %v9019_v54 = vld [vmem:[%s9885_s24 + $0x150] sm:$0xff]  }
 0x45f   : > { %1766 = vmatpush1.bf16.msra.mxu1 %v8966_v46  ;;  %1714 = vmatprep.subr.bf16.mxu0 %v8971_v4  ;;  %v9014_v49 = vld [vmem:[%s9885_s24 + $0x1a0] sm:$0xff]   ;;  %v9017_v47 = vld [vmem:[%s9885_s24 + $0x118] sm:$0xff]   ;;  %v9020_v55 = vld [vmem:[%s9885_s24 + $0x1d0] sm:$0xff]  }
 0x460   : > { %1767 = vmatprep.subr.bf16.mxu1 %v8974_v50  ;;  %1740 = vmatprep.mubr.bf16.mxu0 %v9800_v36  ;;  %v9018_v48 = vld [vmem:[%s9885_s24 + $0x198] sm:$0xff]   ;;  %v9021_v56 = vld [vmem:[%s9885_s24 + $0x110] sm:$0xff]   ;;  %v9023_v59 = vld [vmem:[%s9885_s24 + $0x148] sm:$0xff]  }
 0x461   : > { %1793 = vmatprep.mubr.bf16.mxu1 %v9800_v36  ;;  %v9022_v58 = vld [vmem:[%s9885_s24 + $0x190] sm:$0xff]   ;;  %v9024_v61 = vld [vmem:[%s9885_s24 + $0x1c8] sm:$0xff]   ;;  %v9027_v1 = vld [vmem:[%s9885_s24 + $0x140] sm:$0xff]  }
 0x462   : > { %1715 = vmatpush1.bf16.msra.mxu0 %v8969_v60  ;;  %v9025_v62 = vld [vmem:[%s9885_s24 + $0x108] sm:$0xff]   ;;  %v9028_v51 = vld [vmem:[%s9885_s24 + $0x1c0] sm:$0xff]  }
 0x463   : > { %1768 = vmatpush1.bf16.msra.mxu1 %v8972_v6  ;;  %1716 = vmatprep.subr.bf16.mxu0 %v8977_v8  ;;  %v9026_v0 = vld [vmem:[%s9885_s24 + $0x188] sm:$0xff]   ;;  %v9029_v52 = vld [vmem:[%s9885_s24 + $0x100] sm:$0xff]  }
 0x464   : > { %1769 = vmatprep.subr.bf16.mxu1 %v8980_v27  ;;  %v9030_v46 = vld [vmem:[%s9885_s24 + $0x180] sm:$0xff]   ;;  %v9036_v5 = vld [vmem:[%s9875_s18 + $0x2ec] ss:$16 sps:$4 sm:$0xff]  }
 0x465   : > { %v9033_v4 = vld [vmem:[%s9875_s18 + $0x2e4] ss:$16 sps:$4 sm:$0xff]   ;;  %v7137_v57 = vld [vmem:[%s9890_s27] ss:$0 sm:$0xff] }
 0x466   : > { %1717 = vmatpush1.bf16.msra.mxu0 %v8975_v10 }
 0x467   : > { %1770 = vmatpush1.bf16.msra.mxu1 %v8978_v11  ;;  %1718 = vmatprep.subr.bf16.mxu0 %v8983_v12 }
 0x468   : > { %1771 = vmatprep.subr.bf16.mxu1 %v8986_v13 }
 0x46a   : > { %1719 = vmatpush1.bf16.msra.mxu0 %v8981_v14 }
 0x46b   : > { %1772 = vmatpush1.bf16.msra.mxu1 %v8984_v15  ;;  %1720 = vmatprep.subr.bf16.mxu0 %v8989_v17 }
 0x46c   : > { %1773 = vmatprep.subr.bf16.mxu1 %v8992_v18 }
 0x46e   : > { %1721 = vmatpush1.bf16.msra.mxu0 %v8987_v20 }
 0x46f   : > { %1774 = vmatpush1.bf16.msra.mxu1 %v8990_v22  ;;  %1722 = vmatprep.subr.bf16.mxu0 %v8995_v23 }
 0x470   : > { %1775 = vmatprep.subr.bf16.mxu1 %v8998_v24 }
 0x472   : > { %1723 = vmatpush1.bf16.msra.mxu0 %v8993_v26 }
 0x473   : > { %1776 = vmatpush1.bf16.msra.mxu1 %v8996_v28  ;;  %8399 = vmatprep.subr.bf16.mxu0 %v8999_v9 }
 0x474   : > { %8427 = vmatprep.subr.bf16.mxu1 %v9000_v31 }
 0x475   : > { %1741 = vmatmul.mubr.bf16.vlgmr.msra.gmra.mxu0 %v10118_v29 }
 0x476   : > { %1794 = vmatmul.mubr.bf16.vlgmr.msra.gmra.mxu1 %v10118_v29  ;;  %1750 = vmatprep.mubr.bf16.mxu0 %v9800_v36 }
 0x477   : > { %1803 = vmatprep.mubr.bf16.mxu1 %v9800_v36  ;;  %8400 = vmatpush3.bf16.msra.mxu0 %v9001_v32 }
 0x478   : > { %8428 = vmatpush3.bf16.msra.mxu1 %v9002_v3  ;;  %8401 = vmatprep.subr.bf16.mxu0 %v9003_v16 }
 0x479   : > { %8429 = vmatprep.subr.bf16.mxu1 %v9004_v19 }
 0x47b   : > { %8402 = vmatpush3.bf16.msra.mxu0 %v9005_v33 }
 0x47c   : > { %8430 = vmatpush3.bf16.msra.mxu1 %v9006_v34  ;;  %8403 = vmatprep.subr.bf16.mxu0 %v9007_v37 }
 0x47d   : > { %1751 = vmatmul.mubr.bf16.gmra.mxu0 %v10124_v30  ;;  %8431 = vmatprep.subr.bf16.mxu1 %v9008_v63 }
 0x47e   : > { %1804 = vmatmul.mubr.bf16.gmra.mxu1 %v10124_v30 }
 0x47f   : > { %8404 = vmatpush3.bf16.msra.mxu0 %v9009_v38  ;;  %v7202_v38 = vld [vmem:[%s9880_s21 + $0x4] sm:$0xf] }
 0x480   : > { %8432 = vmatpush3.bf16.msra.mxu1 %v9010_v7  ;;  %8405 = vmatprep.subr.bf16.mxu0 %v9011_v39  ;;  %v1531_v7 = vrot.slane %v7202_v38, %v10013_v42  ;;  %v1539_v39 = vrot.slane %v7202_v38, %v10015_v43 }
 0x481   : > { %8433 = vmatprep.subr.bf16.mxu1 %v9012_v21  ;;  %v1535_v21 = vrot.slane %v7202_v38, %v10017_v44 }
 0x483   : > { %8406 = vmatpush3.bf16.msra.mxu0 %v9013_v41 }
 0x484   : > { %8434 = vmatpush3.bf16.msra.mxu1 %v9014_v49  ;;  %8407 = vmatprep.subr.bf16.mxu0 %v9015_v53  ;;  %v1543_v49 = vrot.slane %v7202_v38, %v10019_v45 }
 0x485   : > { %8435 = vmatprep.subr.bf16.mxu1 %v9016_v2 }
 0x487   : > { %8408 = vmatpush3.bf16.msra.mxu0 %v9017_v47 }
 0x488   : > { %8436 = vmatpush3.bf16.msra.mxu1 %v9018_v48  ;;  %8409 = vmatprep.subr.bf16.mxu0 %v9019_v54 }
 0x489   : > { %8437 = vmatprep.subr.bf16.mxu1 %v9020_v55 }
 0x48b   : > { %8410 = vmatpush3.bf16.msra.mxu0 %v9021_v56 }
 0x48c   : > { %8438 = vmatpush3.bf16.msra.mxu1 %v9022_v58  ;;  %8411 = vmatprep.subr.bf16.mxu0 %v9023_v59 }
 0x48d   : > { %8439 = vmatprep.subr.bf16.mxu1 %v9024_v61 }
 0x48f   : > { %8412 = vmatpush3.bf16.msra.mxu0 %v9025_v62 }
 0x490   : > { %8440 = vmatpush3.bf16.msra.mxu1 %v9026_v0  ;;  %8413 = vmatprep.subr.bf16.mxu0 %v9027_v1 }
 0x491   : > { %8441 = vmatprep.subr.bf16.mxu1 %v9028_v51 }
 0x493   : > { %8414 = vmatpush3.bf16.msra.mxu0 %v9029_v52 }
 0x494   : > { %8442 = vmatpush3.bf16.msra.mxu1 %v9030_v46  ;;  %2485 = vmatprep.subr.bf16.mxu0 %v9033_v4 }
 0x495   : > { %2538 = vmatprep.subr.bf16.mxu1 %v9036_v5 }
 0x515   : > { %v8359_v35 = vpop.f32.mrf.mxu0 }
 0x516   : > { %v8387_v50 = vpop.f32.mrf.mxu1 }
 0x517   : > { %v8360_v25 = vpop.f32.mrf.mxu0 }
 0x518   : > { %v8361_v40 = vadd.f32 %v8360_v25, %v8359_v35  ;;  %v8388_v60 = vpop.f32.mrf.mxu1 }
 0x519   : > { %v8389_v6 = vadd.f32 %v8388_v60, %v8387_v50  ;;  %v8362_v8 = vpop.f32.mrf.mxu0 }
 0x51a   : > { %v1425_v27 = vadd.f32 %v8361_v40, %v7137_v57  ;;  %v8390_v10 = vpop.f32.mrf.mxu1 }
 0x51b   : > { %v8363_v11 = vpop.f32.mrf.mxu0 }
 0x51c   : > { %v10163_v12 = vadd.f32 %v8389_v6, %v1425_v27  ;;  %v8364_v13 = vadd.f32 %v8363_v11, %v8362_v8  ;;  %v8391_v14 = vpop.f32.mrf.mxu1 }
 0x51d   : > { %v8392_v17 = vadd.f32 %v8391_v14, %v8390_v10  ;;  %v8365_v18 = vpop.f32.mrf.mxu0 }
 0x51e   : > { %v1428_v15 = vadd.f32 %v8364_v13, %v7137_v57  ;;  %v8393_v20 = vpop.f32.mrf.mxu1 }
 0x51f   : > { %v8366_v23 = vpop.f32.mrf.mxu0 }
 0x520   : > { %v10165_v22 = vadd.f32 %v8392_v17, %v1428_v15  ;;  %v8367_v24 = vadd.f32 %v8366_v23, %v8365_v18  ;;  %v8394_v26 = vpop.f32.mrf.mxu1 }
 0x521   : > { %v8395_v28 = vadd.f32 %v8394_v26, %v8393_v20  ;;  %v8368_v9 = vpop.f32.mrf.mxu0 }
 0x522   : > { %v1433_v31 = vadd.f32 %v8367_v24, %v7137_v57  ;;  %v8396_v32 = vpop.f32.mrf.mxu1 }
 0x523   : > { %v8369_v3 = vpop.f32.mrf.mxu0 }
 0x524   : > { %v10167_v16 = vadd.f32 %v8395_v28, %v1433_v31  ;;  %v8370_v19 = vadd.f32 %v8369_v3, %v8368_v9  ;;  %v8397_v33 = vpop.f32.mrf.mxu1 }
 0x525   : > { %v8398_v37 = vadd.f32 %v8397_v33, %v8396_v32 }
 0x526   : > { %v1436_v34 = vadd.f32 %v8370_v19, %v7137_v57 }
 0x528   : > { %v10169_v63 = vadd.f32 %v8398_v37, %v1436_v34 }
 0x535   : > { %v1742_v41 = vpop.f32.mrf.mxu0 }
 0x536   : > { %v10176_v53 = vadd.f32 %v1742_v41, %v1531_v7  ;;  %v1795_v2 = vpop.f32.mrf.mxu1 }
 0x537   : > { %v10178_v47 = vadd.f32 %v1795_v2, %v1539_v39  ;;  %v1744_v48 = vpop.f32.mrf.mxu0 }
 0x538   : > { %v1830_v54 = vmul.f32 0.70710677, %v10176_v53  ;;  %v10181_v55 = vadd.f32 %v1744_v48, %v1535_v21  ;;  %v1797_v56 = vpop.f32.mrf.mxu1  ;;  %v1814_v48 = vmul.f32 0.5, %v10176_v53 }
 0x539   : > { %v1832_v58 = vmul.f32 0.70710677, %v10178_v47  ;;  %v10184_v59 = vadd.f32 %v1797_v56, %v1543_v49  ;;  %v1746_v61 = vpop.f32.mrf.mxu0 }
 0x53a   : > { %9543 = verf.f32 %v1830_v54  ;;  %v1831_v62 = vmul.f32 0.70710677, %v10181_v55  ;;  %v10187_v0 = vadd.f32 %v1746_v61, %v1531_v7  ;;  %v1799_v1 = vpop.f32.mrf.mxu1  ;;  %v1815_v54 = vmul.f32 0.5, %v10181_v55 }
 0x53b   : > { %9545 = verf.f32 %v1832_v58  ;;  %v1833_v51 = vmul.f32 0.70710677, %v10184_v59  ;;  %v10190_v52 = vadd.f32 %v1799_v1, %v1539_v39  ;;  %v1748_v46 = vpop.f32.mrf.mxu0 }
 0x53c   : > { %9547 = verf.f32 %v1831_v62  ;;  %v1834_v4 = vmul.f32 0.70710677, %v10187_v0  ;;  %v1749_v5 = vadd.f32 %v1748_v46, %v1535_v21  ;;  %v1801_v35 = vpop.f32.mrf.mxu1  ;;  %v1818_v1 = vmul.f32 0.5, %v10187_v0 }
 0x53d   : > { %9549 = verf.f32 %v1833_v51  ;;  %v1836_v50 = vmul.f32 0.70710677, %v10190_v52  ;;  %v1802_v57 = vadd.f32 %v1801_v35, %v1543_v49  ;;  %v1752_v25 = vpop.f32.mrf.mxu0  ;;  %v1820_v35 = vmul.f32 0.5, %v10190_v52 }
 0x53e   : > { %9551 = verf.f32 %v1834_v4  ;;  %v1835_v40 = vmul.f32 0.70710677, %v1749_v5  ;;  %v10194_v60 = vadd.f32 %v1752_v25, %v1531_v7  ;;  %v1805_v6 = vpop.f32.mrf.mxu1 }
 0x53f   : > { %9553 = verf.f32 %v1836_v50  ;;  %v1837_v8 = vmul.f32 0.70710677, %v1802_v57  ;;  %v10196_v27 = vadd.f32 %v1805_v6, %v1539_v39  ;;  %v1754_v10 = vpop.f32.mrf.mxu0  ;;  %v1819_v50 = vmul.f32 0.5, %v1749_v5 }
 0x540   : > { %9555 = verf.f32 %v1835_v40  ;;  %v1838_v11 = vmul.f32 0.70710677, %v10194_v60  ;;  %v10199_v13 = vadd.f32 %v1754_v10, %v1535_v21  ;;  %v1807_v14 = vpop.f32.mrf.mxu1  ;;  %v1817_v6 = vmul.f32 0.5, %v10184_v59 }
 0x541   : > { %9557 = verf.f32 %v1837_v8  ;;  %v1840_v15 = vmul.f32 0.70710677, %v10196_v27  ;;  %v10202_v17 = vadd.f32 %v1807_v14, %v1543_v49  ;;  %v1756_v18 = vpop.f32.mrf.mxu0  ;;  %v1821_v55 = vmul.f32 0.5, %v1802_v57  ;;  %v9031_v57 = vld [vmem:[%s9875_s18 + $0x2e0] ss:$16 sps:$4 sm:$0xff]  }
 0x542   : > { %9559 = verf.f32 %v1838_v11  ;;  %v1839_v20 = vmul.f32 0.70710677, %v10199_v13  ;;  %v10205_v23 = vadd.f32 %v1756_v18, %v1531_v7  ;;  %v1809_v24 = vpop.f32.mrf.mxu1  ;;  %v1816_v11 = vmul.f32 0.5, %v10178_v47 }
 0x543   : > { %9561 = verf.f32 %v1840_v15  ;;  %v1841_v26 = vmul.f32 0.70710677, %v10202_v17  ;;  %v10208_v28 = vadd.f32 %v1809_v24, %v1539_v39  ;;  %v1758_v9 = vpop.f32.mrf.mxu0  ;;  %v1822_v59 = vmul.f32 0.5, %v10194_v60  ;;  %v9042_v60 = vld [vmem:[%s9875_s18 + $0x2cc] ss:$16 sps:$4 sm:$0xff]  }
 0x544   : > { %9563 = verf.f32 %v1839_v20  ;;  %v1842_v31 = vmul.f32 0.70710677, %v10205_v23  ;;  %v10211_v32 = vadd.f32 %v1758_v9, %v1535_v21  ;;  %v1811_v3 = vpop.f32.mrf.mxu1  ;;  %v1824_v47 = vmul.f32 0.5, %v10196_v27 }
 0x545   : > { %9565 = verf.f32 %v1841_v26  ;;  %v1844_v19 = vmul.f32 0.70710677, %v10208_v28  ;;  %v10214_v33 = vadd.f32 %v1811_v3, %v1543_v49 }
 0x546   : > { %9567 = verf.f32 %v1842_v31  ;;  %v1843_v34 = vmul.f32 0.70710677, %v10211_v32 }
 0x547   : > { %v9544_v37 = vpop.eup %9543  ;;  %9569 = verf.f32 %v1844_v19  ;;  %v1845_v38 = vmul.f32 0.70710677, %v10214_v33  ;;  %v1823_v19 = vmul.f32 0.5, %v10199_v13 }
 0x548   : > { %v9546_v7 = vpop.eup %9545  ;;  %9571 = verf.f32 %v1843_v34  ;;  %v1862_v61 = vadd.f32 1.0, %v9544_v37  ;;  %v9034_v37 = vld [vmem:[%s9875_s18 + $0x2e8] ss:$16 sps:$4 sm:$0xff]  }
 0x549   : > { %v9548_v39 = vpop.eup %9547  ;;  %9573 = verf.f32 %v1845_v38  ;;  %v1864_v4 = vadd.f32 1.0, %v9546_v7  ;;  %v9039_v38 = vld [vmem:[%s9875_s18 + $0x2c4] ss:$16 sps:$4 sm:$0xff]  }
 0x54a   : > { %v9550_v41 = vpop.eup %9549  ;;  %v1863_v49 = vadd.f32 1.0, %v9548_v39  ;;  %v1878_v20 = vmul.f32 %v1862_v61, %v1814_v48  ;;  %v1828_v61 = vmul.f32 0.5, %v10208_v28 }
 0x54b   : > { %v9552_v21 = vpop.eup %9551  ;;  %v1865_v62 = vadd.f32 1.0, %v9550_v41  ;;  %v1880_v26 = vmul.f32 %v1864_v4, %v1816_v11  ;;  %v9040_v4 = vld [vmem:[%s9875_s18 + $0x2c8] ss:$16 sps:$4 sm:$0xff]  }
 0x54c   : > { %v9554_v2 = vpop.eup %9553  ;;  %v1866_v56 = vadd.f32 1.0, %v9552_v21  ;;  %v1879_v14 = vmul.f32 %v1863_v49, %v1815_v54  ;;  %v1825_v21 = vmul.f32 0.5, %v10202_v17  ;;  %v1827_v17 = vmul.f32 0.5, %v10211_v32  ;;  %v9048_v32 = vld [vmem:[%s9875_s18 + $0x2ac] ss:$16 sps:$4 sm:$0xff]  }
 0x54d   : > { %v9556_v58 = vpop.eup %9555  ;;  %v1868_v51 = vadd.f32 1.0, %v9554_v2  ;;  %v1881_v52 = vmul.f32 %v1865_v62, %v1817_v6  ;;  %v9046_v11 = vld [vmem:[%s9875_s18 + $0x2a8] ss:$16 sps:$4 sm:$0xff]  }
 0x54e   : > { %v9558_v46 = vpop.eup %9557  ;;  %v1867_v25 = vadd.f32 1.0, %v9556_v58  ;;  %v1882_v53 = vmul.f32 %v1866_v56, %v1818_v1  ;;  %v1826_v56 = vmul.f32 0.5, %v10205_v23  ;;  %v9037_v1 = vld [vmem:[%s9875_s18 + $0x2c0] ss:$16 sps:$4 sm:$0xff]  }
 0x54f   : > { %v9560_v40 = vpop.eup %9559  ;;  %v1869_v8 = vadd.f32 1.0, %v9558_v46  ;;  %v1884_v15 = vmul.f32 %v1868_v51, %v1820_v35  ;;  %v1829_v46 = vmul.f32 0.5, %v10214_v33  ;;  %v9045_v35 = vld [vmem:[%s9875_s18 + $0x2a4] ss:$16 sps:$4 sm:$0xff]  }
 0x550   : > { %v9562_v10 = vpop.eup %9561  ;;  %v1883_v0 = vmul.f32 %v1867_v25, %v1819_v50  ;;  %v1894_v3 = vpack.c.bf16 %v1882_v53, %v1878_v20  ;;  %v1870_v54 = vadd.f32 1.0, %v9560_v40  ;;  %v9049_v20 = vld [vmem:[%s9875_s18 + $0x280] ss:$16 sps:$4 sm:$0xff]  }
 0x551   : > { %v9564_v18 = vpop.eup %9563  ;;  %v1885_v5 = vmul.f32 %v1869_v8, %v1821_v55  ;;  %v1896_v39 = vpack.c.bf16 %v1884_v15, %v1880_v26  ;;  %v1872_v58 = vadd.f32 1.0, %v9562_v10  ;;  %v9043_v8 = vld [vmem:[%s9875_s18 + $0x2a0] ss:$16 sps:$4 sm:$0xff]   ;;  %v9051_v15 = vld [vmem:[%s9875_s18 + $0x284] ss:$16 sps:$4 sm:$0xff]  }
 0x552   : > { %v9566_v24 = vpop.eup %9565  ;;  %v1895_v9 = vpack.c.bf16 %v1883_v0, %v1879_v14  ;;  %v1871_v41 = vadd.f32 1.0, %v9564_v18  ;;  %v1886_v40 = vmul.f32 %v1870_v54, %v1822_v59  ;;  %v9054_v18 = vld [vmem:[%s9875_s18 + $0x28c] ss:$16 sps:$4 sm:$0xff]   ;;  %v9055_v26 = vld [vmem:[%s9875_s18 + $0x260] ss:$16 sps:$4 sm:$0xff]  }
 0x553   : > { %v9568_v31 = vpop.eup %9567  ;;  %v1897_v34 = vpack.c.bf16 %v1885_v5, %v1881_v52  ;;  %v1873_v49 = vadd.f32 1.0, %v9566_v24  ;;  %v1888_v55 = vmul.f32 %v1872_v58, %v1824_v47  ;;  %v9052_v52 = vld [vmem:[%s9875_s18 + $0x288] ss:$16 sps:$4 sm:$0xff]   ;;  %v9057_v5 = vld [vmem:[%s9875_s18 + $0x264] ss:$16 sps:$4 sm:$0xff]  }
 0x554   : > { %v9570_v7 = vpop.eup %9569  ;;  %v1874_v2 = vadd.f32 1.0, %v9568_v31  ;;  %2199 = vmatprep.mubr.bf16.mxu0 %v1895_v9  ;;  %v1887_v50 = vmul.f32 %v1871_v41, %v1823_v19  ;;  %v9060_v24 = vld [vmem:[%s9875_s18 + $0x26c] ss:$16 sps:$4 sm:$0xff]   ;;  %v9058_v59 = vld [vmem:[%s9875_s18 + $0x268] ss:$16 sps:$4 sm:$0xff]   ;;  %v9084_v54 = vld [vmem:[%s9885_s24 + $0x2f0] sm:$0xff]  }
 0x555   : > { %v9572_v48 = vpop.eup %9571  ;;  %v1876_v27 = vadd.f32 1.0, %v9570_v7  ;;  %2248 = vmatprep.mubr.bf16.mxu1 %v1897_v34  ;;  %2200 = vmatmul.mubr.bf16.vlgmr.msra.gmra.mxu0 %v1894_v3  ;;  %v1889_v6 = vmul.f32 %v1873_v49, %v1825_v21  ;;  %v9063_v9 = vld [vmem:[%s9875_s18 + $0x244] ss:$16 sps:$4 sm:$0xff]   ;;  %v9061_v31 = vld [vmem:[%s9875_s18 + $0x240] ss:$16 sps:$4 sm:$0xff]   ;;  %v9079_v21 = vld [vmem:[%s9885_s24 + $0x278] sm:$0xff]  }
 0x556   : > { %v9574_v13 = vpop.eup %9573  ;;  %v1875_v62 = vadd.f32 1.0, %v9572_v48  ;;  %2249 = vmatmul.mubr.bf16.vlgmr.msra.gmra.mxu1 %v1896_v39  ;;  %2486 = vmatpush1.bf16.msra.mxu0 %v9031_v57  ;;  %v1890_v51 = vmul.f32 %v1874_v2, %v1826_v56  ;;  %v9066_v57 = vld [vmem:[%s9875_s18 + $0x24c] ss:$16 sps:$4 sm:$0xff]   ;;  %v9064_v3 = vld [vmem:[%s9875_s18 + $0x248] ss:$16 sps:$4 sm:$0xff]   ;;  %v9085_v49 = vld [vmem:[%s9885_s24 + $0x230] sm:$0xff]  }
 0x557   : > { %v1877_v23 = vadd.f32 1.0, %v9574_v13  ;;  %2539 = vmatpush1.bf16.msra.mxu1 %v9034_v37  ;;  %2487 = vmatprep.subr.bf16.mxu0 %v9039_v38  ;;  %v1892_v25 = vmul.f32 %v1876_v27, %v1828_v61  ;;  %v9069_v47 = vld [vmem:[%s9875_s18 + $0x224] ss:$16 sps:$4 sm:$0xff]   ;;  %v9072_v19 = vld [vmem:[%s9875_s18 + $0x22c] ss:$16 sps:$4 sm:$0xff]  }
 0x558   : > { %v1891_v28 = vmul.f32 %v1875_v62, %v1827_v17  ;;  %2540 = vmatprep.subr.bf16.mxu1 %v9042_v60  ;;  %v1898_v14 = vpack.c.bf16 %v1890_v51, %v1886_v40  ;;  %v9067_v34 = vld [vmem:[%s9875_s18 + $0x220] ss:$16 sps:$4 sm:$0xff]   ;;  %v9070_v37 = vld [vmem:[%s9875_s18 + $0x228] ss:$16 sps:$4 sm:$0xff]   ;;  %v9075_v38 = vld [vmem:[%s9875_s18 + $0x204] ss:$16 sps:$4 sm:$0xff]  }
 0x559   : > { %v1893_v53 = vmul.f32 %v1877_v23, %v1829_v46  ;;  %v1900_v0 = vpack.c.bf16 %v1892_v25, %v1888_v55  ;;  %v9078_v7 = vld [vmem:[%s9875_s18 + $0x20c] ss:$16 sps:$4 sm:$0xff]   ;;  %v9073_v39 = vld [vmem:[%s9875_s18 + $0x200] ss:$16 sps:$4 sm:$0xff]   ;;  %v9076_v41 = vld [vmem:[%s9875_s18 + $0x208] ss:$16 sps:$4 sm:$0xff]  }
 0x55a   : > { %2488 = vmatpush1.bf16.msra.mxu0 %v9037_v1  ;;  %v1899_v33 = vpack.c.bf16 %v1891_v28, %v1887_v50  ;;  %v9080_v2 = vld [vmem:[%s9885_s24 + $0x2f8] sm:$0xff]   ;;  %v9086_v56 = vld [vmem:[%s9885_s24 + $0x2b0] sm:$0xff]   ;;  %v9088_v27 = vld [vmem:[%s9885_s24 + $0x2e8] sm:$0xff]  }
 0x55b   : > { %2541 = vmatpush1.bf16.msra.mxu1 %v9040_v4  ;;  %v1901_v10 = vpack.c.bf16 %v1893_v53, %v1889_v6  ;;  %2489 = vmatprep.subr.bf16.mxu0 %v9045_v35  ;;  %v9081_v60 = vld [vmem:[%s9885_s24 + $0x238] sm:$0xff]   ;;  %v9089_v13 = vld [vmem:[%s9885_s24 + $0x228] sm:$0xff]   ;;  %v9091_v61 = vld [vmem:[%s9885_s24 + $0x260] sm:$0xff]  }
 0x55c   : > { %2207 = vmatprep.mubr.bf16.mxu0 %v1899_v33  ;;  %2542 = vmatprep.subr.bf16.mxu1 %v9048_v32  ;;  %v9082_v48 = vld [vmem:[%s9885_s24 + $0x2b8] sm:$0xff]   ;;  %v9090_v58 = vld [vmem:[%s9885_s24 + $0x2a8] sm:$0xff]   ;;  %v9092_v17 = vld [vmem:[%s9885_s24 + $0x2e0] sm:$0xff]  }
 0x55d   : > { %2256 = vmatprep.mubr.bf16.mxu1 %v1901_v10  ;;  %2208 = vmatmul.mubr.bf16.gmra.mxu0 %v1898_v14  ;;  %v9093_v62 = vld [vmem:[%s9885_s24 + $0x220] sm:$0xff]   ;;  %v9095_v51 = vld [vmem:[%s9885_s24 + $0x258] sm:$0xff]   ;;  %v9099_v35 = vld [vmem:[%s9885_s24 + $0x250] sm:$0xff]  }
 0x55e   : > { %2257 = vmatmul.mubr.bf16.gmra.mxu1 %v1900_v0  ;;  %2490 = vmatpush1.bf16.msra.mxu0 %v9043_v8  ;;  %v9094_v1 = vld [vmem:[%s9885_s24 + $0x2a0] sm:$0xff]   ;;  %v9096_v46 = vld [vmem:[%s9885_s24 + $0x2d8] sm:$0xff]   ;;  %v9100_v50 = vld [vmem:[%s9885_s24 + $0x2d0] sm:$0xff]  }
 0x55f   : > { %2543 = vmatpush1.bf16.msra.mxu1 %v9046_v11  ;;  %2491 = vmatprep.subr.bf16.mxu0 %v9051_v15  ;;  %v9097_v23 = vld [vmem:[%s9885_s24 + $0x218] sm:$0xff]   ;;  %v9101_v25 = vld [vmem:[%s9885_s24 + $0x210] sm:$0xff]   ;;  %v9103_v32 = vld [vmem:[%s9885_s24 + $0x248] sm:$0xff]  }
 0x560   : > { %2544 = vmatprep.subr.bf16.mxu1 %v9054_v18  ;;  %2517 = vmatprep.mubr.bf16.mxu0 %v9800_v36  ;;  %v9098_v4 = vld [vmem:[%s9885_s24 + $0x298] sm:$0xff]   ;;  %v9102_v28 = vld [vmem:[%s9885_s24 + $0x290] sm:$0xff]   ;;  %v9104_v40 = vld [vmem:[%s9885_s24 + $0x2c8] sm:$0xff]  }
 0x561   : > { %2570 = vmatprep.mubr.bf16.mxu1 %v9800_v36  ;;  %v9105_v6 = vld [vmem:[%s9885_s24 + $0x208] sm:$0xff]   ;;  %v9107_v55 = vld [vmem:[%s9885_s24 + $0x240] sm:$0xff]  }
 0x562   : > { %2492 = vmatpush1.bf16.msra.mxu0 %v9049_v20  ;;  %v9106_v53 = vld [vmem:[%s9885_s24 + $0x288] sm:$0xff]   ;;  %v9108_v33 = vld [vmem:[%s9885_s24 + $0x2c0] sm:$0xff]  }
 0x563   : > { %2545 = vmatpush1.bf16.msra.mxu1 %v9052_v52  ;;  %2493 = vmatprep.subr.bf16.mxu0 %v9057_v5  ;;  %v9109_v8 = vld [vmem:[%s9885_s24 + $0x200] sm:$0xff]   ;;  %v9116_v14 = vld [vmem:[%s9875_s18 + $0x3ec] ss:$16 sps:$4 sm:$0xff]  }
 0x564   : > { %2546 = vmatprep.subr.bf16.mxu1 %v9060_v24  ;;  %v9110_v10 = vld [vmem:[%s9885_s24 + $0x280] sm:$0xff]   ;;  %v703_v24 = vld [vmem:[#allocation4] sm:$0xff] }
 0x565   : > { %v9113_v11 = vld [vmem:[%s9875_s18 + $0x3e4] ss:$16 sps:$4 sm:$0xff]   ;;  %v7300_v18 = vld [vmem:[%s9890_s27 + $0x1] ss:$0 sm:$0xff] }
 0x566   : > { %2494 = vmatpush1.bf16.msra.mxu0 %v9055_v26 }
 0x567   : > { %2547 = vmatpush1.bf16.msra.mxu1 %v9058_v59  ;;  %2495 = vmatprep.subr.bf16.mxu0 %v9063_v9 }
 0x568   : > { %2548 = vmatprep.subr.bf16.mxu1 %v9066_v57 }
 0x56a   : > { %2496 = vmatpush1.bf16.msra.mxu0 %v9061_v31 }
 0x56b   : > { %2549 = vmatpush1.bf16.msra.mxu1 %v9064_v3  ;;  %2497 = vmatprep.subr.bf16.mxu0 %v9069_v47  ;;  %v1488_v3 = vadd.f32 %v10163_v12, %v703_v24 }
 0x56c   : > { %2550 = vmatprep.subr.bf16.mxu1 %v9072_v19 }
 0x56e   : > { %2498 = vmatpush1.bf16.msra.mxu0 %v9067_v34 }
 0x56f   : > { %2551 = vmatpush1.bf16.msra.mxu1 %v9070_v37  ;;  %2499 = vmatprep.subr.bf16.mxu0 %v9075_v38  ;;  %v704_v37 = vld [vmem:[#allocation4 + $0x18] sm:$0xff] }
 0x570   : > { %2552 = vmatprep.subr.bf16.mxu1 %v9078_v7 }
 0x572   : > { %2500 = vmatpush1.bf16.msra.mxu0 %v9073_v39 }
 0x573   : > { %2553 = vmatpush1.bf16.msra.mxu1 %v9076_v41  ;;  %8455 = vmatprep.subr.bf16.mxu0 %v9079_v21 }
 0x574   : > { %8483 = vmatprep.subr.bf16.mxu1 %v9080_v2 }
 0x575   : > { %2518 = vmatmul.mubr.bf16.vlgmr.msra.gmra.mxu0 %v10118_v29 }
 0x576   : > { %2571 = vmatmul.mubr.bf16.vlgmr.msra.gmra.mxu1 %v10118_v29  ;;  %2527 = vmatprep.mubr.bf16.mxu0 %v9800_v36  ;;  %v9083_v29 = vld [vmem:[%s9885_s24 + $0x270] sm:$0xff]  }
 0x577   : > { %2580 = vmatprep.mubr.bf16.mxu1 %v9800_v36  ;;  %8456 = vmatpush3.bf16.msra.mxu0 %v9081_v60  ;;  %v1489_v60 = vadd.f32 %v10165_v22, %v704_v37 }
 0x578   : > { %8484 = vmatpush3.bf16.msra.mxu1 %v9082_v48  ;;  %8457 = vmatprep.subr.bf16.mxu0 %v9083_v29 }
 0x579   : > { %8485 = vmatprep.subr.bf16.mxu1 %v9084_v54 }
 0x57b   : > { %8458 = vmatpush3.bf16.msra.mxu0 %v9085_v49  ;;  %v705_v49 = vld [vmem:[#allocation4 + $0x8] sm:$0xff] }
 0x57c   : > { %8486 = vmatpush3.bf16.msra.mxu1 %v9086_v56 }
 0x57d   : > { %2528 = vmatmul.mubr.bf16.gmra.mxu0 %v10124_v30  ;;  %8487 = vmatprep.subr.bf16.mxu1 %v9088_v27 }
 0x57e   : > { %2581 = vmatmul.mubr.bf16.gmra.mxu1 %v10124_v30  ;;  %v9087_v30 = vld [vmem:[%s9885_s24 + $0x268] sm:$0xff]  }
 0x57f   : > { %8459 = vmatprep.subr.bf16.mxu0 %v9087_v30 }
 0x580   : > { %8460 = vmatpush3.bf16.msra.mxu0 %v9089_v13  ;;  %8488 = vmatpush3.bf16.msra.mxu1 %v9090_v58 }
 0x581   : > { %8461 = vmatprep.subr.bf16.mxu0 %v9091_v61  ;;  %8489 = vmatprep.subr.bf16.mxu1 %v9092_v17  ;;  %v1490_v61 = vadd.f32 %v10167_v16, %v705_v49 }
 0x584   : > { %8462 = vmatpush3.bf16.msra.mxu0 %v9093_v62  ;;  %8490 = vmatpush3.bf16.msra.mxu1 %v9094_v1 }
 0x585   : > { %8463 = vmatprep.subr.bf16.mxu0 %v9095_v51  ;;  %8491 = vmatprep.subr.bf16.mxu1 %v9096_v46  ;;  %v706_v51 = vld [vmem:[#allocation4 + $0x10] sm:$0xff] }
 0x588   : > { %8464 = vmatpush3.bf16.msra.mxu0 %v9097_v23  ;;  %8492 = vmatpush3.bf16.msra.mxu1 %v9098_v4  ;;  %v1491_v4 = vadd.f32 %v10169_v63, %v706_v51 }
 0x589   : > { %8465 = vmatprep.subr.bf16.mxu0 %v9099_v35  ;;  %8493 = vmatprep.subr.bf16.mxu1 %v9100_v50 }
 0x58c   : > { %8466 = vmatpush3.bf16.msra.mxu0 %v9101_v25  ;;  %8494 = vmatpush3.bf16.msra.mxu1 %v9102_v28  ;;  %v7365_v25 = vld [vmem:[%s9880_s21 + $0x8] sm:$0xf] }
 0x58d   : > { %8467 = vmatprep.subr.bf16.mxu0 %v9103_v32  ;;  %8495 = vmatprep.subr.bf16.mxu1 %v9104_v40  ;;  %v2308_v28 = vrot.slane %v7365_v25, %v10013_v42  ;;  %v2316_v32 = vrot.slane %v7365_v25, %v10015_v43  ;;  %v2312_v16 = vrot.slane %v7365_v25, %v10017_v44 }
 0x590   : > { %8468 = vmatpush3.bf16.msra.mxu0 %v9105_v6  ;;  %8496 = vmatpush3.bf16.msra.mxu1 %v9106_v53  ;;  %v2320_v6 = vrot.slane %v7365_v25, %v10019_v45 }
 0x591   : > { %8469 = vmatprep.subr.bf16.mxu0 %v9107_v55  ;;  %8497 = vmatprep.subr.bf16.mxu1 %v9108_v33 }
 0x594   : > { %8470 = vmatpush3.bf16.msra.mxu0 %v9109_v8  ;;  %8498 = vmatpush3.bf16.msra.mxu1 %v9110_v10 }
 0x595   : > { %3262 = vmatprep.subr.bf16.mxu0 %v9113_v11  ;;  %3315 = vmatprep.subr.bf16.mxu1 %v9116_v14 }
 0x615   : > { %v8415_v15 = vpop.f32.mrf.mxu0 }
 0x616   : > { %v8443_v0 = vpop.f32.mrf.mxu1 }
 0x617   : > { %v8416_v20 = vpop.f32.mrf.mxu0 }
 0x618   : > { %v8417_v52 = vadd.f32 %v8416_v20, %v8415_v15  ;;  %v8444_v5 = vpop.f32.mrf.mxu1 }
 0x619   : > { %v8445_v26 = vadd.f32 %v8444_v5, %v8443_v0  ;;  %v8418_v59 = vpop.f32.mrf.mxu0 }
 0x61a   : > { %v2202_v9 = vadd.f32 %v8417_v52, %v7300_v18  ;;  %v8446_v57 = vpop.f32.mrf.mxu1 }
 0x61b   : > { %v8419_v31 = vpop.f32.mrf.mxu0 }
 0x61c   : > { %v2251_v47 = vadd.f32 %v8445_v26, %v2202_v9  ;;  %v8420_v19 = vadd.f32 %v8419_v31, %v8418_v59  ;;  %v8447_v34 = vpop.f32.mrf.mxu1 }
 0x61d   : > { %v8448_v38 = vadd.f32 %v8447_v34, %v8446_v57  ;;  %v8421_v7 = vpop.f32.mrf.mxu0 }
 0x61e   : > { %v10306_v39 = vadd.f32 %v2251_v47, %v1488_v3  ;;  %v2205_v41 = vadd.f32 %v8420_v19, %v7300_v18  ;;  %v8449_v21 = vpop.f32.mrf.mxu1 }
 0x61f   : > { %v8422_v2 = vpop.f32.mrf.mxu0 }
 0x620   : > { %v2254_v48 = vadd.f32 %v8448_v38, %v2205_v41  ;;  %v8423_v29 = vadd.f32 %v8422_v2, %v8421_v7  ;;  %v8450_v54 = vpop.f32.mrf.mxu1 }
 0x621   : > { %v8451_v56 = vadd.f32 %v8450_v54, %v8449_v21  ;;  %v8424_v30 = vpop.f32.mrf.mxu0 }
 0x622   : > { %v10309_v12 = vadd.f32 %v2254_v48, %v1489_v60  ;;  %v2210_v27 = vadd.f32 %v8423_v29, %v7300_v18  ;;  %v8452_v13 = vpop.f32.mrf.mxu1 }
 0x623   : > { %v8425_v58 = vpop.f32.mrf.mxu0 }
 0x624   : > { %v2259_v17 = vadd.f32 %v8451_v56, %v2210_v27  ;;  %v8426_v62 = vadd.f32 %v8425_v58, %v8424_v30  ;;  %v8453_v1 = vpop.f32.mrf.mxu1 }
 0x625   : > { %v8454_v46 = vadd.f32 %v8453_v1, %v8452_v13 }
 0x626   : > { %v10312_v22 = vadd.f32 %v2259_v17, %v1490_v61  ;;  %v2213_v23 = vadd.f32 %v8426_v62, %v7300_v18 }
 0x628   : > { %v2262_v35 = vadd.f32 %v8454_v46, %v2213_v23 }
 0x62a   : > { %v10315_v50 = vadd.f32 %v2262_v35, %v1491_v4 }
 0x635   : > { %v2519_v40 = vpop.f32.mrf.mxu0 }
 0x636   : > { %v10322_v53 = vadd.f32 %v2519_v40, %v2308_v28  ;;  %v2572_v55 = vpop.f32.mrf.mxu1 }
 0x637   : > { %v10324_v33 = vadd.f32 %v2572_v55, %v2316_v32  ;;  %v2521_v8 = vpop.f32.mrf.mxu0 }
 0x638   : > { %v2607_v63 = vmul.f32 0.70710677, %v10322_v53  ;;  %v10327_v10 = vadd.f32 %v2521_v8, %v2312_v16  ;;  %v2574_v11 = vpop.f32.mrf.mxu1  ;;  %v2591_v40 = vmul.f32 0.5, %v10322_v53 }
 0x639   : > { %v2609_v14 = vmul.f32 0.70710677, %v10324_v33  ;;  %v10330_v15 = vadd.f32 %v2574_v11, %v2320_v6  ;;  %v2523_v0 = vpop.f32.mrf.mxu0 }
 0x63a   : > { %9575 = verf.f32 %v2607_v63  ;;  %v2608_v18 = vmul.f32 0.70710677, %v10327_v10  ;;  %v10333_v20 = vadd.f32 %v2523_v0, %v2308_v28  ;;  %v2576_v52 = vpop.f32.mrf.mxu1  ;;  %v2592_v55 = vmul.f32 0.5, %v10327_v10 }
 0x63b   : > { %9577 = verf.f32 %v2609_v14  ;;  %v2610_v5 = vmul.f32 0.70710677, %v10330_v15  ;;  %v10336_v24 = vadd.f32 %v2576_v52, %v2316_v32  ;;  %v2525_v26 = vpop.f32.mrf.mxu0 }
 0x63c   : > { %9579 = verf.f32 %v2608_v18  ;;  %v2611_v59 = vmul.f32 0.70710677, %v10333_v20  ;;  %v2526_v9 = vadd.f32 %v2525_v26, %v2312_v16  ;;  %v2578_v57 = vpop.f32.mrf.mxu1  ;;  %v2595_v0 = vmul.f32 0.5, %v10333_v20 }
 0x63d   : > { %9581 = verf.f32 %v2610_v5  ;;  %v2613_v31 = vmul.f32 0.70710677, %v10336_v24  ;;  %v2579_v3 = vadd.f32 %v2578_v57, %v2320_v6  ;;  %v2529_v47 = vpop.f32.mrf.mxu0  ;;  %v2597_v26 = vmul.f32 0.5, %v10336_v24 }
 0x63e   : > { %9583 = verf.f32 %v2611_v59  ;;  %v2612_v19 = vmul.f32 0.70710677, %v2526_v9  ;;  %v10340_v34 = vadd.f32 %v2529_v47, %v2308_v28  ;;  %v2582_v37 = vpop.f32.mrf.mxu1  ;;  %v2596_v59 = vmul.f32 0.5, %v2526_v9 }
 0x63f   : > { %9585 = verf.f32 %v2613_v31  ;;  %v2614_v38 = vmul.f32 0.70710677, %v2579_v3  ;;  %v10342_v7 = vadd.f32 %v2582_v37, %v2316_v32  ;;  %v2531_v41 = vpop.f32.mrf.mxu0  ;;  %v2594_v47 = vmul.f32 0.5, %v10330_v15 }
 0x640   : > { %9587 = verf.f32 %v2612_v19  ;;  %v2615_v21 = vmul.f32 0.70710677, %v10340_v34  ;;  %v10345_v2 = vadd.f32 %v2531_v41, %v2312_v16  ;;  %v2584_v60 = vpop.f32.mrf.mxu1  ;;  %v2598_v10 = vmul.f32 0.5, %v2579_v3  ;;  %v9111_v3 = vld [vmem:[%s9875_s18 + $0x3e0] ss:$16 sps:$4 sm:$0xff]  }
 0x641   : > { %9589 = verf.f32 %v2614_v38  ;;  %v2617_v48 = vmul.f32 0.70710677, %v10342_v7  ;;  %v10348_v29 = vadd.f32 %v2584_v60, %v2320_v6  ;;  %v2533_v54 = vpop.f32.mrf.mxu0  ;;  %v2593_v38 = vmul.f32 0.5, %v10324_v33 }
 0x642   : > { %9591 = verf.f32 %v2615_v21  ;;  %v2616_v49 = vmul.f32 0.70710677, %v10345_v2  ;;  %v10351_v56 = vadd.f32 %v2533_v54, %v2308_v28  ;;  %v2586_v30 = vpop.f32.mrf.mxu1  ;;  %v2599_v15 = vmul.f32 0.5, %v10340_v34  ;;  %v9122_v34 = vld [vmem:[%s9875_s18 + $0x3cc] ss:$16 sps:$4 sm:$0xff]  }
 0x643   : > { %9593 = verf.f32 %v2617_v48  ;;  %v2618_v27 = vmul.f32 0.70710677, %v10348_v29  ;;  %v10354_v13 = vadd.f32 %v2586_v30, %v2316_v32  ;;  %v2535_v58 = vpop.f32.mrf.mxu0  ;;  %v2601_v33 = vmul.f32 0.5, %v10342_v7 }
 0x644   : > { %9595 = verf.f32 %v2616_v49  ;;  %v2619_v61 = vmul.f32 0.70710677, %v10351_v56  ;;  %v10357_v17 = vadd.f32 %v2535_v58, %v2312_v16  ;;  %v2588_v62 = vpop.f32.mrf.mxu1 }
 0x645   : > { %9597 = verf.f32 %v2618_v27  ;;  %v2621_v1 = vmul.f32 0.70710677, %v10354_v13  ;;  %v10360_v51 = vadd.f32 %v2588_v62, %v2320_v6 }
 0x646   : > { %9599 = verf.f32 %v2619_v61  ;;  %v2620_v46 = vmul.f32 0.70710677, %v10357_v17  ;;  %v2600_v61 = vmul.f32 0.5, %v10345_v2 }
 0x647   : > { %v9576_v23 = vpop.eup %9575  ;;  %9601 = verf.f32 %v2621_v1  ;;  %v2622_v4 = vmul.f32 0.70710677, %v10360_v51  ;;  %v9114_v1 = vld [vmem:[%s9875_s18 + $0x3e8] ss:$16 sps:$4 sm:$0xff]  }
 0x648   : > { %v9578_v35 = vpop.eup %9577  ;;  %9603 = verf.f32 %v2620_v46  ;;  %v2639_v11 = vadd.f32 1.0, %v9576_v23  ;;  %v9119_v46 = vld [vmem:[%s9875_s18 + $0x3c4] ss:$16 sps:$4 sm:$0xff]  }
 0x649   : > { %v9580_v25 = vpop.eup %9579  ;;  %9605 = verf.f32 %v2622_v4  ;;  %v2641_v5 = vadd.f32 1.0, %v9578_v35 }
 0x64a   : > { %v9582_v28 = vpop.eup %9581  ;;  %v2640_v6 = vadd.f32 1.0, %v9580_v25  ;;  %v2655_v48 = vmul.f32 %v2639_v11, %v2591_v40  ;;  %v2602_v25 = vmul.f32 0.5, %v10348_v29  ;;  %v2604_v29 = vmul.f32 0.5, %v10357_v17  ;;  %v9117_v11 = vld [vmem:[%s9875_s18 + $0x3c0] ss:$16 sps:$4 sm:$0xff]  }
 0x64b   : > { %v9584_v32 = vpop.eup %9583  ;;  %v2642_v14 = vadd.f32 1.0, %v9582_v28  ;;  %v2657_v49 = vmul.f32 %v2641_v5, %v2593_v38  ;;  %v9128_v17 = vld [vmem:[%s9875_s18 + $0x3ac] ss:$16 sps:$4 sm:$0xff]   ;;  %v9131_v38 = vld [vmem:[%s9875_s18 + $0x384] ss:$16 sps:$4 sm:$0xff]  }
 0x64c   : > { %v9586_v16 = vpop.eup %9585  ;;  %v2643_v8 = vadd.f32 1.0, %v9584_v32  ;;  %v2656_v41 = vmul.f32 %v2640_v6, %v2592_v55  ;;  %v2603_v55 = vmul.f32 0.5, %v10351_v56 }
 0x64d   : > { %v9588_v63 = vpop.eup %9587  ;;  %v2645_v18 = vadd.f32 1.0, %v9586_v16  ;;  %v2658_v24 = vmul.f32 %v2642_v14, %v2594_v47 }
 0x64e   : > { %v9590_v52 = vpop.eup %9589  ;;  %v2644_v57 = vadd.f32 1.0, %v9588_v63  ;;  %v2659_v53 = vmul.f32 %v2643_v8, %v2595_v0  ;;  %v2605_v8 = vmul.f32 0.5, %v10354_v13  ;;  %v2606_v0 = vmul.f32 0.5, %v10360_v51 }
 0x64f   : > { %v9592_v31 = vpop.eup %9591  ;;  %v2646_v19 = vadd.f32 1.0, %v9590_v52  ;;  %v2661_v21 = vmul.f32 %v2645_v18, %v2597_v26  ;;  %v9120_v18 = vld [vmem:[%s9875_s18 + $0x3c8] ss:$16 sps:$4 sm:$0xff]   ;;  %v9125_v52 = vld [vmem:[%s9875_s18 + $0x3a4] ss:$16 sps:$4 sm:$0xff]  }
 0x650   : > { %v9594_v37 = vpop.eup %9593  ;;  %v2660_v20 = vmul.f32 %v2644_v57, %v2596_v59  ;;  %v2671_v58 = vpack.c.bf16 %v2659_v53, %v2655_v48  ;;  %v2647_v16 = vadd.f32 1.0, %v9592_v31  ;;  %v9123_v53 = vld [vmem:[%s9875_s18 + $0x3a0] ss:$16 sps:$4 sm:$0xff]   ;;  %v9137_v48 = vld [vmem:[%s9875_s18 + $0x364] ss:$16 sps:$4 sm:$0xff]  }
 0x651   : > { %v9596_v60 = vpop.eup %9595  ;;  %v2662_v9 = vmul.f32 %v2646_v19, %v2598_v10  ;;  %v2673_v4 = vpack.c.bf16 %v2661_v21, %v2657_v49  ;;  %v2649_v6 = vadd.f32 1.0, %v9594_v37  ;;  %v9126_v19 = vld [vmem:[%s9875_s18 + $0x3a8] ss:$16 sps:$4 sm:$0xff]   ;;  %v9134_v21 = vld [vmem:[%s9875_s18 + $0x38c] ss:$16 sps:$4 sm:$0xff]  }
 0x652   : > { %v9598_v54 = vpop.eup %9597  ;;  %v2672_v30 = vpack.c.bf16 %v2660_v20, %v2656_v41  ;;  %v2648_v35 = vadd.f32 1.0, %v9596_v60  ;;  %v2663_v59 = vmul.f32 %v2647_v16, %v2599_v15  ;;  %v9129_v20 = vld [vmem:[%s9875_s18 + $0x380] ss:$16 sps:$4 sm:$0xff]   ;;  %v9132_v60 = vld [vmem:[%s9875_s18 + $0x388] ss:$16 sps:$4 sm:$0xff]  }
 0x653   : > { %v9600_v27 = vpop.eup %9599  ;;  %v2674_v62 = vpack.c.bf16 %v2662_v9, %v2658_v24  ;;  %v2650_v40 = vadd.f32 1.0, %v9598_v54  ;;  %v2665_v47 = vmul.f32 %v2649_v6, %v2601_v33  ;;  %v9140_v24 = vld [vmem:[%s9875_s18 + $0x36c] ss:$16 sps:$4 sm:$0xff]   ;;  %v9135_v9 = vld [vmem:[%s9875_s18 + $0x360] ss:$16 sps:$4 sm:$0xff]  }
 0x654   : > { %v9602_v23 = vpop.eup %9601  ;;  %v2651_v28 = vadd.f32 1.0, %v9600_v27  ;;  %2976 = vmatprep.mubr.bf16.mxu0 %v2672_v30  ;;  %v2664_v5 = vmul.f32 %v2648_v35, %v2600_v61  ;;  %v9138_v54 = vld [vmem:[%s9875_s18 + $0x368] ss:$16 sps:$4 sm:$0xff]   ;;  %v9143_v49 = vld [vmem:[%s9875_s18 + $0x344] ss:$16 sps:$4 sm:$0xff]  }
 0x655   : > { %v9604_v32 = vpop.eup %9603  ;;  %v2653_v7 = vadd.f32 1.0, %v9602_v23  ;;  %3025 = vmatprep.mubr.bf16.mxu1 %v2674_v62  ;;  %2977 = vmatmul.mubr.bf16.vlgmr.msra.gmra.mxu0 %v2671_v58  ;;  %v2666_v57 = vmul.f32 %v2650_v40, %v2602_v25  ;;  %v9146_v15 = vld [vmem:[%s9875_s18 + $0x34c] ss:$16 sps:$4 sm:$0xff]   ;;  %v9141_v30 = vld [vmem:[%s9875_s18 + $0x340] ss:$16 sps:$4 sm:$0xff]  }
 0x656   : > { %v9606_v2 = vpop.eup %9605  ;;  %v2652_v63 = vadd.f32 1.0, %v9604_v32  ;;  %3026 = vmatmul.mubr.bf16.vlgmr.msra.gmra.mxu1 %v2673_v4  ;;  %3263 = vmatpush1.bf16.msra.mxu0 %v9111_v3  ;;  %v2667_v14 = vmul.f32 %v2651_v28, %v2603_v55  ;;  %v9144_v3 = vld [vmem:[%s9875_s18 + $0x348] ss:$16 sps:$4 sm:$0xff]   ;;  %v9149_v27 = vld [vmem:[%s9875_s18 + $0x324] ss:$16 sps:$4 sm:$0xff]  }
 0x657   : > { %v2654_v56 = vadd.f32 1.0, %v9606_v2  ;;  %3316 = vmatpush1.bf16.msra.mxu1 %v9114_v1  ;;  %3264 = vmatprep.subr.bf16.mxu0 %v9119_v46  ;;  %v2669_v26 = vmul.f32 %v2653_v7, %v2605_v8  ;;  %v9152_v58 = vld [vmem:[%s9875_s18 + $0x32c] ss:$16 sps:$4 sm:$0xff]   ;;  %v9147_v33 = vld [vmem:[%s9875_s18 + $0x320] ss:$16 sps:$4 sm:$0xff]  }
 0x658   : > { %v2668_v13 = vmul.f32 %v2652_v63, %v2604_v29  ;;  %3317 = vmatprep.subr.bf16.mxu1 %v9122_v34  ;;  %v2675_v37 = vpack.c.bf16 %v2667_v14, %v2663_v59  ;;  %v9150_v61 = vld [vmem:[%s9875_s18 + $0x328] ss:$16 sps:$4 sm:$0xff]   ;;  %v9155_v62 = vld [vmem:[%s9875_s18 + $0x304] ss:$16 sps:$4 sm:$0xff]   ;;  %v9158_v1 = vld [vmem:[%s9875_s18 + $0x30c] ss:$16 sps:$4 sm:$0xff]  }
 0x659   : > { %v2670_v31 = vmul.f32 %v2654_v56, %v2606_v0  ;;  %v2677_v41 = vpack.c.bf16 %v2669_v26, %v2665_v47  ;;  %v9153_v46 = vld [vmem:[%s9875_s18 + $0x300] ss:$16 sps:$4 sm:$0xff]   ;;  %v9156_v23 = vld [vmem:[%s9875_s18 + $0x308] ss:$16 sps:$4 sm:$0xff]  }
 0x65a   : > { %3265 = vmatpush1.bf16.msra.mxu0 %v9117_v11  ;;  %v2676_v51 = vpack.c.bf16 %v2668_v13, %v2664_v5  ;;  %v10410_v4 = vld [vmem:[#allocation2] sm:$0xff]   ;;  %v10416_v35 = vld [vmem:[#allocation2 + $0x8] sm:$0xff]   ;;  %v9159_v25 = vld [vmem:[%s9885_s24 + $0x378] sm:$0xff]  }
 0x65b   : > { %3318 = vmatpush1.bf16.msra.mxu1 %v9120_v18  ;;  %v2678_v10 = vpack.c.bf16 %v2670_v31, %v2666_v57  ;;  %3266 = vmatprep.subr.bf16.mxu0 %v9125_v52  ;;  %v9160_v28 = vld [vmem:[%s9885_s24 + $0x3f8] sm:$0xff]   ;;  %v9163_v16 = vld [vmem:[%s9885_s24 + $0x370] sm:$0xff]   ;;  %v9167_v2 = vld [vmem:[%s9885_s24 + $0x368] sm:$0xff]  }
 0x65c   : > { %2984 = vmatprep.mubr.bf16.mxu0 %v2676_v51  ;;  %3319 = vmatprep.subr.bf16.mxu1 %v9128_v17  ;;  %v9161_v34 = vld [vmem:[%s9885_s24 + $0x338] sm:$0xff]   ;;  %v9164_v40 = vld [vmem:[%s9885_s24 + $0x3f0] sm:$0xff]   ;;  %v9168_v6 = vld [vmem:[%s9885_s24 + $0x3e8] sm:$0xff]  }
 0x65d   : > { %3033 = vmatprep.mubr.bf16.mxu1 %v2678_v10  ;;  %2985 = vmatmul.mubr.bf16.gmra.mxu0 %v2675_v37  ;;  %v9162_v32 = vld [vmem:[%s9885_s24 + $0x3b8] sm:$0xff]   ;;  %v9165_v55 = vld [vmem:[%s9885_s24 + $0x330] sm:$0xff]   ;;  %v9169_v8 = vld [vmem:[%s9885_s24 + $0x328] sm:$0xff]  }
 0x65e   : > { %3034 = vmatmul.mubr.bf16.gmra.mxu1 %v2677_v41  ;;  %3267 = vmatpush1.bf16.msra.mxu0 %v9123_v53  ;;  %v9166_v7 = vld [vmem:[%s9885_s24 + $0x3b0] sm:$0xff]   ;;  %v9170_v29 = vld [vmem:[%s9885_s24 + $0x3a8] sm:$0xff]   ;;  %v9171_v63 = vld [vmem:[%s9885_s24 + $0x360] sm:$0xff]  }
 0x65f   : > { %3320 = vmatpush1.bf16.msra.mxu1 %v9126_v19  ;;  %3268 = vmatprep.subr.bf16.mxu0 %v9131_v38  ;;  %v9172_v11 = vld [vmem:[%s9885_s24 + $0x3e0] sm:$0xff]   ;;  %v9175_v56 = vld [vmem:[%s9885_s24 + $0x358] sm:$0xff]   ;;  %v9179_v26 = vld [vmem:[%s9885_s24 + $0x350] sm:$0xff]  }
 0x660   : > { %3321 = vmatprep.subr.bf16.mxu1 %v9134_v21  ;;  %3294 = vmatprep.mubr.bf16.mxu0 %v9800_v36  ;;  %v9173_v14 = vld [vmem:[%s9885_s24 + $0x320] sm:$0xff]   ;;  %v9176_v18 = vld [vmem:[%s9885_s24 + $0x3d8] sm:$0xff]   ;;  %v9180_v13 = vld [vmem:[%s9885_s24 + $0x3d0] sm:$0xff]  }
 0x661   : > { %3347 = vmatprep.mubr.bf16.mxu1 %v9800_v36  ;;  %v9174_v0 = vld [vmem:[%s9885_s24 + $0x3a0] sm:$0xff]   ;;  %v9177_v52 = vld [vmem:[%s9885_s24 + $0x318] sm:$0xff]   ;;  %v9181_v17 = vld [vmem:[%s9885_s24 + $0x310] sm:$0xff]  }
 0x662   : > { %3269 = vmatpush1.bf16.msra.mxu0 %v9129_v20  ;;  %v9178_v5 = vld [vmem:[%s9885_s24 + $0x398] sm:$0xff]   ;;  %v9182_v59 = vld [vmem:[%s9885_s24 + $0x390] sm:$0xff]   ;;  %v9183_v57 = vld [vmem:[%s9885_s24 + $0x348] sm:$0xff]  }
 0x663   : > { %3322 = vmatpush1.bf16.msra.mxu1 %v9132_v60  ;;  %3270 = vmatprep.subr.bf16.mxu0 %v9137_v48  ;;  %v9184_v31 = vld [vmem:[%s9885_s24 + $0x3c8] sm:$0xff]   ;;  %v9187_v53 = vld [vmem:[%s9885_s24 + $0x340] sm:$0xff]  }
 0x664   : > { %3323 = vmatprep.subr.bf16.mxu1 %v9140_v24  ;;  %v9185_v47 = vld [vmem:[%s9885_s24 + $0x308] sm:$0xff]   ;;  %v9188_v10 = vld [vmem:[%s9885_s24 + $0x3c0] sm:$0xff]  }
 0x665   : > { %v9186_v51 = vld [vmem:[%s9885_s24 + $0x388] sm:$0xff]   ;;  %v9189_v19 = vld [vmem:[%s9885_s24 + $0x300] sm:$0xff]  }
 0x666   : > { %3271 = vmatpush1.bf16.msra.mxu0 %v9135_v9  ;;  %v9190_v37 = vld [vmem:[%s9885_s24 + $0x380] sm:$0xff]   ;;  %v9196_v41 = vld [vmem:[%s9875_s18 + $0x4ec] ss:$16 sps:$4 sm:$0xff]  }
 0x667   : > { %3324 = vmatpush1.bf16.msra.mxu1 %v9138_v54  ;;  %3272 = vmatprep.subr.bf16.mxu0 %v9143_v49  ;;  %v9193_v38 = vld [vmem:[%s9875_s18 + $0x4e4] ss:$16 sps:$4 sm:$0xff]   ;;  %v7463_v60 = vld [vmem:[%s9890_s27 + $0x2] ss:$0 sm:$0xff] }
 0x668   : > { %3325 = vmatprep.subr.bf16.mxu1 %v9146_v15 }
 0x66a   : > { %3273 = vmatpush1.bf16.msra.mxu0 %v9141_v30 }
 0x66b   : > { %3326 = vmatpush1.bf16.msra.mxu1 %v9144_v3  ;;  %3274 = vmatprep.subr.bf16.mxu0 %v9149_v27 }
 0x66c   : > { %3327 = vmatprep.subr.bf16.mxu1 %v9152_v58 }
 0x66e   : > { %3275 = vmatpush1.bf16.msra.mxu0 %v9147_v33 }
 0x66f   : > { %3328 = vmatpush1.bf16.msra.mxu1 %v9150_v61  ;;  %3276 = vmatprep.subr.bf16.mxu0 %v9155_v62 }
 0x670   : > { %3329 = vmatprep.subr.bf16.mxu1 %v9158_v1 }
 0x672   : > { %3277 = vmatpush1.bf16.msra.mxu0 %v9153_v46 }
 0x673   : > { %3330 = vmatpush1.bf16.msra.mxu1 %v9156_v23  ;;  %8511 = vmatprep.subr.bf16.mxu0 %v9159_v25 }
 0x674   : > { %8539 = vmatprep.subr.bf16.mxu1 %v9160_v28 }
 0x675   : > { %3295 = vmatmul.mubr.bf16.vlgmr.msra.gmra.mxu0 %v10410_v4 }
 0x676   : > { %3348 = vmatmul.mubr.bf16.vlgmr.msra.gmra.mxu1 %v10410_v4  ;;  %3304 = vmatprep.mubr.bf16.mxu0 %v9800_v36 }
 0x677   : > { %3357 = vmatprep.mubr.bf16.mxu1 %v9800_v36  ;;  %8512 = vmatpush3.bf16.msra.mxu0 %v9161_v34 }
 0x678   : > { %8540 = vmatpush3.bf16.msra.mxu1 %v9162_v32  ;;  %8513 = vmatprep.subr.bf16.mxu0 %v9163_v16 }
 0x679   : > { %8541 = vmatprep.subr.bf16.mxu1 %v9164_v40 }
 0x67b   : > { %8514 = vmatpush3.bf16.msra.mxu0 %v9165_v55 }
 0x67c   : > { %8542 = vmatpush3.bf16.msra.mxu1 %v9166_v7  ;;  %8515 = vmatprep.subr.bf16.mxu0 %v9167_v2 }
 0x67d   : > { %3305 = vmatmul.mubr.bf16.gmra.mxu0 %v10416_v35  ;;  %8543 = vmatprep.subr.bf16.mxu1 %v9168_v6 }
 0x67e   : > { %3358 = vmatmul.mubr.bf16.gmra.mxu1 %v10416_v35 }
 0x67f   : > { %8516 = vmatpush3.bf16.msra.mxu0 %v9169_v8 }
 0x680   : > { %8544 = vmatpush3.bf16.msra.mxu1 %v9170_v29  ;;  %8517 = vmatprep.subr.bf16.mxu0 %v9171_v63 }
 0x681   : > { %8545 = vmatprep.subr.bf16.mxu1 %v9172_v11 }
 0x683   : > { %8518 = vmatpush3.bf16.msra.mxu0 %v9173_v14 }
 0x684   : > { %8546 = vmatpush3.bf16.msra.mxu1 %v9174_v0  ;;  %8519 = vmatprep.subr.bf16.mxu0 %v9175_v56 }
 0x685   : > { %8547 = vmatprep.subr.bf16.mxu1 %v9176_v18  ;;  %v7528_v18 = vld [vmem:[%s9880_s21 + $0xc] sm:$0xf] }
 0x687   : > { %8520 = vmatpush3.bf16.msra.mxu0 %v9177_v52  ;;  %v3085_v52 = vrot.slane %v7528_v18, %v10013_v42 }
 0x688   : > { %8548 = vmatpush3.bf16.msra.mxu1 %v9178_v5  ;;  %8521 = vmatprep.subr.bf16.mxu0 %v9179_v26  ;;  %v3089_v5 = vrot.slane %v7528_v18, %v10017_v44 }
 0x689   : > { %8549 = vmatprep.subr.bf16.mxu1 %v9180_v13  ;;  %v3097_v13 = vrot.slane %v7528_v18, %v10019_v45 }
 0x68b   : > { %8522 = vmatpush3.bf16.msra.mxu0 %v9181_v17 }
 0x68c   : > { %8550 = vmatpush3.bf16.msra.mxu1 %v9182_v59  ;;  %8523 = vmatprep.subr.bf16.mxu0 %v9183_v57 }
 0x68d   : > { %8551 = vmatprep.subr.bf16.mxu1 %v9184_v31 }
 0x68f   : > { %8524 = vmatpush3.bf16.msra.mxu0 %v9185_v47 }
 0x690   : > { %8552 = vmatpush3.bf16.msra.mxu1 %v9186_v51  ;;  %8525 = vmatprep.subr.bf16.mxu0 %v9187_v53 }
 0x691   : > { %8553 = vmatprep.subr.bf16.mxu1 %v9188_v10 }
 0x693   : > { %8526 = vmatpush3.bf16.msra.mxu0 %v9189_v19 }
 0x694   : > { %8554 = vmatpush3.bf16.msra.mxu1 %v9190_v37  ;;  %4039 = vmatprep.subr.bf16.mxu0 %v9193_v38 }
 0x695   : > { %4092 = vmatprep.subr.bf16.mxu1 %v9196_v41 }
 0x715   : > { %v8471_v21 = vpop.f32.mrf.mxu0 }
 0x716   : > { %v8499_v20 = vpop.f32.mrf.mxu1 }
 0x717   : > { %v8472_v48 = vpop.f32.mrf.mxu0 }
 0x718   : > { %v8473_v24 = vadd.f32 %v8472_v48, %v8471_v21  ;;  %v8500_v9 = vpop.f32.mrf.mxu1 }
 0x719   : > { %v8501_v54 = vadd.f32 %v8500_v9, %v8499_v20  ;;  %v8474_v49 = vpop.f32.mrf.mxu0 }
 0x71a   : > { %v2979_v15 = vadd.f32 %v8473_v24, %v7463_v60  ;;  %v8502_v30 = vpop.f32.mrf.mxu1 }
 0x71b   : > { %v8475_v3 = vpop.f32.mrf.mxu0 }
 0x71c   : > { %v3028_v27 = vadd.f32 %v8501_v54, %v2979_v15  ;;  %v8476_v58 = vadd.f32 %v8475_v3, %v8474_v49  ;;  %v8503_v33 = vpop.f32.mrf.mxu1 }
 0x71d   : > { %v8504_v61 = vadd.f32 %v8503_v33, %v8502_v30  ;;  %v8477_v62 = vpop.f32.mrf.mxu0 }
 0x71e   : > { %v10456_v1 = vadd.f32 %v3028_v27, %v10306_v39  ;;  %v2982_v46 = vadd.f32 %v8476_v58, %v7463_v60  ;;  %v8505_v23 = vpop.f32.mrf.mxu1 }
 0x71f   : > { %v8478_v25 = vpop.f32.mrf.mxu0 }
 0x720   : > { %v3031_v28 = vadd.f32 %v8504_v61, %v2982_v46  ;;  %v8479_v34 = vadd.f32 %v8478_v25, %v8477_v62  ;;  %v8506_v32 = vpop.f32.mrf.mxu1 }
 0x721   : > { %v8507_v16 = vadd.f32 %v8506_v32, %v8505_v23  ;;  %v8480_v40 = vpop.f32.mrf.mxu0 }
 0x722   : > { %v10459_v55 = vadd.f32 %v3031_v28, %v10309_v12  ;;  %v2987_v7 = vadd.f32 %v8479_v34, %v7463_v60  ;;  %v8508_v2 = vpop.f32.mrf.mxu1  ;;  %v3093_v12 = vrot.slane %v7528_v18, %v10015_v43 }
 0x723   : > { %v8481_v6 = vpop.f32.mrf.mxu0 }
 0x724   : > { %v3036_v8 = vadd.f32 %v8507_v16, %v2987_v7  ;;  %v8482_v29 = vadd.f32 %v8481_v6, %v8480_v40  ;;  %v8509_v63 = vpop.f32.mrf.mxu1 }
 0x725   : > { %v8510_v39 = vadd.f32 %v8509_v63, %v8508_v2 }
 0x726   : > { %v10462_v11 = vadd.f32 %v3036_v8, %v10312_v22  ;;  %v2990_v14 = vadd.f32 %v8482_v29, %v7463_v60 }
 0x728   : > { %v3039_v0 = vadd.f32 %v8510_v39, %v2990_v14 }
 0x72a   : > { %v10465_v56 = vadd.f32 %v3039_v0, %v10315_v50 }
 0x735   : > { %v3296_v26 = vpop.f32.mrf.mxu0 }
 0x736   : > { %v10472_v17 = vadd.f32 %v3296_v26, %v3085_v52  ;;  %v3349_v59 = vpop.f32.mrf.mxu1 }
 0x737   : > { %v10474_v22 = vadd.f32 %v3349_v59, %v3093_v12  ;;  %v3298_v57 = vpop.f32.mrf.mxu0 }
 0x738   : > { %v3384_v31 = vmul.f32 0.70710677, %v10472_v17  ;;  %v10477_v50 = vadd.f32 %v3298_v57, %v3089_v5  ;;  %v3351_v47 = vpop.f32.mrf.mxu1  ;;  %v3368_v57 = vmul.f32 0.5, %v10472_v17 }
 0x739   : > { %v3386_v51 = vmul.f32 0.70710677, %v10474_v22  ;;  %v10480_v53 = vadd.f32 %v3351_v47, %v3097_v13  ;;  %v3300_v10 = vpop.f32.mrf.mxu0 }
 0x73a   : > { %9607 = verf.f32 %v3384_v31  ;;  %v3385_v19 = vmul.f32 0.70710677, %v10477_v50  ;;  %v10483_v37 = vadd.f32 %v3300_v10, %v3085_v52  ;;  %v3353_v38 = vpop.f32.mrf.mxu1  ;;  %v3369_v31 = vmul.f32 0.5, %v10477_v50 }
 0x73b   : > { %9609 = verf.f32 %v3386_v51  ;;  %v3387_v41 = vmul.f32 0.70710677, %v10480_v53  ;;  %v10486_v21 = vadd.f32 %v3353_v38, %v3093_v12  ;;  %v3302_v20 = vpop.f32.mrf.mxu0 }
 0x73c   : > { %9611 = verf.f32 %v3385_v19  ;;  %v3388_v60 = vmul.f32 0.70710677, %v10483_v37  ;;  %v3303_v48 = vadd.f32 %v3302_v20, %v3089_v5  ;;  %v3355_v24 = vpop.f32.mrf.mxu1  ;;  %v3372_v38 = vmul.f32 0.5, %v10483_v37 }
 0x73d   : > { %9613 = verf.f32 %v3387_v41  ;;  %v3390_v9 = vmul.f32 0.70710677, %v10486_v21  ;;  %v3356_v54 = vadd.f32 %v3355_v24, %v3097_v13  ;;  %v3306_v49 = vpop.f32.mrf.mxu0  ;;  %v3374_v24 = vmul.f32 0.5, %v10486_v21 }
 0x73e   : > { %9615 = verf.f32 %v3388_v60  ;;  %v3389_v15 = vmul.f32 0.70710677, %v3303_v48  ;;  %v10490_v30 = vadd.f32 %v3306_v49, %v3085_v52  ;;  %v3359_v3 = vpop.f32.mrf.mxu1 }
 0x73f   : > { %9617 = verf.f32 %v3390_v9  ;;  %v3391_v27 = vmul.f32 0.70710677, %v3356_v54  ;;  %v10492_v58 = vadd.f32 %v3359_v3, %v3093_v12  ;;  %v3308_v33 = vpop.f32.mrf.mxu0  ;;  %v3373_v9 = vmul.f32 0.5, %v3303_v48 }
 0x740   : > { %9619 = verf.f32 %v3389_v15  ;;  %v3392_v61 = vmul.f32 0.70710677, %v10490_v30  ;;  %v10495_v62 = vadd.f32 %v3308_v33, %v3089_v5  ;;  %v3361_v46 = vpop.f32.mrf.mxu1  ;;  %v3371_v3 = vmul.f32 0.5, %v10480_v53 }
 0x741   : > { %9621 = verf.f32 %v3391_v27  ;;  %v3394_v23 = vmul.f32 0.70710677, %v10492_v58  ;;  %v10498_v25 = vadd.f32 %v3361_v46, %v3097_v13  ;;  %v3310_v28 = vpop.f32.mrf.mxu0  ;;  %v3375_v50 = vmul.f32 0.5, %v3356_v54  ;;  %v9191_v54 = vld [vmem:[%s9875_s18 + $0x4e0] ss:$16 sps:$4 sm:$0xff]  }
 0x742   : > { %9623 = verf.f32 %v3392_v61  ;;  %v3393_v34 = vmul.f32 0.70710677, %v10495_v62  ;;  %v10501_v32 = vadd.f32 %v3310_v28, %v3085_v52  ;;  %v3363_v16 = vpop.f32.mrf.mxu1  ;;  %v3370_v61 = vmul.f32 0.5, %v10474_v22 }
 0x743   : > { %9625 = verf.f32 %v3394_v23  ;;  %v3395_v40 = vmul.f32 0.70710677, %v10498_v25  ;;  %v10504_v7 = vadd.f32 %v3363_v16, %v3093_v12  ;;  %v3312_v2 = vpop.f32.mrf.mxu0  ;;  %v3376_v53 = vmul.f32 0.5, %v10490_v30  ;;  %v9202_v30 = vld [vmem:[%s9875_s18 + $0x4cc] ss:$16 sps:$4 sm:$0xff]  }
 0x744   : > { %9627 = verf.f32 %v3393_v34  ;;  %v3396_v6 = vmul.f32 0.70710677, %v10501_v32  ;;  %v10507_v8 = vadd.f32 %v3312_v2, %v3089_v5  ;;  %v3365_v29 = vpop.f32.mrf.mxu1  ;;  %v3378_v22 = vmul.f32 0.5, %v10492_v58 }
 0x745   : > { %9629 = verf.f32 %v3395_v40  ;;  %v3398_v63 = vmul.f32 0.70710677, %v10504_v7  ;;  %v10510_v39 = vadd.f32 %v3365_v29, %v3097_v13 }
 0x746   : > { %9631 = verf.f32 %v3396_v6  ;;  %v3397_v14 = vmul.f32 0.70710677, %v10507_v8 }
 0x747   : > { %v9608_v0 = vpop.eup %9607  ;;  %9633 = verf.f32 %v3398_v63  ;;  %v3399_v18 = vmul.f32 0.70710677, %v10510_v39  ;;  %v3377_v63 = vmul.f32 0.5, %v10495_v62 }
 0x748   : > { %v9610_v52 = vpop.eup %9609  ;;  %9635 = verf.f32 %v3397_v14  ;;  %v3416_v10 = vadd.f32 1.0, %v9608_v0  ;;  %v9194_v0 = vld [vmem:[%s9875_s18 + $0x4e8] ss:$16 sps:$4 sm:$0xff]  }
 0x749   : > { %v9612_v12 = vpop.eup %9611  ;;  %9637 = verf.f32 %v3399_v18  ;;  %v3418_v60 = vadd.f32 1.0, %v9610_v52  ;;  %v9199_v18 = vld [vmem:[%s9875_s18 + $0x4c4] ss:$16 sps:$4 sm:$0xff]  }
 0x74a   : > { %v9614_v26 = vpop.eup %9613  ;;  %v3417_v13 = vadd.f32 1.0, %v9612_v12  ;;  %v3432_v34 = vmul.f32 %v3416_v10, %v3368_v57  ;;  %v3382_v10 = vmul.f32 0.5, %v10504_v7 }
 0x74b   : > { %v9616_v5 = vpop.eup %9615  ;;  %v3419_v19 = vadd.f32 1.0, %v9614_v26  ;;  %v3434_v40 = vmul.f32 %v3418_v60, %v3370_v61  ;;  %v9200_v60 = vld [vmem:[%s9875_s18 + $0x4c8] ss:$16 sps:$4 sm:$0xff]  }
 0x74c   : > { %v9618_v59 = vpop.eup %9617  ;;  %v3420_v47 = vadd.f32 1.0, %v9616_v5  ;;  %v3433_v46 = vmul.f32 %v3417_v13, %v3369_v31  ;;  %v3379_v5 = vmul.f32 0.5, %v10498_v25  ;;  %v3381_v25 = vmul.f32 0.5, %v10507_v8  ;;  %v9208_v8 = vld [vmem:[%s9875_s18 + $0x4ac] ss:$16 sps:$4 sm:$0xff]  }
 0x74d   : > { %v9620_v51 = vpop.eup %9619  ;;  %v3422_v41 = vadd.f32 1.0, %v9618_v59  ;;  %v3435_v21 = vmul.f32 %v3419_v19, %v3371_v3  ;;  %v9206_v61 = vld [vmem:[%s9875_s18 + $0x4a8] ss:$16 sps:$4 sm:$0xff]  }
 0x74e   : > { %v9622_v20 = vpop.eup %9621  ;;  %v3421_v49 = vadd.f32 1.0, %v9620_v51  ;;  %v3436_v17 = vmul.f32 %v3420_v47, %v3372_v38  ;;  %v3380_v47 = vmul.f32 0.5, %v10501_v32  ;;  %v9197_v38 = vld [vmem:[%s9875_s18 + $0x4c0] ss:$16 sps:$4 sm:$0xff]  }
 0x74f   : > { %v9624_v15 = vpop.eup %9623  ;;  %v3423_v27 = vadd.f32 1.0, %v9622_v20  ;;  %v3438_v23 = vmul.f32 %v3422_v41, %v3374_v24  ;;  %v3383_v20 = vmul.f32 0.5, %v10510_v39  ;;  %v9205_v24 = vld [vmem:[%s9875_s18 + $0x4a4] ss:$16 sps:$4 sm:$0xff]  }
 0x750   : > { %v9626_v33 = vpop.eup %9625  ;;  %v3437_v37 = vmul.f32 %v3421_v49, %v3373_v9  ;;  %v3448_v29 = vpack.c.bf16 %v3436_v17, %v3432_v34  ;;  %v3424_v31 = vadd.f32 1.0, %v9624_v15  ;;  %v9209_v34 = vld [vmem:[%s9875_s18 + $0x480] ss:$16 sps:$4 sm:$0xff]  }
 0x751   : > { %v9628_v28 = vpop.eup %9627  ;;  %v3439_v48 = vmul.f32 %v3423_v27, %v3375_v50  ;;  %v3450_v12 = vpack.c.bf16 %v3438_v23, %v3434_v40  ;;  %v3426_v51 = vadd.f32 1.0, %v9626_v33  ;;  %v9203_v27 = vld [vmem:[%s9875_s18 + $0x4a0] ss:$16 sps:$4 sm:$0xff]   ;;  %v9211_v23 = vld [vmem:[%s9875_s18 + $0x484] ss:$16 sps:$4 sm:$0xff]  }
 0x752   : > { %v9630_v16 = vpop.eup %9629  ;;  %v3449_v2 = vpack.c.bf16 %v3437_v37, %v3433_v46  ;;  %v3425_v26 = vadd.f32 1.0, %v9628_v28  ;;  %v3440_v15 = vmul.f32 %v3424_v31, %v3376_v53  ;;  %v9214_v28 = vld [vmem:[%s9875_s18 + $0x48c] ss:$16 sps:$4 sm:$0xff]   ;;  %v9215_v40 = vld [vmem:[%s9875_s18 + $0x460] ss:$16 sps:$4 sm:$0xff]  }
 0x753   : > { %v9632_v6 = vpop.eup %9631  ;;  %v3451_v14 = vpack.c.bf16 %v3439_v48, %v3435_v21  ;;  %v3427_v13 = vadd.f32 1.0, %v9630_v16  ;;  %v3442_v50 = vmul.f32 %v3426_v51, %v3378_v22  ;;  %v9212_v21 = vld [vmem:[%s9875_s18 + $0x488] ss:$16 sps:$4 sm:$0xff]   ;;  %v9217_v48 = vld [vmem:[%s9875_s18 + $0x464] ss:$16 sps:$4 sm:$0xff]  }
 0x754   : > { %v9634_v52 = vpop.eup %9633  ;;  %v3428_v59 = vadd.f32 1.0, %v9632_v6  ;;  %3753 = vmatprep.mubr.bf16.mxu0 %v3449_v2  ;;  %v3441_v9 = vmul.f32 %v3425_v26, %v3377_v63  ;;  %v9220_v16 = vld [vmem:[%s9875_s18 + $0x46c] ss:$16 sps:$4 sm:$0xff]   ;;  %v9218_v53 = vld [vmem:[%s9875_s18 + $0x468] ss:$16 sps:$4 sm:$0xff]   ;;  %v9244_v31 = vld [vmem:[%s9885_s24 + $0x4f0] sm:$0xff]  }
 0x755   : > { %v9636_v57 = vpop.eup %9635  ;;  %v3430_v58 = vadd.f32 1.0, %v9634_v52  ;;  %3802 = vmatprep.mubr.bf16.mxu1 %v3451_v14  ;;  %3754 = vmatmul.mubr.bf16.vlgmr.msra.gmra.mxu0 %v3448_v29  ;;  %v3443_v3 = vmul.f32 %v3427_v13, %v3379_v5  ;;  %v9223_v2 = vld [vmem:[%s9875_s18 + $0x444] ss:$16 sps:$4 sm:$0xff]   ;;  %v9221_v6 = vld [vmem:[%s9875_s18 + $0x440] ss:$16 sps:$4 sm:$0xff]   ;;  %v9239_v5 = vld [vmem:[%s9885_s24 + $0x478] sm:$0xff]  }
 0x756   : > { %v9638_v62 = vpop.eup %9637  ;;  %v3429_v19 = vadd.f32 1.0, %v9636_v57  ;;  %3803 = vmatmul.mubr.bf16.vlgmr.msra.gmra.mxu1 %v3450_v12  ;;  %4040 = vmatpush1.bf16.msra.mxu0 %v9191_v54  ;;  %v3444_v41 = vmul.f32 %v3428_v59, %v3380_v47  ;;  %v9226_v54 = vld [vmem:[%s9875_s18 + $0x44c] ss:$16 sps:$4 sm:$0xff]   ;;  %v9224_v29 = vld [vmem:[%s9875_s18 + $0x448] ss:$16 sps:$4 sm:$0xff]   ;;  %v9245_v13 = vld [vmem:[%s9885_s24 + $0x430] sm:$0xff]  }
 0x757   : > { %v3431_v32 = vadd.f32 1.0, %v9638_v62  ;;  %4093 = vmatpush1.bf16.msra.mxu1 %v9194_v0  ;;  %4041 = vmatprep.subr.bf16.mxu0 %v9199_v18  ;;  %v3446_v49 = vmul.f32 %v3430_v58, %v3382_v10  ;;  %v9229_v22 = vld [vmem:[%s9875_s18 + $0x424] ss:$16 sps:$4 sm:$0xff]   ;;  %v9232_v63 = vld [vmem:[%s9875_s18 + $0x42c] ss:$16 sps:$4 sm:$0xff]  }
 0x758   : > { %v3445_v7 = vmul.f32 %v3429_v19, %v3381_v25  ;;  %4094 = vmatprep.subr.bf16.mxu1 %v9202_v30  ;;  %v3452_v46 = vpack.c.bf16 %v3444_v41, %v3440_v15  ;;  %v9227_v14 = vld [vmem:[%s9875_s18 + $0x420] ss:$16 sps:$4 sm:$0xff]   ;;  %v9230_v0 = vld [vmem:[%s9875_s18 + $0x428] ss:$16 sps:$4 sm:$0xff]   ;;  %v9235_v18 = vld [vmem:[%s9875_s18 + $0x404] ss:$16 sps:$4 sm:$0xff]  }
 0x759   : > { %v3447_v17 = vmul.f32 %v3431_v32, %v3383_v20  ;;  %v3454_v37 = vpack.c.bf16 %v3446_v49, %v3442_v50  ;;  %v9238_v52 = vld [vmem:[%s9875_s18 + $0x40c] ss:$16 sps:$4 sm:$0xff]   ;;  %v9233_v12 = vld [vmem:[%s9875_s18 + $0x400] ss:$16 sps:$4 sm:$0xff]   ;;  %v9236_v26 = vld [vmem:[%s9875_s18 + $0x408] ss:$16 sps:$4 sm:$0xff]  }
 0x75a   : > { %4042 = vmatpush1.bf16.msra.mxu0 %v9197_v38  ;;  %v3453_v39 = vpack.c.bf16 %v3445_v7, %v3441_v9  ;;  %v9240_v59 = vld [vmem:[%s9885_s24 + $0x4f8] sm:$0xff]   ;;  %v9246_v47 = vld [vmem:[%s9885_s24 + $0x4b0] sm:$0xff]   ;;  %v9248_v58 = vld [vmem:[%s9885_s24 + $0x4e8] sm:$0xff]  }
 0x75b   : > { %4095 = vmatpush1.bf16.msra.mxu1 %v9200_v60  ;;  %v3455_v33 = vpack.c.bf16 %v3447_v17, %v3443_v3  ;;  %4043 = vmatprep.subr.bf16.mxu0 %v9205_v24  ;;  %v9241_v30 = vld [vmem:[%s9885_s24 + $0x438] sm:$0xff]   ;;  %v9249_v62 = vld [vmem:[%s9885_s24 + $0x428] sm:$0xff]   ;;  %v9251_v10 = vld [vmem:[%s9885_s24 + $0x460] sm:$0xff]  }
 0x75c   : > { %3761 = vmatprep.mubr.bf16.mxu0 %v3453_v39  ;;  %4096 = vmatprep.subr.bf16.mxu1 %v9208_v8  ;;  %v9242_v57 = vld [vmem:[%s9885_s24 + $0x4b8] sm:$0xff]   ;;  %v9250_v51 = vld [vmem:[%s9885_s24 + $0x4a8] sm:$0xff]   ;;  %v9252_v25 = vld [vmem:[%s9885_s24 + $0x4e0] sm:$0xff]  }
 0x75d   : > { %3810 = vmatprep.mubr.bf16.mxu1 %v3455_v33  ;;  %3762 = vmatmul.mubr.bf16.gmra.mxu0 %v3452_v46  ;;  %v9253_v19 = vld [vmem:[%s9885_s24 + $0x420] sm:$0xff]   ;;  %v9255_v41 = vld [vmem:[%s9885_s24 + $0x458] sm:$0xff]   ;;  %v9259_v24 = vld [vmem:[%s9885_s24 + $0x450] sm:$0xff]  }
 0x75e   : > { %3811 = vmatmul.mubr.bf16.gmra.mxu1 %v3454_v37  ;;  %4044 = vmatpush1.bf16.msra.mxu0 %v9203_v27  ;;  %v9254_v38 = vld [vmem:[%s9885_s24 + $0x4a0] sm:$0xff]   ;;  %v9256_v20 = vld [vmem:[%s9885_s24 + $0x4d8] sm:$0xff]   ;;  %v9260_v9 = vld [vmem:[%s9885_s24 + $0x4d0] sm:$0xff]  }
 0x75f   : > { %4097 = vmatpush1.bf16.msra.mxu1 %v9206_v61  ;;  %4045 = vmatprep.subr.bf16.mxu0 %v9211_v23  ;;  %v9257_v32 = vld [vmem:[%s9885_s24 + $0x418] sm:$0xff]   ;;  %v9261_v49 = vld [vmem:[%s9885_s24 + $0x410] sm:$0xff]   ;;  %v9263_v8 = vld [vmem:[%s9885_s24 + $0x448] sm:$0xff]  }
 0x760   : > { %4098 = vmatprep.subr.bf16.mxu1 %v9214_v28  ;;  %4071 = vmatprep.mubr.bf16.mxu0 %v9800_v36  ;;  %v9258_v60 = vld [vmem:[%s9885_s24 + $0x498] sm:$0xff]   ;;  %v9262_v7 = vld [vmem:[%s9885_s24 + $0x490] sm:$0xff]   ;;  %v9264_v15 = vld [vmem:[%s9885_s24 + $0x4c8] sm:$0xff]  }
 0x761   : > { %4124 = vmatprep.mubr.bf16.mxu1 %v9800_v36  ;;  %v9265_v3 = vld [vmem:[%s9885_s24 + $0x408] sm:$0xff]   ;;  %v9267_v50 = vld [vmem:[%s9885_s24 + $0x440] sm:$0xff]  }
 0x762   : > { %4046 = vmatpush1.bf16.msra.mxu0 %v9209_v34  ;;  %v9266_v17 = vld [vmem:[%s9885_s24 + $0x488] sm:$0xff]   ;;  %v9268_v39 = vld [vmem:[%s9885_s24 + $0x4c0] sm:$0xff]  }
 0x763   : > { %4099 = vmatpush1.bf16.msra.mxu1 %v9212_v21  ;;  %4047 = vmatprep.subr.bf16.mxu0 %v9217_v48  ;;  %v9269_v27 = vld [vmem:[%s9885_s24 + $0x400] sm:$0xff]   ;;  %v9276_v46 = vld [vmem:[%s9875_s18 + $0x5ec] ss:$16 sps:$4 sm:$0xff]  }
 0x764   : > { %4100 = vmatprep.subr.bf16.mxu1 %v9220_v16  ;;  %v9270_v33 = vld [vmem:[%s9885_s24 + $0x480] sm:$0xff]  }
 0x765   : > { %v9273_v61 = vld [vmem:[%s9875_s18 + $0x5e4] ss:$16 sps:$4 sm:$0xff]   ;;  %v7626_v28 = vld [vmem:[%s9890_s27 + $0x3] ss:$0 sm:$0xff] }
 0x766   : > { %4048 = vmatpush1.bf16.msra.mxu0 %v9215_v40 }
 0x767   : > { %4101 = vmatpush1.bf16.msra.mxu1 %v9218_v53  ;;  %4049 = vmatprep.subr.bf16.mxu0 %v9223_v2 }
 0x768   : > { %4102 = vmatprep.subr.bf16.mxu1 %v9226_v54 }
 0x76a   : > { %4050 = vmatpush1.bf16.msra.mxu0 %v9221_v6 }
 0x76b   : > { %4103 = vmatpush1.bf16.msra.mxu1 %v9224_v29  ;;  %4051 = vmatprep.subr.bf16.mxu0 %v9229_v22 }
 0x76c   : > { %4104 = vmatprep.subr.bf16.mxu1 %v9232_v63 }
 0x76e   : > { %4052 = vmatpush1.bf16.msra.mxu0 %v9227_v14 }
 0x76f   : > { %4105 = vmatpush1.bf16.msra.mxu1 %v9230_v0  ;;  %4053 = vmatprep.subr.bf16.mxu0 %v9235_v18 }
 0x770   : > { %4106 = vmatprep.subr.bf16.mxu1 %v9238_v52 }
 0x772   : > { %4054 = vmatpush1.bf16.msra.mxu0 %v9233_v12 }
 0x773   : > { %4107 = vmatpush1.bf16.msra.mxu1 %v9236_v26  ;;  %8567 = vmatprep.subr.bf16.mxu0 %v9239_v5 }
 0x774   : > { %8595 = vmatprep.subr.bf16.mxu1 %v9240_v59 }
 0x775   : > { %4072 = vmatmul.mubr.bf16.vlgmr.msra.gmra.mxu0 %v10410_v4 }
 0x776   : > { %4125 = vmatmul.mubr.bf16.vlgmr.msra.gmra.mxu1 %v10410_v4  ;;  %4081 = vmatprep.mubr.bf16.mxu0 %v9800_v36  ;;  %v9243_v4 = vld [vmem:[%s9885_s24 + $0x470] sm:$0xff]  }
 0x777   : > { %4134 = vmatprep.mubr.bf16.mxu1 %v9800_v36  ;;  %8568 = vmatpush3.bf16.msra.mxu0 %v9241_v30 }
 0x778   : > { %8596 = vmatpush3.bf16.msra.mxu1 %v9242_v57  ;;  %8569 = vmatprep.subr.bf16.mxu0 %v9243_v4 }
 0x779   : > { %8597 = vmatprep.subr.bf16.mxu1 %v9244_v31 }
 0x77b   : > { %8570 = vmatpush3.bf16.msra.mxu0 %v9245_v13 }
 0x77c   : > { %8598 = vmatpush3.bf16.msra.mxu1 %v9246_v47 }
 0x77d   : > { %4082 = vmatmul.mubr.bf16.gmra.mxu0 %v10416_v35  ;;  %8599 = vmatprep.subr.bf16.mxu1 %v9248_v58 }
 0x77e   : > { %4135 = vmatmul.mubr.bf16.gmra.mxu1 %v10416_v35  ;;  %v9247_v35 = vld [vmem:[%s9885_s24 + $0x468] sm:$0xff]  }
 0x77f   : > { %8571 = vmatprep.subr.bf16.mxu0 %v9247_v35 }
 0x780   : > { %8572 = vmatpush3.bf16.msra.mxu0 %v9249_v62  ;;  %8600 = vmatpush3.bf16.msra.mxu1 %v9250_v51 }
 0x781   : > { %8573 = vmatprep.subr.bf16.mxu0 %v9251_v10  ;;  %8601 = vmatprep.subr.bf16.mxu1 %v9252_v25 }
 0x784   : > { %8574 = vmatpush3.bf16.msra.mxu0 %v9253_v19  ;;  %8602 = vmatpush3.bf16.msra.mxu1 %v9254_v38  ;;  %v7691_v38 = vld [vmem:[%s9880_s21 + $0x10] sm:$0xf] }
 0x785   : > { %8575 = vmatprep.subr.bf16.mxu0 %v9255_v41  ;;  %8603 = vmatprep.subr.bf16.mxu1 %v9256_v20  ;;  %v3862_v41 = vrot.slane %v7691_v38, %v10013_v42  ;;  %v3866_v20 = vrot.slane %v7691_v38, %v10017_v44 }
 0x788   : > { %8576 = vmatpush3.bf16.msra.mxu0 %v9257_v32  ;;  %8604 = vmatpush3.bf16.msra.mxu1 %v9258_v60  ;;  %v3874_v60 = vrot.slane %v7691_v38, %v10019_v45 }
 0x789   : > { %8577 = vmatprep.subr.bf16.mxu0 %v9259_v24  ;;  %8605 = vmatprep.subr.bf16.mxu1 %v9260_v9 }
 0x78c   : > { %8578 = vmatpush3.bf16.msra.mxu0 %v9261_v49  ;;  %8606 = vmatpush3.bf16.msra.mxu1 %v9262_v7 }
 0x78d   : > { %8579 = vmatprep.subr.bf16.mxu0 %v9263_v8  ;;  %8607 = vmatprep.subr.bf16.mxu1 %v9264_v15 }
 0x790   : > { %8580 = vmatpush3.bf16.msra.mxu0 %v9265_v3  ;;  %8608 = vmatpush3.bf16.msra.mxu1 %v9266_v17 }
 0x791   : > { %8581 = vmatprep.subr.bf16.mxu0 %v9267_v50  ;;  %8609 = vmatprep.subr.bf16.mxu1 %v9268_v39 }
 0x794   : > { %8582 = vmatpush3.bf16.msra.mxu0 %v9269_v27  ;;  %8610 = vmatpush3.bf16.msra.mxu1 %v9270_v33 }
 0x795   : > { %4816 = vmatprep.subr.bf16.mxu0 %v9273_v61  ;;  %4869 = vmatprep.subr.bf16.mxu1 %v9276_v46 }
 0x815   : > { %v8527_v23 = vpop.f32.mrf.mxu0 }
 0x816   : > { %v8555_v37 = vpop.f32.mrf.mxu1 }
 0x817   : > { %v8528_v34 = vpop.f32.mrf.mxu0 }
 0x818   : > { %v8529_v21 = vadd.f32 %v8528_v34, %v8527_v23  ;;  %v8556_v48 = vpop.f32.mrf.mxu1 }
 0x819   : > { %v8557_v16 = vadd.f32 %v8556_v48, %v8555_v37  ;;  %v8530_v40 = vpop.f32.mrf.mxu0 }
 0x81a   : > { %v3756_v53 = vadd.f32 %v8529_v21, %v7626_v28  ;;  %v8558_v2 = vpop.f32.mrf.mxu1 }
 0x81b   : > { %v8531_v54 = vpop.f32.mrf.mxu0 }
 0x81c   : > { %v3805_v6 = vadd.f32 %v8557_v16, %v3756_v53  ;;  %v8532_v29 = vadd.f32 %v8531_v54, %v8530_v40  ;;  %v8559_v22 = vpop.f32.mrf.mxu1 }
 0x81d   : > { %v8560_v63 = vadd.f32 %v8559_v22, %v8558_v2  ;;  %v8533_v14 = vpop.f32.mrf.mxu0 }
 0x81e   : > { %v10602_v0 = vadd.f32 %v3805_v6, %v10456_v1  ;;  %v3759_v18 = vadd.f32 %v8532_v29, %v7626_v28  ;;  %v8561_v52 = vpop.f32.mrf.mxu1 }
 0x81f   : > { %v8534_v12 = vpop.f32.mrf.mxu0 }
 0x820   : > { %v3808_v26 = vadd.f32 %v8560_v63, %v3759_v18  ;;  %v8535_v5 = vadd.f32 %v8534_v12, %v8533_v14  ;;  %v8562_v59 = vpop.f32.mrf.mxu1 }
 0x821   : > { %v8563_v30 = vadd.f32 %v8562_v59, %v8561_v52  ;;  %v8536_v57 = vpop.f32.mrf.mxu0 }
 0x822   : > { %v10605_v4 = vadd.f32 %v3808_v26, %v10459_v55  ;;  %v3764_v31 = vadd.f32 %v8535_v5, %v7626_v28  ;;  %v8564_v13 = vpop.f32.mrf.mxu1  ;;  %v3870_v55 = vrot.slane %v7691_v38, %v10015_v43 }
 0x823   : > { %v8537_v47 = vpop.f32.mrf.mxu0 }
 0x824   : > { %v3813_v35 = vadd.f32 %v8563_v30, %v3764_v31  ;;  %v8538_v58 = vadd.f32 %v8537_v47, %v8536_v57  ;;  %v8565_v62 = vpop.f32.mrf.mxu1 }
 0x825   : > { %v8566_v1 = vadd.f32 %v8565_v62, %v8564_v13 }
 0x826   : > { %v10608_v51 = vadd.f32 %v3813_v35, %v10462_v11  ;;  %v3767_v10 = vadd.f32 %v8538_v58, %v7626_v28 }
 0x828   : > { %v3816_v25 = vadd.f32 %v8566_v1, %v3767_v10 }
 0x82a   : > { %v10611_v19 = vadd.f32 %v3816_v25, %v10465_v56 }
 0x835   : > { %v4073_v32 = vpop.f32.mrf.mxu0 }
 0x836   : > { %v10618_v24 = vadd.f32 %v4073_v32, %v3862_v41  ;;  %v4126_v9 = vpop.f32.mrf.mxu1 }
 0x837   : > { %v10620_v11 = vadd.f32 %v4126_v9, %v3870_v55  ;;  %v4075_v49 = vpop.f32.mrf.mxu0 }
 0x838   : > { %v4161_v7 = vmul.f32 0.70710677, %v10618_v24  ;;  %v10623_v56 = vadd.f32 %v4075_v49, %v3866_v20  ;;  %v4128_v8 = vpop.f32.mrf.mxu1  ;;  %v4145_v32 = vmul.f32 0.5, %v10618_v24 }
 0x839   : > { %v4163_v15 = vmul.f32 0.70710677, %v10620_v11  ;;  %v10626_v3 = vadd.f32 %v4128_v8, %v3874_v60  ;;  %v4077_v17 = vpop.f32.mrf.mxu0 }
 0x83a   : > { %9639 = verf.f32 %v4161_v7  ;;  %v4162_v50 = vmul.f32 0.70710677, %v10623_v56  ;;  %v10629_v39 = vadd.f32 %v4077_v17, %v3862_v41  ;;  %v4130_v27 = vpop.f32.mrf.mxu1  ;;  %v4146_v9 = vmul.f32 0.5, %v10623_v56 }
 0x83b   : > { %9641 = verf.f32 %v4163_v15  ;;  %v4164_v33 = vmul.f32 0.70710677, %v10626_v3  ;;  %v10632_v61 = vadd.f32 %v4130_v27, %v3870_v55  ;;  %v4079_v46 = vpop.f32.mrf.mxu0 }
 0x83c   : > { %9643 = verf.f32 %v4162_v50  ;;  %v4165_v23 = vmul.f32 0.70710677, %v10629_v39  ;;  %v4080_v37 = vadd.f32 %v4079_v46, %v3866_v20  ;;  %v4132_v28 = vpop.f32.mrf.mxu1  ;;  %v4149_v17 = vmul.f32 0.5, %v10629_v39 }
 0x83d   : > { %9645 = verf.f32 %v4164_v33  ;;  %v4167_v34 = vmul.f32 0.70710677, %v10632_v61  ;;  %v4133_v21 = vadd.f32 %v4132_v28, %v3874_v60  ;;  %v4083_v48 = vpop.f32.mrf.mxu0  ;;  %v4151_v46 = vmul.f32 0.5, %v10632_v61 }
 0x83e   : > { %9647 = verf.f32 %v4165_v23  ;;  %v4166_v16 = vmul.f32 0.70710677, %v4080_v37  ;;  %v10636_v40 = vadd.f32 %v4083_v48, %v3862_v41  ;;  %v4136_v53 = vpop.f32.mrf.mxu1  ;;  %v4150_v23 = vmul.f32 0.5, %v4080_v37 }
 0x83f   : > { %9649 = verf.f32 %v4167_v34  ;;  %v4168_v2 = vmul.f32 0.70710677, %v4133_v21  ;;  %v10638_v54 = vadd.f32 %v4136_v53, %v3870_v55  ;;  %v4085_v6 = vpop.f32.mrf.mxu0  ;;  %v4148_v48 = vmul.f32 0.5, %v10626_v3 }
 0x840   : > { %9651 = verf.f32 %v4166_v16  ;;  %v4169_v29 = vmul.f32 0.70710677, %v10636_v40  ;;  %v10641_v22 = vadd.f32 %v4085_v6, %v3866_v20  ;;  %v4138_v63 = vpop.f32.mrf.mxu1  ;;  %v4152_v56 = vmul.f32 0.5, %v4133_v21  ;;  %v9271_v21 = vld [vmem:[%s9875_s18 + $0x5e0] ss:$16 sps:$4 sm:$0xff]  }
 0x841   : > { %9653 = verf.f32 %v4168_v2  ;;  %v4171_v14 = vmul.f32 0.70710677, %v10638_v54  ;;  %v10644_v18 = vadd.f32 %v4138_v63, %v3874_v60  ;;  %v4087_v52 = vpop.f32.mrf.mxu0  ;;  %v4147_v2 = vmul.f32 0.5, %v10620_v11 }
 0x842   : > { %9655 = verf.f32 %v4169_v29  ;;  %v4170_v12 = vmul.f32 0.70710677, %v10641_v22  ;;  %v10647_v26 = vadd.f32 %v4087_v52, %v3862_v41  ;;  %v4140_v5 = vpop.f32.mrf.mxu1  ;;  %v4153_v3 = vmul.f32 0.5, %v10636_v40  ;;  %v9282_v40 = vld [vmem:[%s9875_s18 + $0x5cc] ss:$16 sps:$4 sm:$0xff]  }
 0x843   : > { %9657 = verf.f32 %v4171_v14  ;;  %v4172_v59 = vmul.f32 0.70710677, %v10644_v18  ;;  %v10650_v30 = vadd.f32 %v4140_v5, %v3870_v55  ;;  %v4089_v57 = vpop.f32.mrf.mxu0  ;;  %v4155_v11 = vmul.f32 0.5, %v10638_v54 }
 0x844   : > { %9659 = verf.f32 %v4170_v12  ;;  %v4173_v31 = vmul.f32 0.70710677, %v10647_v26  ;;  %v10653_v13 = vadd.f32 %v4089_v57, %v3866_v20  ;;  %v4142_v47 = vpop.f32.mrf.mxu1 }
 0x845   : > { %9661 = verf.f32 %v4172_v59  ;;  %v4175_v35 = vmul.f32 0.70710677, %v10650_v30  ;;  %v10656_v58 = vadd.f32 %v4142_v47, %v3874_v60 }
 0x846   : > { %9663 = verf.f32 %v4173_v31  ;;  %v4174_v62 = vmul.f32 0.70710677, %v10653_v13  ;;  %v4154_v31 = vmul.f32 0.5, %v10641_v22 }
 0x847   : > { %v9640_v1 = vpop.eup %9639  ;;  %9665 = verf.f32 %v4175_v35  ;;  %v4176_v10 = vmul.f32 0.70710677, %v10656_v58  ;;  %v9274_v35 = vld [vmem:[%s9875_s18 + $0x5e8] ss:$16 sps:$4 sm:$0xff]  }
 0x848   : > { %v9642_v25 = vpop.eup %9641  ;;  %9667 = verf.f32 %v4174_v62  ;;  %v4193_v8 = vadd.f32 1.0, %v9640_v1  ;;  %v9279_v62 = vld [vmem:[%s9875_s18 + $0x5c4] ss:$16 sps:$4 sm:$0xff]  }
 0x849   : > { %v9644_v38 = vpop.eup %9643  ;;  %9669 = verf.f32 %v4176_v10  ;;  %v4195_v33 = vadd.f32 1.0, %v9642_v25 }
 0x84a   : > { %v9646_v41 = vpop.eup %9645  ;;  %v4194_v60 = vadd.f32 1.0, %v9644_v38  ;;  %v4209_v14 = vmul.f32 %v4193_v8, %v4145_v32  ;;  %v4156_v38 = vmul.f32 0.5, %v10644_v18  ;;  %v4158_v18 = vmul.f32 0.5, %v10653_v13  ;;  %v9277_v8 = vld [vmem:[%s9875_s18 + $0x5c0] ss:$16 sps:$4 sm:$0xff]  }
 0x84b   : > { %v9648_v55 = vpop.eup %9647  ;;  %v4196_v15 = vadd.f32 1.0, %v9646_v41  ;;  %v4211_v12 = vmul.f32 %v4195_v33, %v4147_v2  ;;  %v9288_v13 = vld [vmem:[%s9875_s18 + $0x5ac] ss:$16 sps:$4 sm:$0xff]   ;;  %v9291_v2 = vld [vmem:[%s9875_s18 + $0x584] ss:$16 sps:$4 sm:$0xff]  }
 0x84c   : > { %v9650_v20 = vpop.eup %9649  ;;  %v4197_v49 = vadd.f32 1.0, %v9648_v55  ;;  %v4210_v6 = vmul.f32 %v4194_v60, %v4146_v9  ;;  %v4157_v9 = vmul.f32 0.5, %v10647_v26 }
 0x84d   : > { %v9652_v7 = vpop.eup %9651  ;;  %v4199_v50 = vadd.f32 1.0, %v9650_v20  ;;  %v4212_v61 = vmul.f32 %v4196_v15, %v4148_v48 }
 0x84e   : > { %v9654_v27 = vpop.eup %9653  ;;  %v4198_v28 = vadd.f32 1.0, %v9652_v7  ;;  %v4213_v24 = vmul.f32 %v4197_v49, %v4149_v17  ;;  %v4159_v49 = vmul.f32 0.5, %v10650_v30  ;;  %v4160_v17 = vmul.f32 0.5, %v10656_v58 }
 0x84f   : > { %v9656_v34 = vpop.eup %9655  ;;  %v4200_v16 = vadd.f32 1.0, %v9654_v27  ;;  %v4215_v29 = vmul.f32 %v4199_v50, %v4151_v46  ;;  %v9280_v50 = vld [vmem:[%s9875_s18 + $0x5c8] ss:$16 sps:$4 sm:$0xff]   ;;  %v9285_v27 = vld [vmem:[%s9875_s18 + $0x5a4] ss:$16 sps:$4 sm:$0xff]  }
 0x850   : > { %v9658_v53 = vpop.eup %9657  ;;  %v4214_v39 = vmul.f32 %v4198_v28, %v4150_v23  ;;  %v4225_v57 = vpack.c.bf16 %v4213_v24, %v4209_v14  ;;  %v4201_v20 = vadd.f32 1.0, %v9656_v34  ;;  %v9283_v24 = vld [vmem:[%s9875_s18 + $0x5a0] ss:$16 sps:$4 sm:$0xff]   ;;  %v9297_v14 = vld [vmem:[%s9875_s18 + $0x564] ss:$16 sps:$4 sm:$0xff]  }
 0x851   : > { %v9660_v63 = vpop.eup %9659  ;;  %v4216_v37 = vmul.f32 %v4200_v16, %v4152_v56  ;;  %v4227_v10 = vpack.c.bf16 %v4215_v29, %v4211_v12  ;;  %v4203_v60 = vadd.f32 1.0, %v9658_v53  ;;  %v9286_v16 = vld [vmem:[%s9875_s18 + $0x5a8] ss:$16 sps:$4 sm:$0xff]   ;;  %v9294_v29 = vld [vmem:[%s9875_s18 + $0x58c] ss:$16 sps:$4 sm:$0xff]  }
 0x852   : > { %v9662_v52 = vpop.eup %9661  ;;  %v4226_v5 = vpack.c.bf16 %v4214_v39, %v4210_v6  ;;  %v4202_v25 = vadd.f32 1.0, %v9660_v63  ;;  %v4217_v23 = vmul.f32 %v4201_v20, %v4153_v3  ;;  %v9289_v39 = vld [vmem:[%s9875_s18 + $0x580] ss:$16 sps:$4 sm:$0xff]   ;;  %v9292_v63 = vld [vmem:[%s9875_s18 + $0x588] ss:$16 sps:$4 sm:$0xff]  }
 0x853   : > { %v9664_v59 = vpop.eup %9663  ;;  %v4228_v47 = vpack.c.bf16 %v4216_v37, %v4212_v61  ;;  %v4204_v32 = vadd.f32 1.0, %v9662_v52  ;;  %v4219_v48 = vmul.f32 %v4203_v60, %v4155_v11  ;;  %v9300_v61 = vld [vmem:[%s9875_s18 + $0x56c] ss:$16 sps:$4 sm:$0xff]   ;;  %v9295_v37 = vld [vmem:[%s9875_s18 + $0x560] ss:$16 sps:$4 sm:$0xff]  }
 0x854   : > { %v9666_v1 = vpop.eup %9665  ;;  %v4205_v41 = vadd.f32 1.0, %v9664_v59  ;;  %4530 = vmatprep.mubr.bf16.mxu0 %v4226_v5  ;;  %v4218_v33 = vmul.f32 %v4202_v25, %v4154_v31  ;;  %v9298_v52 = vld [vmem:[%s9875_s18 + $0x568] ss:$16 sps:$4 sm:$0xff]   ;;  %v9303_v12 = vld [vmem:[%s9875_s18 + $0x544] ss:$16 sps:$4 sm:$0xff]  }
 0x855   : > { %v9668_v55 = vpop.eup %9667  ;;  %v4207_v54 = vadd.f32 1.0, %v9666_v1  ;;  %4579 = vmatprep.mubr.bf16.mxu1 %v4228_v47  ;;  %4531 = vmatmul.mubr.bf16.vlgmr.msra.gmra.mxu0 %v4225_v57  ;;  %v4220_v28 = vmul.f32 %v4204_v32, %v4156_v38  ;;  %v9306_v3 = vld [vmem:[%s9875_s18 + $0x54c] ss:$16 sps:$4 sm:$0xff]   ;;  %v9301_v5 = vld [vmem:[%s9875_s18 + $0x540] ss:$16 sps:$4 sm:$0xff]  }
 0x856   : > { %v9670_v22 = vpop.eup %9669  ;;  %v4206_v7 = vadd.f32 1.0, %v9668_v55  ;;  %4580 = vmatmul.mubr.bf16.vlgmr.msra.gmra.mxu1 %v4227_v10  ;;  %4817 = vmatpush1.bf16.msra.mxu0 %v9271_v21  ;;  %v4221_v15 = vmul.f32 %v4205_v41, %v4157_v9  ;;  %v9304_v21 = vld [vmem:[%s9875_s18 + $0x548] ss:$16 sps:$4 sm:$0xff]   ;;  %v9309_v59 = vld [vmem:[%s9875_s18 + $0x524] ss:$16 sps:$4 sm:$0xff]  }
 0x857   : > { %v4208_v26 = vadd.f32 1.0, %v9670_v22  ;;  %4870 = vmatpush1.bf16.msra.mxu1 %v9274_v35  ;;  %4818 = vmatprep.subr.bf16.mxu0 %v9279_v62  ;;  %v4223_v46 = vmul.f32 %v4207_v54, %v4159_v49  ;;  %v9312_v57 = vld [vmem:[%s9875_s18 + $0x52c] ss:$16 sps:$4 sm:$0xff]   ;;  %v9307_v11 = vld [vmem:[%s9875_s18 + $0x520] ss:$16 sps:$4 sm:$0xff]  }
 0x858   : > { %v4222_v30 = vmul.f32 %v4206_v7, %v4158_v18  ;;  %4871 = vmatprep.subr.bf16.mxu1 %v9282_v40  ;;  %v4229_v53 = vpack.c.bf16 %v4221_v15, %v4217_v23  ;;  %v9310_v31 = vld [vmem:[%s9875_s18 + $0x528] ss:$16 sps:$4 sm:$0xff]   ;;  %v9315_v47 = vld [vmem:[%s9875_s18 + $0x504] ss:$16 sps:$4 sm:$0xff]   ;;  %v9318_v35 = vld [vmem:[%s9875_s18 + $0x50c] ss:$16 sps:$4 sm:$0xff]  }
 0x859   : > { %v4224_v34 = vmul.f32 %v4208_v26, %v4160_v17  ;;  %v4231_v6 = vpack.c.bf16 %v4223_v46, %v4219_v48  ;;  %v9313_v62 = vld [vmem:[%s9875_s18 + $0x500] ss:$16 sps:$4 sm:$0xff]   ;;  %v9316_v1 = vld [vmem:[%s9875_s18 + $0x508] ss:$16 sps:$4 sm:$0xff]  }
 0x85a   : > { %4819 = vmatpush1.bf16.msra.mxu0 %v9277_v8  ;;  %v4230_v58 = vpack.c.bf16 %v4222_v30, %v4218_v33  ;;  %v10706_v10 = vld [vmem:[#allocation2] sm:$0xff]   ;;  %v10712_v25 = vld [vmem:[#allocation2 + $0x8] sm:$0xff]   ;;  %v9319_v38 = vld [vmem:[%s9885_s24 + $0x578] sm:$0xff]  }
 0x85b   : > { %4872 = vmatpush1.bf16.msra.mxu1 %v9280_v50  ;;  %v4232_v56 = vpack.c.bf16 %v4224_v34, %v4220_v28  ;;  %4820 = vmatprep.subr.bf16.mxu0 %v9285_v27  ;;  %v9320_v41 = vld [vmem:[%s9885_s24 + $0x5f8] sm:$0xff]   ;;  %v9323_v20 = vld [vmem:[%s9885_s24 + $0x570] sm:$0xff]   ;;  %v9327_v22 = vld [vmem:[%s9885_s24 + $0x568] sm:$0xff]  }
 0x85c   : > { %4538 = vmatprep.mubr.bf16.mxu0 %v4230_v58  ;;  %4873 = vmatprep.subr.bf16.mxu1 %v9288_v13  ;;  %v9321_v40 = vld [vmem:[%s9885_s24 + $0x538] sm:$0xff]   ;;  %v9324_v32 = vld [vmem:[%s9885_s24 + $0x5f0] sm:$0xff]   ;;  %v9328_v60 = vld [vmem:[%s9885_s24 + $0x5e8] sm:$0xff]  }
 0x85d   : > { %4587 = vmatprep.mubr.bf16.mxu1 %v4232_v56  ;;  %4539 = vmatmul.mubr.bf16.gmra.mxu0 %v4229_v53  ;;  %v9322_v55 = vld [vmem:[%s9885_s24 + $0x5b8] sm:$0xff]   ;;  %v9325_v9 = vld [vmem:[%s9885_s24 + $0x530] sm:$0xff]   ;;  %v9329_v49 = vld [vmem:[%s9885_s24 + $0x528] sm:$0xff]  }
 0x85e   : > { %4588 = vmatmul.mubr.bf16.gmra.mxu1 %v4231_v6  ;;  %4821 = vmatpush1.bf16.msra.mxu0 %v9283_v24  ;;  %v9326_v54 = vld [vmem:[%s9885_s24 + $0x5b0] sm:$0xff]   ;;  %v9330_v18 = vld [vmem:[%s9885_s24 + $0x5a8] sm:$0xff]   ;;  %v9331_v7 = vld [vmem:[%s9885_s24 + $0x560] sm:$0xff]  }
 0x85f   : > { %4874 = vmatpush1.bf16.msra.mxu1 %v9286_v16  ;;  %4822 = vmatprep.subr.bf16.mxu0 %v9291_v2  ;;  %v9332_v8 = vld [vmem:[%s9885_s24 + $0x5e0] sm:$0xff]   ;;  %v9335_v26 = vld [vmem:[%s9885_s24 + $0x558] sm:$0xff]   ;;  %v9339_v46 = vld [vmem:[%s9885_s24 + $0x550] sm:$0xff]  }
 0x860   : > { %4875 = vmatprep.subr.bf16.mxu1 %v9294_v29  ;;  %4848 = vmatprep.mubr.bf16.mxu0 %v9800_v36  ;;  %v9333_v15 = vld [vmem:[%s9885_s24 + $0x520] sm:$0xff]   ;;  %v9336_v50 = vld [vmem:[%s9885_s24 + $0x5d8] sm:$0xff]   ;;  %v9340_v30 = vld [vmem:[%s9885_s24 + $0x5d0] sm:$0xff]  }
 0x861   : > { %4901 = vmatprep.mubr.bf16.mxu1 %v9800_v36  ;;  %v9334_v17 = vld [vmem:[%s9885_s24 + $0x5a0] sm:$0xff]   ;;  %v9337_v27 = vld [vmem:[%s9885_s24 + $0x518] sm:$0xff]   ;;  %v9341_v13 = vld [vmem:[%s9885_s24 + $0x510] sm:$0xff]  }
 0x862   : > { %4823 = vmatpush1.bf16.msra.mxu0 %v9289_v39  ;;  %v9338_v33 = vld [vmem:[%s9885_s24 + $0x598] sm:$0xff]   ;;  %v9342_v23 = vld [vmem:[%s9885_s24 + $0x590] sm:$0xff]   ;;  %v9343_v28 = vld [vmem:[%s9885_s24 + $0x548] sm:$0xff]  }
 0x863   : > { %4876 = vmatpush1.bf16.msra.mxu1 %v9292_v63  ;;  %4824 = vmatprep.subr.bf16.mxu0 %v9297_v14  ;;  %v9344_v34 = vld [vmem:[%s9885_s24 + $0x5c8] sm:$0xff]   ;;  %v9347_v24 = vld [vmem:[%s9885_s24 + $0x540] sm:$0xff]  }
 0x864   : > { %4877 = vmatprep.subr.bf16.mxu1 %v9300_v61  ;;  %v9345_v48 = vld [vmem:[%s9885_s24 + $0x508] sm:$0xff]   ;;  %v9348_v56 = vld [vmem:[%s9885_s24 + $0x5c0] sm:$0xff]  }
 0x865   : > { %v9346_v58 = vld [vmem:[%s9885_s24 + $0x588] sm:$0xff]   ;;  %v9349_v16 = vld [vmem:[%s9885_s24 + $0x500] sm:$0xff]  }
 0x866   : > { %4825 = vmatpush1.bf16.msra.mxu0 %v9295_v37  ;;  %v9350_v53 = vld [vmem:[%s9885_s24 + $0x580] sm:$0xff]   ;;  %v9356_v6 = vld [vmem:[%s9875_s18 + $0x6ec] ss:$16 sps:$4 sm:$0xff]  }
 0x867   : > { %4878 = vmatpush1.bf16.msra.mxu1 %v9298_v52  ;;  %4826 = vmatprep.subr.bf16.mxu0 %v9303_v12  ;;  %v9353_v2 = vld [vmem:[%s9875_s18 + $0x6e4] ss:$16 sps:$4 sm:$0xff]  }
 0x868   : > { %4879 = vmatprep.subr.bf16.mxu1 %v9306_v3  ;;  %v7789_v63 = vld [vmem:[%s9890_s27 + $0x4] ss:$0 sm:$0xff] }
 0x86a   : > { %4827 = vmatpush1.bf16.msra.mxu0 %v9301_v5 }
 0x86b   : > { %4880 = vmatpush1.bf16.msra.mxu1 %v9304_v21  ;;  %4828 = vmatprep.subr.bf16.mxu0 %v9309_v59 }
 0x86c   : > { %4881 = vmatprep.subr.bf16.mxu1 %v9312_v57 }
 0x86e   : > { %4829 = vmatpush1.bf16.msra.mxu0 %v9307_v11 }
 0x86f   : > { %4882 = vmatpush1.bf16.msra.mxu1 %v9310_v31  ;;  %4830 = vmatprep.subr.bf16.mxu0 %v9315_v47 }
 0x870   : > { %4883 = vmatprep.subr.bf16.mxu1 %v9318_v35 }
 0x872   : > { %4831 = vmatpush1.bf16.msra.mxu0 %v9313_v62 }
 0x873   : > { %4884 = vmatpush1.bf16.msra.mxu1 %v9316_v1  ;;  %8623 = vmatprep.subr.bf16.mxu0 %v9319_v38 }
 0x874   : > { %8651 = vmatprep.subr.bf16.mxu1 %v9320_v41 }
 0x875   : > { %4849 = vmatmul.mubr.bf16.vlgmr.msra.gmra.mxu0 %v10706_v10 }
 0x876   : > { %4902 = vmatmul.mubr.bf16.vlgmr.msra.gmra.mxu1 %v10706_v10  ;;  %4858 = vmatprep.mubr.bf16.mxu0 %v9800_v36 }
 0x877   : > { %4911 = vmatprep.mubr.bf16.mxu1 %v9800_v36  ;;  %8624 = vmatpush3.bf16.msra.mxu0 %v9321_v40 }
 0x878   : > { %8652 = vmatpush3.bf16.msra.mxu1 %v9322_v55  ;;  %8625 = vmatprep.subr.bf16.mxu0 %v9323_v20 }
 0x879   : > { %8653 = vmatprep.subr.bf16.mxu1 %v9324_v32 }
 0x87b   : > { %8626 = vmatpush3.bf16.msra.mxu0 %v9325_v9 }
 0x87c   : > { %8654 = vmatpush3.bf16.msra.mxu1 %v9326_v54  ;;  %8627 = vmatprep.subr.bf16.mxu0 %v9327_v22 }
 0x87d   : > { %4859 = vmatmul.mubr.bf16.gmra.mxu0 %v10712_v25  ;;  %8655 = vmatprep.subr.bf16.mxu1 %v9328_v60 }
 0x87e   : > { %4912 = vmatmul.mubr.bf16.gmra.mxu1 %v10712_v25 }
 0x87f   : > { %8628 = vmatpush3.bf16.msra.mxu0 %v9329_v49 }
 0x880   : > { %8656 = vmatpush3.bf16.msra.mxu1 %v9330_v18  ;;  %8629 = vmatprep.subr.bf16.mxu0 %v9331_v7 }
 0x881   : > { %8657 = vmatprep.subr.bf16.mxu1 %v9332_v8 }
 0x883   : > { %8630 = vmatpush3.bf16.msra.mxu0 %v9333_v15 }
 0x884   : > { %8658 = vmatpush3.bf16.msra.mxu1 %v9334_v17  ;;  %8631 = vmatprep.subr.bf16.mxu0 %v9335_v26 }
 0x885   : > { %8659 = vmatprep.subr.bf16.mxu1 %v9336_v50  ;;  %v7854_v50 = vld [vmem:[%s9880_s21 + $0x14] sm:$0xf] }
 0x887   : > { %8632 = vmatpush3.bf16.msra.mxu0 %v9337_v27  ;;  %v4639_v27 = vrot.slane %v7854_v50, %v10013_v42 }
 0x888   : > { %8660 = vmatpush3.bf16.msra.mxu1 %v9338_v33  ;;  %8633 = vmatprep.subr.bf16.mxu0 %v9339_v46  ;;  %v4643_v33 = vrot.slane %v7854_v50, %v10017_v44 }
 0x889   : > { %8661 = vmatprep.subr.bf16.mxu1 %v9340_v30  ;;  %v4651_v30 = vrot.slane %v7854_v50, %v10019_v45 }
 0x88b   : > { %8634 = vmatpush3.bf16.msra.mxu0 %v9341_v13 }
 0x88c   : > { %8662 = vmatpush3.bf16.msra.mxu1 %v9342_v23  ;;  %8635 = vmatprep.subr.bf16.mxu0 %v9343_v28 }
 0x88d   : > { %8663 = vmatprep.subr.bf16.mxu1 %v9344_v34 }
 0x88f   : > { %8636 = vmatpush3.bf16.msra.mxu0 %v9345_v48 }
 0x890   : > { %8664 = vmatpush3.bf16.msra.mxu1 %v9346_v58  ;;  %8637 = vmatprep.subr.bf16.mxu0 %v9347_v24 }
 0x891   : > { %8665 = vmatprep.subr.bf16.mxu1 %v9348_v56 }
 0x893   : > { %8638 = vmatpush3.bf16.msra.mxu0 %v9349_v16 }
 0x894   : > { %8666 = vmatpush3.bf16.msra.mxu1 %v9350_v53  ;;  %5593 = vmatprep.subr.bf16.mxu0 %v9353_v2 }
 0x895   : > { %5646 = vmatprep.subr.bf16.mxu1 %v9356_v6 }
 0x915   : > { %v8583_v29 = vpop.f32.mrf.mxu0 }
 0x916   : > { %v8611_v39 = vpop.f32.mrf.mxu1 }
 0x917   : > { %v8584_v14 = vpop.f32.mrf.mxu0 }
 0x918   : > { %v8585_v61 = vadd.f32 %v8584_v14, %v8583_v29  ;;  %v8612_v37 = vpop.f32.mrf.mxu1 }
 0x919   : > { %v8613_v52 = vadd.f32 %v8612_v37, %v8611_v39  ;;  %v8586_v12 = vpop.f32.mrf.mxu0 }
 0x91a   : > { %v4533_v3 = vadd.f32 %v8585_v61, %v7789_v63  ;;  %v8614_v5 = vpop.f32.mrf.mxu1 }
 0x91b   : > { %v8587_v21 = vpop.f32.mrf.mxu0 }
 0x91c   : > { %v4582_v59 = vadd.f32 %v8613_v52, %v4533_v3  ;;  %v8588_v57 = vadd.f32 %v8587_v21, %v8586_v12  ;;  %v8615_v11 = vpop.f32.mrf.mxu1 }
 0x91d   : > { %v8616_v31 = vadd.f32 %v8615_v11, %v8614_v5  ;;  %v8589_v47 = vpop.f32.mrf.mxu0 }
 0x91e   : > { %v10752_v35 = vadd.f32 %v4582_v59, %v10602_v0  ;;  %v4536_v62 = vadd.f32 %v8588_v57, %v7789_v63  ;;  %v8617_v1 = vpop.f32.mrf.mxu1 }
 0x91f   : > { %v8590_v38 = vpop.f32.mrf.mxu0 }
 0x920   : > { %v4585_v41 = vadd.f32 %v8616_v31, %v4536_v62  ;;  %v8591_v40 = vadd.f32 %v8590_v38, %v8589_v47  ;;  %v8618_v55 = vpop.f32.mrf.mxu1 }
 0x921   : > { %v8619_v20 = vadd.f32 %v8618_v55, %v8617_v1  ;;  %v8592_v32 = vpop.f32.mrf.mxu0 }
 0x922   : > { %v10755_v9 = vadd.f32 %v4585_v41, %v10605_v4  ;;  %v4541_v54 = vadd.f32 %v8591_v40, %v7789_v63  ;;  %v8620_v22 = vpop.f32.mrf.mxu1  ;;  %v4647_v4 = vrot.slane %v7854_v50, %v10015_v43 }
 0x923   : > { %v8593_v60 = vpop.f32.mrf.mxu0 }
 0x924   : > { %v4590_v49 = vadd.f32 %v8619_v20, %v4541_v54  ;;  %v8594_v18 = vadd.f32 %v8593_v60, %v8592_v32  ;;  %v8621_v7 = vpop.f32.mrf.mxu1 }
 0x925   : > { %v8622_v0 = vadd.f32 %v8621_v7, %v8620_v22 }
 0x926   : > { %v10758_v8 = vadd.f32 %v4590_v49, %v10608_v51  ;;  %v4544_v15 = vadd.f32 %v8594_v18, %v7789_v63 }
 0x928   : > { %v4593_v17 = vadd.f32 %v8622_v0, %v4544_v15 }
 0x92a   : > { %v10761_v26 = vadd.f32 %v4593_v17, %v10611_v19 }
 0x935   : > { %v4850_v46 = vpop.f32.mrf.mxu0 }
 0x936   : > { %v10768_v13 = vadd.f32 %v4850_v46, %v4639_v27  ;;  %v4903_v23 = vpop.f32.mrf.mxu1 }
 0x937   : > { %v10770_v51 = vadd.f32 %v4903_v23, %v4647_v4  ;;  %v4852_v28 = vpop.f32.mrf.mxu0 }
 0x938   : > { %v4938_v34 = vmul.f32 0.70710677, %v10768_v13  ;;  %v10773_v19 = vadd.f32 %v4852_v28, %v4643_v33  ;;  %v4905_v48 = vpop.f32.mrf.mxu1  ;;  %v4922_v28 = vmul.f32 0.5, %v10768_v13 }
 0x939   : > { %v4940_v58 = vmul.f32 0.70710677, %v10770_v51  ;;  %v10776_v24 = vadd.f32 %v4905_v48, %v4651_v30  ;;  %v4854_v56 = vpop.f32.mrf.mxu0 }
 0x93a   : > { %9671 = verf.f32 %v4938_v34  ;;  %v4939_v16 = vmul.f32 0.70710677, %v10773_v19  ;;  %v10779_v53 = vadd.f32 %v4854_v56, %v4639_v27  ;;  %v4907_v2 = vpop.f32.mrf.mxu1  ;;  %v4923_v34 = vmul.f32 0.5, %v10773_v19 }
 0x93b   : > { %9673 = verf.f32 %v4940_v58  ;;  %v4941_v6 = vmul.f32 0.70710677, %v10776_v24  ;;  %v10782_v29 = vadd.f32 %v4907_v2, %v4647_v4  ;;  %v4856_v39 = vpop.f32.mrf.mxu0 }
 0x93c   : > { %9675 = verf.f32 %v4939_v16  ;;  %v4942_v63 = vmul.f32 0.70710677, %v10779_v53  ;;  %v4857_v14 = vadd.f32 %v4856_v39, %v4643_v33  ;;  %v4909_v61 = vpop.f32.mrf.mxu1  ;;  %v4926_v2 = vmul.f32 0.5, %v10779_v53 }
 0x93d   : > { %9677 = verf.f32 %v4941_v6  ;;  %v4944_v37 = vmul.f32 0.70710677, %v10782_v29  ;;  %v4910_v52 = vadd.f32 %v4909_v61, %v4651_v30  ;;  %v4860_v12 = vpop.f32.mrf.mxu0  ;;  %v4928_v61 = vmul.f32 0.5, %v10782_v29 }
 0x93e   : > { %9679 = verf.f32 %v4942_v63  ;;  %v4943_v3 = vmul.f32 0.70710677, %v4857_v14  ;;  %v10786_v5 = vadd.f32 %v4860_v12, %v4639_v27  ;;  %v4913_v21 = vpop.f32.mrf.mxu1 }
 0x93f   : > { %9681 = verf.f32 %v4944_v37  ;;  %v4945_v59 = vmul.f32 0.70710677, %v4910_v52  ;;  %v10788_v57 = vadd.f32 %v4913_v21, %v4647_v4  ;;  %v4862_v11 = vpop.f32.mrf.mxu0  ;;  %v4927_v37 = vmul.f32 0.5, %v4857_v14 }
 0x940   : > { %9683 = verf.f32 %v4943_v3  ;;  %v4946_v31 = vmul.f32 0.70710677, %v10786_v5  ;;  %v10791_v47 = vadd.f32 %v4862_v11, %v4643_v33  ;;  %v4915_v62 = vpop.f32.mrf.mxu1  ;;  %v4925_v21 = vmul.f32 0.5, %v10776_v24 }
 0x941   : > { %9685 = verf.f32 %v4945_v59  ;;  %v4948_v1 = vmul.f32 0.70710677, %v10788_v57  ;;  %v10794_v38 = vadd.f32 %v4915_v62, %v4651_v30  ;;  %v4864_v41 = vpop.f32.mrf.mxu0  ;;  %v4929_v19 = vmul.f32 0.5, %v4910_v52  ;;  %v9351_v52 = vld [vmem:[%s9875_s18 + $0x6e0] ss:$16 sps:$4 sm:$0xff]  }
 0x942   : > { %9687 = verf.f32 %v4946_v31  ;;  %v4947_v40 = vmul.f32 0.70710677, %v10791_v47  ;;  %v10797_v55 = vadd.f32 %v4864_v41, %v4639_v27  ;;  %v4917_v20 = vpop.f32.mrf.mxu1  ;;  %v4924_v31 = vmul.f32 0.5, %v10770_v51 }
 0x943   : > { %9689 = verf.f32 %v4948_v1  ;;  %v4949_v32 = vmul.f32 0.70710677, %v10794_v38  ;;  %v10800_v54 = vadd.f32 %v4917_v20, %v4647_v4  ;;  %v4866_v22 = vpop.f32.mrf.mxu0  ;;  %v4930_v24 = vmul.f32 0.5, %v10786_v5  ;;  %v9362_v5 = vld [vmem:[%s9875_s18 + $0x6cc] ss:$16 sps:$4 sm:$0xff]  }
 0x944   : > { %9691 = verf.f32 %v4947_v40  ;;  %v4950_v60 = vmul.f32 0.70710677, %v10797_v55  ;;  %v10803_v49 = vadd.f32 %v4866_v22, %v4643_v33  ;;  %v4919_v18 = vpop.f32.mrf.mxu1  ;;  %v4932_v51 = vmul.f32 0.5, %v10788_v57 }
 0x945   : > { %9693 = verf.f32 %v4949_v32  ;;  %v4952_v7 = vmul.f32 0.70710677, %v10800_v54  ;;  %v10806_v0 = vadd.f32 %v4919_v18, %v4651_v30 }
 0x946   : > { %9695 = verf.f32 %v4950_v60  ;;  %v4951_v15 = vmul.f32 0.70710677, %v10803_v49 }
 0x947   : > { %v9672_v17 = vpop.eup %9671  ;;  %9697 = verf.f32 %v4952_v7  ;;  %v4953_v50 = vmul.f32 0.70710677, %v10806_v0  ;;  %v4931_v7 = vmul.f32 0.5, %v10791_v47 }
 0x948   : > { %v9674_v27 = vpop.eup %9673  ;;  %9699 = verf.f32 %v4951_v15  ;;  %v4970_v56 = vadd.f32 1.0, %v9672_v17  ;;  %v9354_v17 = vld [vmem:[%s9875_s18 + $0x6e8] ss:$16 sps:$4 sm:$0xff]  }
 0x949   : > { %v9676_v4 = vpop.eup %9675  ;;  %9701 = verf.f32 %v4953_v50  ;;  %v4972_v63 = vadd.f32 1.0, %v9674_v27  ;;  %v9359_v50 = vld [vmem:[%s9875_s18 + $0x6c4] ss:$16 sps:$4 sm:$0xff]  }
 0x94a   : > { %v9678_v46 = vpop.eup %9677  ;;  %v4971_v30 = vadd.f32 1.0, %v9676_v4  ;;  %v4986_v40 = vmul.f32 %v4970_v56, %v4922_v28  ;;  %v4936_v56 = vmul.f32 0.5, %v10800_v54 }
 0x94b   : > { %v9680_v33 = vpop.eup %9679  ;;  %v4973_v16 = vadd.f32 1.0, %v9678_v46  ;;  %v4988_v32 = vmul.f32 %v4972_v63, %v4924_v31  ;;  %v9360_v63 = vld [vmem:[%s9875_s18 + $0x6c8] ss:$16 sps:$4 sm:$0xff]  }
 0x94c   : > { %v9682_v23 = vpop.eup %9681  ;;  %v4974_v48 = vadd.f32 1.0, %v9680_v33  ;;  %v4987_v62 = vmul.f32 %v4971_v30, %v4923_v34  ;;  %v4933_v33 = vmul.f32 0.5, %v10794_v38  ;;  %v4935_v38 = vmul.f32 0.5, %v10803_v49  ;;  %v9368_v49 = vld [vmem:[%s9875_s18 + $0x6ac] ss:$16 sps:$4 sm:$0xff]  }
 0x94d   : > { %v9684_v58 = vpop.eup %9683  ;;  %v4976_v6 = vadd.f32 1.0, %v9682_v23  ;;  %v4989_v29 = vmul.f32 %v4973_v16, %v4925_v21  ;;  %v9366_v31 = vld [vmem:[%s9875_s18 + $0x6a8] ss:$16 sps:$4 sm:$0xff]  }
 0x94e   : > { %v9686_v39 = vpop.eup %9685  ;;  %v4975_v12 = vadd.f32 1.0, %v9684_v58  ;;  %v4990_v13 = vmul.f32 %v4974_v48, %v4926_v2  ;;  %v4934_v48 = vmul.f32 0.5, %v10797_v55  ;;  %v9357_v2 = vld [vmem:[%s9875_s18 + $0x6c0] ss:$16 sps:$4 sm:$0xff]  }
 0x94f   : > { %v9688_v3 = vpop.eup %9687  ;;  %v4977_v59 = vadd.f32 1.0, %v9686_v39  ;;  %v4992_v1 = vmul.f32 %v4976_v6, %v4928_v61  ;;  %v4937_v39 = vmul.f32 0.5, %v10806_v0  ;;  %v9365_v61 = vld [vmem:[%s9875_s18 + $0x6a4] ss:$16 sps:$4 sm:$0xff]  }
 0x950   : > { %v9690_v11 = vpop.eup %9689  ;;  %v4991_v53 = vmul.f32 %v4975_v12, %v4927_v37  ;;  %v5002_v18 = vpack.c.bf16 %v4990_v13, %v4986_v40  ;;  %v4978_v34 = vadd.f32 1.0, %v9688_v3  ;;  %v9369_v40 = vld [vmem:[%s9875_s18 + $0x680] ss:$16 sps:$4 sm:$0xff]  }
 0x951   : > { %v9692_v41 = vpop.eup %9691  ;;  %v4993_v14 = vmul.f32 %v4977_v59, %v4929_v19  ;;  %v5004_v4 = vpack.c.bf16 %v4992_v1, %v4988_v32  ;;  %v4980_v58 = vadd.f32 1.0, %v9690_v11  ;;  %v9363_v59 = vld [vmem:[%s9875_s18 + $0x6a0] ss:$16 sps:$4 sm:$0xff]   ;;  %v9371_v1 = vld [vmem:[%s9875_s18 + $0x684] ss:$16 sps:$4 sm:$0xff]  }
 0x952   : > { %v9694_v20 = vpop.eup %9693  ;;  %v5003_v22 = vpack.c.bf16 %v4991_v53, %v4987_v62  ;;  %v4979_v46 = vadd.f32 1.0, %v9692_v41  ;;  %v4994_v3 = vmul.f32 %v4978_v34, %v4930_v24  ;;  %v9374_v41 = vld [vmem:[%s9875_s18 + $0x68c] ss:$16 sps:$4 sm:$0xff]   ;;  %v9375_v32 = vld [vmem:[%s9875_s18 + $0x660] ss:$16 sps:$4 sm:$0xff]  }
 0x953   : > { %v9696_v60 = vpop.eup %9695  ;;  %v5005_v15 = vpack.c.bf16 %v4993_v14, %v4989_v29  ;;  %v4981_v30 = vadd.f32 1.0, %v9694_v20  ;;  %v4996_v19 = vmul.f32 %v4980_v58, %v4932_v51  ;;  %v9372_v29 = vld [vmem:[%s9875_s18 + $0x688] ss:$16 sps:$4 sm:$0xff]   ;;  %v9377_v14 = vld [vmem:[%s9875_s18 + $0x664] ss:$16 sps:$4 sm:$0xff]  }
 0x954   : > { %v9698_v27 = vpop.eup %9697  ;;  %v4982_v23 = vadd.f32 1.0, %v9696_v60  ;;  %5307 = vmatprep.mubr.bf16.mxu0 %v5003_v22  ;;  %v4995_v37 = vmul.f32 %v4979_v46, %v4931_v7  ;;  %v9380_v20 = vld [vmem:[%s9875_s18 + $0x66c] ss:$16 sps:$4 sm:$0xff]   ;;  %v9378_v24 = vld [vmem:[%s9875_s18 + $0x668] ss:$16 sps:$4 sm:$0xff]   ;;  %v9404_v34 = vld [vmem:[%s9885_s24 + $0x6f0] sm:$0xff]  }
 0x955   : > { %v9700_v28 = vpop.eup %9699  ;;  %v4984_v57 = vadd.f32 1.0, %v9698_v27  ;;  %5356 = vmatprep.mubr.bf16.mxu1 %v5005_v15  ;;  %5308 = vmatmul.mubr.bf16.vlgmr.msra.gmra.mxu0 %v5002_v18  ;;  %v4997_v21 = vmul.f32 %v4981_v30, %v4933_v33  ;;  %v9383_v22 = vld [vmem:[%s9875_s18 + $0x644] ss:$16 sps:$4 sm:$0xff]   ;;  %v9381_v60 = vld [vmem:[%s9875_s18 + $0x640] ss:$16 sps:$4 sm:$0xff]   ;;  %v9399_v33 = vld [vmem:[%s9885_s24 + $0x678] sm:$0xff]  }
 0x956   : > { %v9702_v47 = vpop.eup %9701  ;;  %v4983_v16 = vadd.f32 1.0, %v9700_v28  ;;  %5357 = vmatmul.mubr.bf16.vlgmr.msra.gmra.mxu1 %v5004_v4  ;;  %5594 = vmatpush1.bf16.msra.mxu0 %v9351_v52  ;;  %v4998_v6 = vmul.f32 %v4982_v23, %v4934_v48  ;;  %v9386_v52 = vld [vmem:[%s9875_s18 + $0x64c] ss:$16 sps:$4 sm:$0xff]   ;;  %v9384_v18 = vld [vmem:[%s9875_s18 + $0x648] ss:$16 sps:$4 sm:$0xff]   ;;  %v9405_v30 = vld [vmem:[%s9885_s24 + $0x630] sm:$0xff]  }
 0x957   : > { %v4985_v55 = vadd.f32 1.0, %v9702_v47  ;;  %5647 = vmatpush1.bf16.msra.mxu1 %v9354_v17  ;;  %5595 = vmatprep.subr.bf16.mxu0 %v9359_v50  ;;  %v5000_v12 = vmul.f32 %v4984_v57, %v4936_v56  ;;  %v9389_v51 = vld [vmem:[%s9875_s18 + $0x624] ss:$16 sps:$4 sm:$0xff]   ;;  %v9392_v7 = vld [vmem:[%s9875_s18 + $0x62c] ss:$16 sps:$4 sm:$0xff]  }
 0x958   : > { %v4999_v54 = vmul.f32 %v4983_v16, %v4935_v38  ;;  %5648 = vmatprep.subr.bf16.mxu1 %v9362_v5  ;;  %v5006_v62 = vpack.c.bf16 %v4998_v6, %v4994_v3  ;;  %v9387_v15 = vld [vmem:[%s9875_s18 + $0x620] ss:$16 sps:$4 sm:$0xff]   ;;  %v9390_v17 = vld [vmem:[%s9875_s18 + $0x628] ss:$16 sps:$4 sm:$0xff]   ;;  %v9395_v50 = vld [vmem:[%s9875_s18 + $0x604] ss:$16 sps:$4 sm:$0xff]  }
 0x959   : > { %v5001_v13 = vmul.f32 %v4985_v55, %v4937_v39  ;;  %v5008_v53 = vpack.c.bf16 %v5000_v12, %v4996_v19  ;;  %v9398_v27 = vld [vmem:[%s9875_s18 + $0x60c] ss:$16 sps:$4 sm:$0xff]   ;;  %v9393_v4 = vld [vmem:[%s9875_s18 + $0x600] ss:$16 sps:$4 sm:$0xff]   ;;  %v9396_v46 = vld [vmem:[%s9875_s18 + $0x608] ss:$16 sps:$4 sm:$0xff]  }
 0x95a   : > { %5596 = vmatpush1.bf16.msra.mxu0 %v9357_v2  ;;  %v5007_v0 = vpack.c.bf16 %v4999_v54, %v4995_v37  ;;  %v9400_v23 = vld [vmem:[%s9885_s24 + $0x6f8] sm:$0xff]   ;;  %v9406_v48 = vld [vmem:[%s9885_s24 + $0x6b0] sm:$0xff]   ;;  %v9408_v57 = vld [vmem:[%s9885_s24 + $0x6e8] sm:$0xff]  }
 0x95b   : > { %5649 = vmatpush1.bf16.msra.mxu1 %v9360_v63  ;;  %v5009_v11 = vpack.c.bf16 %v5001_v13, %v4997_v21  ;;  %5597 = vmatprep.subr.bf16.mxu0 %v9365_v61  ;;  %v9401_v5 = vld [vmem:[%s9885_s24 + $0x638] sm:$0xff]   ;;  %v9409_v47 = vld [vmem:[%s9885_s24 + $0x628] sm:$0xff]   ;;  %v9411_v56 = vld [vmem:[%s9885_s24 + $0x660] sm:$0xff]  }
 0x95c   : > { %5315 = vmatprep.mubr.bf16.mxu0 %v5007_v0  ;;  %5650 = vmatprep.subr.bf16.mxu1 %v9368_v49  ;;  %v9402_v28 = vld [vmem:[%s9885_s24 + $0x6b8] sm:$0xff]   ;;  %v9410_v58 = vld [vmem:[%s9885_s24 + $0x6a8] sm:$0xff]   ;;  %v9412_v38 = vld [vmem:[%s9885_s24 + $0x6e0] sm:$0xff]  }
 0x95d   : > { %5364 = vmatprep.mubr.bf16.mxu1 %v5009_v11  ;;  %5316 = vmatmul.mubr.bf16.gmra.mxu0 %v5006_v62  ;;  %v9413_v16 = vld [vmem:[%s9885_s24 + $0x620] sm:$0xff]   ;;  %v9415_v6 = vld [vmem:[%s9885_s24 + $0x658] sm:$0xff]   ;;  %v9419_v61 = vld [vmem:[%s9885_s24 + $0x650] sm:$0xff]  }
 0x95e   : > { %5365 = vmatmul.mubr.bf16.gmra.mxu1 %v5008_v53  ;;  %5598 = vmatpush1.bf16.msra.mxu0 %v9363_v59  ;;  %v9414_v2 = vld [vmem:[%s9885_s24 + $0x6a0] sm:$0xff]   ;;  %v9416_v39 = vld [vmem:[%s9885_s24 + $0x6d8] sm:$0xff]   ;;  %v9420_v37 = vld [vmem:[%s9885_s24 + $0x6d0] sm:$0xff]  }
 0x95f   : > { %5651 = vmatpush1.bf16.msra.mxu1 %v9366_v31  ;;  %5599 = vmatprep.subr.bf16.mxu0 %v9371_v1  ;;  %v9417_v55 = vld [vmem:[%s9885_s24 + $0x618] sm:$0xff]   ;;  %v9421_v12 = vld [vmem:[%s9885_s24 + $0x610] sm:$0xff]   ;;  %v9423_v49 = vld [vmem:[%s9885_s24 + $0x648] sm:$0xff]  }
 0x960   : > { %5652 = vmatprep.subr.bf16.mxu1 %v9374_v41  ;;  %5625 = vmatprep.mubr.bf16.mxu0 %v9800_v36  ;;  %v9418_v63 = vld [vmem:[%s9885_s24 + $0x698] sm:$0xff]   ;;  %v9422_v54 = vld [vmem:[%s9885_s24 + $0x690] sm:$0xff]   ;;  %v9424_v3 = vld [vmem:[%s9885_s24 + $0x6c8] sm:$0xff]  }
 0x961   : > { %5678 = vmatprep.mubr.bf16.mxu1 %v9800_v36  ;;  %v9425_v21 = vld [vmem:[%s9885_s24 + $0x608] sm:$0xff]   ;;  %v9427_v19 = vld [vmem:[%s9885_s24 + $0x640] sm:$0xff]  }
 0x962   : > { %5600 = vmatpush1.bf16.msra.mxu0 %v9369_v40  ;;  %v9426_v13 = vld [vmem:[%s9885_s24 + $0x688] sm:$0xff]   ;;  %v9428_v0 = vld [vmem:[%s9885_s24 + $0x6c0] sm:$0xff]  }
 0x963   : > { %5653 = vmatpush1.bf16.msra.mxu1 %v9372_v29  ;;  %5601 = vmatprep.subr.bf16.mxu0 %v9377_v14  ;;  %v9429_v59 = vld [vmem:[%s9885_s24 + $0x600] sm:$0xff]   ;;  %v9436_v62 = vld [vmem:[%s9875_s18 + $0x7ec] ss:$16 sps:$4 sm:$0xff]  }
 0x964   : > { %5654 = vmatprep.subr.bf16.mxu1 %v9380_v20  ;;  %v9430_v11 = vld [vmem:[%s9885_s24 + $0x680] sm:$0xff]  }
 0x965   : > { %v9433_v31 = vld [vmem:[%s9875_s18 + $0x7e4] ss:$16 sps:$4 sm:$0xff]  }
 0x966   : > { %5602 = vmatpush1.bf16.msra.mxu0 %v9375_v32  ;;  %v7952_v41 = vld [vmem:[%s9890_s27 + $0x5] ss:$0 sm:$0xff] }
 0x967   : > { %5655 = vmatpush1.bf16.msra.mxu1 %v9378_v24  ;;  %5603 = vmatprep.subr.bf16.mxu0 %v9383_v22 }
 0x968   : > { %5656 = vmatprep.subr.bf16.mxu1 %v9386_v52 }
 0x96a   : > { %5604 = vmatpush1.bf16.msra.mxu0 %v9381_v60 }
 0x96b   : > { %5657 = vmatpush1.bf16.msra.mxu1 %v9384_v18  ;;  %5605 = vmatprep.subr.bf16.mxu0 %v9389_v51 }
 0x96c   : > { %5658 = vmatprep.subr.bf16.mxu1 %v9392_v7 }
 0x96e   : > { %5606 = vmatpush1.bf16.msra.mxu0 %v9387_v15 }
 0x96f   : > { %5659 = vmatpush1.bf16.msra.mxu1 %v9390_v17  ;;  %5607 = vmatprep.subr.bf16.mxu0 %v9395_v50 }
 0x970   : > { %5660 = vmatprep.subr.bf16.mxu1 %v9398_v27 }
 0x972   : > { %5608 = vmatpush1.bf16.msra.mxu0 %v9393_v4 }
 0x973   : > { %5661 = vmatpush1.bf16.msra.mxu1 %v9396_v46  ;;  %8679 = vmatprep.subr.bf16.mxu0 %v9399_v33 }
 0x974   : > { %8707 = vmatprep.subr.bf16.mxu1 %v9400_v23 }
 0x975   : > { %5626 = vmatmul.mubr.bf16.vlgmr.msra.gmra.mxu0 %v10706_v10 }
 0x976   : > { %5679 = vmatmul.mubr.bf16.vlgmr.msra.gmra.mxu1 %v10706_v10  ;;  %5635 = vmatprep.mubr.bf16.mxu0 %v9800_v36  ;;  %v9403_v10 = vld [vmem:[%s9885_s24 + $0x670] sm:$0xff]  }
 0x977   : > { %5688 = vmatprep.mubr.bf16.mxu1 %v9800_v36  ;;  %8680 = vmatpush3.bf16.msra.mxu0 %v9401_v5 }
 0x978   : > { %8708 = vmatpush3.bf16.msra.mxu1 %v9402_v28  ;;  %8681 = vmatprep.subr.bf16.mxu0 %v9403_v10 }
 0x979   : > { %8709 = vmatprep.subr.bf16.mxu1 %v9404_v34 }
 0x97b   : > { %8682 = vmatpush3.bf16.msra.mxu0 %v9405_v30 }
 0x97c   : > { %8710 = vmatpush3.bf16.msra.mxu1 %v9406_v48 }
 0x97d   : > { %5636 = vmatmul.mubr.bf16.gmra.mxu0 %v10712_v25  ;;  %8711 = vmatprep.subr.bf16.mxu1 %v9408_v57 }
 0x97e   : > { %5689 = vmatmul.mubr.bf16.gmra.mxu1 %v10712_v25  ;;  %v9407_v25 = vld [vmem:[%s9885_s24 + $0x668] sm:$0xff]  }
 0x97f   : > { %8683 = vmatprep.subr.bf16.mxu0 %v9407_v25 }
 0x980   : > { %8684 = vmatpush3.bf16.msra.mxu0 %v9409_v47  ;;  %8712 = vmatpush3.bf16.msra.mxu1 %v9410_v58 }
 0x981   : > { %8685 = vmatprep.subr.bf16.mxu0 %v9411_v56  ;;  %8713 = vmatprep.subr.bf16.mxu1 %v9412_v38 }
 0x984   : > { %8686 = vmatpush3.bf16.msra.mxu0 %v9413_v16  ;;  %8714 = vmatpush3.bf16.msra.mxu1 %v9414_v2  ;;  %v8017_v2 = vld [vmem:[%s9880_s21 + $0x18] sm:$0xf] }
 0x985   : > { %8687 = vmatprep.subr.bf16.mxu0 %v9415_v6  ;;  %8715 = vmatprep.subr.bf16.mxu1 %v9416_v39  ;;  %v5416_v6 = vrot.slane %v8017_v2, %v10013_v42  ;;  %v5420_v39 = vrot.slane %v8017_v2, %v10017_v44 }
 0x988   : > { %8688 = vmatpush3.bf16.msra.mxu0 %v9417_v55  ;;  %8716 = vmatpush3.bf16.msra.mxu1 %v9418_v63  ;;  %v5428_v63 = vrot.slane %v8017_v2, %v10019_v45 }
 0x989   : > { %8689 = vmatprep.subr.bf16.mxu0 %v9419_v61  ;;  %8717 = vmatprep.subr.bf16.mxu1 %v9420_v37 }
 0x98c   : > { %8690 = vmatpush3.bf16.msra.mxu0 %v9421_v12  ;;  %8718 = vmatpush3.bf16.msra.mxu1 %v9422_v54 }
 0x98d   : > { %8691 = vmatprep.subr.bf16.mxu0 %v9423_v49  ;;  %8719 = vmatprep.subr.bf16.mxu1 %v9424_v3 }
 0x990   : > { %8692 = vmatpush3.bf16.msra.mxu0 %v9425_v21  ;;  %8720 = vmatpush3.bf16.msra.mxu1 %v9426_v13 }
 0x991   : > { %8693 = vmatprep.subr.bf16.mxu0 %v9427_v19  ;;  %8721 = vmatprep.subr.bf16.mxu1 %v9428_v0 }
 0x994   : > { %8694 = vmatpush3.bf16.msra.mxu0 %v9429_v59  ;;  %8722 = vmatpush3.bf16.msra.mxu1 %v9430_v11 }
 0x995   : > { %6370 = vmatprep.subr.bf16.mxu0 %v9433_v31  ;;  %6423 = vmatprep.subr.bf16.mxu1 %v9436_v62 }
 0xa15   : > { %v8639_v1 = vpop.f32.mrf.mxu0 }
 0xa16   : > { %v8667_v53 = vpop.f32.mrf.mxu1 }
 0xa17   : > { %v8640_v40 = vpop.f32.mrf.mxu0 }
 0xa18   : > { %v8641_v29 = vadd.f32 %v8640_v40, %v8639_v1  ;;  %v8668_v14 = vpop.f32.mrf.mxu1 }
 0xa19   : > { %v8669_v20 = vadd.f32 %v8668_v14, %v8667_v53  ;;  %v8642_v32 = vpop.f32.mrf.mxu0 }
 0xa1a   : > { %v5310_v24 = vadd.f32 %v8641_v29, %v7952_v41  ;;  %v8670_v22 = vpop.f32.mrf.mxu1 }
 0xa1b   : > { %v8643_v52 = vpop.f32.mrf.mxu0 }
 0xa1c   : > { %v5359_v60 = vadd.f32 %v8669_v20, %v5310_v24  ;;  %v8644_v18 = vadd.f32 %v8643_v52, %v8642_v32  ;;  %v8671_v51 = vpop.f32.mrf.mxu1 }
 0xa1d   : > { %v8672_v7 = vadd.f32 %v8671_v51, %v8670_v22  ;;  %v8645_v15 = vpop.f32.mrf.mxu0 }
 0xa1e   : > { %v10898_v17 = vadd.f32 %v5359_v60, %v10752_v35  ;;  %v5313_v50 = vadd.f32 %v8644_v18, %v7952_v41  ;;  %v8673_v27 = vpop.f32.mrf.mxu1 }
 0xa1f   : > { %v8646_v4 = vpop.f32.mrf.mxu0 }
 0xa20   : > { %v5362_v46 = vadd.f32 %v8672_v7, %v5313_v50  ;;  %v8647_v33 = vadd.f32 %v8646_v4, %v8645_v15  ;;  %v8674_v23 = vpop.f32.mrf.mxu1 }
 0xa21   : > { %v8675_v5 = vadd.f32 %v8674_v23, %v8673_v27  ;;  %v8648_v28 = vpop.f32.mrf.mxu0 }
 0xa22   : > { %v10901_v10 = vadd.f32 %v5362_v46, %v10755_v9  ;;  %v5318_v34 = vadd.f32 %v8647_v33, %v7952_v41  ;;  %v8676_v30 = vpop.f32.mrf.mxu1  ;;  %v5424_v9 = vrot.slane %v8017_v2, %v10015_v43 }
 0xa23   : > { %v8649_v48 = vpop.f32.mrf.mxu0 }
 0xa24   : > { %v5367_v25 = vadd.f32 %v8675_v5, %v5318_v34  ;;  %v8650_v57 = vadd.f32 %v8649_v48, %v8648_v28  ;;  %v8677_v47 = vpop.f32.mrf.mxu1 }
 0xa25   : > { %v8678_v35 = vadd.f32 %v8677_v47, %v8676_v30 }
 0xa26   : > { %v10904_v58 = vadd.f32 %v5367_v25, %v10758_v8  ;;  %v5321_v56 = vadd.f32 %v8650_v57, %v7952_v41 }
 0xa28   : > { %v5370_v38 = vadd.f32 %v8678_v35, %v5321_v56 }
 0xa2a   : > { %v10907_v16 = vadd.f32 %v5370_v38, %v10761_v26 }
 0xa35   : > { %v5627_v55 = vpop.f32.mrf.mxu0 }
 0xa36   : > { %v10914_v61 = vadd.f32 %v5627_v55, %v5416_v6  ;;  %v5680_v37 = vpop.f32.mrf.mxu1 }
 0xa37   : > { %v10916_v8 = vadd.f32 %v5680_v37, %v5424_v9  ;;  %v5629_v12 = vpop.f32.mrf.mxu0 }
 0xa38   : > { %v5715_v54 = vmul.f32 0.70710677, %v10914_v61  ;;  %v10919_v26 = vadd.f32 %v5629_v12, %v5420_v39  ;;  %v5682_v49 = vpop.f32.mrf.mxu1  ;;  %v5699_v55 = vmul.f32 0.5, %v10914_v61 }
 0xa39   : > { %v5717_v3 = vmul.f32 0.70710677, %v10916_v8  ;;  %v10922_v21 = vadd.f32 %v5682_v49, %v5428_v63  ;;  %v5631_v13 = vpop.f32.mrf.mxu0 }
 0xa3a   : > { %9703 = verf.f32 %v5715_v54  ;;  %v5716_v19 = vmul.f32 0.70710677, %v10919_v26  ;;  %v10925_v0 = vadd.f32 %v5631_v13, %v5416_v6  ;;  %v5684_v59 = vpop.f32.mrf.mxu1  ;;  %v5700_v37 = vmul.f32 0.5, %v10919_v26 }
 0xa3b   : > { %9705 = verf.f32 %v5717_v3  ;;  %v5718_v11 = vmul.f32 0.70710677, %v10922_v21  ;;  %v10928_v31 = vadd.f32 %v5684_v59, %v5424_v9  ;;  %v5633_v62 = vpop.f32.mrf.mxu0 }
 0xa3c   : > { %9707 = verf.f32 %v5716_v19  ;;  %v5719_v1 = vmul.f32 0.70710677, %v10925_v0  ;;  %v5634_v53 = vadd.f32 %v5633_v62, %v5420_v39  ;;  %v5686_v41 = vpop.f32.mrf.mxu1  ;;  %v5703_v13 = vmul.f32 0.5, %v10925_v0 }
 0xa3d   : > { %9709 = verf.f32 %v5718_v11  ;;  %v5721_v40 = vmul.f32 0.70710677, %v10928_v31  ;;  %v5687_v29 = vadd.f32 %v5686_v41, %v5428_v63  ;;  %v5637_v14 = vpop.f32.mrf.mxu0  ;;  %v5705_v62 = vmul.f32 0.5, %v10928_v31 }
 0xa3e   : > { %9711 = verf.f32 %v5719_v1  ;;  %v5720_v20 = vmul.f32 0.70710677, %v5634_v53  ;;  %v10932_v32 = vadd.f32 %v5637_v14, %v5416_v6  ;;  %v5690_v24 = vpop.f32.mrf.mxu1  ;;  %v5704_v1 = vmul.f32 0.5, %v5634_v53 }
 0xa3f   : > { %9713 = verf.f32 %v5721_v40  ;;  %v5722_v22 = vmul.f32 0.70710677, %v5687_v29  ;;  %v10934_v52 = vadd.f32 %v5690_v24, %v5424_v9  ;;  %v5639_v60 = vpop.f32.mrf.mxu0  ;;  %v5702_v14 = vmul.f32 0.5, %v10922_v21 }
 0xa40   : > { %9715 = verf.f32 %v5720_v20  ;;  %v5723_v18 = vmul.f32 0.70710677, %v10932_v32  ;;  %v10937_v51 = vadd.f32 %v5639_v60, %v5420_v39  ;;  %v5692_v7 = vpop.f32.mrf.mxu1  ;;  %v5706_v26 = vmul.f32 0.5, %v5687_v29  ;;  %v9431_v29 = vld [vmem:[%s9875_s18 + $0x7e0] ss:$16 sps:$4 sm:$0xff]  }
 0xa41   : > { %9717 = verf.f32 %v5722_v22  ;;  %v5725_v15 = vmul.f32 0.70710677, %v10934_v52  ;;  %v10940_v50 = vadd.f32 %v5692_v7, %v5428_v63  ;;  %v5641_v27 = vpop.f32.mrf.mxu0  ;;  %v5701_v22 = vmul.f32 0.5, %v10916_v8 }
 0xa42   : > { %9719 = verf.f32 %v5723_v18  ;;  %v5724_v4 = vmul.f32 0.70710677, %v10937_v51  ;;  %v10943_v46 = vadd.f32 %v5641_v27, %v5416_v6  ;;  %v5694_v33 = vpop.f32.mrf.mxu1  ;;  %v5707_v21 = vmul.f32 0.5, %v10932_v32  ;;  %v9442_v32 = vld [vmem:[%s9875_s18 + $0x7cc] ss:$16 sps:$4 sm:$0xff]  }
 0xa43   : > { %9721 = verf.f32 %v5725_v15  ;;  %v5726_v23 = vmul.f32 0.70710677, %v10940_v50  ;;  %v10946_v5 = vadd.f32 %v5694_v33, %v5424_v9  ;;  %v5643_v28 = vpop.f32.mrf.mxu0  ;;  %v5709_v8 = vmul.f32 0.5, %v10934_v52 }
 0xa44   : > { %9723 = verf.f32 %v5724_v4  ;;  %v5727_v34 = vmul.f32 0.70710677, %v10943_v46  ;;  %v10949_v30 = vadd.f32 %v5643_v28, %v5420_v39  ;;  %v5696_v48 = vpop.f32.mrf.mxu1 }
 0xa45   : > { %9725 = verf.f32 %v5726_v23  ;;  %v5729_v25 = vmul.f32 0.70710677, %v10946_v5  ;;  %v10952_v57 = vadd.f32 %v5696_v48, %v5428_v63 }
 0xa46   : > { %9727 = verf.f32 %v5727_v34  ;;  %v5728_v47 = vmul.f32 0.70710677, %v10949_v30  ;;  %v5708_v34 = vmul.f32 0.5, %v10937_v51 }
 0xa47   : > { %v9704_v35 = vpop.eup %9703  ;;  %9729 = verf.f32 %v5729_v25  ;;  %v5730_v56 = vmul.f32 0.70710677, %v10952_v57  ;;  %v9434_v25 = vld [vmem:[%s9875_s18 + $0x7e8] ss:$16 sps:$4 sm:$0xff]  }
 0xa48   : > { %v9706_v38 = vpop.eup %9705  ;;  %9731 = verf.f32 %v5728_v47  ;;  %v5747_v49 = vadd.f32 1.0, %v9704_v35  ;;  %v9439_v47 = vld [vmem:[%s9875_s18 + $0x7c4] ss:$16 sps:$4 sm:$0xff]  }
 0xa49   : > { %v9708_v2 = vpop.eup %9707  ;;  %9733 = verf.f32 %v5730_v56  ;;  %v5749_v11 = vadd.f32 1.0, %v9706_v38 }
 0xa4a   : > { %v9710_v6 = vpop.eup %9709  ;;  %v5748_v63 = vadd.f32 1.0, %v9708_v2  ;;  %v5763_v15 = vmul.f32 %v5747_v49, %v5699_v55  ;;  %v5710_v2 = vmul.f32 0.5, %v10940_v50  ;;  %v5712_v50 = vmul.f32 0.5, %v10949_v30  ;;  %v9437_v49 = vld [vmem:[%s9875_s18 + $0x7c0] ss:$16 sps:$4 sm:$0xff]  }
 0xa4b   : > { %v9712_v9 = vpop.eup %9711  ;;  %v5750_v3 = vadd.f32 1.0, %v9710_v6  ;;  %v5765_v4 = vmul.f32 %v5749_v11, %v5701_v22  ;;  %v9448_v30 = vld [vmem:[%s9875_s18 + $0x7ac] ss:$16 sps:$4 sm:$0xff]   ;;  %v9451_v22 = vld [vmem:[%s9875_s18 + $0x784] ss:$16 sps:$4 sm:$0xff]  }
 0xa4c   : > { %v9714_v39 = vpop.eup %9713  ;;  %v5751_v12 = vadd.f32 1.0, %v9712_v9  ;;  %v5764_v60 = vmul.f32 %v5748_v63, %v5700_v37  ;;  %v5711_v37 = vmul.f32 0.5, %v10943_v46 }
 0xa4d   : > { %v9716_v54 = vpop.eup %9715  ;;  %v5753_v19 = vadd.f32 1.0, %v9714_v39  ;;  %v5766_v31 = vmul.f32 %v5750_v3, %v5702_v14 }
 0xa4e   : > { %v9718_v59 = vpop.eup %9717  ;;  %v5752_v41 = vadd.f32 1.0, %v9716_v54  ;;  %v5767_v61 = vmul.f32 %v5751_v12, %v5703_v13  ;;  %v5713_v12 = vmul.f32 0.5, %v10946_v5  ;;  %v5714_v13 = vmul.f32 0.5, %v10952_v57 }
 0xa4f   : > { %v9720_v40 = vpop.eup %9719  ;;  %v5754_v20 = vadd.f32 1.0, %v9718_v59  ;;  %v5769_v18 = vmul.f32 %v5753_v19, %v5705_v62  ;;  %v9440_v19 = vld [vmem:[%s9875_s18 + $0x7c8] ss:$16 sps:$4 sm:$0xff]   ;;  %v9445_v59 = vld [vmem:[%s9875_s18 + $0x7a4] ss:$16 sps:$4 sm:$0xff]  }
 0xa50   : > { %v9722_v24 = vpop.eup %9721  ;;  %v5768_v0 = vmul.f32 %v5752_v41, %v5704_v1  ;;  %v5779_v28 = vpack.c.bf16 %v5767_v61, %v5763_v15  ;;  %v5755_v39 = vadd.f32 1.0, %v9720_v40  ;;  %v9443_v61 = vld [vmem:[%s9875_s18 + $0x7a0] ss:$16 sps:$4 sm:$0xff]   ;;  %v9457_v15 = vld [vmem:[%s9875_s18 + $0x764] ss:$16 sps:$4 sm:$0xff]  }
 0xa51   : > { %v9724_v7 = vpop.eup %9723  ;;  %v5770_v53 = vmul.f32 %v5754_v20, %v5706_v26  ;;  %v5781_v56 = vpack.c.bf16 %v5769_v18, %v5765_v4  ;;  %v5757_v63 = vadd.f32 1.0, %v9722_v24  ;;  %v9446_v20 = vld [vmem:[%s9875_s18 + $0x7a8] ss:$16 sps:$4 sm:$0xff]   ;;  %v9454_v18 = vld [vmem:[%s9875_s18 + $0x78c] ss:$16 sps:$4 sm:$0xff]  }
 0xa52   : > { %v9726_v27 = vpop.eup %9725  ;;  %v5780_v33 = vpack.c.bf16 %v5768_v0, %v5764_v60  ;;  %v5756_v38 = vadd.f32 1.0, %v9724_v7  ;;  %v5771_v1 = vmul.f32 %v5755_v39, %v5707_v21  ;;  %v9449_v0 = vld [vmem:[%s9875_s18 + $0x780] ss:$16 sps:$4 sm:$0xff]   ;;  %v9452_v7 = vld [vmem:[%s9875_s18 + $0x788] ss:$16 sps:$4 sm:$0xff]  }
 0xa53   : > { %v9728_v23 = vpop.eup %9727  ;;  %v5782_v48 = vpack.c.bf16 %v5770_v53, %v5766_v31  ;;  %v5758_v55 = vadd.f32 1.0, %v9726_v27  ;;  %v5773_v14 = vmul.f32 %v5757_v63, %v5709_v8  ;;  %v9460_v31 = vld [vmem:[%s9875_s18 + $0x76c] ss:$16 sps:$4 sm:$0xff]   ;;  %v9455_v53 = vld [vmem:[%s9875_s18 + $0x760] ss:$16 sps:$4 sm:$0xff]  }
 0xa54   : > { %v9730_v35 = vpop.eup %9729  ;;  %v5759_v6 = vadd.f32 1.0, %v9728_v23  ;;  %6084 = vmatprep.mubr.bf16.mxu0 %v5780_v33  ;;  %v5772_v11 = vmul.f32 %v5756_v38, %v5708_v34  ;;  %v9458_v27 = vld [vmem:[%s9875_s18 + $0x768] ss:$16 sps:$4 sm:$0xff]   ;;  %v9463_v4 = vld [vmem:[%s9875_s18 + $0x744] ss:$16 sps:$4 sm:$0xff]  }
 0xa55   : > { %v9732_v9 = vpop.eup %9731  ;;  %v5761_v52 = vadd.f32 1.0, %v9730_v35  ;;  %6133 = vmatprep.mubr.bf16.mxu1 %v5782_v48  ;;  %6085 = vmatmul.mubr.bf16.vlgmr.msra.gmra.mxu0 %v5779_v28  ;;  %v5774_v41 = vmul.f32 %v5758_v55, %v5710_v2  ;;  %v9466_v21 = vld [vmem:[%s9875_s18 + $0x74c] ss:$16 sps:$4 sm:$0xff]   ;;  %v9461_v33 = vld [vmem:[%s9875_s18 + $0x740] ss:$16 sps:$4 sm:$0xff]  }
 0xa56   : > { %v9734_v51 = vpop.eup %9733  ;;  %v5760_v54 = vadd.f32 1.0, %v9732_v9  ;;  %6134 = vmatmul.mubr.bf16.vlgmr.msra.gmra.mxu1 %v5781_v56  ;;  %6371 = vmatpush1.bf16.msra.mxu0 %v9431_v29  ;;  %v5775_v3 = vmul.f32 %v5759_v6, %v5711_v37  ;;  %v9464_v29 = vld [vmem:[%s9875_s18 + $0x748] ss:$16 sps:$4 sm:$0xff]   ;;  %v9469_v23 = vld [vmem:[%s9875_s18 + $0x724] ss:$16 sps:$4 sm:$0xff]  }
 0xa57   : > { %v5762_v46 = vadd.f32 1.0, %v9734_v51  ;;  %6424 = vmatpush1.bf16.msra.mxu1 %v9434_v25  ;;  %6372 = vmatprep.subr.bf16.mxu0 %v9439_v47  ;;  %v5777_v62 = vmul.f32 %v5761_v52, %v5713_v12  ;;  %v9472_v28 = vld [vmem:[%s9875_s18 + $0x72c] ss:$16 sps:$4 sm:$0xff]   ;;  %v9467_v8 = vld [vmem:[%s9875_s18 + $0x720] ss:$16 sps:$4 sm:$0xff]  }
 0xa58   : > { %v5776_v5 = vmul.f32 %v5760_v54, %v5712_v50  ;;  %6425 = vmatprep.subr.bf16.mxu1 %v9442_v32  ;;  %v5783_v24 = vpack.c.bf16 %v5775_v3, %v5771_v1  ;;  %v9470_v34 = vld [vmem:[%s9875_s18 + $0x728] ss:$16 sps:$4 sm:$0xff]   ;;  %v9475_v48 = vld [vmem:[%s9875_s18 + $0x704] ss:$16 sps:$4 sm:$0xff]   ;;  %v9478_v25 = vld [vmem:[%s9875_s18 + $0x70c] ss:$16 sps:$4 sm:$0xff]  }
 0xa59   : > { %v5778_v40 = vmul.f32 %v5762_v46, %v5714_v13  ;;  %v5785_v60 = vpack.c.bf16 %v5777_v62, %v5773_v14  ;;  %v9473_v47 = vld [vmem:[%s9875_s18 + $0x700] ss:$16 sps:$4 sm:$0xff]   ;;  %v9476_v35 = vld [vmem:[%s9875_s18 + $0x708] ss:$16 sps:$4 sm:$0xff]  }
 0xa5a   : > { %6373 = vmatpush1.bf16.msra.mxu0 %v9437_v49  ;;  %v5784_v57 = vpack.c.bf16 %v5776_v5, %v5772_v11  ;;  %v9773_v56 = vld [vmem:[#allocation2] sm:$0xff]   ;;  %v9774_v38 = vld [vmem:[#allocation2 + $0x8] sm:$0xff]   ;;  %v9479_v2 = vld [vmem:[%s9885_s24 + $0x778] sm:$0xff]  }
 0xa5b   : > { %6426 = vmatpush1.bf16.msra.mxu1 %v9440_v19  ;;  %v5786_v26 = vpack.c.bf16 %v5778_v40, %v5774_v41  ;;  %6374 = vmatprep.subr.bf16.mxu0 %v9445_v59  ;;  %v9480_v6 = vld [vmem:[%s9885_s24 + $0x7f8] sm:$0xff]   ;;  %v9483_v39 = vld [vmem:[%s9885_s24 + $0x770] sm:$0xff]   ;;  %v9487_v52 = vld [vmem:[%s9885_s24 + $0x768] sm:$0xff]  }
 0xa5c   : > { %6092 = vmatprep.mubr.bf16.mxu0 %v5784_v57  ;;  %6427 = vmatprep.subr.bf16.mxu1 %v9448_v30  ;;  %v9481_v32 = vld [vmem:[%s9885_s24 + $0x738] sm:$0xff]   ;;  %v9484_v55 = vld [vmem:[%s9885_s24 + $0x7f0] sm:$0xff]   ;;  %v9488_v51 = vld [vmem:[%s9885_s24 + $0x7e8] sm:$0xff]  }
 0xa5d   : > { %6141 = vmatprep.mubr.bf16.mxu1 %v5786_v26  ;;  %6093 = vmatmul.mubr.bf16.gmra.mxu0 %v5783_v24  ;;  %v9482_v9 = vld [vmem:[%s9885_s24 + $0x7b8] sm:$0xff]   ;;  %v9486_v37 = vld [vmem:[%s9885_s24 + $0x7b0] sm:$0xff]   ;;  %v9489_v63 = vld [vmem:[%s9885_s24 + $0x728] sm:$0xff]  }
 0xa5e   : > { %6142 = vmatmul.mubr.bf16.gmra.mxu1 %v5785_v60  ;;  %6375 = vmatpush1.bf16.msra.mxu0 %v9443_v61  ;;  %v9490_v12 = vld [vmem:[%s9885_s24 + $0x7a8] sm:$0xff]   ;;  %v9491_v50 = vld [vmem:[%s9885_s24 + $0x760] sm:$0xff]   ;;  %v9495_v13 = vld [vmem:[%s9885_s24 + $0x758] sm:$0xff]  }
 0xa5f   : > { %6428 = vmatpush1.bf16.msra.mxu1 %v9446_v20  ;;  %6376 = vmatprep.subr.bf16.mxu0 %v9451_v22  ;;  %v9492_v54 = vld [vmem:[%s9885_s24 + $0x7e0] sm:$0xff]   ;;  %v9496_v46 = vld [vmem:[%s9885_s24 + $0x7d8] sm:$0xff]   ;;  %v9499_v11 = vld [vmem:[%s9885_s24 + $0x750] sm:$0xff]  }
 0xa60   : > { %6429 = vmatprep.subr.bf16.mxu1 %v9454_v18  ;;  %6402 = vmatprep.mubr.bf16.mxu0 %v9800_v36  ;;  %v9493_v49 = vld [vmem:[%s9885_s24 + $0x720] sm:$0xff]   ;;  %v9497_v19 = vld [vmem:[%s9885_s24 + $0x718] sm:$0xff]   ;;  %v9500_v62 = vld [vmem:[%s9885_s24 + $0x7d0] sm:$0xff]  }
 0xa61   : > { %6455 = vmatprep.mubr.bf16.mxu1 %v9800_v36  ;;  %v9494_v3 = vld [vmem:[%s9885_s24 + $0x7a0] sm:$0xff]   ;;  %v9498_v59 = vld [vmem:[%s9885_s24 + $0x798] sm:$0xff]   ;;  %v9501_v5 = vld [vmem:[%s9885_s24 + $0x710] sm:$0xff]  }
 0xa62   : > { %6377 = vmatpush1.bf16.msra.mxu0 %v9449_v0  ;;  %v9502_v30 = vld [vmem:[%s9885_s24 + $0x790] sm:$0xff]   ;;  %v9503_v1 = vld [vmem:[%s9885_s24 + $0x748] sm:$0xff]   ;;  %v9507_v57 = vld [vmem:[%s9885_s24 + $0x740] sm:$0xff]  }
 0xa63   : > { %6430 = vmatpush1.bf16.msra.mxu1 %v9452_v7  ;;  %6378 = vmatprep.subr.bf16.mxu0 %v9457_v15  ;;  %v9504_v41 = vld [vmem:[%s9885_s24 + $0x7c8] sm:$0xff]   ;;  %v9508_v61 = vld [vmem:[%s9885_s24 + $0x7c0] sm:$0xff]  }
 0xa64   : > { %6431 = vmatprep.subr.bf16.mxu1 %v9460_v31  ;;  %v9505_v40 = vld [vmem:[%s9885_s24 + $0x708] sm:$0xff]   ;;  %v9509_v26 = vld [vmem:[%s9885_s24 + $0x700] sm:$0xff]  }
 0xa65   : > { %v9506_v14 = vld [vmem:[%s9885_s24 + $0x788] sm:$0xff]   ;;  %v9510_v20 = vld [vmem:[%s9885_s24 + $0x780] sm:$0xff]  }
 0xa66   : > { %6379 = vmatpush1.bf16.msra.mxu0 %v9455_v53  ;;  %v8115_v60 = vld [vmem:[%s9890_s27 + $0x6] ss:$0 sm:$0xff] }
 0xa67   : > { %6432 = vmatpush1.bf16.msra.mxu1 %v9458_v27  ;;  %6380 = vmatprep.subr.bf16.mxu0 %v9463_v4 }
 0xa68   : > { %6433 = vmatprep.subr.bf16.mxu1 %v9466_v21 }
 0xa6a   : > { %6381 = vmatpush1.bf16.msra.mxu0 %v9461_v33 }
 0xa6b   : > { %6434 = vmatpush1.bf16.msra.mxu1 %v9464_v29  ;;  %6382 = vmatprep.subr.bf16.mxu0 %v9469_v23 }
 0xa6c   : > { %6435 = vmatprep.subr.bf16.mxu1 %v9472_v28 }
 0xa6e   : > { %6383 = vmatpush1.bf16.msra.mxu0 %v9467_v8 }
 0xa6f   : > { %6436 = vmatpush1.bf16.msra.mxu1 %v9470_v34  ;;  %6384 = vmatprep.subr.bf16.mxu0 %v9475_v48 }
 0xa70   : > { %6437 = vmatprep.subr.bf16.mxu1 %v9478_v25 }
 0xa72   : > { %6385 = vmatpush1.bf16.msra.mxu0 %v9473_v47 }
 0xa73   : > { %6438 = vmatpush1.bf16.msra.mxu1 %v9476_v35  ;;  %8735 = vmatprep.subr.bf16.mxu0 %v9479_v2 }
 0xa74   : > { %8763 = vmatprep.subr.bf16.mxu1 %v9480_v6 }
 0xa75   : > { %6403 = vmatmul.mubr.bf16.vlgmr.msra.gmra.mxu0 %v9773_v56 }
 0xa76   : > { %6456 = vmatmul.mubr.bf16.vlgmr.msra.gmra.mxu1 %v9773_v56  ;;  %6412 = vmatprep.mubr.bf16.mxu0 %v9800_v36 }
 0xa77   : > { %6465 = vmatprep.mubr.bf16.mxu1 %v9800_v36  ;;  %8736 = vmatpush3.bf16.msra.mxu0 %v9481_v32  ;;  %v9485_v36 = vld [vmem:[%s9885_s24 + $0x730] sm:$0xff]  }
 0xa78   : > { %8764 = vmatpush3.bf16.msra.mxu1 %v9482_v9  ;;  %8737 = vmatprep.subr.bf16.mxu0 %v9483_v39 }
 0xa79   : > { %8765 = vmatprep.subr.bf16.mxu1 %v9484_v55 }
 0xa7b   : > { %8738 = vmatpush3.bf16.msra.mxu0 %v9485_v36 }
 0xa7c   : > { %8766 = vmatpush3.bf16.msra.mxu1 %v9486_v37  ;;  %8739 = vmatprep.subr.bf16.mxu0 %v9487_v52 }
 0xa7d   : > { %6413 = vmatmul.mubr.bf16.gmra.mxu0 %v9774_v38  ;;  %8767 = vmatprep.subr.bf16.mxu1 %v9488_v51 }
 0xa7e   : > { %6466 = vmatmul.mubr.bf16.gmra.mxu1 %v9774_v38 }
 0xa7f   : > { %8740 = vmatpush3.bf16.msra.mxu0 %v9489_v63 }
 0xa80   : > { %8768 = vmatpush3.bf16.msra.mxu1 %v9490_v12  ;;  %8741 = vmatprep.subr.bf16.mxu0 %v9491_v50  ;;  %v8180_v50 = vld [vmem:[%s9880_s21 + $0x1c] sm:$0xf] }
 0xa81   : > { %8769 = vmatprep.subr.bf16.mxu1 %v9492_v54  ;;  %v6193_v54 = vrot.slane %v8180_v50, %v10013_v42 }
 0xa83   : > { %8742 = vmatpush3.bf16.msra.mxu0 %v9493_v49  ;;  %v6197_v49 = vrot.slane %v8180_v50, %v10017_v44 }
 0xa84   : > { %8770 = vmatpush3.bf16.msra.mxu1 %v9494_v3  ;;  %8743 = vmatprep.subr.bf16.mxu0 %v9495_v13  ;;  %v6205_v13 = vrot.slane %v8180_v50, %v10019_v45 }
 0xa85   : > { %8771 = vmatprep.subr.bf16.mxu1 %v9496_v46 }
 0xa87   : > { %8744 = vmatpush3.bf16.msra.mxu0 %v9497_v19 }
 0xa88   : > { %8772 = vmatpush3.bf16.msra.mxu1 %v9498_v59  ;;  %8745 = vmatprep.subr.bf16.mxu0 %v9499_v11 }
 0xa89   : > { %8773 = vmatprep.subr.bf16.mxu1 %v9500_v62 }
 0xa8b   : > { %8746 = vmatpush3.bf16.msra.mxu0 %v9501_v5 }
 0xa8c   : > { %8774 = vmatpush3.bf16.msra.mxu1 %v9502_v30  ;;  %8747 = vmatprep.subr.bf16.mxu0 %v9503_v1 }
 0xa8d   : > { %8775 = vmatprep.subr.bf16.mxu1 %v9504_v41 }
 0xa8f   : > { %8748 = vmatpush3.bf16.msra.mxu0 %v9505_v40 }
 0xa90   : > { %8776 = vmatpush3.bf16.msra.mxu1 %v9506_v14  ;;  %8749 = vmatprep.subr.bf16.mxu0 %v9507_v57 }
 0xa91   : > { %8777 = vmatprep.subr.bf16.mxu1 %v9508_v61 }
 0xa93   : > { %8750 = vmatpush3.bf16.msra.mxu0 %v9509_v26 }
 0xa94   : > { %8778 = vmatpush3.bf16.msra.mxu1 %v9510_v20 }
 0xb15   : > { %v8695_v24 = vpop.f32.mrf.mxu0 }
 0xb16   : > { %v8723_v22 = vpop.f32.mrf.mxu1 }
 0xb17   : > { %v8696_v18 = vpop.f32.mrf.mxu0 }
 0xb18   : > { %v8697_v0 = vadd.f32 %v8696_v18, %v8695_v24  ;;  %v8724_v7 = vpop.f32.mrf.mxu1 }
 0xb19   : > { %v8725_v15 = vadd.f32 %v8724_v7, %v8723_v22  ;;  %v8698_v31 = vpop.f32.mrf.mxu0 }
 0xb1a   : > { %v6087_v53 = vadd.f32 %v8697_v0, %v8115_v60  ;;  %v8726_v27 = vpop.f32.mrf.mxu1 }
 0xb1b   : > { %v8699_v4 = vpop.f32.mrf.mxu0 }
 0xb1c   : > { %v6136_v21 = vadd.f32 %v8725_v15, %v6087_v53  ;;  %v8700_v33 = vadd.f32 %v8699_v4, %v8698_v31  ;;  %v8727_v29 = vpop.f32.mrf.mxu1 }
 0xb1d   : > { %v8728_v23 = vadd.f32 %v8727_v29, %v8726_v27  ;;  %v8701_v28 = vpop.f32.mrf.mxu0 }
 0xb1e   : > { %v11038_v8 = vadd.f32 %v6136_v21, %v10898_v17  ;;  %v6090_v34 = vadd.f32 %v8700_v33, %v8115_v60  ;;  %v8729_v48 = vpop.f32.mrf.mxu1 }
 0xb1f   : > { %v8702_v25 = vpop.f32.mrf.mxu0 }
 0xb20   : > { %v6139_v47 = vadd.f32 %v8728_v23, %v6090_v34  ;;  %v8703_v35 = vadd.f32 %v8702_v25, %v8701_v28  ;;  %v8730_v56 = vpop.f32.mrf.mxu1 }
 0xb21   : > { %v8731_v38 = vadd.f32 %v8730_v56, %v8729_v48  ;;  %v8704_v2 = vpop.f32.mrf.mxu0 }
 0xb22   : > { %v11041_v6 = vadd.f32 %v6139_v47, %v10901_v10  ;;  %v6095_v32 = vadd.f32 %v8703_v35, %v8115_v60  ;;  %v8732_v9 = vpop.f32.mrf.mxu1  ;;  %v6201_v10 = vrot.slane %v8180_v50, %v10015_v43 }
 0xb23   : > { %v8705_v39 = vpop.f32.mrf.mxu0 }
 0xb24   : > { %v6144_v55 = vadd.f32 %v8731_v38, %v6095_v32  ;;  %v8706_v36 = vadd.f32 %v8705_v39, %v8704_v2  ;;  %v8733_v37 = vpop.f32.mrf.mxu1 }
 0xb25   : > { %v8734_v17 = vadd.f32 %v8733_v37, %v8732_v9 }
 0xb26   : > { %v11044_v52 = vadd.f32 %v6144_v55, %v10904_v58  ;;  %v6098_v51 = vadd.f32 %v8706_v36, %v8115_v60 }
 0xb28   : > { %v6147_v63 = vadd.f32 %v8734_v17, %v6098_v51 }
 0xb2a   : > { %v11047_v12 = vadd.f32 %v6147_v63, %v10907_v16 }
 0xb35   : > { %v6404_v3 = vpop.f32.mrf.mxu0 }
 0xb36   : > { %v11054_v46 = vadd.f32 %v6404_v3, %v6193_v54  ;;  %v6457_v19 = vpop.f32.mrf.mxu1 }
 0xb37   : > { %v11056_v58 = vadd.f32 %v6457_v19, %v6201_v10  ;;  %v6406_v59 = vpop.f32.mrf.mxu0 }
 0xb38   : > { %v6492_v11 = vmul.f32 0.70710677, %v11054_v46  ;;  %v11059_v16 = vadd.f32 %v6406_v59, %v6197_v49  ;;  %v6459_v62 = vpop.f32.mrf.mxu1  ;;  %v6476_v63 = vmul.f32 0.5, %v11054_v46 }
 0xb39   : > { %v6494_v42 = vmul.f32 0.70710677, %v11056_v58  ;;  %v11062_v5 = vadd.f32 %v6459_v62, %v6205_v13  ;;  %v6408_v43 = vpop.f32.mrf.mxu0 }
 0xb3a   : > { %9735 = verf.f32 %v6492_v11  ;;  %v6493_v44 = vmul.f32 0.70710677, %v11059_v16  ;;  %v11065_v45 = vadd.f32 %v6408_v43, %v6193_v54  ;;  %v6461_v30 = vpop.f32.mrf.mxu1  ;;  %v6477_v50 = vmul.f32 0.5, %v11059_v16 }
 0xb3b   : > { %9737 = verf.f32 %v6494_v42  ;;  %v6495_v1 = vmul.f32 0.70710677, %v11062_v5  ;;  %v11068_v41 = vadd.f32 %v6461_v30, %v6201_v10  ;;  %v6410_v40 = vpop.f32.mrf.mxu0 }
 0xb3c   : > { %9739 = verf.f32 %v6493_v44  ;;  %v6496_v14 = vmul.f32 0.70710677, %v11065_v45  ;;  %v6411_v57 = vadd.f32 %v6410_v40, %v6197_v49  ;;  %v6463_v61 = vpop.f32.mrf.mxu1  ;;  %v6480_v19 = vmul.f32 0.5, %v11065_v45 }
 0xb3d   : > { %9741 = verf.f32 %v6495_v1  ;;  %v6498_v26 = vmul.f32 0.70710677, %v11068_v41  ;;  %v6464_v20 = vadd.f32 %v6463_v61, %v6205_v13  ;;  %v6414_v24 = vpop.f32.mrf.mxu0  ;;  %v6482_v42 = vmul.f32 0.5, %v11068_v41 }
 0xb3e   : > { %9743 = verf.f32 %v6496_v14  ;;  %v6497_v22 = vmul.f32 0.70710677, %v6411_v57  ;;  %v11072_v60 = vadd.f32 %v6414_v24, %v6193_v54  ;;  %v6467_v18 = vpop.f32.mrf.mxu1  ;;  %v6481_v43 = vmul.f32 0.5, %v6411_v57 }
 0xb3f   : > { %9745 = verf.f32 %v6498_v26  ;;  %v6499_v0 = vmul.f32 0.70710677, %v6464_v20  ;;  %v11074_v7 = vadd.f32 %v6467_v18, %v6201_v10  ;;  %v6416_v15 = vpop.f32.mrf.mxu0  ;;  %v6479_v1 = vmul.f32 0.5, %v11062_v5 }
 0xb40   : > { %9747 = verf.f32 %v6497_v22  ;;  %v6500_v31 = vmul.f32 0.70710677, %v11072_v60  ;;  %v11077_v53 = vadd.f32 %v6416_v15, %v6197_v49  ;;  %v6469_v27 = vpop.f32.mrf.mxu1  ;;  %v6483_v40 = vmul.f32 0.5, %v6464_v20 }
 0xb41   : > { %9749 = verf.f32 %v6499_v0  ;;  %v6502_v4 = vmul.f32 0.70710677, %v11074_v7  ;;  %v11080_v21 = vadd.f32 %v6469_v27, %v6205_v13  ;;  %v6418_v33 = vpop.f32.mrf.mxu0  ;;  %v6478_v61 = vmul.f32 0.5, %v11056_v58 }
 0xb42   : > { %9751 = verf.f32 %v6500_v31  ;;  %v6501_v29 = vmul.f32 0.70710677, %v11077_v53  ;;  %v11083_v23 = vadd.f32 %v6418_v33, %v6193_v54  ;;  %v6471_v28 = vpop.f32.mrf.mxu1  ;;  %v6484_v5 = vmul.f32 0.5, %v11072_v60 }
 0xb43   : > { %9753 = verf.f32 %v6502_v4  ;;  %v6503_v34 = vmul.f32 0.70710677, %v11080_v21  ;;  %v11086_v48 = vadd.f32 %v6471_v28, %v6201_v10  ;;  %v6420_v25 = vpop.f32.mrf.mxu0  ;;  %v6485_v28 = vmul.f32 0.5, %v11077_v53 }
 0xb44   : > { %9755 = verf.f32 %v6501_v29  ;;  %v6504_v47 = vmul.f32 0.70710677, %v11083_v23  ;;  %v11089_v35 = vadd.f32 %v6420_v25, %v6197_v49  ;;  %v6473_v56 = vpop.f32.mrf.mxu1  ;;  %v6487_v53 = vmul.f32 0.5, %v11080_v21 }
 0xb45   : > { %9757 = verf.f32 %v6503_v34  ;;  %v6506_v38 = vmul.f32 0.70710677, %v11086_v48  ;;  %v11092_v2 = vadd.f32 %v6473_v56, %v6205_v13  ;;  %v6490_v60 = vmul.f32 0.5, %v11086_v48 }
 0xb46   : > { %9759 = verf.f32 %v6504_v47  ;;  %v6505_v32 = vmul.f32 0.70710677, %v11089_v35 }
 0xb47   : > { %v9736_v9 = vpop.eup %9735  ;;  %9761 = verf.f32 %v6506_v38  ;;  %v6507_v39 = vmul.f32 0.70710677, %v11092_v2  ;;  %v6488_v38 = vmul.f32 0.5, %v11083_v23 }
 0xb48   : > { %v9738_v55 = vpop.eup %9737  ;;  %9763 = verf.f32 %v6505_v32  ;;  %v6524_v3 = vadd.f32 1.0, %v9736_v9 }
 0xb49   : > { %v9740_v36 = vpop.eup %9739  ;;  %9765 = verf.f32 %v6507_v39  ;;  %v6526_v62 = vadd.f32 1.0, %v9738_v55  ;;  %v6489_v55 = vmul.f32 0.5, %v11089_v35 }
 0xb4a   : > { %v9742_v37 = vpop.eup %9741  ;;  %v6525_v54 = vadd.f32 1.0, %v9740_v36  ;;  %v6540_v18 = vmul.f32 %v6524_v3, %v6476_v63  ;;  %v6486_v63 = vmul.f32 0.5, %v11074_v7 }
 0xb4b   : > { %v9744_v17 = vpop.eup %9743  ;;  %v6527_v13 = vadd.f32 1.0, %v9742_v37  ;;  %v6542_v41 = vmul.f32 %v6526_v62, %v6478_v61 }
 0xb4c   : > { %v9746_v51 = vpop.eup %9745  ;;  %v6528_v10 = vadd.f32 1.0, %v9744_v17  ;;  %v6541_v26 = vmul.f32 %v6525_v54, %v6477_v50  ;;  %v6491_v17 = vmul.f32 0.5, %v11092_v2 }
 0xb4d   : > { %v9748_v49 = vpop.eup %9747  ;;  %v6530_v59 = vadd.f32 1.0, %v9746_v51  ;;  %v6543_v0 = vmul.f32 %v6527_v13, %v6479_v1 }
 0xb4e   : > { %v9750_v11 = vpop.eup %9749  ;;  %v6529_v44 = vadd.f32 1.0, %v9748_v49  ;;  %v6544_v46 = vmul.f32 %v6528_v10, %v6480_v19 }
 0xb4f   : > { %v9752_v30 = vpop.eup %9751  ;;  %v6531_v16 = vadd.f32 1.0, %v9750_v11  ;;  %v6546_v24 = vmul.f32 %v6530_v59, %v6482_v42  ;;  %v8278_v11 = vld [vmem:[%s9890_s27 + $0x7] ss:$0 sm:$0xff] }
 0xb50   : > { %v9754_v14 = vpop.eup %9753  ;;  %v6545_v22 = vmul.f32 %v6529_v44, %v6481_v43  ;;  %v6556_v4 = vpack.c.bf16 %v6544_v46, %v6540_v18  ;;  %v6532_v47 = vadd.f32 1.0, %v9752_v30 }
 0xb51   : > { %v9756_v45 = vpop.eup %9755  ;;  %v6547_v15 = vmul.f32 %v6531_v16, %v6483_v40  ;;  %v6558_v29 = vpack.c.bf16 %v6546_v24, %v6542_v41  ;;  %v6534_v39 = vadd.f32 1.0, %v9754_v14 }
 0xb52   : > { %v9758_v31 = vpop.eup %9757  ;;  %v6557_v57 = vpack.c.bf16 %v6545_v22, %v6541_v26  ;;  %v6533_v58 = vadd.f32 1.0, %v9756_v45  ;;  %v6548_v10 = vmul.f32 %v6532_v47, %v6484_v5 }
 0xb53   : > { %v9760_v27 = vpop.eup %9759  ;;  %v6559_v33 = vpack.c.bf16 %v6547_v15, %v6543_v0  ;;  %v6535_v56 = vadd.f32 1.0, %v9758_v31  ;;  %v6550_v48 = vmul.f32 %v6534_v39, %v6486_v63 }
 0xb54   : > { %v9762_v20 = vpop.eup %9761  ;;  %v6536_v34 = vadd.f32 1.0, %v9760_v27  ;;  %6861 = vmatprep.mubr.bf16.mxu0 %v6557_v57  ;;  %v6549_v23 = vmul.f32 %v6533_v58, %v6485_v28 }
 0xb55   : > { %v9764_v25 = vpop.eup %9763  ;;  %v6538_v32 = vadd.f32 1.0, %v9762_v20  ;;  %6910 = vmatprep.mubr.bf16.mxu1 %v6559_v33  ;;  %6862 = vmatmul.mubr.bf16.vlgmr.msra.gmra.mxu0 %v6556_v4  ;;  %v6551_v49 = vmul.f32 %v6535_v56, %v6487_v53 }
 0xb56   : > { %v9766_v9 = vpop.eup %9765  ;;  %v6537_v36 = vadd.f32 1.0, %v9764_v25  ;;  %6911 = vmatmul.mubr.bf16.vlgmr.msra.gmra.mxu1 %v6558_v29  ;;  %v6552_v37 = vmul.f32 %v6536_v34, %v6488_v38 }
 0xb57   : > { %v6539_v51 = vadd.f32 1.0, %v9766_v9  ;;  %v6554_v50 = vmul.f32 %v6538_v32, %v6490_v60 }
 0xb58   : > { %v6553_v54 = vmul.f32 %v6537_v36, %v6489_v55  ;;  %v6560_v35 = vpack.c.bf16 %v6552_v37, %v6548_v10 }
 0xb59   : > { %v6555_v3 = vmul.f32 %v6539_v51, %v6491_v17  ;;  %v6562_v59 = vpack.c.bf16 %v6554_v50, %v6550_v48 }
 0xb5a   : > { %v6561_v13 = vpack.c.bf16 %v6553_v54, %v6549_v23 }
 0xb5b   : > { %v6563_v19 = vpack.c.bf16 %v6555_v3, %v6551_v49 }
 0xb5c   : > { %6869 = vmatprep.mubr.bf16.mxu0 %v6561_v13 }
 0xb5d   : > { %6918 = vmatprep.mubr.bf16.mxu1 %v6563_v19  ;;  %6870 = vmatmul.mubr.bf16.gmra.mxu0 %v6560_v35 }
 0xb5e   : > { %6919 = vmatmul.mubr.bf16.gmra.mxu1 %v6562_v59 }
 0xc15   : > { %v8751_v21 = vpop.f32.mrf.mxu0 }
 0xc16   : > { %v8779_v2 = vpop.f32.mrf.mxu1 }
 0xc17   : > { %v8752_v7 = vpop.f32.mrf.mxu0 }
 0xc18   : > { %v8753_v62 = vadd.f32 %v8752_v7, %v8751_v21  ;;  %v8780_v42 = vpop.f32.mrf.mxu1 }
 0xc19   : > { %v8754_v43 = vpop.f32.mrf.mxu0  ;;  %v8781_v30 = vadd.f32 %v8780_v42, %v8779_v2 }
 0xc1a   : > { %v6864_v44 = vadd.f32 %v8753_v62, %v8278_v11  ;;  %v8782_v1 = vpop.f32.mrf.mxu1 }
 0xc1b   : > { %v8755_v46 = vpop.f32.mrf.mxu0 }
 0xc1c   : > { %v6913_v40 = vadd.f32 %v8781_v30, %v6864_v44  ;;  %v8756_v16 = vadd.f32 %v8755_v46, %v8754_v43  ;;  %v8783_v14 = vpop.f32.mrf.mxu1 }
 0xc1d   : > { %v8757_v61 = vpop.f32.mrf.mxu0  ;;  %v8784_v22 = vadd.f32 %v8783_v14, %v8782_v1 }
 0xc1e   : > { %v6927_v26 = vadd.f32 %v6913_v40, %v11038_v8  ;;  %v6867_v24 = vadd.f32 %v8756_v16, %v8278_v11  ;;  %v8785_v45 = vpop.f32.mrf.mxu1 }
 0xc1f   : > { %v8758_v18 = vpop.f32.mrf.mxu0 }
 0xc20   : > { %6931 = vst [vmem:[#allocation4] sm:$0xff] %v6927_v26  ;;  %v6916_v0 = vadd.f32 %v8784_v22, %v6867_v24  ;;  %v8759_v15 = vadd.f32 %v8758_v18, %v8757_v61  ;;  %v8786_v31 = vpop.f32.mrf.mxu1 }
 0xc21   : > { %v8760_v41 = vpop.f32.mrf.mxu0  ;;  %v8787_v4 = vadd.f32 %v8786_v31, %v8785_v45 }
 0xc22   : > { %v6928_v57 = vadd.f32 %v6916_v0, %v11041_v6  ;;  %v6872_v27 = vadd.f32 %v8759_v15, %v8278_v11  ;;  %v8788_v5 = vpop.f32.mrf.mxu1 }
 0xc23   : > { %v8761_v33 = vpop.f32.mrf.mxu0 }
 0xc24   : > { %6932 = vst [vmem:[#allocation4 + $0x18] sm:$0xff] %v6928_v57  ;;  %v6921_v20 = vadd.f32 %v8787_v4, %v6872_v27  ;;  %v8762_v29 = vadd.f32 %v8761_v33, %v8760_v41  ;;  %v8789_v28 = vpop.f32.mrf.mxu1 }
 0xc25   : > { %v8790_v34 = vadd.f32 %v8789_v28, %v8788_v5 }
 0xc26   : > { %v6929_v8 = vadd.f32 %v6921_v20, %v11044_v52  ;;  %v6875_v58 = vadd.f32 %v8762_v29, %v8278_v11 }
 0xc28   : > { %6933 = vst [vmem:[#allocation4 + $0x8] sm:$0xff] %v6929_v8  ;;  %v6924_v25 = vadd.f32 %v8790_v34, %v6875_v58  ;;  %6938 = sbr.rel (%p8311_p6) target bundleno = 3129 (0xc39), region = 64 }
 0xc2a   : > { %v6930_v47 = vadd.f32 %v6924_v25, %v11047_v12 }
 0xc2c   : > { %6934 = vst [vmem:[#allocation4 + $0x10] sm:$0xff] %v6930_v47 }
 0xc2d   : > { %v6939_v6 = vld [vmem:[%s11149_s0] sm:$0xff]  ;;  %v6947_v38 = vld [vmem:[#allocation4] sm:$0xff]  ;;  %v6940_v52 = vld [vmem:[%s11149_s0 + $0x8] sm:$0xff] }
 0xc2e   : > { %v6943_v56 = vld [vmem:[#allocation3 + $0x10] sm:$0xff]  ;;  %v6944_v9 = vld [vmem:[#allocation3] sm:$0xff]  ;;  %v6948_v39 = vld [vmem:[#allocation4 + $0x18] sm:$0xff] }
 0xc2f   : > { %v6951_v32 = vmul.f32 %v6947_v38, %v6943_v56  ;;  %v6952_v60 = vmul.f32 %v6948_v39, %v6944_v9  ;;  %v6941_v12 = vld [vmem:[%s11149_s0 + $0x10] sm:$0xff]  ;;  %v6945_v55 = vld [vmem:[#allocation3 + $0x18] sm:$0xff]  ;;  %v6949_v36 = vld [vmem:[#allocation4 + $0x8] sm:$0xff] }
 0xc30   : > { %v6953_v37 = vmul.f32 %v6949_v36, %v6945_v55  ;;  %v6942_v17 = vld [vmem:[%s11149_s0 + $0x18] sm:$0xff] }
 0xc31   : > { %v6955_v53 = vadd.f32 %v6951_v32, %v6939_v6  ;;  %v6946_v51 = vld [vmem:[#allocation3 + $0x8] sm:$0xff]  ;;  %v6956_v23 = vadd.f32 %v6952_v60, %v6940_v52 }
 0xc32   : > { %v6957_v54 = vadd.f32 %v6953_v37, %v6941_v12 }
 0xc33   : > { %v6950_v63 = vld [vmem:[#allocation4 + $0x10] sm:$0xff]  ;;  %6959 = vst [vmem:[%s11158_s9] sm:$0xff] %v6955_v53  ;;  %6960 = vst [vmem:[%s11158_s9 + $0x8] sm:$0xff] %v6956_v23 }
 0xc34   : > { %v6954_v50 = vmul.f32 %v6950_v63, %v6946_v51  ;;  %6961 = vst [vmem:[%s11158_s9 + $0x10] sm:$0xff] %v6957_v54 }
 0xc36   : > { %v6958_v10 = vadd.f32 %v6954_v50, %v6942_v17 }
 0xc38   : > { %6962 = vst [vmem:[%s11158_s9 + $0x18] sm:$0xff] %v6958_v10 }
 0xc39 PF: > { %s19_s11 = sadd.s32 1, %s9797_s11   ;;  %s11159_s30 = smov %s9793_s10 }
 0xc3a   : > { %p16_p7 = scmp.ge.s32.totalorder %s19_s11, 18   ;;  %s11160_s10 = smov %s11162_s12 }
 0xc3c   :  { %18 = sbr.rel (!%p16_p7) target bundleno = 2 (0x2), region = 134 }

</bundles_post_ra>
